<compile_context>
chip_gen: v7x
topology: tpu7x:2x2x1
jax: 0.10.0
libtpu: 0.0.40
codegen_flags: <defaults>
</compile_context>

<pallas_src>
import functools

import jax
import jax.numpy as jnp
from jax.experimental import pallas as pl
from jax.experimental.pallas import tpu as pltpu


def _round_up(v, m):
    return (v + m - 1) // m * m


# ---------------------------------------------------------------------------
# Fused 1x1 convolutions:  relu([x @ Wx + pool @ Wp] + b)
# x2d/p2d: (M, Cin) bf16, Wx/Wp: (Cin, Nw) bf16, b: (1, Nw) f32 -> (M, Nw) bf16
# ---------------------------------------------------------------------------
def _fused_1x1_kernel(x_ref, p_ref, wx_ref, wp_ref, b_ref, o_ref):
    acc = jnp.dot(x_ref[...], wx_ref[...], preferred_element_type=jnp.float32)
    acc = acc + jnp.dot(p_ref[...], wp_ref[...], preferred_element_type=jnp.float32)
    o_ref[...] = jnp.maximum(acc + b_ref[...], 0.0).astype(o_ref.dtype)


def fused_1x1_relu(x2d, p2d, wx, wp, b, out_dtype=jnp.bfloat16):
    M, K = x2d.shape
    Nw = wx.shape[1]

    M8 = _round_up(M, 8)
    if M8 != M:                                   # rare fallback for odd M
        x2d = jnp.pad(x2d, ((0, M8 - M), (0, 0)))
        p2d = jnp.pad(p2d, ((0, M8 - M), (0, 0)))

    tm = 8
    for cand in (1024, 512, 256, 128, 64, 32, 16, 8):
        if M8 % cand == 0:
            tm = cand
            break
    tn = 256 if (Nw > 128 and Nw % 256 == 0) else 128
    grid = (M8 // tm, Nw // tn)

    y = pl.pallas_call(
        _fused_1x1_kernel,
        out_shape=jax.ShapeDtypeStruct((M8, Nw), out_dtype),
        grid_spec=pltpu.PrefetchScalarGridSpec(
            num_scalar_prefetch=0,
            grid=grid,
            in_specs=[
                pl.BlockSpec((tm, K), lambda i, j: (i, 0)),
                pl.BlockSpec((tm, K), lambda i, j: (i, 0)),
                pl.BlockSpec((K, tn), lambda i, j: (0, j)),
                pl.BlockSpec((K, tn), lambda i, j: (0, j)),
                pl.BlockSpec((1, tn), lambda i, j: (0, j)),
            ],
            out_specs=pl.BlockSpec((tm, tn), lambda i, j: (i, j)),
        ),
        compiler_params=pltpu.CompilerParams(
            dimension_semantics=("parallel", "parallel")),
    )(x2d, p2d, wx, wp, b)
    return y[:M] if M8 != M else y


# ---------------------------------------------------------------------------
# k x k conv (stride 1, 'same' pad) + bias + ReLU.
# No HBM im2col: the padded image is flattened to (Hp*Wp, Cin) rows per image,
# the k dw-shifts are stacked once in VMEM (K = k*Cin) and the conv is k deep-K
# matmuls at sublane-aligned row offsets dh*Wp (Wp % 8 == 0).
# ---------------------------------------------------------------------------
def conv2d_relu_kxk(x_nhwc, wt_p, b_p, k, cout, out_dtype=jnp.float32):
    x_nhwc = x_nhwc.astype(jnp.bfloat16)
    N, H, W, Cin = x_nhwc.shape
    p = k // 2
    Wp = _round_up(W + 2 * p, 8)                  # aligned row pitch
    Hp = H + 2 * p
    Co_pad = wt_p.shape[-1]
    Kc = k * Cin

    # zero pad: p rows top/bottom, p cols left, (Wp - W - p) >= p cols right
    xp = jnp.pad(x_nhwc, ((0, 0), (p, p), (p, Wp - W - p), (0, 0)))
    R_in = Hp * Wp + 8                            # +8 tail rows keep windows in-bounds
    xf = jnp.pad(xp.reshape(N, Hp * Wp, Cin), ((0, 0), (0, 8), (0, 0)))

    # row-block plan: rb_h image rows per grid step (flat rows = rb_h*Wp, mult of 8)
    rb_h = 1
    for d in range(1, H + 1):
        if H % d == 0 and d * Wp <= 512:
            rb_h = d
    RB = H // rb_h
    TR = rb_h * Wp                                # output rows per block
    NW = TR + (k - 1) * Wp                        # stacked-window rows
    NWIN = NW + 8                                 # aligned fetch window (+j shifts)

    def kern(x_ref, w_ref, b_ref, o_ref, xwin_ref, xs_ref, acc_ref):
        row0 = pl.multiple_of(pl.program_id(1) * TR, 8)      # aligned dynamic offset
        # one aligned dynamic copy of the window, then static dw sub-shifts
        xwin_ref[...] = x_ref[pl.ds(row0, NWIN), :]
        for j in range(k):
            xs_ref[:, j * Cin:(j + 1) * Cin] = xwin_ref[j:j + NW, :]
        acc_ref[...] = jnp.zeros_like(acc_ref)
        for dh in range(k):                                    # k deep-K matmuls
            acc_ref[...] += jnp.dot(xs_ref[dh * Wp:dh * Wp + TR, :], w_ref[dh],
                                    preferred_element_type=jnp.float32)
        o_ref[...] = jnp.maximum(acc_ref[...] + b_ref[...], 0.0).astype(o_ref.dtype)

    out = pl.pallas_call(
        kern,
        out_shape=jax.ShapeDtypeStruct((N, H * Wp, Co_pad), out_dtype),
        grid_spec=pltpu.PrefetchScalarGridSpec(
            num_scalar_prefetch=0,
            grid=(N, RB),
            in_specs=[
                # full flat image per n: block index constant across row blocks
                pl.BlockSpec((None, R_in, Cin), lambda n, r: (n, 0, 0)),
                pl.BlockSpec((k, Kc, Co_pad), lambda n, r: (0, 0, 0)),
                pl.BlockSpec((1, Co_pad), lambda n, r: (0, 0)),
            ],
            out_specs=pl.BlockSpec((None, TR, Co_pad), lambda n, r: (n, r, 0)),
            scratch_shapes=[
                pltpu.VMEM((NWIN, Cin), jnp.bfloat16),
                pltpu.VMEM((NW, Kc), jnp.bfloat16),
                pltpu.VMEM((TR, Co_pad), jnp.float32),
            ],
        ),
        compiler_params=pltpu.CompilerParams(
            dimension_semantics=("parallel", "parallel")),
    )(xf, wt_p, b_p)

    return out.reshape(N, H, Wp, Co_pad)[:, :, :W, :cout]


# ---------------------------------------------------------------------------
# 3x3 / stride-1 / pad-1 max-pool, separable (3 W-taps then 3 H-taps), fused
# ReLU (this module's forward applies F.relu(p4_1(x))), bf16 output.
# ---------------------------------------------------------------------------
def maxpool3x3_relu(x_nhwc_bf16):
    N, H, W, C = x_nhwc_bf16.shape
    xp = jnp.pad(x_nhwc_bf16, ((0, 0), (1, 1), (1, 1), (0, 0)),
                 constant_values=-jnp.inf)

    def kern(x_ref, o_ref):
        x = x_ref[...]                                         # (H+2, W+2, C)
        wm = jnp.maximum(jnp.maximum(x[:, 0:W, :], x[:, 1:W + 1, :]),
                         x[:, 2:W + 2, :])                     # (H+2, W, C)
        out = jnp.maximum(jnp.maximum(wm[0:H], wm[1:H + 1]), wm[2:H + 2])
        o_ref[...] = jnp.maximum(out, 0.0).astype(o_ref.dtype)

    return pl.pallas_call(
        kern,
        out_shape=jax.ShapeDtypeStruct((N, H, W, C), jnp.bfloat16),
        grid_spec=pltpu.PrefetchScalarGridSpec(
            num_scalar_prefetch=0,
            grid=(N,),
            in_specs=[pl.BlockSpec((None, H + 2, W + 2, C), lambda n: (n, 0, 0, 0))],
            out_specs=pl.BlockSpec((None, H, W, C), lambda n: (n, 0, 0, 0)),
        ),
        compiler_params=pltpu.CompilerParams(dimension_semantics=("parallel",)),
    )(xp)


# ---------------------------------------------------------------------------
# Inception forward (NCHW in / NCHW out, like the PyTorch module)
# ---------------------------------------------------------------------------
def inception_forward(packed, x_nchw, sizes):
    n1, n2a, n2b, n3a, n3b, n4 = sizes
    x = jnp.transpose(x_nchw, (0, 2, 3, 1)).astype(jnp.bfloat16)   # cast once
    N, H, W, Cin = x.shape

    pooled = maxpool3x3_relu(x)                                    # relu(maxpool(x))

    M = N * H * W
    y = fused_1x1_relu(x.reshape(M, Cin), pooled.reshape(M, Cin),
                       packed["wx"], packed["wp"], packed["b1x1"])  # (M, Nw) bf16

    o2, o3, o4 = n1, n1 + n2a, n1 + n2a + n3a
    p1 = y[:, 0:n1].reshape(N, H, W, n1)
    p2a = y[:, o2:o2 + n2a].reshape(N, H, W, n2a)
    p3a = y[:, o3:o3 + n3a].reshape(N, H, W, n3a)
    p4 = y[:, o4:o4 + n4].reshape(N, H, W, n4)

    p2 = conv2d_relu_kxk(p2a, packed["w3"], packed["b3"], k=3, cout=n2b)
    p3 = conv2d_relu_kxk(p3a, packed["w5"], packed["b5"], k=5, cout=n3b)

    # TODO(synk): write each branch straight into its channel slice of a
    # preallocated (N,H,W,ntot) buffer via out_specs offsets to save this
    # HBM concat pass.
    out = jnp.concatenate(
        [p1.astype(jnp.float32), p2, p3, p4.astype(jnp.float32)], axis=-1)
    return jnp.transpose(out, (0, 3, 1, 2))                        # NHWC -> NCHW


# ---------------------------------------------------------------------------
# Module wrapper: weight packing hoisted to __init__ (done once).
# ---------------------------------------------------------------------------
def _pack_conv_weight(w_oihw, k):
    cout, cin = w_oihw.shape[0], w_oihw.shape[1]
    co_pad = _round_up(cout, 128)
    # (Cout, Cin, kh, kw) -> (kh, kw, Cin, Cout) -> (kh, kw*Cin, Cout), pad lanes.
    wt = jnp.transpose(w_oihw, (2, 3, 1, 0)).reshape(k, k * cin, cout)
    return (jnp.zeros((k, k * cin, co_pad), jnp.float32)
            .at[:, :, :cout].set(wt).astype(jnp.bfloat16))


def _pack_bias(b):
    co_pad = _round_up(b.shape[0], 128)
    return jnp.zeros((1, co_pad), jnp.float32).at[0, :b.shape[0]].set(b)


class InceptionPallas:
    """Pallas-TPU implementation of the GoogLeNet Inception block."""

    def __init__(self, in_channels, c1, c2, c3, c4, key):
        keys = jax.random.split(key, 12)

        def conv_params(kidx, cin, cout, k):
            fan_in = cin * k * k
            bound = 1.0 / (fan_in ** 0.5)
            w = jax.random.uniform(keys[kidx], (cout, cin, k, k),
                                   jnp.float32, -bound, bound)
            b = jax.random.uniform(keys[kidx + 1], (cout,),
                                   jnp.float32, -bound, bound)
            return w, b

        self.params = {
            "p1_1": conv_params(0, in_channels, c1, 1),
            "p2_1": conv_params(2, in_channels, c2[0], 1),
            "p2_2": conv_params(4, c2[0], c2[1], 3),
            "p3_1": conv_params(6, in_channels, c3[0], 1),
            "p3_2": conv_params(8, c3[0], c3[1], 5),
            "p4_2": conv_params(10, in_channels, c4, 1),
        }

        # ---- pack weights once (outside the jitted hot path) -----------------
        cin = in_channels
        n1, n2a, n2b, n3a, n3b, n4 = c1, c2[0], c2[1], c3[0], c3[1], c4
        ntot = n1 + n2a + n3a + n4
        nw = _round_up(ntot, 128)
        o2, o3, o4 = n1, n1 + n2a, n1 + n2a + n3a

        w1, b1 = self.params["p1_1"]
        w2a, b2a = self.params["p2_1"]
        w22, b22 = self.params["p2_2"]
        w3a, b3a = self.params["p3_1"]
        w32, b32 = self.params["p3_2"]
        w4, b4 = self.params["p4_2"]

        wx = jnp.zeros((cin, nw), jnp.float32)
        wx = wx.at[:, 0:n1].set(w1.reshape(n1, cin).T)
        wx = wx.at[:, o2:o2 + n2a].set(w2a.reshape(n2a, cin).T)
        wx = wx.at[:, o3:o3 + n3a].set(w3a.reshape(n3a, cin).T)
        wp = jnp.zeros((cin, nw), jnp.float32).at[:, o4:o4 + n4].set(
            w4.reshape(n4, cin).T)
        b1x1 = (jnp.zeros((1, nw), jnp.float32)
                .at[0, 0:n1].set(b1)
                .at[0, o2:o2 + n2a].set(b2a)
                .at[0, o3:o3 + n3a].set(b3a)
                .at[0, o4:o4 + n4].set(b4))

        self.packed = {
            "wx": wx.astype(jnp.bfloat16),
            "wp": wp.astype(jnp.bfloat16),
            "b1x1": b1x1,
            "w3": _pack_conv_weight(w22, 3), "b3": _pack_bias(b22),
            "w5": _pack_conv_weight(w32, 5), "b5": _pack_bias(b32),
        }
        sizes = (n1, n2a, n2b, n3a, n3b, n4)
        self._forward = jax.jit(functools.partial(inception_forward, sizes=sizes))

    def __call__(self, x_nchw):
        return self._forward(self.packed, x_nchw)


# ---------------------------------------------------------------------------
# Pure-JAX (f32) reference of the PyTorch module, for a loose numeric check.
# ---------------------------------------------------------------------------
def _reference_forward(params, x_nchw):
    def conv(x, w, b, pad):
        y = jax.lax.conv_general_dilated(
            x, w, window_strides=(1, 1), padding=[(pad, pad), (pad, pad)],
            dimension_numbers=("NCHW", "OIHW", "NCHW"))
        return jax.nn.relu(y + b.reshape(1, -1, 1, 1))

    w1, b1 = params["p1_1"]; w2a, b2a = params["p2_1"]; w22, b22 = params["p2_2"]
    w3a, b3a = params["p3_1"]; w32, b32 = params["p3_2"]; w4, b4 = params["p4_2"]
    p1 = conv(x_nchw, w1, b1, 0)
    p2 = conv(conv(x_nchw, w2a, b2a, 0), w22, b22, 1)
    p3 = conv(conv(x_nchw, w3a, b3a, 0), w32, b32, 2)
    pool = jax.nn.relu(jax.lax.reduce_window(
        x_nchw, -jnp.inf, jax.lax.max, (1, 1, 3, 3), (1, 1, 1, 1),
        [(0, 0), (0, 0), (1, 1), (1, 1)]))
    p4 = conv(pool, w4, b4, 0)
    return jnp.concatenate([p1, p2, p3, p4], axis=1)


# ---------------------------------------------------------------------------
if __name__ == "__main__":
    key = jax.random.PRNGKey(0)
    xkey, pkey = jax.random.split(key)

    # Small shapes consistent with the module: batch=2, in_channels=4, 16x16 spatial.
    x = jax.random.normal(xkey, (2, 4, 16, 16), jnp.float32)

    model = InceptionPallas(in_channels=4, c1=8, c2=(4, 8), c3=(4, 8), c4=8, key=pkey)
    out = model(x)
    jax.block_until_ready(out)

    assert out.shape == (2, 8 + 8 + 8 + 8, 16, 16), out.shape
    assert out.dtype == jnp.float32, out.dtype
    assert bool(jnp.all(out >= 0.0))  # every branch ends in ReLU

    # Loose check vs the f32 reference (kernel uses bf16 MXU inputs, f32 accum).
    ref = _reference_forward(model.params, x)
    max_err = float(jnp.max(jnp.abs(out - ref)))
    assert jnp.allclose(out, ref, atol=1e-1, rtol=1e-1), max_err

    print("KERNEL_OK")
</pallas_src>

<mosaic_0001>
module attributes {stable_mosaic.version = 11 : i64} {
  func.func @kern(%arg0: i32, %arg1: memref<1x18x18x4xbf16, #tpu.memory_space<vmem>>, %arg2: memref<1x16x16x4xbf16, #tpu.memory_space<vmem>>) attributes {dimension_semantics = [#tpu.dimension_semantics<parallel>], iteration_bounds = array<i64: 2>, scalar_prefetch = 0 : i64, scratch_operands = 0 : i64, tpu.core_type = #tpu.core_type<tc>, window_params = [{transform_indices = @transform_0, window_bounds = array<i64: 1, 18, 18, 4>}, {transform_indices = @transform_1, window_bounds = array<i64: 1, 16, 16, 4>}]} {
    %c0 = arith.constant 0 : index
    %c0_0 = arith.constant 0 : index
    %c0_1 = arith.constant 0 : index
    %c0_2 = arith.constant 0 : index
    %0 = vector.load %arg1[%c0, %c0_0, %c0_1, %c0_2] : memref<1x18x18x4xbf16, #tpu.memory_space<vmem>>, vector<1x18x18x4xbf16>
    %1 = vector.shape_cast %0 : vector<1x18x18x4xbf16> to vector<18x18x4xbf16>
    %2 = vector.extract_strided_slice %1 {offsets = [0, 0, 0], sizes = [18, 16, 4], strides = [1, 1, 1]} : vector<18x18x4xbf16> to vector<18x16x4xbf16>
    %3 = vector.extract_strided_slice %1 {offsets = [0, 1, 0], sizes = [18, 16, 4], strides = [1, 1, 1]} : vector<18x18x4xbf16> to vector<18x16x4xbf16>
    %4 = arith.maximumf %2, %3 : vector<18x16x4xbf16>
    %5 = vector.extract_strided_slice %1 {offsets = [0, 2, 0], sizes = [18, 16, 4], strides = [1, 1, 1]} : vector<18x18x4xbf16> to vector<18x16x4xbf16>
    %6 = arith.maximumf %4, %5 : vector<18x16x4xbf16>
    %7 = vector.extract_strided_slice %6 {offsets = [0, 0, 0], sizes = [16, 16, 4], strides = [1, 1, 1]} : vector<18x16x4xbf16> to vector<16x16x4xbf16>
    %8 = vector.extract_strided_slice %6 {offsets = [1, 0, 0], sizes = [16, 16, 4], strides = [1, 1, 1]} : vector<18x16x4xbf16> to vector<16x16x4xbf16>
    %9 = arith.maximumf %7, %8 : vector<16x16x4xbf16>
    %10 = vector.extract_strided_slice %6 {offsets = [2, 0, 0], sizes = [16, 16, 4], strides = [1, 1, 1]} : vector<18x16x4xbf16> to vector<16x16x4xbf16>
    %11 = arith.maximumf %9, %10 : vector<16x16x4xbf16>
    %cst = arith.constant 0.000000e+00 : bf16
    %12 = vector.broadcast %cst : bf16 to vector<16x16x4xbf16>
    %13 = arith.maximumf %11, %12 : vector<16x16x4xbf16>
    %c0_3 = arith.constant 0 : index
    %c0_4 = arith.constant 0 : index
    %c0_5 = arith.constant 0 : index
    %c0_6 = arith.constant 0 : index
    %14 = vector.load %arg2[%c0_3, %c0_4, %c0_5, %c0_6] : memref<1x16x16x4xbf16, #tpu.memory_space<vmem>>, vector<1x16x16x4xbf16>
    %15 = vector.shape_cast %14 : vector<1x16x16x4xbf16> to vector<16x16x4xbf16>
    %16 = vector.shape_cast %13 : vector<16x16x4xbf16> to vector<1x16x16x4xbf16>
    tpu.vector_store %arg2[%c0_3, %c0_4, %c0_5, %c0_6], %16 {strides = array<i32>} : memref<1x16x16x4xbf16, #tpu.memory_space<vmem>>, vector<1x16x16x4xbf16>,
    return
  }
  func.func @transform_0(%arg0: i32) -> (i32, i32, i32, i32) {
    %c0_i32 = arith.constant 0 : i32
    %c0_i32_0 = arith.constant 0 : i32
    %c0_i32_1 = arith.constant 0 : i32
    %c0_i32_2 = arith.constant 0 : i32
    return %arg0, %c0_i32, %c0_i32_0, %c0_i32_1 : i32, i32, i32, i32
  }
  func.func @transform_1(%arg0: i32) -> (i32, i32, i32, i32) {
    %c0_i32 = arith.constant 0 : i32
    %c0_i32_0 = arith.constant 0 : i32
    %c0_i32_1 = arith.constant 0 : i32
    %c0_i32_2 = arith.constant 0 : i32
    return %arg0, %c0_i32, %c0_i32_0, %c0_i32_1 : i32, i32, i32, i32
  }
}

module attributes {stable_mosaic.version = 11 : i64} {
  func.func @_fused_1x1_kernel(%arg0: i32, %arg1: i32, %arg2: memref<512x4xbf16, #tpu.memory_space<vmem>>, %arg3: memref<512x4xbf16, #tpu.memory_space<vmem>>, %arg4: memref<4x128xbf16, #tpu.memory_space<vmem>>, %arg5: memref<4x128xbf16, #tpu.memory_space<vmem>>, %arg6: memref<1x128xf32, #tpu.memory_space<vmem>>, %arg7: memref<512x128xbf16, #tpu.memory_space<vmem>>) attributes {dimension_semantics = [#tpu.dimension_semantics<parallel>, #tpu.dimension_semantics<parallel>], iteration_bounds = array<i64: 1, 1>, scalar_prefetch = 0 : i64, scratch_operands = 0 : i64, tpu.core_type = #tpu.core_type<tc>, window_params = [{transform_indices = @transform_0, window_bounds = array<i64: 512, 4>}, {transform_indices = @transform_1, window_bounds = array<i64: 512, 4>}, {transform_indices = @transform_2, window_bounds = array<i64: 4, 128>}, {transform_indices = @transform_3, window_bounds = array<i64: 4, 128>}, {transform_indices = @transform_4, window_bounds = array<i64: 1, 128>}, {transform_indices = @transform_5, window_bounds = array<i64: 512, 128>}]} {
    %c0 = arith.constant 0 : index
    %c0_0 = arith.constant 0 : index
    %0 = vector.load %arg2[%c0, %c0_0] : memref<512x4xbf16, #tpu.memory_space<vmem>>, vector<512x4xbf16>
    %c0_1 = arith.constant 0 : index
    %c0_2 = arith.constant 0 : index
    %1 = vector.load %arg4[%c0_1, %c0_2] : memref<4x128xbf16, #tpu.memory_space<vmem>>, vector<4x128xbf16>
    %cst = arith.constant dense<0.000000e+00> : vector<512x128xf32>
    %2 = tpu.matmul %0, %1, %cst {dimension_numbers = #tpu.dot_dimension_numbers<[1], [0], [0], [1], [0, 0, 1, 1], [], []>} : vector<512x4xbf16>, vector<4x128xbf16>, vector<512x128xf32> -> vector<512x128xf32>
    %c0_3 = arith.constant 0 : index
    %c0_4 = arith.constant 0 : index
    %3 = vector.load %arg3[%c0_3, %c0_4] : memref<512x4xbf16, #tpu.memory_space<vmem>>, vector<512x4xbf16>
    %c0_5 = arith.constant 0 : index
    %c0_6 = arith.constant 0 : index
    %4 = vector.load %arg5[%c0_5, %c0_6] : memref<4x128xbf16, #tpu.memory_space<vmem>>, vector<4x128xbf16>
    %cst_7 = arith.constant dense<0.000000e+00> : vector<512x128xf32>
    %5 = tpu.matmul %3, %4, %cst_7 {dimension_numbers = #tpu.dot_dimension_numbers<[1], [0], [0], [1], [0, 0, 1, 1], [], []>} : vector<512x4xbf16>, vector<4x128xbf16>, vector<512x128xf32> -> vector<512x128xf32>
    %6 = arith.addf %2, %5 : vector<512x128xf32>
    %c0_8 = arith.constant 0 : index
    %c0_9 = arith.constant 0 : index
    %7 = vector.load %arg6[%c0_8, %c0_9] : memref<1x128xf32, #tpu.memory_space<vmem>>, vector<1x128xf32>
    %8 = vector.broadcast %7 : vector<1x128xf32> to vector<512x128xf32>
    %9 = arith.addf %6, %8 : vector<512x128xf32>
    %cst_10 = arith.constant 0.000000e+00 : f32
    %10 = vector.broadcast %cst_10 : f32 to vector<512x128xf32>
    %11 = arith.maximumf %9, %10 : vector<512x128xf32>
    %12 = arith.truncf %11 : vector<512x128xf32> to vector<512x128xbf16>
    %c0_11 = arith.constant 0 : index
    %c0_12 = arith.constant 0 : index
    %13 = vector.load %arg7[%c0_11, %c0_12] : memref<512x128xbf16, #tpu.memory_space<vmem>>, vector<512x128xbf16>
    tpu.vector_store %arg7[%c0_11, %c0_12], %12 {strides = array<i32>} : memref<512x128xbf16, #tpu.memory_space<vmem>>, vector<512x128xbf16>,
    return
  }
  func.func @transform_0(%arg0: i32, %arg1: i32) -> (i32, i32) {
    %c0_i32 = arith.constant 0 : i32
    %c0_i32_0 = arith.constant 0 : i32
    return %arg0, %c0_i32 : i32, i32
  }
  func.func @transform_1(%arg0: i32, %arg1: i32) -> (i32, i32) {
    %c0_i32 = arith.constant 0 : i32
    %c0_i32_0 = arith.constant 0 : i32
    return %arg0, %c0_i32 : i32, i32
  }
  func.func @transform_2(%arg0: i32, %arg1: i32) -> (i32, i32) {
    %c0_i32 = arith.constant 0 : i32
    %c0_i32_0 = arith.constant 0 : i32
    return %c0_i32, %arg1 : i32, i32
  }
  func.func @transform_3(%arg0: i32, %arg1: i32) -> (i32, i32) {
    %c0_i32 = arith.constant 0 : i32
    %c0_i32_0 = arith.constant 0 : i32
    return %c0_i32, %arg1 : i32, i32
  }
  func.func @transform_4(%arg0: i32, %arg1: i32) -> (i32, i32) {
    %c0_i32 = arith.constant 0 : i32
    %c0_i32_0 = arith.constant 0 : i32
    return %c0_i32, %arg1 : i32, i32
  }
  func.func @transform_5(%arg0: i32, %arg1: i32) -> (i32, i32) {
    %c0_i32 = arith.constant 0 : i32
    return %arg0, %arg1 : i32, i32
  }
}

module attributes {stable_mosaic.version = 11 : i64} {
  func.func @kern(%arg0: i32, %arg1: i32, %arg2: memref<1x488x4xbf16, #tpu.memory_space<vmem>>, %arg3: memref<5x20x128xbf16, #tpu.memory_space<vmem>>, %arg4: memref<1x128xf32, #tpu.memory_space<vmem>>, %arg5: memref<1x384x128xf32, #tpu.memory_space<vmem>>, %arg6: memref<488x4xbf16, #tpu.memory_space<vmem>>, %arg7: memref<480x20xbf16, #tpu.memory_space<vmem>>, %arg8: memref<384x128xf32, #tpu.memory_space<vmem>>) attributes {dimension_semantics = [#tpu.dimension_semantics<parallel>, #tpu.dimension_semantics<parallel>], iteration_bounds = array<i64: 2, 1>, scalar_prefetch = 0 : i64, scratch_operands = 3 : i64, tpu.core_type = #tpu.core_type<tc>, window_params = [{transform_indices = @transform_0, window_bounds = array<i64: 1, 488, 4>}, {pipeline_mode = #tpu.pipeline_mode<synchronous>, transform_indices = @transform_1, window_bounds = array<i64: 5, 20, 128>}, {pipeline_mode = #tpu.pipeline_mode<synchronous>, transform_indices = @transform_2, window_bounds = array<i64: 1, 128>}, {transform_indices = @transform_3, window_bounds = array<i64: 1, 384, 128>}]} {
    %c384_i32 = arith.constant 384 : i32
    %0 = arith.muli %arg1, %c384_i32 : i32
    %1 = tpu.assume_multiple %0, 8 : i32
    %c0 = arith.constant 0 : index
    %2 = arith.index_cast %1 : i32 to index
    %c0_0 = arith.constant 0 : index
    %3 = vector.load %arg2[%c0, %2, %c0_0] : memref<1x488x4xbf16, #tpu.memory_space<vmem>>, vector<1x488x4xbf16>
    %4 = vector.shape_cast %3 : vector<1x488x4xbf16> to vector<488x4xbf16>
    %c0_1 = arith.constant 0 : index
    %c0_2 = arith.constant 0 : index
    %5 = vector.load %arg6[%c0_1, %c0_2] : memref<488x4xbf16, #tpu.memory_space<vmem>>, vector<488x4xbf16>
    tpu.vector_store %arg6[%c0_1, %c0_2], %4 {strides = array<i32>} : memref<488x4xbf16, #tpu.memory_space<vmem>>, vector<488x4xbf16>,
    %c0_3 = arith.constant 0 : index
    %c0_4 = arith.constant 0 : index
    %6 = vector.load %arg6[%c0_3, %c0_4] : memref<488x4xbf16, #tpu.memory_space<vmem>>, vector<480x4xbf16>
    %c0_5 = arith.constant 0 : index
    %c0_6 = arith.constant 0 : index
    %7 = vector.load %arg7[%c0_5, %c0_6] : memref<480x20xbf16, #tpu.memory_space<vmem>>, vector<480x4xbf16>
    tpu.vector_store %arg7[%c0_5, %c0_6], %6 {strides = array<i32>} : memref<480x20xbf16, #tpu.memory_space<vmem>>, vector<480x4xbf16>,
    %c1 = arith.constant 1 : index
    %c0_7 = arith.constant 0 : index
    %8 = vector.load %arg6[%c1, %c0_7] : memref<488x4xbf16, #tpu.memory_space<vmem>>, vector<480x4xbf16>
    %c0_8 = arith.constant 0 : index
    %c4 = arith.constant 4 : index
    %9 = vector.load %arg7[%c0_8, %c4] : memref<480x20xbf16, #tpu.memory_space<vmem>>, vector<480x4xbf16>
    tpu.vector_store %arg7[%c0_8, %c4], %8 {strides = array<i32>} : memref<480x20xbf16, #tpu.memory_space<vmem>>, vector<480x4xbf16>,
    %c2 = arith.constant 2 : index
    %c0_9 = arith.constant 0 : index
    %10 = vector.load %arg6[%c2, %c0_9] : memref<488x4xbf16, #tpu.memory_space<vmem>>, vector<480x4xbf16>
    %c0_10 = arith.constant 0 : index
    %c8 = arith.constant 8 : index
    %11 = vector.load %arg7[%c0_10, %c8] : memref<480x20xbf16, #tpu.memory_space<vmem>>, vector<480x4xbf16>
    tpu.vector_store %arg7[%c0_10, %c8], %10 {strides = array<i32>} : memref<480x20xbf16, #tpu.memory_space<vmem>>, vector<480x4xbf16>,
    %c3 = arith.constant 3 : index
    %c0_11 = arith.constant 0 : index
    %12 = vector.load %arg6[%c3, %c0_11] : memref<488x4xbf16, #tpu.memory_space<vmem>>, vector<480x4xbf16>
    %c0_12 = arith.constant 0 : index
    %c12 = arith.constant 12 : index
    %13 = vector.load %arg7[%c0_12, %c12] : memref<480x20xbf16, #tpu.memory_space<vmem>>, vector<480x4xbf16>
    tpu.vector_store %arg7[%c0_12, %c12], %12 {strides = array<i32>} : memref<480x20xbf16, #tpu.memory_space<vmem>>, vector<480x4xbf16>,
    %c4_13 = arith.constant 4 : index
    %c0_14 = arith.constant 0 : index
    %14 = vector.load %arg6[%c4_13, %c0_14] : memref<488x4xbf16, #tpu.memory_space<vmem>>, vector<480x4xbf16>
    %c0_15 = arith.constant 0 : index
    %c16 = arith.constant 16 : index
    %15 = vector.load %arg7[%c0_15, %c16] : memref<480x20xbf16, #tpu.memory_space<vmem>>, vector<480x4xbf16>
    tpu.vector_store %arg7[%c0_15, %c16], %14 {strides = array<i32>} : memref<480x20xbf16, #tpu.memory_space<vmem>>, vector<480x4xbf16>,
    %cst = arith.constant 0.000000e+00 : f32
    %16 = vector.broadcast %cst : f32 to vector<384x128xf32>
    %c0_16 = arith.constant 0 : index
    %c0_17 = arith.constant 0 : index
    %17 = vector.load %arg8[%c0_16, %c0_17] : memref<384x128xf32, #tpu.memory_space<vmem>>, vector<384x128xf32>
    tpu.vector_store %arg8[%c0_16, %c0_17], %16 {strides = array<i32>} : memref<384x128xf32, #tpu.memory_space<vmem>>, vector<384x128xf32>,
    %c0_18 = arith.constant 0 : index
    %c0_19 = arith.constant 0 : index
    %18 = vector.load %arg8[%c0_18, %c0_19] : memref<384x128xf32, #tpu.memory_space<vmem>>, vector<384x128xf32>
    %c0_20 = arith.constant 0 : index
    %c0_21 = arith.constant 0 : index
    %19 = vector.load %arg7[%c0_20, %c0_21] : memref<480x20xbf16, #tpu.memory_space<vmem>>, vector<384x20xbf16>
    %c0_22 = arith.constant 0 : index
    %c0_23 = arith.constant 0 : index
    %c0_24 = arith.constant 0 : index
    %20 = vector.load %arg3[%c0_22, %c0_23, %c0_24] : memref<5x20x128xbf16, #tpu.memory_space<vmem>>, vector<1x20x128xbf16>
    %21 = vector.shape_cast %20 : vector<1x20x128xbf16> to vector<20x128xbf16>
    %cst_25 = arith.constant dense<0.000000e+00> : vector<384x128xf32>
    %22 = tpu.matmul %19, %21, %cst_25 {dimension_numbers = #tpu.dot_dimension_numbers<[1], [0], [0], [1], [0, 0, 1, 1], [], []>} : vector<384x20xbf16>, vector<20x128xbf16>, vector<384x128xf32> -> vector<384x128xf32>
    %23 = arith.addf %18, %22 : vector<384x128xf32>
    %c0_26 = arith.constant 0 : index
    %c0_27 = arith.constant 0 : index
    %24 = vector.load %arg8[%c0_26, %c0_27] : memref<384x128xf32, #tpu.memory_space<vmem>>, vector<384x128xf32>
    tpu.vector_store %arg8[%c0_26, %c0_27], %23 {strides = array<i32>} : memref<384x128xf32, #tpu.memory_space<vmem>>, vector<384x128xf32>,
    %c0_28 = arith.constant 0 : index
    %c0_29 = arith.constant 0 : index
    %25 = vector.load %arg8[%c0_28, %c0_29] : memref<384x128xf32, #tpu.memory_space<vmem>>, vector<384x128xf32>
    %c24 = arith.constant 24 : index
    %c0_30 = arith.constant 0 : index
    %26 = vector.load %arg7[%c24, %c0_30] : memref<480x20xbf16, #tpu.memory_space<vmem>>, vector<384x20xbf16>
    %c1_31 = arith.constant 1 : index
    %c0_32 = arith.constant 0 : index
    %c0_33 = arith.constant 0 : index
    %27 = vector.load %arg3[%c1_31, %c0_32, %c0_33] : memref<5x20x128xbf16, #tpu.memory_space<vmem>>, vector<1x20x128xbf16>
    %28 = vector.shape_cast %27 : vector<1x20x128xbf16> to vector<20x128xbf16>
    %cst_34 = arith.constant dense<0.000000e+00> : vector<384x128xf32>
    %29 = tpu.matmul %26, %28, %cst_34 {dimension_numbers = #tpu.dot_dimension_numbers<[1], [0], [0], [1], [0, 0, 1, 1], [], []>} : vector<384x20xbf16>, vector<20x128xbf16>, vector<384x128xf32> -> vector<384x128xf32>
    %30 = arith.addf %25, %29 : vector<384x128xf32>
    %c0_35 = arith.constant 0 : index
    %c0_36 = arith.constant 0 : index
    %31 = vector.load %arg8[%c0_35, %c0_36] : memref<384x128xf32, #tpu.memory_space<vmem>>, vector<384x128xf32>
    tpu.vector_store %arg8[%c0_35, %c0_36], %30 {strides = array<i32>} : memref<384x128xf32, #tpu.memory_space<vmem>>, vector<384x128xf32>,
    %c0_37 = arith.constant 0 : index
    %c0_38 = arith.constant 0 : index
    %32 = vector.load %arg8[%c0_37, %c0_38] : memref<384x128xf32, #tpu.memory_space<vmem>>, vector<384x128xf32>
    %c48 = arith.constant 48 : index
    %c0_39 = arith.constant 0 : index
    %33 = vector.load %arg7[%c48, %c0_39] : memref<480x20xbf16, #tpu.memory_space<vmem>>, vector<384x20xbf16>
    %c2_40 = arith.constant 2 : index
    %c0_41 = arith.constant 0 : index
    %c0_42 = arith.constant 0 : index
    %34 = vector.load %arg3[%c2_40, %c0_41, %c0_42] : memref<5x20x128xbf16, #tpu.memory_space<vmem>>, vector<1x20x128xbf16>
    %35 = vector.shape_cast %34 : vector<1x20x128xbf16> to vector<20x128xbf16>
    %cst_43 = arith.constant dense<0.000000e+00> : vector<384x128xf32>
    %36 = tpu.matmul %33, %35, %cst_43 {dimension_numbers = #tpu.dot_dimension_numbers<[1], [0], [0], [1], [0, 0, 1, 1], [], []>} : vector<384x20xbf16>, vector<20x128xbf16>, vector<384x128xf32> -> vector<384x128xf32>
    %37 = arith.addf %32, %36 : vector<384x128xf32>
    %c0_44 = arith.constant 0 : index
    %c0_45 = arith.constant 0 : index
    %38 = vector.load %arg8[%c0_44, %c0_45] : memref<384x128xf32, #tpu.memory_space<vmem>>, vector<384x128xf32>
    tpu.vector_store %arg8[%c0_44, %c0_45], %37 {strides = array<i32>} : memref<384x128xf32, #tpu.memory_space<vmem>>, vector<384x128xf32>,
    %c0_46 = arith.constant 0 : index
    %c0_47 = arith.constant 0 : index
    %39 = vector.load %arg8[%c0_46, %c0_47] : memref<384x128xf32, #tpu.memory_space<vmem>>, vector<384x128xf32>
    %c72 = arith.constant 72 : index
    %c0_48 = arith.constant 0 : index
    %40 = vector.load %arg7[%c72, %c0_48] : memref<480x20xbf16, #tpu.memory_space<vmem>>, vector<384x20xbf16>
    %c3_49 = arith.constant 3 : index
    %c0_50 = arith.constant 0 : index
    %c0_51 = arith.constant 0 : index
    %41 = vector.load %arg3[%c3_49, %c0_50, %c0_51] : memref<5x20x128xbf16, #tpu.memory_space<vmem>>, vector<1x20x128xbf16>
    %42 = vector.shape_cast %41 : vector<1x20x128xbf16> to vector<20x128xbf16>
    %cst_52 = arith.constant dense<0.000000e+00> : vector<384x128xf32>
    %43 = tpu.matmul %40, %42, %cst_52 {dimension_numbers = #tpu.dot_dimension_numbers<[1], [0], [0], [1], [0, 0, 1, 1], [], []>} : vector<384x20xbf16>, vector<20x128xbf16>, vector<384x128xf32> -> vector<384x128xf32>
    %44 = arith.addf %39, %43 : vector<384x128xf32>
    %c0_53 = arith.constant 0 : index
    %c0_54 = arith.constant 0 : index
    %45 = vector.load %arg8[%c0_53, %c0_54] : memref<384x128xf32, #tpu.memory_space<vmem>>, vector<384x128xf32>
    tpu.vector_store %arg8[%c0_53, %c0_54], %44 {strides = array<i32>} : memref<384x128xf32, #tpu.memory_space<vmem>>, vector<384x128xf32>,
    %c0_55 = arith.constant 0 : index
    %c0_56 = arith.constant 0 : index
    %46 = vector.load %arg8[%c0_55, %c0_56] : memref<384x128xf32, #tpu.memory_space<vmem>>, vector<384x128xf32>
    %c96 = arith.constant 96 : index
    %c0_57 = arith.constant 0 : index
    %47 = vector.load %arg7[%c96, %c0_57] : memref<480x20xbf16, #tpu.memory_space<vmem>>, vector<384x20xbf16>
    %c4_58 = arith.constant 4 : index
    %c0_59 = arith.constant 0 : index
    %c0_60 = arith.constant 0 : index
    %48 = vector.load %arg3[%c4_58, %c0_59, %c0_60] : memref<5x20x128xbf16, #tpu.memory_space<vmem>>, vector<1x20x128xbf16>
    %49 = vector.shape_cast %48 : vector<1x20x128xbf16> to vector<20x128xbf16>
    %cst_61 = arith.constant dense<0.000000e+00> : vector<384x128xf32>
    %50 = tpu.matmul %47, %49, %cst_61 {dimension_numbers = #tpu.dot_dimension_numbers<[1], [0], [0], [1], [0, 0, 1, 1], [], []>} : vector<384x20xbf16>, vector<20x128xbf16>, vector<384x128xf32> -> vector<384x128xf32>
    %51 = arith.addf %46, %50 : vector<384x128xf32>
    %c0_62 = arith.constant 0 : index
    %c0_63 = arith.constant 0 : index
    %52 = vector.load %arg8[%c0_62, %c0_63] : memref<384x128xf32, #tpu.memory_space<vmem>>, vector<384x128xf32>
    tpu.vector_store %arg8[%c0_62, %c0_63], %51 {strides = array<i32>} : memref<384x128xf32, #tpu.memory_space<vmem>>, vector<384x128xf32>,
    %c0_64 = arith.constant 0 : index
    %c0_65 = arith.constant 0 : index
    %53 = vector.load %arg8[%c0_64, %c0_65] : memref<384x128xf32, #tpu.memory_space<vmem>>, vector<384x128xf32>
    %c0_66 = arith.constant 0 : index
    %c0_67 = arith.constant 0 : index
    %54 = vector.load %arg4[%c0_66, %c0_67] : memref<1x128xf32, #tpu.memory_space<vmem>>, vector<1x128xf32>
    %55 = vector.broadcast %54 : vector<1x128xf32> to vector<384x128xf32>
    %56 = arith.addf %53, %55 : vector<384x128xf32>
    %cst_68 = arith.constant 0.000000e+00 : f32
    %57 = vector.broadcast %cst_68 : f32 to vector<384x128xf32>
    %58 = arith.maximumf %56, %57 : vector<384x128xf32>
    %c0_69 = arith.constant 0 : index
    %c0_70 = arith.constant 0 : index
    %c0_71 = arith.constant 0 : index
    %59 = vector.load %arg5[%c0_69, %c0_70, %c0_71] : memref<1x384x128xf32, #tpu.memory_space<vmem>>, vector<1x384x128xf32>
    %60 = vector.shape_cast %59 : vector<1x384x128xf32> to vector<384x128xf32>
    %61 = vector.shape_cast %58 : vector<384x128xf32> to vector<1x384x128xf32>
    tpu.vector_store %arg5[%c0_69, %c0_70, %c0_71], %61 {strides = array<i32>} : memref<1x384x128xf32, #tpu.memory_space<vmem>>, vector<1x384x128xf32>,
    return
  }
  func.func @transform_0(%arg0: i32, %arg1: i32) -> (i32, i32, i32) {
    %c0_i32 = arith.constant 0 : i32
    %c0_i32_0 = arith.constant 0 : i32
    %c0_i32_1 = arith.constant 0 : i32
    return %arg0, %c0_i32, %c0_i32_0 : i32, i32, i32
  }
  func.func @transform_1(%arg0: i32, %arg1: i32) -> (i32, i32, i32) {
    %c0_i32 = arith.constant 0 : i32
    %c0_i32_0 = arith.constant 0 : i32
    %c0_i32_1 = arith.constant 0 : i32
    %c0_i32_2 = arith.constant 0 : i32
    return %c0_i32, %c0_i32_0, %c0_i32_1 : i32, i32, i32
  }
  func.func @transform_2(%arg0: i32, %arg1: i32) -> (i32, i32) {
    %c0_i32 = arith.constant 0 : i32
    %c0_i32_0 = arith.constant 0 : i32
    %c0_i32_1 = arith.constant 0 : i32
    return %c0_i32, %c0_i32_0 : i32, i32
  }
  func.func @transform_3(%arg0: i32, %arg1: i32) -> (i32, i32, i32) {
    %c0_i32 = arith.constant 0 : i32
    %c0_i32_0 = arith.constant 0 : i32
    return %arg0, %arg1, %c0_i32 : i32, i32, i32
  }
}

module attributes {stable_mosaic.version = 11 : i64} {
  func.func @kern(%arg0: i32, %arg1: i32, %arg2: memref<1x440x4xbf16, #tpu.memory_space<vmem>>, %arg3: memref<3x12x128xbf16, #tpu.memory_space<vmem>>, %arg4: memref<1x128xf32, #tpu.memory_space<vmem>>, %arg5: memref<1x384x128xf32, #tpu.memory_space<vmem>>, %arg6: memref<440x4xbf16, #tpu.memory_space<vmem>>, %arg7: memref<432x12xbf16, #tpu.memory_space<vmem>>, %arg8: memref<384x128xf32, #tpu.memory_space<vmem>>) attributes {dimension_semantics = [#tpu.dimension_semantics<parallel>, #tpu.dimension_semantics<parallel>], iteration_bounds = array<i64: 2, 1>, scalar_prefetch = 0 : i64, scratch_operands = 3 : i64, tpu.core_type = #tpu.core_type<tc>, window_params = [{transform_indices = @transform_0, window_bounds = array<i64: 1, 440, 4>}, {pipeline_mode = #tpu.pipeline_mode<synchronous>, transform_indices = @transform_1, window_bounds = array<i64: 3, 12, 128>}, {pipeline_mode = #tpu.pipeline_mode<synchronous>, transform_indices = @transform_2, window_bounds = array<i64: 1, 128>}, {transform_indices = @transform_3, window_bounds = array<i64: 1, 384, 128>}]} {
    %c384_i32 = arith.constant 384 : i32
    %0 = arith.muli %arg1, %c384_i32 : i32
    %1 = tpu.assume_multiple %0, 8 : i32
    %c0 = arith.constant 0 : index
    %2 = arith.index_cast %1 : i32 to index
    %c0_0 = arith.constant 0 : index
    %3 = vector.load %arg2[%c0, %2, %c0_0] : memref<1x440x4xbf16, #tpu.memory_space<vmem>>, vector<1x440x4xbf16>
    %4 = vector.shape_cast %3 : vector<1x440x4xbf16> to vector<440x4xbf16>
    %c0_1 = arith.constant 0 : index
    %c0_2 = arith.constant 0 : index
    %5 = vector.load %arg6[%c0_1, %c0_2] : memref<440x4xbf16, #tpu.memory_space<vmem>>, vector<440x4xbf16>
    tpu.vector_store %arg6[%c0_1, %c0_2], %4 {strides = array<i32>} : memref<440x4xbf16, #tpu.memory_space<vmem>>, vector<440x4xbf16>,
    %c0_3 = arith.constant 0 : index
    %c0_4 = arith.constant 0 : index
    %6 = vector.load %arg6[%c0_3, %c0_4] : memref<440x4xbf16, #tpu.memory_space<vmem>>, vector<432x4xbf16>
    %c0_5 = arith.constant 0 : index
    %c0_6 = arith.constant 0 : index
    %7 = vector.load %arg7[%c0_5, %c0_6] : memref<432x12xbf16, #tpu.memory_space<vmem>>, vector<432x4xbf16>
    tpu.vector_store %arg7[%c0_5, %c0_6], %6 {strides = array<i32>} : memref<432x12xbf16, #tpu.memory_space<vmem>>, vector<432x4xbf16>,
    %c1 = arith.constant 1 : index
    %c0_7 = arith.constant 0 : index
    %8 = vector.load %arg6[%c1, %c0_7] : memref<440x4xbf16, #tpu.memory_space<vmem>>, vector<432x4xbf16>
    %c0_8 = arith.constant 0 : index
    %c4 = arith.constant 4 : index
    %9 = vector.load %arg7[%c0_8, %c4] : memref<432x12xbf16, #tpu.memory_space<vmem>>, vector<432x4xbf16>
    tpu.vector_store %arg7[%c0_8, %c4], %8 {strides = array<i32>} : memref<432x12xbf16, #tpu.memory_space<vmem>>, vector<432x4xbf16>,
    %c2 = arith.constant 2 : index
    %c0_9 = arith.constant 0 : index
    %10 = vector.load %arg6[%c2, %c0_9] : memref<440x4xbf16, #tpu.memory_space<vmem>>, vector<432x4xbf16>
    %c0_10 = arith.constant 0 : index
    %c8 = arith.constant 8 : index
    %11 = vector.load %arg7[%c0_10, %c8] : memref<432x12xbf16, #tpu.memory_space<vmem>>, vector<432x4xbf16>
    tpu.vector_store %arg7[%c0_10, %c8], %10 {strides = array<i32>} : memref<432x12xbf16, #tpu.memory_space<vmem>>, vector<432x4xbf16>,
    %cst = arith.constant 0.000000e+00 : f32
    %12 = vector.broadcast %cst : f32 to vector<384x128xf32>
    %c0_11 = arith.constant 0 : index
    %c0_12 = arith.constant 0 : index
    %13 = vector.load %arg8[%c0_11, %c0_12] : memref<384x128xf32, #tpu.memory_space<vmem>>, vector<384x128xf32>
    tpu.vector_store %arg8[%c0_11, %c0_12], %12 {strides = array<i32>} : memref<384x128xf32, #tpu.memory_space<vmem>>, vector<384x128xf32>,
    %c0_13 = arith.constant 0 : index
    %c0_14 = arith.constant 0 : index
    %14 = vector.load %arg8[%c0_13, %c0_14] : memref<384x128xf32, #tpu.memory_space<vmem>>, vector<384x128xf32>
    %c0_15 = arith.constant 0 : index
    %c0_16 = arith.constant 0 : index
    %15 = vector.load %arg7[%c0_15, %c0_16] : memref<432x12xbf16, #tpu.memory_space<vmem>>, vector<384x12xbf16>
    %c0_17 = arith.constant 0 : index
    %c0_18 = arith.constant 0 : index
    %c0_19 = arith.constant 0 : index
    %16 = vector.load %arg3[%c0_17, %c0_18, %c0_19] : memref<3x12x128xbf16, #tpu.memory_space<vmem>>, vector<1x12x128xbf16>
    %17 = vector.shape_cast %16 : vector<1x12x128xbf16> to vector<12x128xbf16>
    %cst_20 = arith.constant dense<0.000000e+00> : vector<384x128xf32>
    %18 = tpu.matmul %15, %17, %cst_20 {dimension_numbers = #tpu.dot_dimension_numbers<[1], [0], [0], [1], [0, 0, 1, 1], [], []>} : vector<384x12xbf16>, vector<12x128xbf16>, vector<384x128xf32> -> vector<384x128xf32>
    %19 = arith.addf %14, %18 : vector<384x128xf32>
    %c0_21 = arith.constant 0 : index
    %c0_22 = arith.constant 0 : index
    %20 = vector.load %arg8[%c0_21, %c0_22] : memref<384x128xf32, #tpu.memory_space<vmem>>, vector<384x128xf32>
    tpu.vector_store %arg8[%c0_21, %c0_22], %19 {strides = array<i32>} : memref<384x128xf32, #tpu.memory_space<vmem>>, vector<384x128xf32>,
    %c0_23 = arith.constant 0 : index
    %c0_24 = arith.constant 0 : index
    %21 = vector.load %arg8[%c0_23, %c0_24] : memref<384x128xf32, #tpu.memory_space<vmem>>, vector<384x128xf32>
    %c24 = arith.constant 24 : index
    %c0_25 = arith.constant 0 : index
    %22 = vector.load %arg7[%c24, %c0_25] : memref<432x12xbf16, #tpu.memory_space<vmem>>, vector<384x12xbf16>
    %c1_26 = arith.constant 1 : index
    %c0_27 = arith.constant 0 : index
    %c0_28 = arith.constant 0 : index
    %23 = vector.load %arg3[%c1_26, %c0_27, %c0_28] : memref<3x12x128xbf16, #tpu.memory_space<vmem>>, vector<1x12x128xbf16>
    %24 = vector.shape_cast %23 : vector<1x12x128xbf16> to vector<12x128xbf16>
    %cst_29 = arith.constant dense<0.000000e+00> : vector<384x128xf32>
    %25 = tpu.matmul %22, %24, %cst_29 {dimension_numbers = #tpu.dot_dimension_numbers<[1], [0], [0], [1], [0, 0, 1, 1], [], []>} : vector<384x12xbf16>, vector<12x128xbf16>, vector<384x128xf32> -> vector<384x128xf32>
    %26 = arith.addf %21, %25 : vector<384x128xf32>
    %c0_30 = arith.constant 0 : index
    %c0_31 = arith.constant 0 : index
    %27 = vector.load %arg8[%c0_30, %c0_31] : memref<384x128xf32, #tpu.memory_space<vmem>>, vector<384x128xf32>
    tpu.vector_store %arg8[%c0_30, %c0_31], %26 {strides = array<i32>} : memref<384x128xf32, #tpu.memory_space<vmem>>, vector<384x128xf32>,
    %c0_32 = arith.constant 0 : index
    %c0_33 = arith.constant 0 : index
    %28 = vector.load %arg8[%c0_32, %c0_33] : memref<384x128xf32, #tpu.memory_space<vmem>>, vector<384x128xf32>
    %c48 = arith.constant 48 : index
    %c0_34 = arith.constant 0 : index
    %29 = vector.load %arg7[%c48, %c0_34] : memref<432x12xbf16, #tpu.memory_space<vmem>>, vector<384x12xbf16>
    %c2_35 = arith.constant 2 : index
    %c0_36 = arith.constant 0 : index
    %c0_37 = arith.constant 0 : index
    %30 = vector.load %arg3[%c2_35, %c0_36, %c0_37] : memref<3x12x128xbf16, #tpu.memory_space<vmem>>, vector<1x12x128xbf16>
    %31 = vector.shape_cast %30 : vector<1x12x128xbf16> to vector<12x128xbf16>
    %cst_38 = arith.constant dense<0.000000e+00> : vector<384x128xf32>
    %32 = tpu.matmul %29, %31, %cst_38 {dimension_numbers = #tpu.dot_dimension_numbers<[1], [0], [0], [1], [0, 0, 1, 1], [], []>} : vector<384x12xbf16>, vector<12x128xbf16>, vector<384x128xf32> -> vector<384x128xf32>
    %33 = arith.addf %28, %32 : vector<384x128xf32>
    %c0_39 = arith.constant 0 : index
    %c0_40 = arith.constant 0 : index
    %34 = vector.load %arg8[%c0_39, %c0_40] : memref<384x128xf32, #tpu.memory_space<vmem>>, vector<384x128xf32>
    tpu.vector_store %arg8[%c0_39, %c0_40], %33 {strides = array<i32>} : memref<384x128xf32, #tpu.memory_space<vmem>>, vector<384x128xf32>,
    %c0_41 = arith.constant 0 : index
    %c0_42 = arith.constant 0 : index
    %35 = vector.load %arg8[%c0_41, %c0_42] : memref<384x128xf32, #tpu.memory_space<vmem>>, vector<384x128xf32>
    %c0_43 = arith.constant 0 : index
    %c0_44 = arith.constant 0 : index
    %36 = vector.load %arg4[%c0_43, %c0_44] : memref<1x128xf32, #tpu.memory_space<vmem>>, vector<1x128xf32>
    %37 = vector.broadcast %36 : vector<1x128xf32> to vector<384x128xf32>
    %38 = arith.addf %35, %37 : vector<384x128xf32>
    %cst_45 = arith.constant 0.000000e+00 : f32
    %39 = vector.broadcast %cst_45 : f32 to vector<384x128xf32>
    %40 = arith.maximumf %38, %39 : vector<384x128xf32>
    %c0_46 = arith.constant 0 : index
    %c0_47 = arith.constant 0 : index
    %c0_48 = arith.constant 0 : index
    %41 = vector.load %arg5[%c0_46, %c0_47, %c0_48] : memref<1x384x128xf32, #tpu.memory_space<vmem>>, vector<1x384x128xf32>
    %42 = vector.shape_cast %41 : vector<1x384x128xf32> to vector<384x128xf32>
    %43 = vector.shape_cast %40 : vector<384x128xf32> to vector<1x384x128xf32>
    tpu.vector_store %arg5[%c0_46, %c0_47, %c0_48], %43 {strides = array<i32>} : memref<1x384x128xf32, #tpu.memory_space<vmem>>, vector<1x384x128xf32>,
    return
  }
  func.func @transform_0(%arg0: i32, %arg1: i32) -> (i32, i32, i32) {
    %c0_i32 = arith.constant 0 : i32
    %c0_i32_0 = arith.constant 0 : i32
    %c0_i32_1 = arith.constant 0 : i32
    return %arg0, %c0_i32, %c0_i32_0 : i32, i32, i32
  }
  func.func @transform_1(%arg0: i32, %arg1: i32) -> (i32, i32, i32) {
    %c0_i32 = arith.constant 0 : i32
    %c0_i32_0 = arith.constant 0 : i32
    %c0_i32_1 = arith.constant 0 : i32
    %c0_i32_2 = arith.constant 0 : i32
    return %c0_i32, %c0_i32_0, %c0_i32_1 : i32, i32, i32
  }
  func.func @transform_2(%arg0: i32, %arg1: i32) -> (i32, i32) {
    %c0_i32 = arith.constant 0 : i32
    %c0_i32_0 = arith.constant 0 : i32
    %c0_i32_1 = arith.constant 0 : i32
    return %c0_i32, %c0_i32_0 : i32, i32
  }
  func.func @transform_3(%arg0: i32, %arg1: i32) -> (i32, i32, i32) {
    %c0_i32 = arith.constant 0 : i32
    %c0_i32_0 = arith.constant 0 : i32
    return %arg0, %arg1, %c0_i32 : i32, i32, i32
  }
}

</mosaic_0001>

<bundles_post_ra>
// kernel: inception_forward.4
= control target key start
LH: loop header
LB: loop body
LE: loop exit
PB: predicated region body
PF: predicated region fallthrough
CT: control target
= control target key end

     0   :  { %s1176_s6 = smov 0   ;;  %s1752_s0 = inlined_call_operand.vmem [shape: bf16[2,18,18,4], index: 0, kind: input, shape index: {}]   ;;  %s1753_s1 = inlined_call_operand.vmem [shape: bf16[2,16,16,4], index: 1, kind: output, shape index: {}]  }
   0x1 LB: > { %s1118_s7 = sadd.s32 4294967295, %s1163_s6   ;;  %p1122_p0 = scmp.ge.s32.totalorder %s1163_s6, 1  ;;  %s1163_s6 = sphi %s1176_s6, %s11_s6  }
   0x2   : > { %p87_p1 = scmp.lt.s32.totalorder %s1163_s6, 3 }
   0x4   : > { %p88_p2 = pnand %p1122_p0, %p87_p1 }
   0x5   : > { %p107_p3 = scmp.lt.s32.totalorder (!%p88_p2), %s1118_s7, 1  ;;  %vm172_vm0 = vsmask.f32 (!%p88_p2), 3328  ;;  %vm173_vm1 = vsmask.f32 (!%p88_p2), 7440  ;;  %vm733_vm2 = vcmask (!%p88_p2), 1042432  }
   0x6   : > { %91 = sbr.rel (%p88_p2) target bundleno = 169 (0xa9), region = 24  ;;  %vm734_vm3 = vcmask (!%p88_p2), 1046532   ;;  %vm1216_vm5 = vmor (!%p88_p2), %vm172_vm0, %vm173_vm1  ;;  %vm1030_vm6 = vcmask (!%p88_p2), 27648  }
   0x7   : > { %vm1208_vm4 = vmor (!%p88_p2), %vm733_vm2, %vm734_vm3 }
   0xd   : > { %s1759_s7 = smov (!%p107_p3, %s1118_s7), 1 }
   0xe   : > { %s1147_s8 = smul.u32 216, %s1759_s7  ;;  %s1146_s12 = sshll.u32 %s1759_s7, 7 }
   0xf   : > { %s1258_s15 = scalar_lea.vmem %s1753_s1, %s1146_s12 }
  0x10   : > { %s1190_s11 = scalar_lea.vmem %s1752_s0, %s1147_s8 }
  0x11   : > { %v118_v0 = vld [vmem:[%s1190_s11] sm:$0xf]  ;;  %v1194_v1 = vld [vmem:[%s1190_s11 + $0x4] sm:$0xf]  ;;  %v121_v2 = vld [vmem:[%s1190_s11 + $0xc] sm:$0xf] }
  0x12   : > { %v1198_v3 = vld [vmem:[%s1190_s11 + $0x10] sm:$0xf]  ;;  %v124_v4 = vld [vmem:[%s1190_s11 + $0x18] sm:$0xf]  ;;  %v176_v5 = vshrl.u32 %v118_v0, 16  ;;  %v179_v6 = vshll.u32 %v118_v0, 16 }
  0x13   : > { %v185_v7 = vshll.u32 %v1194_v1, 16  ;;  %v200_v8 = vshrl.u32 %v121_v2, 16  ;;  %v1203_v9 = vld [vmem:[%s1190_s11 + $0x1c] sm:$0xf]  ;;  %v203_v10 = vshll.u32 %v121_v2, 16  ;;  %v209_v11 = vshll.u32 %v1198_v3, 16 }
  0x14   : > { %v224_v12 = vshrl.u32 %v124_v4, 16  ;;  %v227_v13 = vshll.u32 %v124_v4, 16  ;;  %v178_v14 = vrot.slane %v176_v5, 4  ;;  %v181_v15 = vrot.slane %v179_v6, 5  ;;  %v120_v32 = vld [vmem:[%s1190_s11 + $0x8] sm:$0x1] }
  0x15   : > { %v187_v16 = vrot.slane %v185_v7, 5  ;;  %v202_v17 = vrot.slane %v200_v8, 4  ;;  %v205_v18 = vrot.slane %v203_v10, 5  ;;  %v211_v19 = vrot.slane %v209_v11, 5  ;;  %v123_v42 = vld [vmem:[%s1190_s11 + $0x14] sm:$0x1] }
  0x16   : > { %v226_v20 = vrot.slane %v224_v12, 4  ;;  %v229_v21 = vrot.slane %v227_v13, 5  ;;  %v182_v23 = vor.u32 %v181_v15, %v178_v14  ;;  %v233_v24 = vshll.u32 %v1203_v9, 16  ;;  %v126_v50 = vld [vmem:[%s1190_s11 + $0x20] sm:$0x1] }
  0x17   : > { %v1126_v25 = vrot.slane %v118_v0, 9  ;;  %v738_v26 = vrot.slane %v1194_v1, 5  ;;  %v206_v28 = vor.u32 %v205_v18, %v202_v17  ;;  %v1127_v30 = vrot.slane %v121_v2, 9  ;;  %v127_v14 = vld [vmem:[%s1190_s11 + $0x24] sm:$0xf] }
  0x18   : > { %v230_v29 = vor.u32 %v229_v21, %v226_v20  ;;  %v745_v31 = vrot.slane %v1198_v3, 5  ;;  %v183_v33 = vrot.slane %v182_v23, 4  ;;  %v235_v34 = vrot.slane %v233_v24, 5 }
  0x19   : > { %v739_v35 = vsel %vm1208_vm4, %v1126_v25, %v738_v26  ;;  %v1128_v36 = vrot.slane %v124_v4, 9  ;;  %v207_v37 = vrot.slane %v206_v28, 4  ;;  %v752_v40 = vrot.slane %v1203_v9, 5 }
  0x1a   : > { %v231_v38 = vrot.slane %v230_v29, 4  ;;  %v746_v39 = vsel %vm1208_vm4, %v1127_v30, %v745_v31  ;;  %v188_v41 = vsel %vm1216_vm5, %v183_v33, %v187_v16  ;;  %v189_v43 = vshrl.u32 %v1194_v1, 16 }
  0x1b   : > { %v195_v44 = vshll.u32 %v120_v32, 16  ;;  %v213_v45 = vshrl.u32 %v1198_v3, 16  ;;  %v212_v46 = vsel %vm1216_vm5, %v207_v37, %v211_v19  ;;  %v643_v48 = vmax.bf16 %v188_v41, %v118_v0  ;;  %v129_v37 = vld [vmem:[%s1190_s11 + $0x2c] sm:$0x1] }
  0x1c   : > { %v236_v47 = vsel %vm1216_vm5, %v231_v38, %v235_v34  ;;  %v753_v49 = vsel %vm1208_vm4, %v1128_v36, %v752_v40  ;;  %v645_v51 = vmax.bf16 %v212_v46, %v121_v2  ;;  %v191_v53 = vrot.slane %v189_v43, 4 }
  0x1d   : > { %v647_v52 = vmax.bf16 %v236_v47, %v124_v4  ;;  %v197_v54 = vrot.slane %v195_v44, 5  ;;  %v898_v55 = vmax.bf16 %v739_v35, %v643_v48  ;;  %v215_v56 = vrot.slane %v213_v45, 4 }
  0x1e   : > { %v219_v57 = vshll.u32 %v123_v42, 16  ;;  %v237_v58 = vshrl.u32 %v1203_v9, 16  ;;  %v1240_v59 = vmax.bf16 %v746_v39, %v645_v51  ;;  %v192_v61 = vor.u32 %v191_v53, %v187_v16 }
  0x1f   : > { %v1242_v60 = vmax.bf16 %v753_v49, %v647_v52  ;;  %v243_v62 = vshll.u32 %v126_v50, 16  ;;  %v216_v63 = vor.u32 %v215_v56, %v211_v19  ;;  %v740_v2 = vrot.slane %v738_v26, 4  ;;  %v1253_v19 = vld [vmem:[%s1190_s11 + $0x28] sm:$0xf]  ;;  %v1289_v49 = vld [vmem:[%s1190_s11 + $0x34] sm:$0xf] }
  0x20   : > { %v221_v0 = vrot.slane %v219_v57, 5  ;;  %v239_v5 = vrot.slane %v237_v58, 4  ;;  %v934_v4 = vmax.bf16 %v1240_v59, %v898_v55  ;;  %v193_v6 = vrot.slane %v192_v61, 4 }
  0x21   : > { %v245_v7 = vrot.slane %v243_v62, 5  ;;  %v741_v8 = vrot.slane %v120_v32, 5  ;;  %v217_v10 = vrot.slane %v216_v63, 4  ;;  %v747_v12 = vrot.slane %v745_v31, 4  ;;  %v132_v63 = vld [vmem:[%s1190_s11 + $0x38] sm:$0x1] }
  0x22   : > { %v240_v11 = vor.u32 %v239_v5, %v235_v34  ;;  %v748_v13 = vrot.slane %v123_v42, 5  ;;  %v966_v15 = vmax.bf16 %v934_v4, %v1242_v60  ;;  %v198_v16 = vsel %vm1216_vm5, %v193_v6, %v197_v54 }
  0x23   : > { %v742_v17 = vsel %vm1208_vm4, %v740_v2, %v741_v8  ;;  %v754_v18 = vrot.slane %v752_v40, 4  ;;  %v222_v20 = vsel %vm1216_vm5, %v217_v10, %v221_v0  ;;  %v644_v23 = vmax.bf16 %v198_v16, %v1194_v1  ;;  %v133_v16 = vld [vmem:[%s1190_s11 + $0x3c] sm:$0xf] }
  0x24   : > { %v241_v21 = vrot.slane %v240_v11, 4  ;;  %v749_v24 = vsel %vm1208_vm4, %v747_v12, %v748_v13  ;;  %v1165_v25 = vmov 0   ;;  %v646_v28 = vmax.bf16 %v222_v20, %v1198_v3 }
  0x25   : > { %v998_v26 = vmax.bf16 %v1165_v25, %v966_v15  ;;  %v755_v29 = vrot.slane %v126_v50, 5  ;;  %v248_v30 = vshrl.u32 %v127_v14, 16  ;;  %v899_v32 = vmax.bf16 %v742_v17, %v644_v23 }
  0x26   : > { %v246_v31 = vsel %vm1216_vm5, %v241_v21, %v245_v7  ;;  %v251_v33 = vshll.u32 %v127_v14, 16  ;;  %v257_v34 = vshll.u32 %v1253_v19, 16  ;;  %v1275_v36 = vmax.bf16 %v749_v24, %v646_v28  ;;  %v1314_v28 = vld [vmem:[%s1190_s11 + $0x40] sm:$0xf] }
  0x27   : > { %1031 = vst.msk [vmem:[%s1258_s15] sm:$0xf] %vm1030_vm6, %v998_v26  ;;  %v648_v1 = vmax.bf16 %v246_v31, %v1203_v9  ;;  %v756_v35 = vsel %vm1208_vm4, %v754_v18, %v755_v29  ;;  %v250_v3 = vrot.slane %v248_v30, 4  ;;  %v1129_v39 = vrot.slane %v127_v14, 9  ;;  %v130_v9 = vld [vmem:[%s1190_s11 + $0x30] sm:$0xf] }
  0x28   : > { %v253_v38 = vrot.slane %v251_v33, 5  ;;  %v759_v40 = vrot.slane %v1253_v19, 5  ;;  %v935_v42 = vmax.bf16 %v1275_v36, %v899_v32  ;;  %v259_v43 = vrot.slane %v257_v34, 5 }
  0x29   : > { %v1279_v41 = vmax.bf16 %v756_v35, %v648_v1  ;;  %v261_v44 = vshrl.u32 %v1253_v19, 16  ;;  %v936_v47 = vmax.bf16 %v1242_v60, %v1240_v59  ;;  %v267_v48 = vshll.u32 %v129_v37, 16 }
  0x2a   : > { %v254_v45 = vor.u32 %v253_v38, %v250_v3  ;;  %v760_v46 = vsel %vm1208_vm4, %v1129_v39, %v759_v40  ;;  %v761_v52 = vrot.slane %v759_v40, 4  ;;  %v762_v53 = vrot.slane %v129_v37, 5 }
  0x2b   : > { %v967_v50 = vmax.bf16 %v935_v42, %v1279_v41  ;;  %v263_v51 = vrot.slane %v261_v44, 4  ;;  %v937_v55 = vmax.bf16 %v1279_v41, %v1275_v36  ;;  %v272_v56 = vshrl.u32 %v130_v9, 16 }
  0x2c   : > { %v255_v54 = vrot.slane %v254_v45, 4  ;;  %v275_v57 = vshll.u32 %v130_v9, 16  ;;  %v269_v62 = vrot.slane %v267_v48, 5  ;;  %v281_v59 = vshll.u32 %v1289_v49, 16  ;;  %v135_v45 = vld [vmem:[%s1190_s11 + $0x44] sm:$0x1] }
  0x2d   : > { %v999_v58 = vmax.bf16 %v1165_v25, %v967_v50  ;;  %v264_v61 = vor.u32 %v263_v51, %v259_v43  ;;  %v274_v5 = vrot.slane %v272_v56, 4  ;;  %v1130_v4 = vrot.slane %v130_v9, 9  ;;  %v136_v51 = vld [vmem:[%s1190_s11 + $0x48] sm:$0xf] }
  0x2e   : > { %v260_v0 = vsel %vm1216_vm5, %v255_v54, %v259_v43  ;;  %v277_v2 = vrot.slane %v275_v57, 5  ;;  %v763_v8 = vsel %vm1208_vm4, %v761_v52, %v762_v53  ;;  %v766_v10 = vrot.slane %v1289_v49, 5 }
  0x2f   : > { %1032 = vst.msk [vmem:[%s1258_s15 + $0x4] sm:$0xf] %vm1030_vm6, %v999_v58  ;;  %v649_v6 = vmax.bf16 %v260_v0, %v127_v14  ;;  %v265_v7 = vrot.slane %v264_v61, 4  ;;  %v283_v12 = vrot.slane %v281_v59, 5  ;;  %v285_v13 = vshrl.u32 %v1289_v49, 16 }
  0x30   : > { %v278_v11 = vor.u32 %v277_v2, %v274_v5  ;;  %v291_v15 = vshll.u32 %v132_v63, 16  ;;  %v767_v14 = vsel %vm1208_vm4, %v1130_v4, %v766_v10  ;;  %v769_v20 = vrot.slane %v132_v63, 5  ;;  %v1351_v0 = vld [vmem:[%s1190_s11 + $0x4c] sm:$0xf] }
  0x31   : > { %v1306_v17 = vmax.bf16 %v760_v46, %v649_v6  ;;  %v270_v18 = vsel %vm1216_vm5, %v265_v7, %v269_v62  ;;  %v287_v24 = vrot.slane %v285_v13, 4  ;;  %v768_v26 = vrot.slane %v766_v10, 4 }
  0x32   : > { %v650_v21 = vmax.bf16 %v270_v18, %v1253_v19  ;;  %v279_v23 = vrot.slane %v278_v11, 4  ;;  %v293_v31 = vrot.slane %v291_v15, 5  ;;  %v296_v32 = vshrl.u32 %v133_v16, 16 }
  0x33   : > { %v968_v29 = vmax.bf16 %v936_v47, %v1306_v17  ;;  %v938_v30 = vmax.bf16 %v1306_v17, %v1242_v60  ;;  %v288_v19 = vor.u32 %v287_v24, %v283_v12  ;;  %v299_v1 = vshll.u32 %v133_v16, 16 }
  0x34   : > { %v1319_v33 = vmax.bf16 %v763_v8, %v650_v21  ;;  %v284_v34 = vsel %vm1216_vm5, %v279_v23, %v283_v12  ;;  %v298_v3 = vrot.slane %v296_v32, 4  ;;  %v305_v37 = vshll.u32 %v1314_v28, 16  ;;  %v138_v21 = vld [vmem:[%s1190_s11 + $0x50] sm:$0x1] }
  0x35   : > { %v1000_v35 = vmax.bf16 %v1165_v25, %v968_v29  ;;  %v651_v36 = vmax.bf16 %v284_v34, %v130_v9  ;;  %v289_v60 = vrot.slane %v288_v19, 4  ;;  %v770_v39 = vsel %vm1208_vm4, %v768_v26, %v769_v20  ;;  %v139_v29 = vld [vmem:[%s1190_s11 + $0x54] sm:$0xf] }
  0x36   : > { %v969_v38 = vmax.bf16 %v937_v55, %v1319_v33  ;;  %v301_v40 = vrot.slane %v299_v1, 5  ;;  %v307_v43 = vrot.slane %v305_v37, 5  ;;  %v1131_v44 = vrot.slane %v133_v16, 9 }
  0x37   : > { %1033 = vst.msk [vmem:[%s1258_s15 + $0x8] sm:$0xf] %vm1030_vm6, %v1000_v35  ;;  %v1330_v42 = vmax.bf16 %v767_v14, %v651_v36  ;;  %v773_v9 = vrot.slane %v1314_v28, 5  ;;  %v294_v47 = vsel %vm1216_vm5, %v289_v60, %v293_v31  ;;  %v309_v50 = vshrl.u32 %v1314_v28, 16  ;;  %v1384_v60 = vld [vmem:[%s1190_s11 + $0x58] sm:$0xf] }
  0x38   : > { %v1001_v46 = vmax.bf16 %v1165_v25, %v969_v38  ;;  %v302_v48 = vor.u32 %v301_v40, %v298_v3  ;;  %v652_v53 = vmax.bf16 %v294_v47, %v1289_v49  ;;  %v939_v54 = vmax.bf16 %v1319_v33, %v1279_v41 }
  0x39   : > { %v970_v52 = vmax.bf16 %v938_v30, %v1330_v42  ;;  %v774_v55 = vsel %vm1208_vm4, %v1131_v44, %v773_v9  ;;  %v311_v57 = vrot.slane %v309_v50, 4  ;;  %v315_v58 = vshll.u32 %v135_v45, 16 }
  0x3a   : > { %1034 = vst.msk [vmem:[%s1258_s15 + $0xc] sm:$0xf] %vm1030_vm6, %v1001_v46  ;;  %v303_v56 = vrot.slane %v302_v48, 4  ;;  %v775_v61 = vrot.slane %v773_v9, 4  ;;  %v1348_v59 = vmax.bf16 %v770_v39, %v652_v53  ;;  %v776_v63 = vrot.slane %v135_v45, 5 }
  0x3b   : > { %v1002_v62 = vmax.bf16 %v1165_v25, %v970_v52  ;;  %v320_v49 = vshrl.u32 %v136_v51, 16  ;;  %v312_v5 = vor.u32 %v311_v57, %v307_v43  ;;  %v317_v2 = vrot.slane %v315_v58, 5 }
  0x3c   : > { %v308_v41 = vsel %vm1216_vm5, %v303_v56, %v307_v43  ;;  %v323_v4 = vshll.u32 %v136_v51, 16  ;;  %v971_v6 = vmax.bf16 %v939_v54, %v1348_v59  ;;  %v940_v8 = vmax.bf16 %v1330_v42, %v1306_v17  ;;  %v141_v56 = vld [vmem:[%s1190_s11 + $0x5c] sm:$0x1] }
  0x3d   : > { %1035 = vst.msk [vmem:[%s1258_s15 + $0x10] sm:$0xf] %vm1030_vm6, %v1002_v62  ;;  %v653_v7 = vmax.bf16 %v308_v41, %v133_v16  ;;  %v777_v10 = vsel %vm1208_vm4, %v775_v61, %v776_v63  ;;  %v313_v11 = vrot.slane %v312_v5, 4  ;;  %v322_v12 = vrot.slane %v320_v49, 4  ;;  %v142_v62 = vld [vmem:[%s1190_s11 + $0x60] sm:$0xf] }
  0x3e   : > { %v325_v13 = vrot.slane %v323_v4, 5  ;;  %v329_v15 = vshll.u32 %v1351_v0, 16  ;;  %v1003_v18 = vmax.bf16 %v1165_v25, %v971_v6  ;;  %v1132_v20 = vrot.slane %v136_v51, 9 }
  0x3f   : > { %v1364_v14 = vmax.bf16 %v774_v55, %v653_v7  ;;  %v780_v16 = vrot.slane %v1351_v0, 5  ;;  %v318_v17 = vsel %vm1216_vm5, %v313_v11, %v317_v2  ;;  %v333_v26 = vshrl.u32 %v1351_v0, 16 }
  0x40   : > { %v326_v23 = vor.u32 %v325_v13, %v322_v12  ;;  %v331_v24 = vrot.slane %v329_v15, 5  ;;  %1036 = vst.msk [vmem:[%s1258_s15 + $0x14] sm:$0xf] %vm1030_vm6, %v1003_v18  ;;  %v654_v31 = vmax.bf16 %v318_v17, %v1314_v28  ;;  %v941_v32 = vmax.bf16 %v1348_v59, %v1319_v33  ;;  %v1417_v12 = vld [vmem:[%s1190_s11 + $0x64] sm:$0xf] }
  0x41   : > { %v972_v30 = vmax.bf16 %v940_v8, %v1364_v14  ;;  %v781_v34 = vsel %vm1208_vm4, %v1132_v20, %v780_v16  ;;  %v335_v1 = vrot.slane %v333_v26, 4  ;;  %v339_v35 = vshll.u32 %v138_v21, 16 }
  0x42   : > { %v327_v19 = vrot.slane %v326_v23, 4  ;;  %v782_v36 = vrot.slane %v780_v16, 4  ;;  %v1381_v37 = vmax.bf16 %v777_v10, %v654_v31  ;;  %v783_v38 = vrot.slane %v138_v21, 5 }
  0x43   : > { %v1004_v3 = vmax.bf16 %v1165_v25, %v972_v30  ;;  %v344_v39 = vshrl.u32 %v139_v29, 16  ;;  %v336_v40 = vor.u32 %v335_v1, %v331_v24  ;;  %v341_v33 = vrot.slane %v339_v35, 5 }
  0x44   : > { %v332_v28 = vsel %vm1216_vm5, %v327_v19, %v331_v24  ;;  %v347_v43 = vshll.u32 %v139_v29, 16  ;;  %v973_v44 = vmax.bf16 %v941_v32, %v1381_v37  ;;  %v942_v45 = vmax.bf16 %v1364_v14, %v1330_v42  ;;  %v144_v19 = vld [vmem:[%s1190_s11 + $0x68] sm:$0x1] }
  0x45   : > { %1037 = vst.msk [vmem:[%s1258_s15 + $0x18] sm:$0xf] %vm1030_vm6, %v1004_v3  ;;  %v655_v9 = vmax.bf16 %v332_v28, %v136_v51  ;;  %v784_v46 = vsel %vm1208_vm4, %v782_v36, %v783_v38  ;;  %v337_v47 = vrot.slane %v336_v40, 4  ;;  %v346_v48 = vrot.slane %v344_v39, 4  ;;  %v145_v3 = vld [vmem:[%s1190_s11 + $0x6c] sm:$0xf] }
  0x46   : > { %v349_v50 = vrot.slane %v347_v43, 5  ;;  %v353_v52 = vshll.u32 %v1384_v60, 16  ;;  %v1005_v53 = vmax.bf16 %v1165_v25, %v973_v44  ;;  %v1133_v55 = vrot.slane %v139_v29, 9 }
  0x47   : > { %v1397_v54 = vmax.bf16 %v781_v34, %v655_v9  ;;  %v787_v51 = vrot.slane %v1384_v60, 5  ;;  %v342_v42 = vsel %vm1216_vm5, %v337_v47, %v341_v33  ;;  %v357_v61 = vshrl.u32 %v1384_v60, 16 }
  0x48   : > { %v350_v57 = vor.u32 %v349_v50, %v346_v48  ;;  %v355_v58 = vrot.slane %v353_v52, 5  ;;  %1038 = vst.msk [vmem:[%s1258_s15 + $0x1c] sm:$0xf] %vm1030_vm6, %v1005_v53  ;;  %v656_v49 = vmax.bf16 %v342_v42, %v1351_v0  ;;  %v943_v41 = vmax.bf16 %v1381_v37, %v1348_v59  ;;  %v1450_v48 = vld [vmem:[%s1190_s11 + $0x70] sm:$0xf] }
  0x49   : > { %v974_v63 = vmax.bf16 %v942_v45, %v1397_v54  ;;  %v788_v5 = vsel %vm1208_vm4, %v1133_v55, %v787_v51  ;;  %v359_v4 = vrot.slane %v357_v61, 4  ;;  %v363_v6 = vshll.u32 %v141_v56, 16 }
  0x4a   : > { %v351_v2 = vrot.slane %v350_v57, 4  ;;  %v789_v7 = vrot.slane %v787_v51, 4  ;;  %v1414_v10 = vmax.bf16 %v784_v46, %v656_v49  ;;  %v790_v11 = vrot.slane %v141_v56, 5 }
  0x4b   : > { %v1006_v8 = vmax.bf16 %v1165_v25, %v974_v63  ;;  %v368_v13 = vshrl.u32 %v142_v62, 16  ;;  %v360_v15 = vor.u32 %v359_v4, %v355_v58  ;;  %v365_v59 = vrot.slane %v363_v6, 5 }
  0x4c   : > { %v356_v0 = vsel %vm1216_vm5, %v351_v2, %v355_v58  ;;  %v371_v18 = vshll.u32 %v142_v62, 16  ;;  %v975_v20 = vmax.bf16 %v943_v41, %v1414_v10  ;;  %v944_v21 = vmax.bf16 %v1397_v54, %v1364_v14  ;;  %v147_v2 = vld [vmem:[%s1190_s11 + $0x74] sm:$0x1] }
  0x4d   : > { %1039 = vst.msk [vmem:[%s1258_s15 + $0x20] sm:$0xf] %vm1030_vm6, %v1006_v8  ;;  %v657_v16 = vmax.bf16 %v356_v0, %v139_v29  ;;  %v791_v17 = vsel %vm1208_vm4, %v789_v7, %v790_v11  ;;  %v361_v23 = vrot.slane %v360_v15, 4  ;;  %v370_v24 = vrot.slane %v368_v13, 4  ;;  %v148_v8 = vld [vmem:[%s1190_s11 + $0x78] sm:$0xf] }
  0x4e   : > { %v373_v26 = vrot.slane %v371_v18, 5  ;;  %v377_v30 = vshll.u32 %v1417_v12, 16  ;;  %v1007_v31 = vmax.bf16 %v1165_v25, %v975_v20  ;;  %v1134_v34 = vrot.slane %v142_v62, 9 }
  0x4f   : > { %v1430_v32 = vmax.bf16 %v788_v5, %v657_v16  ;;  %v794_v29 = vrot.slane %v1417_v12, 5  ;;  %v366_v14 = vsel %vm1216_vm5, %v361_v23, %v365_v59  ;;  %v381_v36 = vshrl.u32 %v1417_v12, 16 }
  0x50   : > { %v374_v1 = vor.u32 %v373_v26, %v370_v24  ;;  %v379_v35 = vrot.slane %v377_v30, 5  ;;  %1040 = vst.msk [vmem:[%s1258_s15 + $0x24] sm:$0xf] %vm1030_vm6, %v1007_v31  ;;  %v658_v39 = vmax.bf16 %v366_v14, %v1384_v60  ;;  %v945_v28 = vmax.bf16 %v1414_v10, %v1381_v37  ;;  %v1483_v24 = vld [vmem:[%s1190_s11 + $0x7c] sm:$0xf] }
  0x51   : > { %v976_v38 = vmax.bf16 %v944_v21, %v1430_v32  ;;  %v795_v40 = vsel %vm1208_vm4, %v1134_v34, %v794_v29  ;;  %v383_v43 = vrot.slane %v381_v36, 4  ;;  %v387_v44 = vshll.u32 %v144_v19, 16 }
  0x52   : > { %v375_v33 = vrot.slane %v374_v1, 4  ;;  %v796_v9 = vrot.slane %v794_v29, 4  ;;  %v1447_v46 = vmax.bf16 %v791_v17, %v658_v39  ;;  %v797_v47 = vrot.slane %v144_v19, 5 }
  0x53   : > { %v1008_v45 = vmax.bf16 %v1165_v25, %v976_v38  ;;  %v392_v50 = vshrl.u32 %v145_v3, 16  ;;  %v384_v52 = vor.u32 %v383_v43, %v379_v35  ;;  %v389_v37 = vrot.slane %v387_v44, 5 }
  0x54   : > { %v380_v60 = vsel %vm1216_vm5, %v375_v33, %v379_v35  ;;  %v395_v53 = vshll.u32 %v145_v3, 16  ;;  %v977_v55 = vmax.bf16 %v945_v28, %v1447_v46  ;;  %v946_v56 = vmax.bf16 %v1430_v32, %v1397_v54  ;;  %v150_v33 = vld [vmem:[%s1190_s11 + $0x80] sm:$0x1] }
  0x55   : > { %1041 = vst.msk [vmem:[%s1258_s15 + $0x28] sm:$0xf] %vm1030_vm6, %v1008_v45  ;;  %v659_v51 = vmax.bf16 %v380_v60, %v142_v62  ;;  %v798_v42 = vsel %vm1208_vm4, %v796_v9, %v797_v47  ;;  %v385_v57 = vrot.slane %v384_v52, 4  ;;  %v394_v58 = vrot.slane %v392_v50, 4  ;;  %v151_v45 = vld [vmem:[%s1190_s11 + $0x84] sm:$0xf] }
  0x56   : > { %v397_v61 = vrot.slane %v395_v53, 5  ;;  %v401_v63 = vshll.u32 %v1450_v48, 16  ;;  %v1009_v49 = vmax.bf16 %v1165_v25, %v977_v55  ;;  %v1135_v5 = vrot.slane %v145_v3, 9 }
  0x57   : > { %v1463_v41 = vmax.bf16 %v795_v40, %v659_v51  ;;  %v801_v62 = vrot.slane %v1450_v48, 5  ;;  %v390_v54 = vsel %vm1216_vm5, %v385_v57, %v389_v37  ;;  %v405_v7 = vshrl.u32 %v1450_v48, 16 }
  0x58   : > { %v398_v4 = vor.u32 %v397_v61, %v394_v58  ;;  %v403_v6 = vrot.slane %v401_v63, 5  ;;  %1042 = vst.msk [vmem:[%s1258_s15 + $0x2c] sm:$0xf] %vm1030_vm6, %v1009_v49  ;;  %v660_v13 = vmax.bf16 %v390_v54, %v1417_v12  ;;  %v947_v0 = vmax.bf16 %v1447_v46, %v1414_v10  ;;  %v1516_v58 = vld [vmem:[%s1190_s11 + $0x88] sm:$0xf] }
  0x59   : > { %v978_v11 = vmax.bf16 %v946_v56, %v1463_v41  ;;  %v802_v15 = vsel %vm1208_vm4, %v1135_v5, %v801_v62  ;;  %v407_v18 = vrot.slane %v405_v7, 4  ;;  %v411_v20 = vshll.u32 %v147_v2, 16 }
  0x5a   : > { %v399_v59 = vrot.slane %v398_v4, 4  ;;  %v803_v16 = vrot.slane %v801_v62, 4  ;;  %v1480_v17 = vmax.bf16 %v798_v42, %v660_v13  ;;  %v804_v23 = vrot.slane %v147_v2, 5 }
  0x5b   : > { %v1010_v21 = vmax.bf16 %v1165_v25, %v978_v11  ;;  %v416_v26 = vshrl.u32 %v148_v8, 16  ;;  %v408_v30 = vor.u32 %v407_v18, %v403_v6  ;;  %v413_v10 = vrot.slane %v411_v20, 5 }
  0x5c   : > { %v404_v12 = vsel %vm1216_vm5, %v399_v59, %v403_v6  ;;  %v419_v31 = vshll.u32 %v148_v8, 16  ;;  %v979_v34 = vmax.bf16 %v947_v0, %v1480_v17  ;;  %v948_v19 = vmax.bf16 %v1463_v41, %v1430_v32  ;;  %v153_v59 = vld [vmem:[%s1190_s11 + $0x8c] sm:$0x1] }
  0x5d   : > { %1043 = vst.msk [vmem:[%s1258_s15 + $0x30] sm:$0xf] %vm1030_vm6, %v1010_v21  ;;  %v661_v29 = vmax.bf16 %v404_v12, %v145_v3  ;;  %v805_v14 = vsel %vm1208_vm4, %v803_v16, %v804_v23  ;;  %v409_v1 = vrot.slane %v408_v30, 4  ;;  %v418_v35 = vrot.slane %v416_v26, 4  ;;  %v154_v21 = vld [vmem:[%s1190_s11 + $0x90] sm:$0xf] }
  0x5e   : > { %v421_v36 = vrot.slane %v419_v31, 5  ;;  %v425_v38 = vshll.u32 %v1483_v24, 16  ;;  %v1011_v39 = vmax.bf16 %v1165_v25, %v979_v34  ;;  %v1136_v40 = vrot.slane %v148_v8, 9 }
  0x5f   : > { %v1496_v28 = vmax.bf16 %v802_v15, %v661_v29  ;;  %v808_v3 = vrot.slane %v1483_v24, 5  ;;  %v414_v32 = vsel %vm1216_vm5, %v409_v1, %v413_v10  ;;  %v429_v9 = vshrl.u32 %v1483_v24, 16 }
  0x60   : > { %v422_v43 = vor.u32 %v421_v36, %v418_v35  ;;  %v427_v44 = vrot.slane %v425_v38, 5  ;;  %1044 = vst.msk [vmem:[%s1258_s15 + $0x34] sm:$0xf] %vm1030_vm6, %v1011_v39  ;;  %v662_v50 = vmax.bf16 %v414_v32, %v1450_v48  ;;  %v949_v60 = vmax.bf16 %v1480_v17, %v1447_v46  ;;  %v1549_v35 = vld [vmem:[%s1190_s11 + $0x94] sm:$0xf] }
  0x61   : > { %v980_v47 = vmax.bf16 %v948_v19, %v1496_v28  ;;  %v809_v52 = vsel %vm1208_vm4, %v1136_v40, %v808_v3  ;;  %v431_v53 = vrot.slane %v429_v9, 4  ;;  %v435_v55 = vshll.u32 %v150_v33, 16 }
  0x62   : > { %v423_v37 = vrot.slane %v422_v43, 4  ;;  %v810_v51 = vrot.slane %v808_v3, 4  ;;  %v1513_v42 = vmax.bf16 %v805_v14, %v662_v50  ;;  %v811_v57 = vrot.slane %v150_v33, 5 }
  0x63   : > { %v1012_v56 = vmax.bf16 %v1165_v25, %v980_v47  ;;  %v440_v61 = vshrl.u32 %v151_v45, 16  ;;  %v432_v63 = vor.u32 %v431_v53, %v427_v44  ;;  %v437_v46 = vrot.slane %v435_v55, 5 }
  0x64   : > { %v428_v48 = vsel %vm1216_vm5, %v423_v37, %v427_v44  ;;  %v443_v49 = vshll.u32 %v151_v45, 16  ;;  %v981_v5 = vmax.bf16 %v949_v60, %v1513_v42  ;;  %v950_v2 = vmax.bf16 %v1496_v28, %v1463_v41  ;;  %v156_v37 = vld [vmem:[%s1190_s11 + $0x98] sm:$0x1] }
  0x65   : > { %1045 = vst.msk [vmem:[%s1258_s15 + $0x38] sm:$0xf] %vm1030_vm6, %v1012_v56  ;;  %v663_v62 = vmax.bf16 %v428_v48, %v148_v8  ;;  %v812_v54 = vsel %vm1208_vm4, %v810_v51, %v811_v57  ;;  %v433_v4 = vrot.slane %v432_v63, 4  ;;  %v442_v6 = vrot.slane %v440_v61, 4  ;;  %v157_v56 = vld [vmem:[%s1190_s11 + $0x9c] sm:$0xf] }
  0x66   : > { %v445_v7 = vrot.slane %v443_v49, 5  ;;  %v449_v11 = vshll.u32 %v1516_v58, 16  ;;  %v1013_v13 = vmax.bf16 %v1165_v25, %v981_v5  ;;  %v1137_v15 = vrot.slane %v151_v45, 9 }
  0x67   : > { %v1529_v0 = vmax.bf16 %v809_v52, %v663_v62  ;;  %v815_v8 = vrot.slane %v1516_v58, 5  ;;  %v438_v41 = vsel %vm1216_vm5, %v433_v4, %v437_v46  ;;  %v453_v16 = vshrl.u32 %v1516_v58, 16 }
  0x68   : > { %v446_v18 = vor.u32 %v445_v7, %v442_v6  ;;  %v451_v20 = vrot.slane %v449_v11, 5  ;;  %1046 = vst.msk [vmem:[%s1258_s15 + $0x3c] sm:$0xf] %vm1030_vm6, %v1013_v13  ;;  %v664_v26 = vmax.bf16 %v438_v41, %v1483_v24  ;;  %v951_v12 = vmax.bf16 %v1513_v42, %v1480_v17  ;;  %v1582_v6 = vld [vmem:[%s1190_s11 + $0xa0] sm:$0xf] }
  0x69   : > { %v982_v23 = vmax.bf16 %v950_v2, %v1529_v0  ;;  %v816_v30 = vsel %vm1208_vm4, %v1137_v15, %v815_v8  ;;  %v455_v31 = vrot.slane %v453_v16, 4  ;;  %v459_v34 = vshll.u32 %v153_v59, 16 }
  0x6a   : > { %v447_v10 = vrot.slane %v446_v18, 4  ;;  %v817_v29 = vrot.slane %v815_v8, 4  ;;  %v1546_v14 = vmax.bf16 %v812_v54, %v664_v26  ;;  %v818_v1 = vrot.slane %v153_v59, 5 }
  0x6b   : > { %v1014_v19 = vmax.bf16 %v1165_v25, %v982_v23  ;;  %v464_v36 = vshrl.u32 %v154_v21, 16  ;;  %v456_v38 = vor.u32 %v455_v31, %v451_v20  ;;  %v461_v17 = vrot.slane %v459_v34, 5 }
  0x6c   : > { %v452_v24 = vsel %vm1216_vm5, %v447_v10, %v451_v20  ;;  %v467_v39 = vshll.u32 %v154_v21, 16  ;;  %v983_v40 = vmax.bf16 %v951_v12, %v1546_v14  ;;  %v952_v33 = vmax.bf16 %v1529_v0, %v1496_v28  ;;  %v159_v10 = vld [vmem:[%s1190_s11 + $0xa4] sm:$0x1] }
  0x6d   : > { %1047 = vst.msk [vmem:[%s1258_s15 + $0x40] sm:$0xf] %vm1030_vm6, %v1014_v19  ;;  %v665_v3 = vmax.bf16 %v452_v24, %v151_v45  ;;  %v819_v32 = vsel %vm1208_vm4, %v817_v29, %v818_v1  ;;  %v457_v43 = vrot.slane %v456_v38, 4  ;;  %v466_v44 = vrot.slane %v464_v36, 4  ;;  %v160_v19 = vld [vmem:[%s1190_s11 + $0xa8] sm:$0xf] }
  0x6e   : > { %v469_v9 = vrot.slane %v467_v39, 5  ;;  %v473_v47 = vshll.u32 %v1549_v35, 16  ;;  %v1015_v50 = vmax.bf16 %v1165_v25, %v983_v40  ;;  %v1138_v52 = vrot.slane %v154_v21, 9 }
  0x6f   : > { %v1562_v60 = vmax.bf16 %v816_v30, %v665_v3  ;;  %v822_v45 = vrot.slane %v1549_v35, 5  ;;  %v462_v28 = vsel %vm1216_vm5, %v457_v43, %v461_v17  ;;  %v477_v51 = vshrl.u32 %v1549_v35, 16 }
  0x70   : > { %v470_v53 = vor.u32 %v469_v9, %v466_v44  ;;  %v475_v55 = vrot.slane %v473_v47, 5  ;;  %1048 = vst.msk [vmem:[%s1258_s15 + $0x44] sm:$0xf] %vm1030_vm6, %v1015_v50  ;;  %v666_v61 = vmax.bf16 %v462_v28, %v1516_v58  ;;  %v953_v48 = vmax.bf16 %v1546_v14, %v1513_v42  ;;  %v1615_v44 = vld [vmem:[%s1190_s11 + $0xac] sm:$0xf] }
  0x71   : > { %v984_v57 = vmax.bf16 %v952_v33, %v1562_v60  ;;  %v823_v63 = vsel %vm1208_vm4, %v1138_v52, %v822_v45  ;;  %v479_v49 = vrot.slane %v477_v51, 4  ;;  %v483_v5 = vshll.u32 %v156_v37, 16 }
  0x72   : > { %v471_v46 = vrot.slane %v470_v53, 4  ;;  %v824_v62 = vrot.slane %v822_v45, 4  ;;  %v1579_v54 = vmax.bf16 %v819_v32, %v666_v61  ;;  %v825_v4 = vrot.slane %v156_v37, 5 }
  0x73   : > { %v1016_v2 = vmax.bf16 %v1165_v25, %v984_v57  ;;  %v488_v7 = vshrl.u32 %v157_v56, 16  ;;  %v480_v11 = vor.u32 %v479_v49, %v475_v55  ;;  %v485_v42 = vrot.slane %v483_v5, 5 }
  0x74   : > { %v476_v58 = vsel %vm1216_vm5, %v471_v46, %v475_v55  ;;  %v491_v13 = vshll.u32 %v157_v56, 16  ;;  %v985_v15 = vmax.bf16 %v953_v48, %v1579_v54  ;;  %v954_v59 = vmax.bf16 %v1562_v60, %v1529_v0  ;;  %v162_v46 = vld [vmem:[%s1190_s11 + $0xb0] sm:$0x1] }
  0x75   : > { %1049 = vst.msk [vmem:[%s1258_s15 + $0x48] sm:$0xf] %vm1030_vm6, %v1016_v2  ;;  %v667_v8 = vmax.bf16 %v476_v58, %v154_v21  ;;  %v826_v41 = vsel %vm1208_vm4, %v824_v62, %v825_v4  ;;  %v481_v18 = vrot.slane %v480_v11, 4  ;;  %v490_v20 = vrot.slane %v488_v7, 4  ;;  %v163_v2 = vld [vmem:[%s1190_s11 + $0xb4] sm:$0xf] }
  0x76   : > { %v493_v16 = vrot.slane %v491_v13, 5  ;;  %v497_v23 = vshll.u32 %v1582_v6, 16  ;;  %v1017_v26 = vmax.bf16 %v1165_v25, %v985_v15  ;;  %v1139_v30 = vrot.slane %v157_v56, 9 }
  0x77   : > { %v1595_v12 = vmax.bf16 %v823_v63, %v667_v8  ;;  %v829_v21 = vrot.slane %v1582_v6, 5  ;;  %v486_v0 = vsel %vm1216_vm5, %v481_v18, %v485_v42  ;;  %v501_v29 = vshrl.u32 %v1582_v6, 16 }
  0x78   : > { %v494_v31 = vor.u32 %v493_v16, %v490_v20  ;;  %v499_v34 = vrot.slane %v497_v23, 5  ;;  %1050 = vst.msk [vmem:[%s1258_s15 + $0x4c] sm:$0xf] %vm1030_vm6, %v1017_v26  ;;  %v668_v36 = vmax.bf16 %v486_v0, %v1549_v35  ;;  %v955_v24 = vmax.bf16 %v1579_v54, %v1546_v14  ;;  %v1648_v20 = vld [vmem:[%s1190_s11 + $0xb8] sm:$0xf] }
  0x79   : > { %v986_v1 = vmax.bf16 %v954_v59, %v1595_v12  ;;  %v830_v38 = vsel %vm1208_vm4, %v1139_v30, %v829_v21  ;;  %v503_v39 = vrot.slane %v501_v29, 4  ;;  %v507_v40 = vshll.u32 %v159_v10, 16 }
  0x7a   : > { %v495_v17 = vrot.slane %v494_v31, 4  ;;  %v831_v3 = vrot.slane %v829_v21, 4  ;;  %v1612_v32 = vmax.bf16 %v826_v41, %v668_v36  ;;  %v832_v43 = vrot.slane %v159_v10, 5 }
  0x7b   : > { %v1018_v33 = vmax.bf16 %v1165_v25, %v986_v1  ;;  %v512_v9 = vshrl.u32 %v160_v19, 16  ;;  %v504_v47 = vor.u32 %v503_v39, %v499_v34  ;;  %v509_v14 = vrot.slane %v507_v40, 5 }
  0x7c   : > { %v500_v35 = vsel %vm1216_vm5, %v495_v17, %v499_v34  ;;  %v515_v50 = vshll.u32 %v160_v19, 16  ;;  %v987_v52 = vmax.bf16 %v955_v24, %v1612_v32  ;;  %v956_v37 = vmax.bf16 %v1595_v12, %v1562_v60  ;;  %v165_v17 = vld [vmem:[%s1190_s11 + $0xbc] sm:$0x1] }
  0x7d   : > { %1051 = vst.msk [vmem:[%s1258_s15 + $0x50] sm:$0xf] %vm1030_vm6, %v1018_v33  ;;  %v669_v45 = vmax.bf16 %v500_v35, %v157_v56  ;;  %v833_v28 = vsel %vm1208_vm4, %v831_v3, %v832_v43  ;;  %v505_v53 = vrot.slane %v504_v47, 4  ;;  %v514_v55 = vrot.slane %v512_v9, 4  ;;  %v166_v33 = vld [vmem:[%s1190_s11 + $0xc0] sm:$0xf] }
  0x7e   : > { %v517_v51 = vrot.slane %v515_v50, 5  ;;  %v521_v57 = vshll.u32 %v1615_v44, 16  ;;  %v1019_v61 = vmax.bf16 %v1165_v25, %v987_v52  ;;  %v1140_v63 = vrot.slane %v160_v19, 9 }
  0x7f   : > { %v1628_v48 = vmax.bf16 %v830_v38, %v669_v45  ;;  %v836_v56 = vrot.slane %v1615_v44, 5  ;;  %v510_v60 = vsel %vm1216_vm5, %v505_v53, %v509_v14  ;;  %v525_v62 = vshrl.u32 %v1615_v44, 16 }
  0x80   : > { %v518_v49 = vor.u32 %v517_v51, %v514_v55  ;;  %v523_v5 = vrot.slane %v521_v57, 5  ;;  %1052 = vst.msk [vmem:[%s1258_s15 + $0x54] sm:$0xf] %vm1030_vm6, %v1019_v61  ;;  %v670_v7 = vmax.bf16 %v510_v60, %v1582_v6  ;;  %v957_v58 = vmax.bf16 %v1612_v32, %v1579_v54  ;;  %v1681_v55 = vld [vmem:[%s1190_s11 + $0xc4] sm:$0xf] }
  0x81   : > { %v988_v4 = vmax.bf16 %v956_v37, %v1628_v48  ;;  %v837_v11 = vsel %vm1208_vm4, %v1140_v63, %v836_v56  ;;  %v527_v13 = vrot.slane %v525_v62, 4  ;;  %v531_v15 = vshll.u32 %v162_v46, 16 }
  0x82   : > { %v519_v42 = vrot.slane %v518_v49, 4  ;;  %v838_v8 = vrot.slane %v836_v56, 4  ;;  %v1645_v41 = vmax.bf16 %v833_v28, %v670_v7  ;;  %v839_v18 = vrot.slane %v162_v46, 5 }
  0x83   : > { %v1020_v59 = vmax.bf16 %v1165_v25, %v988_v4  ;;  %v536_v16 = vshrl.u32 %v163_v2, 16  ;;  %v528_v23 = vor.u32 %v527_v13, %v523_v5  ;;  %v533_v54 = vrot.slane %v531_v15, 5 }
  0x84   : > { %v524_v6 = vsel %vm1216_vm5, %v519_v42, %v523_v5  ;;  %v539_v26 = vshll.u32 %v163_v2, 16  ;;  %v989_v30 = vmax.bf16 %v957_v58, %v1645_v41  ;;  %v958_v10 = vmax.bf16 %v1628_v48, %v1595_v12  ;;  %v168_v42 = vld [vmem:[%s1190_s11 + $0xc8] sm:$0x1] }
  0x85   : > { %1053 = vst.msk [vmem:[%s1258_s15 + $0x58] sm:$0xf] %vm1030_vm6, %v1020_v59  ;;  %v671_v21 = vmax.bf16 %v524_v6, %v160_v19  ;;  %v840_v0 = vsel %vm1208_vm4, %v838_v8, %v839_v18  ;;  %v529_v31 = vrot.slane %v528_v23, 4  ;;  %v538_v34 = vrot.slane %v536_v16, 4  ;;  %v169_v59 = vld [vmem:[%s1190_s11 + $0xcc] sm:$0xf] }
  0x86   : > { %v541_v29 = vrot.slane %v539_v26, 5  ;;  %v545_v1 = vshll.u32 %v1648_v20, 16  ;;  %v1021_v36 = vmax.bf16 %v1165_v25, %v989_v30  ;;  %v1141_v38 = vrot.slane %v163_v2, 9 }
  0x87   : > { %v1661_v24 = vmax.bf16 %v837_v11, %v671_v21  ;;  %v843_v19 = vrot.slane %v1648_v20, 5  ;;  %v534_v12 = vsel %vm1216_vm5, %v529_v31, %v533_v54  ;;  %v549_v3 = vshrl.u32 %v1648_v20, 16 }
  0x88   : > { %v542_v39 = vor.u32 %v541_v29, %v538_v34  ;;  %v547_v40 = vrot.slane %v545_v1, 5  ;;  %1054 = vst.msk [vmem:[%s1258_s15 + $0x5c] sm:$0xf] %vm1030_vm6, %v1021_v36  ;;  %v672_v9 = vmax.bf16 %v534_v12, %v1615_v44  ;;  %v959_v35 = vmax.bf16 %v1645_v41, %v1612_v32  ;;  %v170_v34 = vld [vmem:[%s1190_s11 + $0xd0] sm:$0xf] }
  0x89   : > { %v990_v43 = vmax.bf16 %v958_v10, %v1661_v24  ;;  %v844_v47 = vsel %vm1208_vm4, %v1141_v38, %v843_v19  ;;  %v551_v50 = vrot.slane %v549_v3, 4  ;;  %v555_v52 = vshll.u32 %v165_v17, 16 }
  0x8a   : > { %v543_v14 = vrot.slane %v542_v39, 4  ;;  %v845_v45 = vrot.slane %v843_v19, 4  ;;  %v1678_v28 = vmax.bf16 %v840_v0, %v672_v9  ;;  %v846_v53 = vrot.slane %v165_v17, 5 }
  0x8b   : > { %v1022_v37 = vmax.bf16 %v1165_v25, %v990_v43  ;;  %v560_v51 = vshrl.u32 %v166_v33, 16  ;;  %v552_v57 = vor.u32 %v551_v50, %v547_v40  ;;  %v557_v32 = vrot.slane %v555_v52, 5  ;;  %v171_v50 = vld [vmem:[%s1190_s11 + $0xd4] sm:$0x1] }
  0x8c   : > { %v548_v44 = vsel %vm1216_vm5, %v543_v14, %v547_v40  ;;  %v563_v61 = vshll.u32 %v166_v33, 16  ;;  %v991_v63 = vmax.bf16 %v959_v35, %v1678_v28  ;;  %v960_v46 = vmax.bf16 %v1661_v24, %v1628_v48 }
  0x8d   : > { %1055 = vst.msk [vmem:[%s1258_s15 + $0x60] sm:$0xf] %vm1030_vm6, %v1022_v37  ;;  %v673_v56 = vmax.bf16 %v548_v44, %v163_v2  ;;  %v847_v60 = vsel %vm1208_vm4, %v845_v45, %v846_v53  ;;  %v553_v49 = vrot.slane %v552_v57, 4  ;;  %v562_v5 = vrot.slane %v560_v51, 4 }
  0x8e   : > { %v565_v62 = vrot.slane %v563_v61, 5  ;;  %v569_v4 = vshll.u32 %v1681_v55, 16  ;;  %v1023_v7 = vmax.bf16 %v1165_v25, %v991_v63  ;;  %v1142_v11 = vrot.slane %v166_v33, 9 }
  0x8f   : > { %v1694_v58 = vmax.bf16 %v844_v47, %v673_v56  ;;  %v850_v2 = vrot.slane %v1681_v55, 5  ;;  %v558_v48 = vsel %vm1216_vm5, %v553_v49, %v557_v32  ;;  %v573_v8 = vshrl.u32 %v1681_v55, 16 }
  0x90   : > { %v566_v13 = vor.u32 %v565_v62, %v562_v5  ;;  %v571_v15 = vrot.slane %v569_v4, 5  ;;  %1056 = vst.msk [vmem:[%s1258_s15 + $0x64] sm:$0xf] %vm1030_vm6, %v1023_v7  ;;  %v674_v16 = vmax.bf16 %v558_v48, %v1648_v20  ;;  %v961_v6 = vmax.bf16 %v1678_v28, %v1645_v41 }
  0x91   : > { %v992_v18 = vmax.bf16 %v960_v46, %v1694_v58  ;;  %v851_v23 = vsel %vm1208_vm4, %v1142_v11, %v850_v2  ;;  %v575_v26 = vrot.slane %v573_v8, 4  ;;  %v579_v30 = vshll.u32 %v168_v42, 16 }
  0x92   : > { %v567_v54 = vrot.slane %v566_v13, 4  ;;  %v852_v21 = vrot.slane %v850_v2, 4  ;;  %v929_v0 = vmax.bf16 %v847_v60, %v674_v16  ;;  %v853_v31 = vrot.slane %v168_v42, 5 }
  0x93   : > { %v1024_v10 = vmax.bf16 %v1165_v25, %v992_v18  ;;  %v584_v29 = vshrl.u32 %v169_v59, 16  ;;  %v576_v1 = vor.u32 %v575_v26, %v571_v15  ;;  %v581_v36 = vrot.slane %v579_v30, 5 }
  0x94   : > { %v572_v20 = vsel %vm1216_vm5, %v567_v54, %v571_v15  ;;  %v587_v41 = vshll.u32 %v169_v59, 16  ;;  %v993_v38 = vmax.bf16 %v961_v6, %v929_v0  ;;  %v962_v17 = vmax.bf16 %v1694_v58, %v1661_v24 }
  0x95   : > { %1057 = vst.msk [vmem:[%s1258_s15 + $0x68] sm:$0xf] %vm1030_vm6, %v1024_v10  ;;  %v675_v19 = vmax.bf16 %v572_v20, %v166_v33  ;;  %v854_v12 = vsel %vm1208_vm4, %v852_v21, %v853_v31  ;;  %v577_v39 = vrot.slane %v576_v1, 4  ;;  %v586_v40 = vrot.slane %v584_v29, 4 }
  0x96   : > { %v589_v3 = vrot.slane %v587_v41, 5  ;;  %v593_v43 = vshll.u32 %v170_v34, 16  ;;  %v1025_v9 = vmax.bf16 %v1165_v25, %v993_v38  ;;  %v1143_v47 = vrot.slane %v169_v59, 9 }
  0x97   : > { %v930_v35 = vmax.bf16 %v851_v23, %v675_v19  ;;  %v857_v14 = vrot.slane %v170_v34, 5  ;;  %v582_v33 = vsel %vm1216_vm5, %v577_v39, %v581_v36  ;;  %v597_v37 = vshrl.u32 %v170_v34, 16 }
  0x98   : > { %v590_v52 = vor.u32 %v589_v3, %v586_v40  ;;  %v595_v45 = vrot.slane %v593_v43, 5  ;;  %1058 = vst.msk [vmem:[%s1258_s15 + $0x6c] sm:$0xf] %vm1030_vm6, %v1025_v9  ;;  %v676_v53 = vmax.bf16 %v582_v33, %v1681_v55  ;;  %v963_v51 = vmax.bf16 %v929_v0, %v1678_v28 }
  0x99   : > { %v994_v24 = vmax.bf16 %v962_v17, %v930_v35  ;;  %v599_v57 = vrot.slane %v597_v37, 4  ;;  %v603_v32 = vshll.u32 %v171_v50, 16  ;;  %v858_v56 = vsel %vm1208_vm4, %v1143_v47, %v857_v14 }
  0x9a   : > { %v591_v44 = vrot.slane %v590_v52, 4  ;;  %v931_v63 = vmax.bf16 %v854_v12, %v676_v53  ;;  %v859_v46 = vrot.slane %v857_v14, 4  ;;  %v860_v62 = vrot.slane %v171_v50, 5 }
  0x9b   : > { %v1026_v61 = vmax.bf16 %v1165_v25, %v994_v24  ;;  %v600_v49 = vor.u32 %v599_v57, %v595_v45  ;;  %v605_v5 = vrot.slane %v603_v32, 5  ;;  %v964_v4 = vmax.bf16 %v930_v35, %v1694_v58 }
  0x9c   : > { %v596_v60 = vsel %vm1216_vm5, %v591_v44, %v595_v45  ;;  %v995_v28 = vmax.bf16 %v963_v51, %v931_v63  ;;  %v861_v48 = vsel %vm1208_vm4, %v859_v46, %v860_v62  ;;  %v965_v8 = vmax.bf16 %v931_v63, %v929_v0 }
  0x9d   : > { %1059 = vst.msk [vmem:[%s1258_s15 + $0x70] sm:$0xf] %vm1030_vm6, %v1026_v61  ;;  %v677_v55 = vmax.bf16 %v596_v60, %v169_v59  ;;  %v601_v7 = vrot.slane %v600_v49, 4 }
  0x9e   : > { %v1027_v11 = vmax.bf16 %v1165_v25, %v995_v28 }
  0x9f   : > { %v932_v2 = vmax.bf16 %v858_v56, %v677_v55  ;;  %v606_v42 = vsel %vm1216_vm5, %v601_v7, %v605_v5 }
  0xa0   : > { %1060 = vst.msk [vmem:[%s1258_s15 + $0x74] sm:$0xf] %vm1030_vm6, %v1027_v11  ;;  %v678_v15 = vmax.bf16 %v606_v42, %v170_v34 }
  0xa1   : > { %v996_v13 = vmax.bf16 %v964_v4, %v932_v2 }
  0xa2   : > { %v933_v18 = vmax.bf16 %v861_v48, %v678_v15 }
  0xa3   : > { %v1028_v59 = vmax.bf16 %v1165_v25, %v996_v13 }
  0xa4   : > { %v997_v58 = vmax.bf16 %v965_v8, %v933_v18 }
  0xa5   : > { %1061 = vst.msk [vmem:[%s1258_s15 + $0x78] sm:$0xf] %vm1030_vm6, %v1028_v59 }
  0xa6   : > { %v1029_v16 = vmax.bf16 %v1165_v25, %v997_v58 }
  0xa8   : > { %1062 = vst.msk [vmem:[%s1258_s15 + $0x7c] sm:$0xf] %vm1030_vm6, %v1029_v16 }
  0xa9 PF: > { %s11_s6 = sadd.s32 1, %s1163_s6  }
  0xaa   : > { %p8_p4 = scmp.ge.s32.totalorder %s11_s6, 4  }
  0xac   :  { %10 = sbr.rel (!%p8_p4) target bundleno = 1 (0x1), region = 54 }

// kernel: inception_forward.5
= control target key start
LH: loop header
LB: loop body
LE: loop exit
PB: predicated region body
PF: predicated region fallthrough
CT: control target
= control target key end

     0   :  { %vm408_vm0 = vcmask 1041408   ;;  %vm311_vm1 = vcmask 31744   ;;  %s2941_s3 = inlined_call_operand.vmem [shape: bf16[4,128], index: 3, kind: input, shape index: {}]   ;;  %s2942_s2 = inlined_call_operand.vmem [shape: bf16[4,128], index: 2, kind: input, shape index: {}]   ;;  %s2943_s1 = inlined_call_operand.vmem [shape: bf16[512,4], index: 1, kind: input, shape index: {}]   ;;  %s2944_s0 = inlined_call_operand.vmem [shape: bf16[512,4], index: 0, kind: input, shape index: {}]   ;;  %s2945_s4 = inlined_call_operand.vmem [shape: f32[1,128], index: 4, kind: input, shape index: {}]   ;;  %s2946_s5 = inlined_call_operand.vmem [shape: bf16[512,128], index: 5, kind: output, shape index: {}]  }
   0x1   :  { %v150_v0 = vld [vmem:[%s2941_s3] sm:$0x3]  ;;  %v2422_v6 = vld [vmem:[%s2943_s1 + $0x8] sm:$0xff]   ;;  %v2424_v8 = vld [vmem:[%s2943_s1 + $0x10] sm:$0xff]  }
   0x2   :  { %v85_v1 = vld [vmem:[%s2942_s2] sm:$0x3]  ;;  %2418 = vmatprep.subr.msk.bf16.mxu1 %vm408_vm0, %v150_v0  ;;  %v410_v2 = vsel %vm408_vm0, %v150_v0, 0  ;;  %v2423_v7 = vld [vmem:[%s2944_s0 + $0x8] sm:$0xff]   ;;  %v2425_v9 = vld [vmem:[%s2944_s0 + $0x10] sm:$0xff]  }
   0x3   :  { %2419 = vmatprep.subr.msk.bf16.mxu0 %vm408_vm0, %v85_v1  ;;  %v958_v3 = vsel %vm408_vm0, %v85_v1, 0  ;;  %v2420_v4 = vld [vmem:[%s2943_s1] sm:$0xff]   ;;  %2223 = vmatpush3.bf16.msra.mxu1 %v410_v2  ;;  %v2426_v10 = vld [vmem:[%s2943_s1 + $0x18] sm:$0xff]   ;;  %v2430_v14 = vld [vmem:[%s2943_s1 + $0x28] sm:$0xff]  }
   0x4   :  { %v2421_v5 = vld [vmem:[%s2944_s0] sm:$0xff]   ;;  %2289 = vmatpush3.bf16.msra.mxu0 %v958_v3  ;;  %2224 = vmatprep.mubr.msk.bf16.mxu1 %vm311_vm1, %v2420_v4  ;;  %v2427_v11 = vld [vmem:[%s2944_s0 + $0x18] sm:$0xff]   ;;  %v2431_v15 = vld [vmem:[%s2944_s0 + $0x28] sm:$0xff]  }
   0x5   :  { %2290 = vmatprep.mubr.msk.bf16.mxu0 %vm311_vm1, %v2421_v5  ;;  %v2428_v12 = vld [vmem:[%s2943_s1 + $0x20] sm:$0xff]   ;;  %v2432_v16 = vld [vmem:[%s2943_s1 + $0x30] sm:$0xff]   ;;  %v2434_v18 = vld [vmem:[%s2943_s1 + $0x38] sm:$0xff]  }
   0x6   :  { %2225 = vmatmul.mubr.msk.bf16.vlgmr.msra.gmra.mrb[0].mxu1 %vm311_vm1, %v2422_v6  ;;  %v2429_v13 = vld [vmem:[%s2944_s0 + $0x20] sm:$0xff]   ;;  %v2433_v17 = vld [vmem:[%s2944_s0 + $0x30] sm:$0xff]   ;;  %v2435_v19 = vld [vmem:[%s2944_s0 + $0x38] sm:$0xff]  }
   0x7   :  { %2291 = vmatmul.mubr.msk.bf16.vlgmr.msra.gmra.mrb[0].mxu0 %vm311_vm1, %v2423_v7  ;;  %2228 = vmatprep.mubr.msk.bf16.mxu1 %vm311_vm1, %v2424_v8  ;;  %v2436_v20 = vld [vmem:[%s2943_s1 + $0x40] sm:$0xff]   ;;  %v2438_v22 = vld [vmem:[%s2943_s1 + $0x48] sm:$0xff]   ;;  %v2440_v24 = vld [vmem:[%s2943_s1 + $0x50] sm:$0xff]  }
   0x8   :  { %2294 = vmatprep.mubr.msk.bf16.mxu0 %vm311_vm1, %v2425_v9  ;;  %v2437_v21 = vld [vmem:[%s2944_s0 + $0x40] sm:$0xff]   ;;  %v2439_v23 = vld [vmem:[%s2944_s0 + $0x48] sm:$0xff]   ;;  %v2441_v25 = vld [vmem:[%s2944_s0 + $0x50] sm:$0xff]  }
   0x9   :  { %v2442_v26 = vld [vmem:[%s2943_s1 + $0x58] sm:$0xff]   ;;  %v2444_v28 = vld [vmem:[%s2943_s1 + $0x60] sm:$0xff]   ;;  %v2446_v30 = vld [vmem:[%s2943_s1 + $0x68] sm:$0xff]  }
   0xa   :  { %v2443_v27 = vld [vmem:[%s2944_s0 + $0x58] sm:$0xff]   ;;  %v2445_v29 = vld [vmem:[%s2944_s0 + $0x60] sm:$0xff]   ;;  %v2447_v31 = vld [vmem:[%s2944_s0 + $0x68] sm:$0xff]  }
   0xb   :  { %v2448_v32 = vld [vmem:[%s2943_s1 + $0x70] sm:$0xff]   ;;  %v2450_v34 = vld [vmem:[%s2943_s1 + $0x78] sm:$0xff]   ;;  %v2452_v36 = vld [vmem:[%s2943_s1 + $0x80] sm:$0xff]  }
   0xc   :  { %v2449_v33 = vld [vmem:[%s2944_s0 + $0x70] sm:$0xff]   ;;  %v2451_v35 = vld [vmem:[%s2944_s0 + $0x78] sm:$0xff]   ;;  %v2453_v37 = vld [vmem:[%s2944_s0 + $0x80] sm:$0xff]  }
   0xd   :  { %v2454_v38 = vld [vmem:[%s2943_s1 + $0x88] sm:$0xff]   ;;  %v2456_v40 = vld [vmem:[%s2943_s1 + $0x90] sm:$0xff]   ;;  %v2458_v42 = vld [vmem:[%s2943_s1 + $0x98] sm:$0xff]  }
   0xe   :  { %2229 = vmatmul.mubr.msk.bf16.gmra.mrb[4].mxu1 %vm311_vm1, %v2426_v10  ;;  %v2455_v39 = vld [vmem:[%s2944_s0 + $0x88] sm:$0xff]   ;;  %v2457_v41 = vld [vmem:[%s2944_s0 + $0x90] sm:$0xff]   ;;  %v2459_v43 = vld [vmem:[%s2944_s0 + $0x98] sm:$0xff]  }
   0xf   :  { %2295 = vmatmul.mubr.msk.bf16.gmra.mrb[4].mxu0 %vm311_vm1, %v2427_v11  ;;  %2232 = vmatprep.mubr.msk.bf16.mxu1 %vm311_vm1, %v2428_v12  ;;  %v2460_v44 = vld [vmem:[%s2943_s1 + $0xa0] sm:$0xff]   ;;  %v2462_v46 = vld [vmem:[%s2943_s1 + $0xa8] sm:$0xff]   ;;  %v2464_v48 = vld [vmem:[%s2943_s1 + $0xb0] sm:$0xff]  }
  0x10   :  { %2298 = vmatprep.mubr.msk.bf16.mxu0 %vm311_vm1, %v2429_v13  ;;  %v2461_v45 = vld [vmem:[%s2944_s0 + $0xa0] sm:$0xff]   ;;  %v2463_v47 = vld [vmem:[%s2944_s0 + $0xa8] sm:$0xff]   ;;  %v2465_v49 = vld [vmem:[%s2944_s0 + $0xb0] sm:$0xff]  }
  0x11   :  { %v2466_v50 = vld [vmem:[%s2943_s1 + $0xb8] sm:$0xff]   ;;  %v2468_v52 = vld [vmem:[%s2943_s1 + $0xc0] sm:$0xff]   ;;  %v2470_v54 = vld [vmem:[%s2943_s1 + $0xc8] sm:$0xff]  }
  0x12   :  { %v2467_v51 = vld [vmem:[%s2944_s0 + $0xb8] sm:$0xff]   ;;  %v2469_v53 = vld [vmem:[%s2944_s0 + $0xc0] sm:$0xff]   ;;  %v2471_v55 = vld [vmem:[%s2944_s0 + $0xc8] sm:$0xff]  }
  0x13   :  { %v2472_v56 = vld [vmem:[%s2943_s1 + $0xd0] sm:$0xff]   ;;  %v2474_v58 = vld [vmem:[%s2943_s1 + $0xd8] sm:$0xff]   ;;  %v2476_v60 = vld [vmem:[%s2943_s1 + $0xe0] sm:$0xff]  }
  0x14   :  { %v2473_v57 = vld [vmem:[%s2944_s0 + $0xd0] sm:$0xff]   ;;  %v2475_v59 = vld [vmem:[%s2944_s0 + $0xd8] sm:$0xff]   ;;  %v2477_v61 = vld [vmem:[%s2944_s0 + $0xe0] sm:$0xff]  }
  0x15   :  { %v2478_v62 = vld [vmem:[%s2943_s1 + $0xe8] sm:$0xff]   ;;  %v2480_v0 = vld [vmem:[%s2943_s1 + $0xf0] sm:$0xff]   ;;  %v2482_v2 = vld [vmem:[%s2943_s1 + $0xf8] sm:$0xff]  }
  0x16   :  { %2233 = vmatmul.mubr.msk.bf16.gmra.mrb[8].mxu1 %vm311_vm1, %v2430_v14  ;;  %v2479_v63 = vld [vmem:[%s2944_s0 + $0xe8] sm:$0xff]   ;;  %v2481_v1 = vld [vmem:[%s2944_s0 + $0xf0] sm:$0xff]   ;;  %v2483_v3 = vld [vmem:[%s2944_s0 + $0xf8] sm:$0xff]  }
  0x17   :  { %2299 = vmatmul.mubr.msk.bf16.gmra.mrb[8].mxu0 %vm311_vm1, %v2431_v15  ;;  %2236 = vmatprep.mubr.msk.bf16.mxu1 %vm311_vm1, %v2432_v16  ;;  %v2779_v6 = vld [vmem:[%s2945_s4] ss:$0 sm:$0xff] }
  0x18   :  { %2302 = vmatprep.mubr.msk.bf16.mxu0 %vm311_vm1, %v2433_v17 }
  0x1e   :  { %2237 = vmatmul.mubr.msk.bf16.gmra.mrb[12].mxu1 %vm311_vm1, %v2434_v18 }
  0x1f   :  { %2303 = vmatmul.mubr.msk.bf16.gmra.mrb[12].mxu0 %vm311_vm1, %v2435_v19  ;;  %2240 = vmatprep.mubr.msk.bf16.mxu1 %vm311_vm1, %v2436_v20 }
  0x20   :  { %2306 = vmatprep.mubr.msk.bf16.mxu0 %vm311_vm1, %v2437_v21 }
  0x26   :  { %2241 = vmatmul.mubr.msk.bf16.gmra.mrb[16].mxu1 %vm311_vm1, %v2438_v22 }
  0x27   :  { %2307 = vmatmul.mubr.msk.bf16.gmra.mrb[16].mxu0 %vm311_vm1, %v2439_v23  ;;  %2244 = vmatprep.mubr.msk.bf16.mxu1 %vm311_vm1, %v2440_v24 }
  0x28   :  { %2310 = vmatprep.mubr.msk.bf16.mxu0 %vm311_vm1, %v2441_v25 }
  0x2e   :  { %2245 = vmatmul.mubr.msk.bf16.gmra.mrb[20].mxu1 %vm311_vm1, %v2442_v26 }
  0x2f   :  { %2311 = vmatmul.mubr.msk.bf16.gmra.mrb[20].mxu0 %vm311_vm1, %v2443_v27  ;;  %2248 = vmatprep.mubr.msk.bf16.mxu1 %vm311_vm1, %v2444_v28 }
  0x30   :  { %2314 = vmatprep.mubr.msk.bf16.mxu0 %vm311_vm1, %v2445_v29 }
  0x36   :  { %2249 = vmatmul.mubr.msk.bf16.gmra.mrb[24].mxu1 %vm311_vm1, %v2446_v30 }
  0x37   :  { %2315 = vmatmul.mubr.msk.bf16.gmra.mrb[24].mxu0 %vm311_vm1, %v2447_v31  ;;  %2252 = vmatprep.mubr.msk.bf16.mxu1 %vm311_vm1, %v2448_v32 }
  0x38   :  { %2318 = vmatprep.mubr.msk.bf16.mxu0 %vm311_vm1, %v2449_v33 }
  0x3e   :  { %2253 = vmatmul.mubr.msk.bf16.gmra.mrb[28].mxu1 %vm311_vm1, %v2450_v34 }
  0x3f   :  { %2319 = vmatmul.mubr.msk.bf16.gmra.mrb[28].mxu0 %vm311_vm1, %v2451_v35  ;;  %2256 = vmatprep.mubr.msk.bf16.mxu1 %vm311_vm1, %v2452_v36 }
  0x40   :  { %2322 = vmatprep.mubr.msk.bf16.mxu0 %vm311_vm1, %v2453_v37 }
  0x46   :  { %2257 = vmatmul.mubr.msk.bf16.gmra.mrb[32].mxu1 %vm311_vm1, %v2454_v38 }
  0x47   :  { %2323 = vmatmul.mubr.msk.bf16.gmra.mrb[32].mxu0 %vm311_vm1, %v2455_v39  ;;  %2260 = vmatprep.mubr.msk.bf16.mxu1 %vm311_vm1, %v2456_v40 }
  0x48   :  { %2326 = vmatprep.mubr.msk.bf16.mxu0 %vm311_vm1, %v2457_v41 }
  0x4e   :  { %2261 = vmatmul.mubr.msk.bf16.gmra.mrb[36].mxu1 %vm311_vm1, %v2458_v42 }
  0x4f   :  { %2327 = vmatmul.mubr.msk.bf16.gmra.mrb[36].mxu0 %vm311_vm1, %v2459_v43  ;;  %2264 = vmatprep.mubr.msk.bf16.mxu1 %vm311_vm1, %v2460_v44 }
  0x50   :  { %2330 = vmatprep.mubr.msk.bf16.mxu0 %vm311_vm1, %v2461_v45 }
  0x56   :  { %2265 = vmatmul.mubr.msk.bf16.gmra.mrb[40].mxu1 %vm311_vm1, %v2462_v46 }
  0x57   :  { %2331 = vmatmul.mubr.msk.bf16.gmra.mrb[40].mxu0 %vm311_vm1, %v2463_v47  ;;  %2268 = vmatprep.mubr.msk.bf16.mxu1 %vm311_vm1, %v2464_v48 }
  0x58   :  { %2334 = vmatprep.mubr.msk.bf16.mxu0 %vm311_vm1, %v2465_v49 }
  0x5e   :  { %2269 = vmatmul.mubr.msk.bf16.gmra.mrb[44].mxu1 %vm311_vm1, %v2466_v50 }
  0x5f   :  { %2335 = vmatmul.mubr.msk.bf16.gmra.mrb[44].mxu0 %vm311_vm1, %v2467_v51  ;;  %2272 = vmatprep.mubr.msk.bf16.mxu1 %vm311_vm1, %v2468_v52 }
  0x60   :  { %2338 = vmatprep.mubr.msk.bf16.mxu0 %vm311_vm1, %v2469_v53 }
  0x66   :  { %2273 = vmatmul.mubr.msk.bf16.gmra.mrb[48].mxu1 %vm311_vm1, %v2470_v54 }
  0x67   :  { %2339 = vmatmul.mubr.msk.bf16.gmra.mrb[48].mxu0 %vm311_vm1, %v2471_v55  ;;  %2276 = vmatprep.mubr.msk.bf16.mxu1 %vm311_vm1, %v2472_v56 }
  0x68   :  { %2342 = vmatprep.mubr.msk.bf16.mxu0 %vm311_vm1, %v2473_v57 }
  0x6e   :  { %2277 = vmatmul.mubr.msk.bf16.gmra.mrb[52].mxu1 %vm311_vm1, %v2474_v58 }
  0x6f   :  { %2343 = vmatmul.mubr.msk.bf16.gmra.mrb[52].mxu0 %vm311_vm1, %v2475_v59  ;;  %2280 = vmatprep.mubr.msk.bf16.mxu1 %vm311_vm1, %v2476_v60 }
  0x70   :  { %2346 = vmatprep.mubr.msk.bf16.mxu0 %vm311_vm1, %v2477_v61 }
  0x76   :  { %2281 = vmatmul.mubr.msk.bf16.gmra.mrb[56].mxu1 %vm311_vm1, %v2478_v62 }
  0x77   :  { %2347 = vmatmul.mubr.msk.bf16.gmra.mrb[56].mxu0 %vm311_vm1, %v2479_v63  ;;  %2284 = vmatprep.mubr.msk.bf16.mxu1 %vm311_vm1, %v2480_v0 }
  0x78   :  { %2350 = vmatprep.mubr.msk.bf16.mxu0 %vm311_vm1, %v2481_v1 }
  0x7e   :  { %2285 = vmatmul.mubr.msk.bf16.gmra.mrb[60].mxu1 %vm311_vm1, %v2482_v2 }
  0x7f   :  { %2351 = vmatmul.mubr.msk.bf16.gmra.mrb[60].mxu0 %vm311_vm1, %v2483_v3 }
  0xd9   :  { %v2226_v4 = vpop.f32.mrb[0].mxu1 }
  0xda   :  { %v2292_v5 = vpop.f32.mrb[0].mxu0  ;;  %v446_v7 = vpop.f32.mrb[1].mxu1 }
  0xdb   :  { %v1003_v8 = vadd.f32 %v2292_v5, %v2226_v4  ;;  %v994_v9 = vpop.f32.mrb[1].mxu0  ;;  %v2227_v10 = vpop.f32.mrb[2].mxu1 }
  0xdc   :  { %v995_v11 = vadd.f32 %v994_v9, %v446_v7  ;;  %v2293_v12 = vpop.f32.mrb[2].mxu0  ;;  %v449_v13 = vpop.f32.mrb[3].mxu1 }
  0xdd   :  { %v1258_v14 = vadd.f32 %v2779_v6, %v1003_v8  ;;  %v1006_v15 = vadd.f32 %v2293_v12, %v2227_v10  ;;  %v997_v16 = vpop.f32.mrb[3].mxu0 }
  0xde   :  { %v1256_v17 = vadd.f32 %v2779_v6, %v995_v11  ;;  %v998_v18 = vadd.f32 %v997_v16, %v449_v13 }
  0xdf   :  { %v1259_v19 = vadd.f32 %v2779_v6, %v1006_v15  ;;  %v1322_v21 = vmax.f32 %v1258_v14, 0.0 }
  0xe0   :  { %v1257_v20 = vadd.f32 %v2779_v6, %v998_v18  ;;  %v1320_v24 = vmax.f32 %v1256_v17, 0.0 }
  0xe1   :  { %v1323_v22 = vmax.f32 %v1259_v19, 0.0  ;;  %v2230_v23 = vpop.f32.mrb[4].mxu1 }
  0xe2   :  { %v1321_v25 = vmax.f32 %v1257_v20, 0.0  ;;  %v2296_v26 = vpop.f32.mrb[4].mxu0  ;;  %v462_v27 = vpop.f32.mrb[5].mxu1 }
  0xe3   :  { %v1973_v28 = vpack.c.bf16 %v1323_v22, %v1322_v21  ;;  %v1019_v29 = vadd.f32 %v2296_v26, %v2230_v23  ;;  %v1010_v30 = vpop.f32.mrb[5].mxu0  ;;  %v2231_v31 = vpop.f32.mrb[6].mxu1 }
  0xe4   :  { %v1968_v32 = vpack.c.bf16 %v1321_v25, %v1320_v24  ;;  %v1011_v33 = vadd.f32 %v1010_v30, %v462_v27  ;;  %v2297_v34 = vpop.f32.mrb[6].mxu0  ;;  %v465_v35 = vpop.f32.mrb[7].mxu1 }
  0xe5   :  { %2125 = vst [vmem:[%s2946_s5 + $0x8] sm:$0xff] %v1973_v28   ;;  %v1262_v36 = vadd.f32 %v2779_v6, %v1019_v29  ;;  %v1022_v37 = vadd.f32 %v2297_v34, %v2231_v31  ;;  %v1013_v38 = vpop.f32.mrb[7].mxu0 }
  0xe6   :  { %1969 = vst [vmem:[%s2946_s5] sm:$0xff] %v1968_v32   ;;  %v1260_v39 = vadd.f32 %v2779_v6, %v1011_v33  ;;  %v1014_v40 = vadd.f32 %v1013_v38, %v465_v35 }
  0xe7   :  { %v1263_v41 = vadd.f32 %v2779_v6, %v1022_v37  ;;  %v1326_v43 = vmax.f32 %v1262_v36, 0.0 }
  0xe8   :  { %v1261_v42 = vadd.f32 %v2779_v6, %v1014_v40  ;;  %v1324_v46 = vmax.f32 %v1260_v39, 0.0 }
  0xe9   :  { %v1327_v44 = vmax.f32 %v1263_v41, 0.0  ;;  %v2234_v45 = vpop.f32.mrb[8].mxu1 }
  0xea   :  { %v1325_v47 = vmax.f32 %v1261_v42, 0.0  ;;  %v2300_v48 = vpop.f32.mrb[8].mxu0  ;;  %v478_v49 = vpop.f32.mrb[9].mxu1 }
  0xeb   :  { %v1983_v50 = vpack.c.bf16 %v1327_v44, %v1326_v43  ;;  %v1035_v51 = vadd.f32 %v2300_v48, %v2234_v45  ;;  %v1026_v52 = vpop.f32.mrb[9].mxu0  ;;  %v2235_v53 = vpop.f32.mrb[10].mxu1 }
  0xec   :  { %v1978_v54 = vpack.c.bf16 %v1325_v47, %v1324_v46  ;;  %v1027_v55 = vadd.f32 %v1026_v52, %v478_v49  ;;  %v2301_v56 = vpop.f32.mrb[10].mxu0  ;;  %v481_v57 = vpop.f32.mrb[11].mxu1 }
  0xed   :  { %2127 = vst [vmem:[%s2946_s5 + $0x18] sm:$0xff] %v1983_v50   ;;  %v1266_v58 = vadd.f32 %v2779_v6, %v1035_v51  ;;  %v1038_v59 = vadd.f32 %v2301_v56, %v2235_v53  ;;  %v1029_v60 = vpop.f32.mrb[11].mxu0 }
  0xee   :  { %2126 = vst [vmem:[%s2946_s5 + $0x10] sm:$0xff] %v1978_v54   ;;  %v1264_v61 = vadd.f32 %v2779_v6, %v1027_v55  ;;  %v1030_v62 = vadd.f32 %v1029_v60, %v481_v57 }
  0xef   :  { %v1267_v63 = vadd.f32 %v2779_v6, %v1038_v59  ;;  %v1330_v1 = vmax.f32 %v1266_v58, 0.0 }
  0xf0   :  { %v1265_v0 = vadd.f32 %v2779_v6, %v1030_v62  ;;  %v1328_v4 = vmax.f32 %v1264_v61, 0.0 }
  0xf1   :  { %v1331_v2 = vmax.f32 %v1267_v63, 0.0  ;;  %v2238_v3 = vpop.f32.mrb[12].mxu1 }
  0xf2   :  { %v1329_v5 = vmax.f32 %v1265_v0, 0.0  ;;  %v2304_v7 = vpop.f32.mrb[12].mxu0  ;;  %v494_v8 = vpop.f32.mrb[13].mxu1 }
  0xf3   :  { %v1993_v9 = vpack.c.bf16 %v1331_v2, %v1330_v1  ;;  %v1051_v10 = vadd.f32 %v2304_v7, %v2238_v3  ;;  %v1042_v11 = vpop.f32.mrb[13].mxu0  ;;  %v2239_v12 = vpop.f32.mrb[14].mxu1 }
  0xf4   :  { %v1988_v13 = vpack.c.bf16 %v1329_v5, %v1328_v4  ;;  %v1043_v14 = vadd.f32 %v1042_v11, %v494_v8  ;;  %v2305_v15 = vpop.f32.mrb[14].mxu0  ;;  %v497_v16 = vpop.f32.mrb[15].mxu1 }
  0xf5   :  { %2129 = vst [vmem:[%s2946_s5 + $0x28] sm:$0xff] %v1993_v9   ;;  %v1270_v17 = vadd.f32 %v2779_v6, %v1051_v10  ;;  %v1054_v18 = vadd.f32 %v2305_v15, %v2239_v12  ;;  %v1045_v19 = vpop.f32.mrb[15].mxu0 }
  0xf6   :  { %2128 = vst [vmem:[%s2946_s5 + $0x20] sm:$0xff] %v1988_v13   ;;  %v1268_v20 = vadd.f32 %v2779_v6, %v1043_v14  ;;  %v1046_v21 = vadd.f32 %v1045_v19, %v497_v16 }
  0xf7   :  { %v1271_v22 = vadd.f32 %v2779_v6, %v1054_v18  ;;  %v1334_v24 = vmax.f32 %v1270_v17, 0.0 }
  0xf8   :  { %v1269_v23 = vadd.f32 %v2779_v6, %v1046_v21  ;;  %v1332_v27 = vmax.f32 %v1268_v20, 0.0 }
  0xf9   :  { %v1335_v25 = vmax.f32 %v1271_v22, 0.0  ;;  %v2242_v26 = vpop.f32.mrb[16].mxu1 }
  0xfa   :  { %v1333_v28 = vmax.f32 %v1269_v23, 0.0  ;;  %v2308_v29 = vpop.f32.mrb[16].mxu0  ;;  %v510_v30 = vpop.f32.mrb[17].mxu1 }
  0xfb   :  { %v2003_v31 = vpack.c.bf16 %v1335_v25, %v1334_v24  ;;  %v1067_v32 = vadd.f32 %v2308_v29, %v2242_v26  ;;  %v1058_v33 = vpop.f32.mrb[17].mxu0  ;;  %v2243_v34 = vpop.f32.mrb[18].mxu1 }
  0xfc   :  { %v1998_v35 = vpack.c.bf16 %v1333_v28, %v1332_v27  ;;  %v1059_v36 = vadd.f32 %v1058_v33, %v510_v30  ;;  %v2309_v37 = vpop.f32.mrb[18].mxu0  ;;  %v513_v38 = vpop.f32.mrb[19].mxu1 }
  0xfd   :  { %2131 = vst [vmem:[%s2946_s5 + $0x38] sm:$0xff] %v2003_v31   ;;  %v1274_v39 = vadd.f32 %v2779_v6, %v1067_v32  ;;  %v1070_v40 = vadd.f32 %v2309_v37, %v2243_v34  ;;  %v1061_v41 = vpop.f32.mrb[19].mxu0 }
  0xfe   :  { %2130 = vst [vmem:[%s2946_s5 + $0x30] sm:$0xff] %v1998_v35   ;;  %v1272_v42 = vadd.f32 %v2779_v6, %v1059_v36  ;;  %v1062_v43 = vadd.f32 %v1061_v41, %v513_v38 }
  0xff   :  { %v1275_v44 = vadd.f32 %v2779_v6, %v1070_v40  ;;  %v1338_v46 = vmax.f32 %v1274_v39, 0.0 }
 0x100   :  { %v1273_v45 = vadd.f32 %v2779_v6, %v1062_v43  ;;  %v1336_v49 = vmax.f32 %v1272_v42, 0.0 }
 0x101   :  { %v1339_v47 = vmax.f32 %v1275_v44, 0.0  ;;  %v2246_v48 = vpop.f32.mrb[20].mxu1 }
 0x102   :  { %v1337_v50 = vmax.f32 %v1273_v45, 0.0  ;;  %v2312_v51 = vpop.f32.mrb[20].mxu0  ;;  %v526_v52 = vpop.f32.mrb[21].mxu1 }
 0x103   :  { %v2013_v53 = vpack.c.bf16 %v1339_v47, %v1338_v46  ;;  %v1083_v54 = vadd.f32 %v2312_v51, %v2246_v48  ;;  %v1074_v55 = vpop.f32.mrb[21].mxu0  ;;  %v2247_v56 = vpop.f32.mrb[22].mxu1 }
 0x104   :  { %v2008_v57 = vpack.c.bf16 %v1337_v50, %v1336_v49  ;;  %v1075_v58 = vadd.f32 %v1074_v55, %v526_v52  ;;  %v2313_v59 = vpop.f32.mrb[22].mxu0  ;;  %v529_v60 = vpop.f32.mrb[23].mxu1 }
 0x105   :  { %2133 = vst [vmem:[%s2946_s5 + $0x48] sm:$0xff] %v2013_v53   ;;  %v1278_v61 = vadd.f32 %v2779_v6, %v1083_v54  ;;  %v1086_v62 = vadd.f32 %v2313_v59, %v2247_v56  ;;  %v1077_v63 = vpop.f32.mrb[23].mxu0 }
 0x106   :  { %2132 = vst [vmem:[%s2946_s5 + $0x40] sm:$0xff] %v2008_v57   ;;  %v1276_v0 = vadd.f32 %v2779_v6, %v1075_v58  ;;  %v1078_v1 = vadd.f32 %v1077_v63, %v529_v60 }
 0x107   :  { %v1279_v2 = vadd.f32 %v2779_v6, %v1086_v62  ;;  %v1342_v4 = vmax.f32 %v1278_v61, 0.0 }
 0x108   :  { %v1277_v3 = vadd.f32 %v2779_v6, %v1078_v1  ;;  %v1340_v8 = vmax.f32 %v1276_v0, 0.0 }
 0x109   :  { %v1343_v5 = vmax.f32 %v1279_v2, 0.0  ;;  %v2250_v7 = vpop.f32.mrb[24].mxu1 }
 0x10a   :  { %v1341_v9 = vmax.f32 %v1277_v3, 0.0  ;;  %v2316_v10 = vpop.f32.mrb[24].mxu0  ;;  %v542_v11 = vpop.f32.mrb[25].mxu1 }
 0x10b   :  { %v2023_v12 = vpack.c.bf16 %v1343_v5, %v1342_v4  ;;  %v1099_v13 = vadd.f32 %v2316_v10, %v2250_v7  ;;  %v1090_v14 = vpop.f32.mrb[25].mxu0  ;;  %v2251_v15 = vpop.f32.mrb[26].mxu1 }
 0x10c   :  { %v2018_v16 = vpack.c.bf16 %v1341_v9, %v1340_v8  ;;  %v1091_v17 = vadd.f32 %v1090_v14, %v542_v11  ;;  %v2317_v18 = vpop.f32.mrb[26].mxu0  ;;  %v545_v19 = vpop.f32.mrb[27].mxu1 }
 0x10d   :  { %2135 = vst [vmem:[%s2946_s5 + $0x58] sm:$0xff] %v2023_v12   ;;  %v1282_v20 = vadd.f32 %v2779_v6, %v1099_v13  ;;  %v1102_v21 = vadd.f32 %v2317_v18, %v2251_v15  ;;  %v1093_v22 = vpop.f32.mrb[27].mxu0 }
 0x10e   :  { %2134 = vst [vmem:[%s2946_s5 + $0x50] sm:$0xff] %v2018_v16   ;;  %v1280_v23 = vadd.f32 %v2779_v6, %v1091_v17  ;;  %v1094_v24 = vadd.f32 %v1093_v22, %v545_v19 }
 0x10f   :  { %v1283_v25 = vadd.f32 %v2779_v6, %v1102_v21  ;;  %v1346_v27 = vmax.f32 %v1282_v20, 0.0 }
 0x110   :  { %v1281_v26 = vadd.f32 %v2779_v6, %v1094_v24  ;;  %v1344_v30 = vmax.f32 %v1280_v23, 0.0 }
 0x111   :  { %v1347_v28 = vmax.f32 %v1283_v25, 0.0  ;;  %v2254_v29 = vpop.f32.mrb[28].mxu1 }
 0x112   :  { %v1345_v31 = vmax.f32 %v1281_v26, 0.0  ;;  %v2320_v32 = vpop.f32.mrb[28].mxu0  ;;  %v558_v33 = vpop.f32.mrb[29].mxu1 }
 0x113   :  { %v2033_v34 = vpack.c.bf16 %v1347_v28, %v1346_v27  ;;  %v1115_v35 = vadd.f32 %v2320_v32, %v2254_v29  ;;  %v1106_v36 = vpop.f32.mrb[29].mxu0  ;;  %v2255_v37 = vpop.f32.mrb[30].mxu1 }
 0x114   :  { %v2028_v38 = vpack.c.bf16 %v1345_v31, %v1344_v30  ;;  %v1107_v39 = vadd.f32 %v1106_v36, %v558_v33  ;;  %v2321_v40 = vpop.f32.mrb[30].mxu0  ;;  %v561_v41 = vpop.f32.mrb[31].mxu1 }
 0x115   :  { %2137 = vst [vmem:[%s2946_s5 + $0x68] sm:$0xff] %v2033_v34   ;;  %v1286_v42 = vadd.f32 %v2779_v6, %v1115_v35  ;;  %v1118_v43 = vadd.f32 %v2321_v40, %v2255_v37  ;;  %v1109_v44 = vpop.f32.mrb[31].mxu0 }
 0x116   :  { %2136 = vst [vmem:[%s2946_s5 + $0x60] sm:$0xff] %v2028_v38   ;;  %v1284_v45 = vadd.f32 %v2779_v6, %v1107_v39  ;;  %v1110_v46 = vadd.f32 %v1109_v44, %v561_v41 }
 0x117   :  { %v1287_v47 = vadd.f32 %v2779_v6, %v1118_v43  ;;  %v1350_v49 = vmax.f32 %v1286_v42, 0.0 }
 0x118   :  { %v1285_v48 = vadd.f32 %v2779_v6, %v1110_v46  ;;  %v1348_v52 = vmax.f32 %v1284_v45, 0.0 }
 0x119   :  { %v1351_v50 = vmax.f32 %v1287_v47, 0.0  ;;  %v2258_v51 = vpop.f32.mrb[32].mxu1 }
 0x11a   :  { %v1349_v53 = vmax.f32 %v1285_v48, 0.0  ;;  %v2324_v54 = vpop.f32.mrb[32].mxu0  ;;  %v574_v55 = vpop.f32.mrb[33].mxu1 }
 0x11b   :  { %v2043_v56 = vpack.c.bf16 %v1351_v50, %v1350_v49  ;;  %v1131_v57 = vadd.f32 %v2324_v54, %v2258_v51  ;;  %v1122_v58 = vpop.f32.mrb[33].mxu0  ;;  %v2259_v59 = vpop.f32.mrb[34].mxu1 }
 0x11c   :  { %v2038_v60 = vpack.c.bf16 %v1349_v53, %v1348_v52  ;;  %v1123_v61 = vadd.f32 %v1122_v58, %v574_v55  ;;  %v2325_v62 = vpop.f32.mrb[34].mxu0  ;;  %v577_v63 = vpop.f32.mrb[35].mxu1 }
 0x11d   :  { %2139 = vst [vmem:[%s2946_s5 + $0x78] sm:$0xff] %v2043_v56   ;;  %v1290_v0 = vadd.f32 %v2779_v6, %v1131_v57  ;;  %v1134_v1 = vadd.f32 %v2325_v62, %v2259_v59  ;;  %v1125_v2 = vpop.f32.mrb[35].mxu0 }
 0x11e   :  { %2138 = vst [vmem:[%s2946_s5 + $0x70] sm:$0xff] %v2038_v60   ;;  %v1288_v3 = vadd.f32 %v2779_v6, %v1123_v61  ;;  %v1126_v4 = vadd.f32 %v1125_v2, %v577_v63 }
 0x11f   :  { %v1291_v5 = vadd.f32 %v2779_v6, %v1134_v1  ;;  %v1354_v8 = vmax.f32 %v1290_v0, 0.0 }
 0x120   :  { %v1289_v7 = vadd.f32 %v2779_v6, %v1126_v4  ;;  %v1352_v11 = vmax.f32 %v1288_v3, 0.0 }
 0x121   :  { %v1355_v9 = vmax.f32 %v1291_v5, 0.0  ;;  %v2262_v10 = vpop.f32.mrb[36].mxu1 }
 0x122   :  { %v1353_v12 = vmax.f32 %v1289_v7, 0.0  ;;  %v2328_v13 = vpop.f32.mrb[36].mxu0  ;;  %v590_v14 = vpop.f32.mrb[37].mxu1 }
 0x123   :  { %v2053_v15 = vpack.c.bf16 %v1355_v9, %v1354_v8  ;;  %v1147_v16 = vadd.f32 %v2328_v13, %v2262_v10  ;;  %v1138_v17 = vpop.f32.mrb[37].mxu0  ;;  %v2263_v18 = vpop.f32.mrb[38].mxu1 }
 0x124   :  { %v2048_v19 = vpack.c.bf16 %v1353_v12, %v1352_v11  ;;  %v1139_v20 = vadd.f32 %v1138_v17, %v590_v14  ;;  %v2329_v21 = vpop.f32.mrb[38].mxu0  ;;  %v593_v22 = vpop.f32.mrb[39].mxu1 }
 0x125   :  { %2141 = vst [vmem:[%s2946_s5 + $0x88] sm:$0xff] %v2053_v15   ;;  %v1294_v23 = vadd.f32 %v2779_v6, %v1147_v16  ;;  %v1150_v24 = vadd.f32 %v2329_v21, %v2263_v18  ;;  %v1141_v25 = vpop.f32.mrb[39].mxu0 }
 0x126   :  { %2140 = vst [vmem:[%s2946_s5 + $0x80] sm:$0xff] %v2048_v19   ;;  %v1292_v26 = vadd.f32 %v2779_v6, %v1139_v20  ;;  %v1142_v27 = vadd.f32 %v1141_v25, %v593_v22 }
 0x127   :  { %v1295_v28 = vadd.f32 %v2779_v6, %v1150_v24  ;;  %v1358_v30 = vmax.f32 %v1294_v23, 0.0 }
 0x128   :  { %v1293_v29 = vadd.f32 %v2779_v6, %v1142_v27  ;;  %v1356_v33 = vmax.f32 %v1292_v26, 0.0 }
 0x129   :  { %v1359_v31 = vmax.f32 %v1295_v28, 0.0  ;;  %v2266_v32 = vpop.f32.mrb[40].mxu1 }
 0x12a   :  { %v1357_v34 = vmax.f32 %v1293_v29, 0.0  ;;  %v2332_v35 = vpop.f32.mrb[40].mxu0  ;;  %v606_v36 = vpop.f32.mrb[41].mxu1 }
 0x12b   :  { %v2063_v37 = vpack.c.bf16 %v1359_v31, %v1358_v30  ;;  %v1163_v38 = vadd.f32 %v2332_v35, %v2266_v32  ;;  %v1154_v39 = vpop.f32.mrb[41].mxu0  ;;  %v2267_v40 = vpop.f32.mrb[42].mxu1 }
 0x12c   :  { %v2058_v41 = vpack.c.bf16 %v1357_v34, %v1356_v33  ;;  %v1155_v42 = vadd.f32 %v1154_v39, %v606_v36  ;;  %v2333_v43 = vpop.f32.mrb[42].mxu0  ;;  %v609_v44 = vpop.f32.mrb[43].mxu1 }
 0x12d   :  { %2143 = vst [vmem:[%s2946_s5 + $0x98] sm:$0xff] %v2063_v37   ;;  %v1298_v45 = vadd.f32 %v2779_v6, %v1163_v38  ;;  %v1166_v46 = vadd.f32 %v2333_v43, %v2267_v40  ;;  %v1157_v47 = vpop.f32.mrb[43].mxu0 }
 0x12e   :  { %2142 = vst [vmem:[%s2946_s5 + $0x90] sm:$0xff] %v2058_v41   ;;  %v1296_v48 = vadd.f32 %v2779_v6, %v1155_v42  ;;  %v1158_v49 = vadd.f32 %v1157_v47, %v609_v44 }
 0x12f   :  { %v1299_v50 = vadd.f32 %v2779_v6, %v1166_v46  ;;  %v1362_v52 = vmax.f32 %v1298_v45, 0.0 }
 0x130   :  { %v1297_v51 = vadd.f32 %v2779_v6, %v1158_v49  ;;  %v1360_v55 = vmax.f32 %v1296_v48, 0.0 }
 0x131   :  { %v1363_v53 = vmax.f32 %v1299_v50, 0.0  ;;  %v2270_v54 = vpop.f32.mrb[44].mxu1 }
 0x132   :  { %v1361_v56 = vmax.f32 %v1297_v51, 0.0  ;;  %v2336_v57 = vpop.f32.mrb[44].mxu0  ;;  %v622_v58 = vpop.f32.mrb[45].mxu1 }
 0x133   :  { %v2073_v59 = vpack.c.bf16 %v1363_v53, %v1362_v52  ;;  %v1179_v60 = vadd.f32 %v2336_v57, %v2270_v54  ;;  %v1170_v61 = vpop.f32.mrb[45].mxu0  ;;  %v2271_v62 = vpop.f32.mrb[46].mxu1 }
 0x134   :  { %v2068_v63 = vpack.c.bf16 %v1361_v56, %v1360_v55  ;;  %v1171_v0 = vadd.f32 %v1170_v61, %v622_v58  ;;  %v2337_v1 = vpop.f32.mrb[46].mxu0  ;;  %v625_v2 = vpop.f32.mrb[47].mxu1 }
 0x135   :  { %2145 = vst [vmem:[%s2946_s5 + $0xa8] sm:$0xff] %v2073_v59   ;;  %v1302_v3 = vadd.f32 %v2779_v6, %v1179_v60  ;;  %v1182_v4 = vadd.f32 %v2337_v1, %v2271_v62  ;;  %v1173_v5 = vpop.f32.mrb[47].mxu0 }
 0x136   :  { %2144 = vst [vmem:[%s2946_s5 + $0xa0] sm:$0xff] %v2068_v63   ;;  %v1300_v7 = vadd.f32 %v2779_v6, %v1171_v0  ;;  %v1174_v8 = vadd.f32 %v1173_v5, %v625_v2 }
 0x137   :  { %v1303_v9 = vadd.f32 %v2779_v6, %v1182_v4  ;;  %v1366_v11 = vmax.f32 %v1302_v3, 0.0 }
 0x138   :  { %v1301_v10 = vadd.f32 %v2779_v6, %v1174_v8  ;;  %v1364_v14 = vmax.f32 %v1300_v7, 0.0 }
 0x139   :  { %v1367_v12 = vmax.f32 %v1303_v9, 0.0  ;;  %v2274_v13 = vpop.f32.mrb[48].mxu1 }
 0x13a   :  { %v1365_v15 = vmax.f32 %v1301_v10, 0.0  ;;  %v2340_v16 = vpop.f32.mrb[48].mxu0  ;;  %v638_v17 = vpop.f32.mrb[49].mxu1 }
 0x13b   :  { %v2083_v18 = vpack.c.bf16 %v1367_v12, %v1366_v11  ;;  %v1195_v19 = vadd.f32 %v2340_v16, %v2274_v13  ;;  %v1186_v20 = vpop.f32.mrb[49].mxu0  ;;  %v2275_v21 = vpop.f32.mrb[50].mxu1 }
 0x13c   :  { %v2078_v22 = vpack.c.bf16 %v1365_v15, %v1364_v14  ;;  %v1187_v23 = vadd.f32 %v1186_v20, %v638_v17  ;;  %v2341_v24 = vpop.f32.mrb[50].mxu0  ;;  %v641_v25 = vpop.f32.mrb[51].mxu1 }
 0x13d   :  { %2147 = vst [vmem:[%s2946_s5 + $0xb8] sm:$0xff] %v2083_v18   ;;  %v1306_v26 = vadd.f32 %v2779_v6, %v1195_v19  ;;  %v1198_v27 = vadd.f32 %v2341_v24, %v2275_v21  ;;  %v1189_v28 = vpop.f32.mrb[51].mxu0 }
 0x13e   :  { %2146 = vst [vmem:[%s2946_s5 + $0xb0] sm:$0xff] %v2078_v22   ;;  %v1304_v29 = vadd.f32 %v2779_v6, %v1187_v23  ;;  %v1190_v30 = vadd.f32 %v1189_v28, %v641_v25 }
 0x13f   :  { %v1307_v31 = vadd.f32 %v2779_v6, %v1198_v27  ;;  %v1370_v33 = vmax.f32 %v1306_v26, 0.0 }
 0x140   :  { %v1305_v32 = vadd.f32 %v2779_v6, %v1190_v30  ;;  %v1368_v36 = vmax.f32 %v1304_v29, 0.0 }
 0x141   :  { %v1371_v34 = vmax.f32 %v1307_v31, 0.0  ;;  %v2278_v35 = vpop.f32.mrb[52].mxu1 }
 0x142   :  { %v1369_v37 = vmax.f32 %v1305_v32, 0.0  ;;  %v2344_v38 = vpop.f32.mrb[52].mxu0  ;;  %v654_v39 = vpop.f32.mrb[53].mxu1 }
 0x143   :  { %v2093_v40 = vpack.c.bf16 %v1371_v34, %v1370_v33  ;;  %v1211_v41 = vadd.f32 %v2344_v38, %v2278_v35  ;;  %v1202_v42 = vpop.f32.mrb[53].mxu0  ;;  %v2279_v43 = vpop.f32.mrb[54].mxu1 }
 0x144   :  { %v2088_v44 = vpack.c.bf16 %v1369_v37, %v1368_v36  ;;  %v1203_v45 = vadd.f32 %v1202_v42, %v654_v39  ;;  %v2345_v46 = vpop.f32.mrb[54].mxu0  ;;  %v657_v47 = vpop.f32.mrb[55].mxu1 }
 0x145   :  { %2149 = vst [vmem:[%s2946_s5 + $0xc8] sm:$0xff] %v2093_v40   ;;  %v1310_v48 = vadd.f32 %v2779_v6, %v1211_v41  ;;  %v1214_v49 = vadd.f32 %v2345_v46, %v2279_v43  ;;  %v1205_v50 = vpop.f32.mrb[55].mxu0 }
 0x146   :  { %2148 = vst [vmem:[%s2946_s5 + $0xc0] sm:$0xff] %v2088_v44   ;;  %v1308_v51 = vadd.f32 %v2779_v6, %v1203_v45  ;;  %v1206_v52 = vadd.f32 %v1205_v50, %v657_v47 }
 0x147   :  { %v1311_v53 = vadd.f32 %v2779_v6, %v1214_v49  ;;  %v1374_v55 = vmax.f32 %v1310_v48, 0.0 }
 0x148   :  { %v1309_v54 = vadd.f32 %v2779_v6, %v1206_v52  ;;  %v1372_v58 = vmax.f32 %v1308_v51, 0.0 }
 0x149   :  { %v1375_v56 = vmax.f32 %v1311_v53, 0.0  ;;  %v2282_v57 = vpop.f32.mrb[56].mxu1 }
 0x14a   :  { %v1373_v59 = vmax.f32 %v1309_v54, 0.0  ;;  %v2348_v60 = vpop.f32.mrb[56].mxu0  ;;  %v670_v61 = vpop.f32.mrb[57].mxu1 }
 0x14b   :  { %v2103_v62 = vpack.c.bf16 %v1375_v56, %v1374_v55  ;;  %v1227_v63 = vadd.f32 %v2348_v60, %v2282_v57  ;;  %v1218_v0 = vpop.f32.mrb[57].mxu0  ;;  %v2283_v1 = vpop.f32.mrb[58].mxu1 }
 0x14c   :  { %v2098_v2 = vpack.c.bf16 %v1373_v59, %v1372_v58  ;;  %v1219_v3 = vadd.f32 %v1218_v0, %v670_v61  ;;  %v2349_v4 = vpop.f32.mrb[58].mxu0  ;;  %v673_v5 = vpop.f32.mrb[59].mxu1 }
 0x14d   :  { %2151 = vst [vmem:[%s2946_s5 + $0xd8] sm:$0xff] %v2103_v62   ;;  %v1314_v7 = vadd.f32 %v2779_v6, %v1227_v63  ;;  %v1230_v8 = vadd.f32 %v2349_v4, %v2283_v1  ;;  %v1221_v9 = vpop.f32.mrb[59].mxu0 }
 0x14e   :  { %2150 = vst [vmem:[%s2946_s5 + $0xd0] sm:$0xff] %v2098_v2   ;;  %v1312_v10 = vadd.f32 %v2779_v6, %v1219_v3  ;;  %v1222_v11 = vadd.f32 %v1221_v9, %v673_v5 }
 0x14f   :  { %v1315_v12 = vadd.f32 %v2779_v6, %v1230_v8  ;;  %v1378_v14 = vmax.f32 %v1314_v7, 0.0 }
 0x150   :  { %v1313_v13 = vadd.f32 %v2779_v6, %v1222_v11  ;;  %v1376_v17 = vmax.f32 %v1312_v10, 0.0 }
 0x151   :  { %v1379_v15 = vmax.f32 %v1315_v12, 0.0  ;;  %v2286_v16 = vpop.f32.mrb[60].mxu1 }
 0x152   :  { %v1377_v18 = vmax.f32 %v1313_v13, 0.0  ;;  %v2352_v19 = vpop.f32.mrb[60].mxu0  ;;  %v686_v20 = vpop.f32.mrb[61].mxu1 }
 0x153   :  { %v2113_v21 = vpack.c.bf16 %v1379_v15, %v1378_v14  ;;  %v1243_v22 = vadd.f32 %v2352_v19, %v2286_v16  ;;  %v1234_v23 = vpop.f32.mrb[61].mxu0  ;;  %v2287_v24 = vpop.f32.mrb[62].mxu1 }
 0x154   :  { %v2108_v25 = vpack.c.bf16 %v1377_v18, %v1376_v17  ;;  %v1235_v26 = vadd.f32 %v1234_v23, %v686_v20  ;;  %v2353_v27 = vpop.f32.mrb[62].mxu0  ;;  %v689_v28 = vpop.f32.mrb[63].mxu1 }
 0x155   :  { %2153 = vst [vmem:[%s2946_s5 + $0xe8] sm:$0xff] %v2113_v21   ;;  %v1318_v29 = vadd.f32 %v2779_v6, %v1243_v22  ;;  %v1246_v30 = vadd.f32 %v2353_v27, %v2287_v24  ;;  %v1237_v31 = vpop.f32.mrb[63].mxu0 }
 0x156   :  { %2152 = vst [vmem:[%s2946_s5 + $0xe0] sm:$0xff] %v2108_v25   ;;  %v1316_v32 = vadd.f32 %v2779_v6, %v1235_v26  ;;  %v1238_v33 = vadd.f32 %v1237_v31, %v689_v28 }
 0x157   :  { %v1319_v34 = vadd.f32 %v2779_v6, %v1246_v30  ;;  %v1382_v36 = vmax.f32 %v1318_v29, 0.0 }
 0x158   :  { %v1317_v35 = vadd.f32 %v2779_v6, %v1238_v33  ;;  %v1380_v38 = vmax.f32 %v1316_v32, 0.0 }
 0x159   :  { %v1383_v37 = vmax.f32 %v1319_v34, 0.0 }
 0x15a   :  { %v1381_v39 = vmax.f32 %v1317_v35, 0.0 }
 0x15b   :  { %v2123_v40 = vpack.c.bf16 %v1383_v37, %v1382_v36 }
 0x15c   :  { %v2118_v41 = vpack.c.bf16 %v1381_v39, %v1380_v38 }
 0x15d   :  { %2155 = vst [vmem:[%s2946_s5 + $0xf8] sm:$0xff] %v2123_v40  }
 0x15e   :  { %2154 = vst [vmem:[%s2946_s5 + $0xf0] sm:$0xff] %v2118_v41  }

// kernel: inception_forward.6
= control target key start
LH: loop header
LB: loop body
LE: loop exit
PB: predicated region body
PF: predicated region fallthrough
CT: control target
= control target key end

     0   :  { %s3930_s12 = smov 0   ;;  %s3932_s13 = smov 0   ;;  %s4730_s0 = inlined_call_operand.vmem [shape: bf16[2,440,4], index: 0, kind: input, shape index: {}]   ;;  %s4731_s1 = inlined_call_operand.vmem [shape: bf16[3,12,128], index: 1, kind: input, shape index: {}]   ;;  %s4732_s2 = inlined_call_operand.vmem [shape: f32[1,128], index: 2, kind: input, shape index: {}]   ;;  %s4733_s3 = inlined_call_operand.vmem [shape: f32[2,384,128], index: 3, kind: output, shape index: {}]  }
   0x1   :  { %s3934_s14 = smov 0  }
   0x2 LB: > { %s25_s15 = sadd.s32 1, %s3902_s13  ;;  %p3275_p0 = scmp.ge.s32.totalorder %s3906_s14, 1  ;;  %s3906_s14 = sphi %s3934_s14, %s13_s14   ;;  %s3902_s13 = sphi %s3932_s13, %s4735_s13   ;;  %s3898_s12 = sphi %s3930_s12, %s4734_s12  }
   0x3   : > { %p27_p1 = scmp.ge.s32.totalorder %s25_s15, 2  ;;  %p151_p2 = scmp.lt.s32.totalorder %s3906_s14, 3 }
   0x5   : > { %s4737_s15 = smov (%p27_p1, %s25_s15), 0  ;;  %p152_p3 = pnand %p3275_p0, %p151_p2 }
   0x6   : > { %p179_p4 = scmp.lt.s32.totalorder (!%p152_p3), %s3898_s12, 1  ;;  %vm255_vm0 = vcmask (!%p152_p3), 27648   ;;  %vm1271_vm1 = vcmask (!%p152_p3), 1046528   ;;  %vm748_vm2 = vsmask.f32 (!%p152_p3), 7424  ;;  %s3908_s20 = smov (!%p152_p3), 8  }
   0x7   : > { %155 = sbr.rel (%p152_p3) target bundleno = 536 (0x218), region = 32  ;;  %s3909_s21 = smov (!%p152_p3), 4   ;;  %vm527_vm3 = vcmask (!%p152_p3), 31744   ;;  %vm1636_vm4 = vcmask (!%p152_p3), 1045504   ;;  %vm1050_vm5 = vcmask (!%p152_p3), 64544   ;;  %vm1408_vm6 = vcmask (!%p152_p3), 97344  }
   0x8   : > { %vm2062_vm7 = vcmask (!%p152_p3), 1043456   ;;  %vm1563_vm8 = vcmask (!%p152_p3), 97280  }
   0xe   : > { %s4739_s12 = smov (!%p179_p4, %s3898_s12), 1 }
   0xf   : > { %s3770_s16 = smul.u32 220, %s4739_s12 }
  0x10   : > { %s3771_s28 = smul.u32 384, %s4739_s12 }
  0x11   : > { %s3954_s19 = scalar_lea.vmem %s4730_s0, %s3770_s16 }
  0x12   : > { %v204_v0 = vld [vmem:[%s3954_s19 + $0x10] sm:$0xf]  ;;  %v205_v1 = vld [vmem:[%s3954_s19 + $0x14] sm:$0xf]  ;;  %v206_v2 = vld [vmem:[%s3954_s19 + $0x18] sm:$0xf]  ;;  %s4610_s6 = scalar_lea.vmem %s4733_s3, %s3771_s28 }
  0x13   : > { %v207_v3 = vld [vmem:[%s3954_s19 + $0x1c] sm:$0xf]  ;;  %260 = vst.msk [vmem:[#allocation2 + $0x10] sm:$0xf] %vm255_vm0, %v204_v0  ;;  %261 = vst.msk [vmem:[#allocation2 + $0x14] sm:$0xf] %vm255_vm0, %v205_v1 }
  0x14   : > { %262 = vst.msk [vmem:[#allocation2 + $0x18] sm:$0xf] %vm255_vm0, %v206_v2  ;;  %v202_v4 = vld [vmem:[%s3954_s19 + $0x8] sm:$0xf]  ;;  %v203_v5 = vld [vmem:[%s3954_s19 + $0xc] sm:$0xf] }
  0x15   : > { %263 = vst.msk [vmem:[#allocation2 + $0x1c] sm:$0xf] %vm255_vm0, %v207_v3  ;;  %258 = vst.msk [vmem:[#allocation2 + $0x8] sm:$0xf] %vm255_vm0, %v202_v4  ;;  %v208_v6 = vld [vmem:[%s3954_s19 + $0x20] sm:$0xf] }
  0x16   : > { %259 = vst.msk [vmem:[#allocation2 + $0xc] sm:$0xf] %vm255_vm0, %v203_v5  ;;  %v209_v7 = vld [vmem:[%s3954_s19 + $0x24] sm:$0xf]  ;;  %v200_v8 = vld [vmem:[%s3954_s19] sm:$0xf] }
  0x17   : > { %264 = vst.msk [vmem:[#allocation2 + $0x20] sm:$0xf] %vm255_vm0, %v208_v6  ;;  %265 = vst.msk [vmem:[#allocation2 + $0x24] sm:$0xf] %vm255_vm0, %v209_v7  ;;  %v201_v9 = vld [vmem:[%s3954_s19 + $0x4] sm:$0xf] }
  0x18   : > { %256 = vst.msk [vmem:[#allocation2] sm:$0xf] %vm255_vm0, %v200_v8  ;;  %v210_v10 = vld [vmem:[%s3954_s19 + $0x28] sm:$0xf]  ;;  %v211_v11 = vld [vmem:[%s3954_s19 + $0x2c] sm:$0xf] }
  0x19   : > { %257 = vst.msk [vmem:[#allocation2 + $0x4] sm:$0xf] %vm255_vm0, %v201_v9  ;;  %v212_v12 = vld [vmem:[%s3954_s19 + $0x30] sm:$0xf]  ;;  %v213_v13 = vld [vmem:[%s3954_s19 + $0x34] sm:$0xf] }
  0x1a   : > { %266 = vst.msk [vmem:[#allocation2 + $0x28] sm:$0xf] %vm255_vm0, %v210_v10  ;;  %267 = vst.msk [vmem:[#allocation2 + $0x2c] sm:$0xf] %vm255_vm0, %v211_v11  ;;  %v214_v14 = vld [vmem:[%s3954_s19 + $0x38] sm:$0xf] }
  0x1b   : > { %268 = vst.msk [vmem:[#allocation2 + $0x30] sm:$0xf] %vm255_vm0, %v212_v12  ;;  %269 = vst.msk [vmem:[#allocation2 + $0x34] sm:$0xf] %vm255_vm0, %v213_v13  ;;  %v215_v15 = vld [vmem:[%s3954_s19 + $0x3c] sm:$0xf] }
  0x1c   : > { %v216_v16 = vld [vmem:[%s3954_s19 + $0x40] sm:$0xf]  ;;  %v217_v17 = vld [vmem:[%s3954_s19 + $0x44] sm:$0xf]  ;;  %270 = vst.msk [vmem:[#allocation2 + $0x38] sm:$0xf] %vm255_vm0, %v214_v14 }
  0x1d   : > { %271 = vst.msk [vmem:[#allocation2 + $0x3c] sm:$0xf] %vm255_vm0, %v215_v15  ;;  %272 = vst.msk [vmem:[#allocation2 + $0x40] sm:$0xf] %vm255_vm0, %v216_v16  ;;  %v218_v18 = vld [vmem:[%s3954_s19 + $0x48] sm:$0xf] }
  0x1e   : > { %273 = vst.msk [vmem:[#allocation2 + $0x44] sm:$0xf] %vm255_vm0, %v217_v17  ;;  %v219_v19 = vld [vmem:[%s3954_s19 + $0x4c] sm:$0xf]  ;;  %v220_v20 = vld [vmem:[%s3954_s19 + $0x50] sm:$0xf] }
  0x1f   : > { %v221_v21 = vld [vmem:[%s3954_s19 + $0x54] sm:$0xf]  ;;  %274 = vst.msk [vmem:[#allocation2 + $0x48] sm:$0xf] %vm255_vm0, %v218_v18  ;;  %275 = vst.msk [vmem:[#allocation2 + $0x4c] sm:$0xf] %vm255_vm0, %v219_v19 }
  0x20   : > { %276 = vst.msk [vmem:[#allocation2 + $0x50] sm:$0xf] %vm255_vm0, %v220_v20  ;;  %v222_v22 = vld [vmem:[%s3954_s19 + $0x58] sm:$0xf]  ;;  %v223_v23 = vld [vmem:[%s3954_s19 + $0x5c] sm:$0xf] }
  0x21   : > { %277 = vst.msk [vmem:[#allocation2 + $0x54] sm:$0xf] %vm255_vm0, %v221_v21  ;;  %278 = vst.msk [vmem:[#allocation2 + $0x58] sm:$0xf] %vm255_vm0, %v222_v22  ;;  %v3798_v24 = vld [vmem:[#allocation2 + $0x10] sm:$0xff]   ;;  %v3799_v25 = vld [vmem:[#allocation2 + $0x18] sm:$0xff]  }
  0x22   : > { %279 = vst.msk [vmem:[#allocation2 + $0x5c] sm:$0xf] %vm255_vm0, %v223_v23  ;;  %v3800_v26 = vld [vmem:[#allocation2 + $0x8] sm:$0xff]   ;;  %v1275_v27 = vrot.slane %v3798_v24, 1  ;;  %v1277_v28 = vrot.slane %v3799_v25, 1  ;;  %v4004_v30 = vld [vmem:[#allocation2 + $0x20] sm:$0xff]  }
  0x23   : > { %v1273_v29 = vrot.slane %v3800_v26, 1  ;;  %v3802_v32 = vld [vmem:[#allocation2 + $0x8] sm:$0xff]   ;;  %v1279_v34 = vrot.slane %v4004_v30, 1  ;;  %v3803_v35 = vld [vmem:[#allocation2 + $0x10] sm:$0xff]   ;;  %v3804_v40 = vld [vmem:[#allocation2 + $0x18] sm:$0xff]  }
  0x24   : > { %v1278_v31 = vsel %vm1271_vm1, %v1275_v27, %v1277_v28  ;;  %v757_v36 = vshll.u32 %v3802_v32, 16  ;;  %v761_v37 = vshrl.u32 %v3802_v32, 16  ;;  %v765_v39 = vshll.u32 %v3803_v35, 16  ;;  %v3805_v41 = vld [vmem:[#allocation2 + $0x20] sm:$0xff]   ;;  %v3808_v54 = vld [vmem:[#allocation2 + $0x28] sm:$0xff]   ;;  %v3809_v60 = vld [vmem:[#allocation2 + $0x30] sm:$0xff]  }
  0x25   : > { %1331 = vrot.lane.b32.xlu0 %v1278_v31, %s3908_s20  ;;  %v1276_v33 = vsel %vm1271_vm1, %v1273_v29, %v1275_v27  ;;  %v1280_v38 = vsel %vm1271_vm1, %v1277_v28, %v1279_v34  ;;  %v769_v42 = vshrl.u32 %v3803_v35, 16  ;;  %v3806_v44 = vld [vmem:[#allocation2] sm:$0xfe]   ;;  %v773_v47 = vshll.u32 %v3804_v40, 16  ;;  %v3810_v6 = vld [vmem:[#allocation2 + $0x28] sm:$0xff]   ;;  %v4019_v7 = vld [vmem:[#allocation2 + $0x30] sm:$0xff]  }
  0x26   : > { %1329 = vrot.lane.b32.xlu1 %v1276_v33, %s3908_s20  ;;  %v759_v43 = vrot.slane %v757_v36, 1  ;;  %v3807_v45 = vld [vmem:[#allocation2] sm:$0xff]   ;;  %v767_v46 = vrot.slane %v765_v39, 1  ;;  %v777_v48 = vshrl.u32 %v3804_v40, 16  ;;  %v781_v49 = vshll.u32 %v3805_v41, 16  ;;  %v3812_v8 = vld [vmem:[#allocation2 + $0x38] sm:$0xff]  }
  0x27   : > { %v1272_v51 = vrot.slane %v3806_v44, 1  ;;  %v750_v52 = vshrl.u32 %v3807_v45, 16  ;;  %v752_v53 = vshll.u32 %v3807_v45, 16  ;;  %v775_v55 = vrot.slane %v773_v47, 1  ;;  %v4024_v12 = vld [vmem:[#allocation2 + $0x40] sm:$0xff]   ;;  %v4030_v20 = vld [vmem:[#allocation2 + $0x38] sm:$0xff]  }
  0x28   : > { %v763_v50 = vor.u32 %v761_v37, %v759_v43  ;;  %v783_v56 = vrot.slane %v781_v49, 1  ;;  %v771_v57 = vor.u32 %v769_v42, %v767_v46  ;;  %v789_v62 = vshll.u32 %v3808_v54, 16  ;;  %v4034_v23 = vld [vmem:[#allocation2 + $0x40] sm:$0xff]   ;;  %v3816_v26 = vld [vmem:[#allocation2 + $0x48] sm:$0xff]   ;;  %v4037_v27 = vld [vmem:[#allocation2 + $0x50] sm:$0xff]  }
  0x29   : > { %v754_v59 = vrot.slane %v752_v53, 1  ;;  %v779_v61 = vor.u32 %v777_v48, %v775_v55  ;;  %v793_v63 = vshrl.u32 %v3808_v54, 16  ;;  %v797_v2 = vshll.u32 %v3809_v60, 16  ;;  %v4040_v31 = vld [vmem:[#allocation2 + $0x58] sm:$0xff]   ;;  %v224_v35 = vld [vmem:[%s3954_s19 + $0x60] sm:$0xf] }
  0x2a   : > { %1333 = vrot.lane.b32.xlu1 %v1280_v38, %s3908_s20  ;;  %v768_v58 = vsel %vm748_vm2, %v763_v50, %v767_v46  ;;  %v776_v0 = vsel %vm748_vm2, %v771_v57, %v775_v55  ;;  %v785_v3 = vshrl.u32 %v3805_v41, 16  ;;  %v791_v5 = vrot.slane %v789_v62, 1  ;;  %v225_v36 = vld [vmem:[%s3954_s19 + $0x64] sm:$0xf]  ;;  %280 = vst.msk [vmem:[#allocation2 + $0x60] sm:$0xf] %vm255_vm0, %v224_v35 }
  0x2b   : > { %971 = vrot.lane.b32.xlu0 %v768_v58, %s3909_s21  ;;  %v755_v1 = vor.u32 %v754_v59, %v750_v52  ;;  %v784_v4 = vsel %vm748_vm2, %v779_v61, %v783_v56  ;;  %v1274_v9 = vsel %vm1271_vm1, %v1272_v51, %v1273_v29  ;;  %v799_v11 = vrot.slane %v797_v2, 1  ;;  %281 = vst.msk [vmem:[#allocation2 + $0x64] sm:$0xf] %vm255_vm0, %v225_v36  ;;  %v226_v30 = vld [vmem:[%s3954_s19 + $0x68] sm:$0xf]  ;;  %v4062_v47 = vld [vmem:[#allocation2 + $0x50] sm:$0xff]  }
  0x2c   : > { %v795_v10 = vor.u32 %v793_v63, %v791_v5  ;;  %v787_v14 = vor.u32 %v785_v3, %v783_v56  ;;  %v805_v15 = vshll.u32 %v3812_v8, 16  ;;  %v1281_v16 = vrot.slane %v3810_v6, 1  ;;  %v3818_v46 = vld [vmem:[#allocation2 + $0x48] sm:$0xff]   ;;  %v228_v49 = vld [vmem:[%s3954_s19 + $0x70] sm:$0xf] }
  0x2d   : > { %v760_v13 = vsel %vm748_vm2, %v755_v1, %v759_v43  ;;  %v1283_v17 = vrot.slane %v4019_v7, 1  ;;  %v809_v18 = vshrl.u32 %v3812_v8, 16  ;;  %v813_v19 = vshll.u32 %v4024_v12, 16  ;;  %v229_v50 = vld [vmem:[%s3954_s19 + $0x74] sm:$0xf] }
  0x2e   : > { %975 = vrot.lane.b32.xlu1 %v784_v4, %s3909_s21  ;;  %v800_v21 = vsel %vm748_vm2, %v795_v10, %v799_v11  ;;  %v807_v22 = vrot.slane %v805_v15, 1  ;;  %v792_v24 = vsel %vm748_vm2, %v787_v14, %v791_v5  ;;  %v801_v25 = vshrl.u32 %v3809_v60, 16  ;;  %282 = vst.msk [vmem:[#allocation2 + $0x68] sm:$0xf] %vm255_vm0, %v226_v30  ;;  %284 = vst.msk [vmem:[#allocation2 + $0x70] sm:$0xf] %vm255_vm0, %v228_v49 }
  0x2f   : > { %973 = vrot.lane.b32.xlu0 %v776_v0, %s3909_s21  ;;  %v815_v28 = vrot.slane %v813_v19, 1  ;;  %v821_v29 = vshll.u32 %v3816_v26, 16  ;;  %v1284_v32 = vsel %vm1271_vm1, %v1281_v16, %v1283_v17  ;;  %v1282_v37 = vsel %vm1271_vm1, %v1279_v34, %v1281_v16  ;;  %v227_v34 = vld [vmem:[%s3954_s19 + $0x6c] sm:$0xf]  ;;  %285 = vst.msk [vmem:[#allocation2 + $0x74] sm:$0xf] %vm255_vm0, %v229_v50 }
  0x30   : > { %v811_v33 = vor.u32 %v809_v18, %v807_v22  ;;  %v803_v38 = vor.u32 %v801_v25, %v799_v11  ;;  %v1285_v39 = vrot.slane %v4030_v20, 1  ;;  %v1287_v40 = vrot.slane %v4034_v23, 1  ;;  %283 = vst.msk [vmem:[#allocation2 + $0x6c] sm:$0xf] %vm255_vm0, %v227_v34  ;;  %v230_v52 = vld [vmem:[%s3954_s19 + $0x78] sm:$0xf] }
  0x31   : > { %v825_v41 = vshrl.u32 %v3816_v26, 16  ;;  %v829_v42 = vshll.u32 %v4037_v27, 16  ;;  %v817_v43 = vshrl.u32 %v4024_v12, 16  ;;  %v823_v45 = vrot.slane %v821_v29, 1  ;;  %v231_v53 = vld [vmem:[%s3954_s19 + $0x7c] sm:$0xf] }
  0x32   : > { %1327 = vrot.lane.b32.xlu1 %v1274_v9, %s3908_s20  ;;  %v816_v44 = vsel %vm748_vm2, %v811_v33, %v815_v28  ;;  %v837_v48 = vshll.u32 %v4040_v31, 16  ;;  %v808_v51 = vsel %vm748_vm2, %v803_v38, %v807_v22  ;;  %v232_v54 = vld [vmem:[%s3954_s19 + $0x80] sm:$0xf]  ;;  %286 = vst.msk [vmem:[#allocation2 + $0x78] sm:$0xf] %vm255_vm0, %v230_v52  ;;  %v1288_v61 = vsel %vm1271_vm1, %v1285_v39, %v1287_v40  ;;  %v3822_v14 = vld [vmem:[#allocation2 + $0x58] sm:$0xff]  }
  0x33   : > { %969 = vrot.lane.b32.xlu0 %v760_v13, %s3909_s21  ;;  %287 = vst.msk [vmem:[#allocation2 + $0x7c] sm:$0xf] %vm255_vm0, %v231_v53  ;;  %v233_v55 = vld [vmem:[%s3954_s19 + $0x84] sm:$0xf]  ;;  %288 = vst.msk [vmem:[#allocation2 + $0x80] sm:$0xf] %vm255_vm0, %v232_v54  ;;  %v827_v62 = vor.u32 %v825_v41, %v823_v45  ;;  %v1286_v1 = vsel %vm1271_vm1, %v1283_v17, %v1285_v39  ;;  %v819_v2 = vor.u32 %v817_v43, %v815_v28 }
  0x34   : > { %v234_v56 = vld [vmem:[%s3954_s19 + $0x88] sm:$0xf]  ;;  %v235_v57 = vld [vmem:[%s3954_s19 + $0x8c] sm:$0xf]  ;;  %289 = vst.msk [vmem:[#allocation2 + $0x84] sm:$0xf] %vm255_vm0, %v233_v55 }
  0x35   : > { %290 = vst.msk [vmem:[#allocation2 + $0x88] sm:$0xf] %vm255_vm0, %v234_v56  ;;  %291 = vst.msk [vmem:[#allocation2 + $0x8c] sm:$0xf] %vm255_vm0, %v235_v57  ;;  %v236_v58 = vld [vmem:[%s3954_s19 + $0x90] sm:$0xf]  ;;  %v824_v12 = vsel %vm748_vm2, %v819_v2, %v823_v45 }
  0x36   : > { %979 = vrot.lane.b32.xlu1 %v800_v21, %s3909_s21  ;;  %v237_v59 = vld [vmem:[%s3954_s19 + $0x94] sm:$0xf]  ;;  %v238_v60 = vld [vmem:[%s3954_s19 + $0x98] sm:$0xf]  ;;  %v831_v63 = vrot.slane %v829_v42, 1  ;;  %v3821_v0 = vld [vmem:[#allocation2 + $0x60] sm:$0xff]  }
  0x37   : > { %977 = vrot.lane.b32.xlu0 %v792_v24, %s3909_s21  ;;  %292 = vst.msk [vmem:[#allocation2 + $0x90] sm:$0xf] %vm255_vm0, %v236_v58  ;;  %293 = vst.msk [vmem:[#allocation2 + $0x94] sm:$0xf] %vm255_vm0, %v237_v59  ;;  %v1289_v3 = vrot.slane %v3818_v46, 1  ;;  %v1291_v4 = vrot.slane %v4062_v47, 1 }
  0x38   : > { %294 = vst.msk [vmem:[#allocation2 + $0x98] sm:$0xf] %vm255_vm0, %v238_v60  ;;  %v239_v5 = vld [vmem:[%s3954_s19 + $0x9c] sm:$0xf]  ;;  %v240_v6 = vld [vmem:[%s3954_s19 + $0xa0] sm:$0xf]  ;;  %v832_v7 = vsel %vm748_vm2, %v827_v62, %v831_v63 }
  0x39   : > { %v839_v8 = vrot.slane %v837_v48, 1  ;;  %v841_v9 = vshrl.u32 %v4040_v31, 16  ;;  %295 = vst.msk [vmem:[#allocation2 + $0x9c] sm:$0xf] %vm255_vm0, %v239_v5  ;;  %296 = vst.msk [vmem:[#allocation2 + $0xa0] sm:$0xf] %vm255_vm0, %v240_v6  ;;  %v1292_v16 = vsel %vm1271_vm1, %v1289_v3, %v1291_v4  ;;  %v1290_v21 = vsel %vm1271_vm1, %v1287_v40, %v1289_v3 }
  0x3a   : > { %1337 = vrot.lane.b32.xlu1 %v1284_v32, %s3908_s20  ;;  %v845_v10 = vshll.u32 %v3821_v0, 16  ;;  %v3824_v11 = vld [vmem:[#allocation2 + $0x68] sm:$0xff]   ;;  %v833_v13 = vshrl.u32 %v4037_v27, 16  ;;  %v4110_v15 = vld [vmem:[#allocation2 + $0x60] sm:$0xff]   ;;  %v4114_v19 = vld [vmem:[#allocation2 + $0x70] sm:$0xff]   ;;  %v1293_v24 = vrot.slane %v3822_v14, 1 }
  0x3b   : > { %1335 = vrot.lane.b32.xlu0 %v1282_v37, %s3908_s20  ;;  %v843_v17 = vor.u32 %v841_v9, %v839_v8  ;;  %v853_v20 = vshll.u32 %v3824_v11, 16  ;;  %v1295_v25 = vrot.slane %v4110_v15, 1  ;;  %v857_v28 = vshrl.u32 %v3824_v11, 16  ;;  %v3828_v31 = vld [vmem:[#allocation2 + $0x78] sm:$0xff]   ;;  %v4125_v33 = vld [vmem:[#allocation2 + $0x80] sm:$0xff]   ;;  %v3826_v35 = vld [vmem:[#allocation2 + $0x68] sm:$0xff]  }
  0x3c   : > { %v847_v18 = vrot.slane %v845_v10, 1  ;;  %v835_v22 = vor.u32 %v833_v13, %v831_v63  ;;  %v861_v29 = vshll.u32 %v4114_v19, 16  ;;  %v849_v23 = vshrl.u32 %v3821_v0, 16  ;;  %v4128_v36 = vld [vmem:[#allocation2 + $0x70] sm:$0xff]   ;;  %v3832_v49 = vld [vmem:[#allocation2 + $0x88] sm:$0xff]   ;;  %v3829_v53 = vld [vmem:[#allocation2 + $0x78] sm:$0xff]  }
  0x3d   : > { %v855_v27 = vrot.slane %v853_v20, 1  ;;  %v1296_v37 = vsel %vm1271_vm1, %v1293_v24, %v1295_v25  ;;  %v869_v40 = vshll.u32 %v3828_v31, 16  ;;  %v1294_v41 = vsel %vm1271_vm1, %v1291_v4, %v1293_v24  ;;  %v242_v50 = vld [vmem:[%s3954_s19 + $0xa8] sm:$0xf]  ;;  %v4145_v55 = vld [vmem:[#allocation2 + $0x80] sm:$0xff]   ;;  %v3851_v58 = vld [vmem:[#allocation2 + $0x18] sm:$0xff]  }
  0x3e   : > { %983 = vrot.lane.b32.xlu1 %v816_v44, %s3909_s21  ;;  %v848_v26 = vsel %vm748_vm2, %v843_v17, %v847_v18  ;;  %v840_v32 = vsel %vm748_vm2, %v835_v22, %v839_v8  ;;  %v863_v39 = vrot.slane %v861_v29, 1  ;;  %v851_v42 = vor.u32 %v849_v23, %v847_v18  ;;  %v241_v44 = vld [vmem:[%s3954_s19 + $0xa4] sm:$0xf]  ;;  %v243_v56 = vld [vmem:[%s3954_s19 + $0xac] sm:$0xf]  ;;  %v4150_v59 = vld [vmem:[#allocation2 + $0x90] sm:$0xff]  }
  0x3f   : > { %981 = vrot.lane.b32.xlu0 %v808_v51, %s3909_s21  ;;  %v859_v38 = vor.u32 %v857_v28, %v855_v27  ;;  %v877_v43 = vshll.u32 %v4125_v33, 16  ;;  %v1297_v30 = vrot.slane %v3826_v35, 1  ;;  %v865_v34 = vshrl.u32 %v4114_v19, 16  ;;  %297 = vst.msk [vmem:[#allocation2 + $0xa4] sm:$0xf] %vm255_vm0, %v241_v44  ;;  %v3850_v51 = vld [vmem:[#allocation2 + $0x8] sm:$0xff]  }
  0x40   : > { %v1299_v45 = vrot.slane %v4128_v36, 1  ;;  %v873_v46 = vshrl.u32 %v3828_v31, 16  ;;  %v871_v48 = vrot.slane %v869_v40, 1  ;;  %v856_v52 = vsel %vm748_vm2, %v851_v42, %v855_v27  ;;  %298 = vst.msk [vmem:[#allocation2 + $0xa8] sm:$0xf] %vm255_vm0, %v242_v50  ;;  %v3852_v11 = vld [vmem:[#allocation2 + $0x10] sm:$0xff]  }
  0x41   : > { %v864_v47 = vsel %vm748_vm2, %v859_v38, %v863_v39  ;;  %v879_v54 = vrot.slane %v877_v43, 1  ;;  %v244_v57 = vld [vmem:[%s3954_s19 + $0xb0] sm:$0xf]  ;;  %299 = vst.msk [vmem:[#allocation2 + $0xac] sm:$0xf] %vm255_vm0, %v243_v56  ;;  %v1298_v5 = vsel %vm1271_vm1, %v1295_v25, %v1297_v30  ;;  %v867_v6 = vor.u32 %v865_v34, %v863_v39  ;;  %v3836_v14 = vld [vmem:[#allocation2 + $0x98] sm:$0xff]  }
  0x42   : > { %1341 = vrot.lane.b32.xlu1 %v1288_v61, %s3908_s20  ;;  %v245_v60 = vld [vmem:[%s3954_s19 + $0xb4] sm:$0xf]  ;;  %300 = vst.msk [vmem:[#allocation2 + $0xb0] sm:$0xf] %vm255_vm0, %v244_v57  ;;  %v246_v61 = vld [vmem:[%s3954_s19 + $0xb8] sm:$0xf]  ;;  %v1300_v2 = vsel %vm1271_vm1, %v1297_v30, %v1299_v45  ;;  %v875_v3 = vor.u32 %v873_v46, %v871_v48 }
  0x43   : > { %1339 = vrot.lane.b32.xlu0 %v1286_v1, %s3908_s20  ;;  %v247_v62 = vld [vmem:[%s3954_s19 + $0xbc] sm:$0xf]  ;;  %529 = vst.msk [vmem:[#allocation3 + $0x8] sm:$0xff] %vm527_vm3, %v3850_v51  ;;  %v248_v63 = vld [vmem:[%s3954_s19 + $0xc0] sm:$0xf]  ;;  %531 = vst.msk [vmem:[#allocation3 + $0x18] sm:$0xff] %vm527_vm3, %v3851_v58  ;;  %v872_v15 = vsel %vm748_vm2, %v867_v6, %v871_v48 }
  0x44   : > { %301 = vst.msk [vmem:[#allocation2 + $0xb4] sm:$0xf] %vm255_vm0, %v245_v60  ;;  %302 = vst.msk [vmem:[#allocation2 + $0xb8] sm:$0xf] %vm255_vm0, %v246_v61  ;;  %v249_v0 = vld [vmem:[%s3954_s19 + $0xc4] sm:$0xf] }
  0x45   : > { %303 = vst.msk [vmem:[#allocation2 + $0xbc] sm:$0xf] %vm255_vm0, %v247_v62  ;;  %v250_v1 = vld [vmem:[%s3954_s19 + $0xc8] sm:$0xf]  ;;  %304 = vst.msk [vmem:[#allocation2 + $0xc0] sm:$0xf] %vm255_vm0, %v248_v63 }
  0x46   : > { %987 = vrot.lane.b32.xlu1 %v832_v7, %s3909_s21  ;;  %305 = vst.msk [vmem:[#allocation2 + $0xc4] sm:$0xf] %vm255_vm0, %v249_v0  ;;  %v251_v4 = vld [vmem:[%s3954_s19 + $0xcc] sm:$0xf]  ;;  %306 = vst.msk [vmem:[#allocation2 + $0xc8] sm:$0xf] %vm255_vm0, %v250_v1 }
  0x47   : > { %985 = vrot.lane.b32.xlu0 %v824_v12, %s3909_s21  ;;  %307 = vst.msk [vmem:[#allocation2 + $0xcc] sm:$0xf] %vm255_vm0, %v251_v4  ;;  %v885_v8 = vshll.u32 %v3832_v49, 16  ;;  %v1301_v9 = vrot.slane %v3829_v53, 1  ;;  %v1303_v7 = vrot.slane %v4145_v55, 1  ;;  %v889_v10 = vshrl.u32 %v3832_v49, 16 }
  0x48   : > { %v880_v12 = vsel %vm748_vm2, %v875_v3, %v879_v54  ;;  %v893_v13 = vshll.u32 %v4150_v59, 16  ;;  %v3834_v17 = vld [vmem:[#allocation2 + $0x88] sm:$0xff]   ;;  %530 = vst.msk [vmem:[#allocation3 + $0x10] sm:$0xff] %vm527_vm3, %v3852_v11  ;;  %v4186_v19 = vld [vmem:[#allocation2 + $0x90] sm:$0xff]   ;;  %v4189_v20 = vld [vmem:[#allocation2 + $0xa0] sm:$0xff]   ;;  %v901_v25 = vshll.u32 %v3836_v14, 16 }
  0x49   : > { %v887_v18 = vrot.slane %v885_v8, 1  ;;  %v1305_v28 = vrot.slane %v3834_v17, 1  ;;  %v4196_v29 = vld [vmem:[#allocation2 + $0xa8] sm:$0xff]   ;;  %v1307_v31 = vrot.slane %v4186_v19, 1  ;;  %v909_v23 = vshll.u32 %v4189_v20, 16  ;;  %v3853_v49 = vld [vmem:[#allocation2] sm:$0xff]  }
  0x4a   : > { %1345 = vrot.lane.b32.xlu1 %v1292_v16, %s3908_s20  ;;  %v881_v16 = vshrl.u32 %v4125_v33, 16  ;;  %v895_v24 = vrot.slane %v893_v13, 1  ;;  %v4203_v33 = vld [vmem:[#allocation2 + $0xa0] sm:$0xff]   ;;  %v897_v36 = vshrl.u32 %v4150_v59, 16  ;;  %v905_v38 = vshrl.u32 %v3836_v14, 16  ;;  %v4213_v43 = vld [vmem:[#allocation2 + $0xa8] sm:$0xff]  }
  0x4b   : > { %1343 = vrot.lane.b32.xlu0 %v1290_v21, %s3908_s20  ;;  %v1304_v21 = vsel %vm1271_vm1, %v1301_v9, %v1303_v7  ;;  %v891_v22 = vor.u32 %v889_v10, %v887_v18  ;;  %v917_v40 = vshll.u32 %v4196_v29, 16  ;;  %v911_v30 = vrot.slane %v909_v23, 1  ;;  %528 = vst.msk [vmem:[#allocation3] sm:$0xff] %vm527_vm3, %v3853_v49  ;;  %v3854_v55 = vld [vmem:[#allocation2 + $0x28] sm:$0xff]   ;;  %v3855_v57 = vld [vmem:[#allocation2 + $0x20] sm:$0xff]   ;;  %v3860_v3 = vld [vmem:[#allocation2 + $0x30] sm:$0xff]  }
  0x4c   : > { %v883_v27 = vor.u32 %v881_v16, %v879_v54  ;;  %v1311_v34 = vrot.slane %v4203_v33, 1  ;;  %v913_v44 = vshrl.u32 %v4189_v20, 16  ;;  %v1308_v46 = vsel %vm1271_vm1, %v1305_v28, %v1307_v31  ;;  %v3856_v58 = vld [vmem:[%s4731_s1 + $0x8] sm:$0x3f]   ;;  %v3857_v59 = vld [vmem:[%s4731_s1] sm:$0x3f]  }
  0x4d   : > { %v896_v35 = vsel %vm748_vm2, %v891_v22, %v895_v24  ;;  %v921_v48 = vshrl.u32 %v4196_v29, 16  ;;  %v1306_v50 = vsel %vm1271_vm1, %v1303_v7, %v1305_v28  ;;  %v899_v51 = vor.u32 %v897_v36, %v895_v24  ;;  %v3844_v61 = vld [vmem:[#allocation2 + $0xb8] sm:$0xff]   ;;  %533 = vst.msk [vmem:[#allocation3 + $0x28] sm:$0xff] %vm527_vm3, %v3854_v55  ;;  %v3858_v62 = vld [vmem:[%s4731_s1 + $0x10] sm:$0x3f]   ;;  %532 = vst.msk [vmem:[#allocation3 + $0x20] sm:$0xff] %vm527_vm3, %v3855_v57 }
  0x4e   : > { %991 = vrot.lane.b32.xlu1 %v848_v26, %s3909_s21  ;;  %v1302_v26 = vsel %vm1271_vm1, %v1299_v45, %v1301_v9  ;;  %v888_v39 = vsel %vm748_vm2, %v883_v27, %v887_v18  ;;  %v4218_v45 = vld [vmem:[#allocation2 + $0xb0] sm:$0xff]   ;;  %v1313_v54 = vrot.slane %v4213_v43, 1  ;;  %3767 = vmatprep.subr.msk.bf16.mxu0 %vm1636_vm4, %v3856_v58  ;;  %v4248_v0 = vsel %vm1636_vm4, %v3856_v58, 0  ;;  %v4251_v4 = vld [vmem:[#allocation2 + $0xc0] sm:$0xff]   ;;  %v3863_v8 = vld [vmem:[#allocation2 + $0x48] sm:$0xff]   ;;  %534 = vst.msk [vmem:[#allocation3 + $0x30] sm:$0xff] %vm527_vm3, %v3860_v3 }
  0x4f   : > { %989 = vrot.lane.b32.xlu0 %v840_v32, %s3909_s21  ;;  %v4199_v32 = vld [vmem:[#allocation2 + $0x98] sm:$0xff]   ;;  %v1315_v56 = vrot.slane %v4218_v45, 1  ;;  %3766 = vmatprep.subr.msk.bf16.mxu1 %vm1636_vm4, %v3857_v59  ;;  %v1638_v1 = vsel %vm1636_vm4, %v3857_v59, 0  ;;  %v252_v6 = vld [vmem:[%s3954_s19 + $0xd0] sm:$0xf]  ;;  %537 = vst.msk [vmem:[#allocation3 + $0x48] sm:$0xff] %vm527_vm3, %v3863_v8  ;;  %v915_v14 = vor.u32 %v913_v44, %v911_v30 }
  0x50   : > { %v1309_v42 = vrot.slane %v4199_v32, 1  ;;  %3569 = vmatpush3.bf16.msra.mxu0 %v4248_v0  ;;  %3519 = vmatpush3.bf16.msra.mxu1 %v1638_v1  ;;  %v253_v9 = vld [vmem:[%s3954_s19 + $0xd4] sm:$0xf]  ;;  %308 = vst.msk [vmem:[#allocation2 + $0xd0] sm:$0xf] %vm255_vm0, %v252_v6  ;;  %v933_v16 = vshll.u32 %v3844_v61, 16 }
  0x51   : > { %3768 = vmatprep.subr.msk.bf16.mxu1 %vm1636_vm4, %v3856_v58  ;;  %3769 = vmatprep.subr.msk.bf16.mxu0 %vm1636_vm4, %v3858_v62  ;;  %309 = vst.msk [vmem:[#allocation2 + $0xd4] sm:$0xf] %vm255_vm0, %v253_v9  ;;  %v3867_v17 = vld [vmem:[#allocation2 + $0x58] sm:$0xff]   ;;  %v937_v18 = vshrl.u32 %v3844_v61, 16  ;;  %v3868_v20 = vld [vmem:[#allocation2 + $0x50] sm:$0xff]   ;;  %v941_v19 = vshll.u32 %v4251_v4, 16  ;;  %v1316_v23 = vsel %vm1271_vm1, %v1313_v54, %v1315_v56 }
  0x52   : > { %1349 = vrot.lane.b32.xlu1 %v1296_v37, %s3908_s20  ;;  %v903_v37 = vrot.slane %v901_v25, 1  ;;  %v1312_v7 = vsel %vm1271_vm1, %v1309_v42, %v1311_v34  ;;  %v1310_v13 = vsel %vm1271_vm1, %v1307_v31, %v1309_v42  ;;  %v4281_v22 = vld [vmem:[#allocation2 + $0xc8] sm:$0xff]   ;;  %539 = vst.msk [vmem:[#allocation3 + $0x58] sm:$0xff] %vm527_vm3, %v3867_v17  ;;  %v3846_v27 = vld [vmem:[#allocation2 + $0xb8] sm:$0xff]   ;;  %538 = vst.msk [vmem:[#allocation3 + $0x50] sm:$0xff] %vm527_vm3, %v3868_v20  ;;  %v935_v29 = vrot.slane %v933_v16, 1 }
  0x53   : > { %1347 = vrot.lane.b32.xlu0 %v1294_v41, %s3908_s20  ;;  %v4210_v41 = vld [vmem:[#allocation2 + $0xb0] sm:$0xff]   ;;  %v3869_v24 = vld [vmem:[#allocation2 + $0x68] sm:$0xff]   ;;  %v3870_v28 = vld [vmem:[#allocation2 + $0x60] sm:$0xff]   ;;  %v943_v36 = vrot.slane %v941_v19, 1  ;;  %v1317_v42 = vrot.slane %v3846_v27, 1  ;;  %v945_v44 = vshrl.u32 %v4251_v4, 16 }
  0x54   : > { %v925_v53 = vshll.u32 %v4210_v41, 16  ;;  %v904_v63 = vsel %vm748_vm2, %v899_v51, %v903_v37  ;;  %541 = vst.msk [vmem:[#allocation3 + $0x68] sm:$0xff] %vm527_vm3, %v3869_v24  ;;  %v3871_v31 = vld [vmem:[#allocation2 + $0x70] sm:$0xff]   ;;  %v3847_v32 = vld [vmem:[#allocation2 + $0xc0] sm:$0xff]   ;;  %540 = vst.msk [vmem:[#allocation3 + $0x60] sm:$0xff] %vm527_vm3, %v3870_v28 }
  0x55   : > { %542 = vst.msk [vmem:[#allocation3 + $0x70] sm:$0xff] %vm527_vm3, %v3871_v31  ;;  %v3877_v58 = vld [vmem:[#allocation2 + $0xa0] sm:$0xff]   ;;  %v1318_v59 = vsel %vm1271_vm1, %v1315_v56, %v1317_v42  ;;  %v3880_v4 = vld [vmem:[#allocation2 + $0xb8] sm:$0xff]  }
  0x56   : > { %995 = vrot.lane.b32.xlu1 %v864_v47, %s3909_s21  ;;  %v907_v47 = vor.u32 %v905_v38, %v903_v37  ;;  %v927_v11 = vrot.slane %v925_v53, 1  ;;  %v1314_v37 = vsel %vm1271_vm1, %v1311_v34, %v1313_v54  ;;  %v953_v34 = vshrl.u32 %v4281_v22, 16  ;;  %v3876_v54 = vld [vmem:[#allocation2 + $0x98] sm:$0xff]   ;;  %548 = vst.msk [vmem:[#allocation3 + $0xa0] sm:$0xff] %vm527_vm3, %v3877_v58  ;;  %v3881_v6 = vld [vmem:[#allocation2 + $0xc0] sm:$0xff]   ;;  %551 = vst.msk [vmem:[#allocation3 + $0xb8] sm:$0xff] %vm527_vm3, %v3880_v4 }
  0x57   : > { %993 = vrot.lane.b32.xlu0 %v856_v52, %s3909_s21  ;;  %v919_v52 = vrot.slane %v917_v40, 1  ;;  %v3872_v40 = vld [vmem:[#allocation2 + $0x78] sm:$0xff]   ;;  %547 = vst.msk [vmem:[#allocation3 + $0x98] sm:$0xff] %vm527_vm3, %v3876_v54  ;;  %552 = vst.msk [vmem:[#allocation3 + $0xc0] sm:$0xff] %vm527_vm3, %v3881_v6 }
  0x58   : > { %v912_v60 = vsel %vm748_vm2, %v907_v47, %v911_v30  ;;  %v1319_v30 = vrot.slane %v3847_v32, 1  ;;  %v3861_v47 = vld [vmem:[#allocation2 + $0xd0] sm:$0xff]   ;;  %543 = vst.msk [vmem:[#allocation3 + $0x78] sm:$0xff] %vm527_vm3, %v3872_v40 }
  0x59   : > { %v923_v10 = vor.u32 %v921_v48, %v919_v52  ;;  %v920_v25 = vsel %vm748_vm2, %v915_v14, %v919_v52  ;;  %v3874_v48 = vld [vmem:[#allocation2 + $0x88] sm:$0xff]   ;;  %v3862_v49 = vld [vmem:[#allocation2 + $0xd0] sm:$0xff]   ;;  %v957_v53 = vshll.u32 %v3861_v47, 16 }
  0x5a   : > { %1353 = vrot.lane.b32.xlu1 %v1300_v2, %s3908_s20  ;;  %v3859_v2 = vld [vmem:[#allocation2 + $0x38] sm:$0xff]   ;;  %545 = vst.msk [vmem:[#allocation3 + $0x88] sm:$0xff] %vm527_vm3, %v3874_v48  ;;  %v3875_v52 = vld [vmem:[#allocation2 + $0x90] sm:$0xff]   ;;  %v1320_v55 = vsel %vm1271_vm1, %v1317_v42, %v1319_v30  ;;  %v1323_v61 = vrot.slane %v3862_v49, 1 }
  0x5b   : > { %1351 = vrot.lane.b32.xlu0 %v1298_v5, %s3908_s20  ;;  %v4255_v5 = vsel %vm1636_vm4, %v3858_v62, 0  ;;  %535 = vst.msk [vmem:[#allocation3 + $0x38] sm:$0xff] %vm527_vm3, %v3859_v2  ;;  %546 = vst.msk [vmem:[#allocation3 + $0x90] sm:$0xff] %vm527_vm3, %v3875_v52  ;;  %v3878_v62 = vld [vmem:[#allocation2 + $0xa8] sm:$0xff]   ;;  %v3879_v2 = vld [vmem:[#allocation2 + $0xb0] sm:$0xff]   ;;  %v959_v3 = vrot.slane %v957_v53, 1 }
  0x5c   : > { %549 = vst.msk [vmem:[#allocation3 + $0xa8] sm:$0xff] %vm527_vm3, %v3878_v62  ;;  %550 = vst.msk [vmem:[#allocation3 + $0xb0] sm:$0xff] %vm527_vm3, %v3879_v2 }
  0x5e   : > { %999 = vrot.lane.b32.xlu1 %v880_v12, %s3909_s21  ;;  %v3864_v12 = vld [vmem:[#allocation2 + $0x40] sm:$0xff]  }
  0x5f   : > { %997 = vrot.lane.b32.xlu0 %v872_v15, %s3909_s21  ;;  %v254_v15 = vld [vmem:[%s3954_s19 + $0xd8] sm:$0xf]  ;;  %536 = vst.msk [vmem:[#allocation3 + $0x40] sm:$0xff] %vm527_vm3, %v3864_v12 }
  0x60   : > { %310 = vst.msk [vmem:[#allocation2 + $0xd8] sm:$0xf] %vm255_vm0, %v254_v15 }
  0x62   : > { %1357 = vrot.lane.b32.xlu1 %v1304_v21, %s3908_s20  ;;  %v928_v21 = vsel %vm748_vm2, %v923_v10, %v927_v11 }
  0x63   : > { %1355 = vrot.lane.b32.xlu0 %v1302_v26, %s3908_s20  ;;  %v929_v26 = vshrl.u32 %v4210_v41, 16  ;;  %v3873_v41 = vld [vmem:[#allocation2 + $0x80] sm:$0xff]  }
  0x64   : > { %544 = vst.msk [vmem:[#allocation3 + $0x80] sm:$0xff] %vm527_vm3, %v3873_v41 }
  0x65   : > { %v931_v38 = vor.u32 %v929_v26, %v927_v11 }
  0x66   : > { %1003 = vrot.lane.b32.xlu1 %v896_v35, %s3909_s21  ;;  %v939_v35 = vor.u32 %v937_v18, %v935_v29 }
  0x67   : > { %1001 = vrot.lane.b32.xlu0 %v888_v39, %s3909_s21  ;;  %v949_v39 = vshll.u32 %v4281_v22, 16  ;;  %v936_v43 = vsel %vm748_vm2, %v931_v38, %v935_v29  ;;  %v3865_v51 = vld [vmem:[#allocation2 + $0xd8] ss:$0 sps:$4 sm:$0x11]   ;;  %v3882_v22 = vld [vmem:[#allocation2 + $0xc8] sm:$0xff]  }
  0x68   : > { %v944_v33 = vsel %vm748_vm2, %v939_v35, %v943_v36  ;;  %v3866_v1 = vld [vmem:[#allocation2 + $0xd8] ss:$0 sps:$4 sm:$0x11]   ;;  %v965_v56 = vshll.u32 %v3865_v51, 16  ;;  %553 = vst.msk [vmem:[#allocation3 + $0xc8] sm:$0xff] %vm527_vm3, %v3882_v22 }
  0x69   : > { %v1325_v10 = vrot.slane %v3866_v1, 1 }
  0x6a   : > { %1361 = vrot.lane.b32.xlu1 %v1308_v46, %s3908_s20  ;;  %v3849_v46 = vld [vmem:[#allocation2 + $0xc8] sm:$0xff]  }
  0x6b   : > { %1359 = vrot.lane.b32.xlu0 %v1306_v50, %s3908_s20  ;;  %v951_v50 = vrot.slane %v949_v39, 1  ;;  %v1321_v57 = vrot.slane %v3849_v46, 1  ;;  %v1326_v14 = vsel %vm1271_vm1, %v1323_v61, %v1325_v10 }
  0x6d   : > { %v1322_v45 = vsel %vm1271_vm1, %v1319_v30, %v1321_v57  ;;  %v955_v9 = vor.u32 %v953_v34, %v951_v50 }
  0x6e   : > { %1007 = vrot.lane.b32.xlu1 %v912_v60, %s3909_s21  ;;  %v947_v60 = vor.u32 %v945_v44, %v943_v36  ;;  %v3883_v36 = vld [vmem:[#allocation2 + $0xd0] sm:$0xff]  }
  0x6f   : > { %1005 = vrot.lane.b32.xlu0 %v904_v63, %s3909_s21  ;;  %v961_v63 = vshrl.u32 %v3861_v47, 16  ;;  %v960_v11 = vsel %vm748_vm2, %v955_v9, %v959_v3  ;;  %554 = vst.msk [vmem:[#allocation3 + $0xd0] sm:$0xff] %vm527_vm3, %v3883_v36 }
  0x70   : > { %v952_v8 = vsel %vm748_vm2, %v947_v60, %v951_v50 }
  0x71   : > { %v963_v12 = vor.u32 %v961_v63, %v959_v3 }
  0x72   : > { %1365 = vrot.lane.b32.xlu1 %v1312_v7, %s3908_s20  ;;  %v1324_v7 = vsel %vm1271_vm1, %v1321_v57, %v1323_v61 }
  0x73   : > { %1363 = vrot.lane.b32.xlu0 %v1310_v13, %s3908_s20  ;;  %v967_v13 = vrot.slane %v965_v56, 1 }
  0x75   : > { %v968_v15 = vsel %vm748_vm2, %v963_v12, %v967_v13 }
  0x76   : > { %1011 = vrot.lane.b32.xlu1 %v928_v21, %s3909_s21 }
  0x77   : > { %1009 = vrot.lane.b32.xlu0 %v920_v25, %s3909_s21 }
  0x7a   : > { %1369 = vrot.lane.b32.xlu1 %v1316_v23, %s3908_s20 }
  0x7b   : > { %1367 = vrot.lane.b32.xlu0 %v1314_v37, %s3908_s20 }
  0x7e   : > { %1015 = vrot.lane.b32.xlu1 %v944_v33, %s3909_s21 }
  0x7f   : > { %1013 = vrot.lane.b32.xlu0 %v936_v43, %s3909_s21 }
  0x82   : > { %1373 = vrot.lane.b32.xlu1 %v1320_v55, %s3908_s20 }
  0x83   : > { %1371 = vrot.lane.b32.xlu0 %v1318_v59, %s3908_s20 }
  0x86   : > { %1375 = vrot.lane.b32.xlu1 %v1322_v45, %s3908_s20 }
  0x87   : > { %1017 = vrot.lane.b32.xlu0 %v952_v8, %s3909_s21 }
  0x8a   : > { %1377 = vrot.lane.b32.xlu1 %v1324_v7, %s3908_s20 }
  0x8b   : > { %1019 = vrot.lane.b32.xlu0 %v960_v11, %s3909_s21 }
  0x8e   : > { %1379 = vrot.lane.b32.xlu1 %v1326_v14, %s3908_s20 }
  0x8f   : > { %1021 = vrot.lane.b32.xlu0 %v968_v15, %s3909_s21 }
  0x97   : > { %v1332_v17 = vpop.permute.xlu0 %1331 }
  0x98   : > { %v1330_v16 = vpop.permute.xlu1 %1329 }
  0x9c   : > { %v1334_v18 = vpop.permute.xlu1 %1333 }
  0x9d   : > { %v972_v20 = vpop.permute.xlu0 %971 }
  0x9e   : > { %1052 = vst.msk [vmem:[#allocation3 + $0x8] sm:$0xff] %vm1050_vm5, %v972_v20 }
  0x9f   : > { %1410 = vst.msk [vmem:[#allocation3 + $0x8] sm:$0xff] %vm1408_vm6, %v1330_v16 }
  0xa0   : > { %v976_v21 = vpop.permute.xlu1 %975 }
  0xa1   : > { %1054 = vst.msk [vmem:[#allocation3 + $0x18] sm:$0xff] %vm1050_vm5, %v976_v21  ;;  %v974_v19 = vpop.permute.xlu0 %973 }
  0xa2   : > { %1412 = vst.msk [vmem:[#allocation3 + $0x18] sm:$0xff] %vm1408_vm6, %v1334_v18 }
  0xa3   : > { %1053 = vst.msk [vmem:[#allocation3 + $0x10] sm:$0xff] %vm1050_vm5, %v974_v19 }
  0xa4   : > { %1411 = vst.msk [vmem:[#allocation3 + $0x10] sm:$0xff] %vm1408_vm6, %v1332_v17  ;;  %v1328_v24 = vpop.permute.xlu1 %1327 }
  0xa5   : > { %v970_v25 = vpop.permute.xlu0 %969 }
  0xa6   : > { %1051 = vst.msk [vmem:[#allocation3] sm:$0xff] %vm1050_vm5, %v970_v25  ;;  %v2009_v27 = vld [vmem:[#allocation3 + $0x8] sm:$0xf0] }
  0xa7   : > { %1409 = vst.msk [vmem:[#allocation3] sm:$0xff] %vm1408_vm6, %v1328_v24  ;;  %v2063_v23 = vrot.slane %v2009_v27, 4  ;;  %v1533_v42 = vld [vmem:[#allocation3 + $0x8] sm:$0xff] }
  0xa8   : > { %v980_v26 = vpop.permute.xlu1 %979 }
  0xa9   : > { %1056 = vst.msk [vmem:[#allocation3 + $0x28] sm:$0xff] %vm1050_vm5, %v980_v26  ;;  %v978_v28 = vpop.permute.xlu0 %977  ;;  %v4349_v29 = vld [vmem:[#allocation3 + $0x18] sm:$0xff] }
  0xaa   : > { %1055 = vst.msk [vmem:[#allocation3 + $0x20] sm:$0xff] %vm1050_vm5, %v978_v28  ;;  %v2066_v32 = vrot.slane %v4349_v29, 4 }
  0xab   : > { %v2010_v31 = vld [vmem:[#allocation3 + $0x10] sm:$0xff] }
  0xac   : > { %v2064_v35 = vrot.slane %v2010_v31, 4  ;;  %v1338_v37 = vpop.permute.xlu1 %1337 }
  0xad   : > { %1414 = vst.msk [vmem:[#allocation3 + $0x28] sm:$0xff] %vm1408_vm6, %v1338_v37  ;;  %v1336_v38 = vpop.permute.xlu0 %1335 }
  0xae   : > { %v2065_v39 = vsel %vm2062_vm7, %v2063_v23, %v2064_v35  ;;  %v2067_v40 = vsel %vm2062_vm7, %v2064_v35, %v2066_v32  ;;  %1413 = vst.msk [vmem:[#allocation3 + $0x20] sm:$0xff] %vm1408_vm6, %v1336_v38  ;;  %v1532_v41 = vld [vmem:[#allocation3] sm:$0xff] }
  0xaf   : > { %3570 = vmatprep.mubr.msk.bf16.mxu0 %vm1563_vm8, %v2065_v39  ;;  %3520 = vmatprep.mubr.msk.bf16.mxu1 %vm1563_vm8, %v1532_v41 }
  0xb0   : > { %3571 = vmatmul.mubr.msk.bf16.vlgmr.msra.gmra.mrb[0].mxu0 %vm1563_vm8, %v2067_v40  ;;  %3521 = vmatmul.mubr.msk.bf16.vlgmr.msra.gmra.mrb[0].mxu1 %vm1563_vm8, %v1533_v42  ;;  %v984_v30 = vpop.permute.xlu1 %983 }
  0xb1   : > { %3619 = vmatpush3.bf16.msra.mxu0 %v4255_v5  ;;  %1058 = vst.msk [vmem:[#allocation3 + $0x38] sm:$0xff] %vm1050_vm5, %v984_v30  ;;  %v982_v44 = vpop.permute.xlu0 %981  ;;  %3524 = vmatprep.mubr.msk.bf16.mxu1 %vm1563_vm8, %v2010_v31 }
  0xb2   : > { %3669 = vmatpush3.bf16.msra.mxu1 %v4248_v0  ;;  %1057 = vst.msk [vmem:[#allocation3 + $0x30] sm:$0xff] %vm1050_vm5, %v982_v44 }
  0xb4   : > { %v1342_v46 = vpop.permute.xlu1 %1341  ;;  %v4367_v47 = vld [vmem:[#allocation3 + $0x28] sm:$0xff] }
  0xb5   : > { %1416 = vst.msk [vmem:[#allocation3 + $0x38] sm:$0xff] %vm1408_vm6, %v1342_v46  ;;  %v1340_v48 = vpop.permute.xlu0 %1339  ;;  %v4370_v33 = vld [vmem:[#allocation3 + $0x20] sm:$0xff]  ;;  %v2070_v43 = vrot.slane %v4367_v47, 4 }
  0xb6   : > { %1415 = vst.msk [vmem:[#allocation3 + $0x30] sm:$0xff] %vm1408_vm6, %v1340_v48  ;;  %v2068_v5 = vrot.slane %v4370_v33, 4 }
  0xb8   : > { %3525 = vmatmul.mubr.msk.bf16.gmra.mrb[4].mxu1 %vm1563_vm8, %v4349_v29  ;;  %v988_v0 = vpop.permute.xlu1 %987  ;;  %v2069_v34 = vsel %vm2062_vm7, %v2066_v32, %v2068_v5  ;;  %v2071_v49 = vsel %vm2062_vm7, %v2068_v5, %v2070_v43 }
  0xb9   : > { %1060 = vst.msk [vmem:[#allocation3 + $0x48] sm:$0xff] %vm1050_vm5, %v988_v0  ;;  %3574 = vmatprep.mubr.msk.bf16.mxu0 %vm1563_vm8, %v2069_v34  ;;  %v986_v50 = vpop.permute.xlu0 %985  ;;  %3528 = vmatprep.mubr.msk.bf16.mxu1 %vm1563_vm8, %v4370_v33 }
  0xba   : > { %1059 = vst.msk [vmem:[#allocation3 + $0x40] sm:$0xff] %vm1050_vm5, %v986_v50  ;;  %3575 = vmatmul.mubr.msk.bf16.gmra.mrb[4].mxu0 %vm1563_vm8, %v2071_v49 }
  0xbc   : > { %v1346_v51 = vpop.permute.xlu1 %1345  ;;  %v4385_v52 = vld [vmem:[#allocation3 + $0x38] sm:$0xff] }
  0xbd   : > { %1418 = vst.msk [vmem:[#allocation3 + $0x48] sm:$0xff] %vm1408_vm6, %v1346_v51  ;;  %v1344_v53 = vpop.permute.xlu0 %1343  ;;  %v4388_v54 = vld [vmem:[#allocation3 + $0x30] sm:$0xff]  ;;  %v2074_v55 = vrot.slane %v4385_v52, 4 }
  0xbe   : > { %1417 = vst.msk [vmem:[#allocation3 + $0x40] sm:$0xff] %vm1408_vm6, %v1344_v53  ;;  %v2072_v57 = vrot.slane %v4388_v54, 4 }
  0xc0   : > { %3529 = vmatmul.mubr.msk.bf16.gmra.mrb[8].mxu1 %vm1563_vm8, %v4367_v47  ;;  %v992_v58 = vpop.permute.xlu1 %991  ;;  %v2073_v59 = vsel %vm2062_vm7, %v2070_v43, %v2072_v57  ;;  %v2075_v60 = vsel %vm2062_vm7, %v2072_v57, %v2074_v55 }
  0xc1   : > { %1062 = vst.msk [vmem:[#allocation3 + $0x58] sm:$0xff] %vm1050_vm5, %v992_v58  ;;  %3578 = vmatprep.mubr.msk.bf16.mxu0 %vm1563_vm8, %v2073_v59  ;;  %v990_v61 = vpop.permute.xlu0 %989  ;;  %3532 = vmatprep.mubr.msk.bf16.mxu1 %vm1563_vm8, %v4388_v54 }
  0xc2   : > { %1061 = vst.msk [vmem:[#allocation3 + $0x50] sm:$0xff] %vm1050_vm5, %v990_v61  ;;  %3579 = vmatmul.mubr.msk.bf16.gmra.mrb[8].mxu0 %vm1563_vm8, %v2075_v60 }
  0xc4   : > { %v1350_v62 = vpop.permute.xlu1 %1349  ;;  %v4403_v63 = vld [vmem:[#allocation3 + $0x48] sm:$0xff] }
  0xc5   : > { %1420 = vst.msk [vmem:[#allocation3 + $0x58] sm:$0xff] %vm1408_vm6, %v1350_v62  ;;  %v1348_v1 = vpop.permute.xlu0 %1347  ;;  %v4406_v2 = vld [vmem:[#allocation3 + $0x40] sm:$0xff]  ;;  %v2078_v3 = vrot.slane %v4403_v63, 4 }
  0xc6   : > { %1419 = vst.msk [vmem:[#allocation3 + $0x50] sm:$0xff] %vm1408_vm6, %v1348_v1  ;;  %v2076_v4 = vrot.slane %v4406_v2, 4 }
  0xc8   : > { %3533 = vmatmul.mubr.msk.bf16.gmra.mrb[12].mxu1 %vm1563_vm8, %v4385_v52  ;;  %v996_v45 = vpop.permute.xlu1 %995  ;;  %v2077_v56 = vsel %vm2062_vm7, %v2074_v55, %v2076_v4  ;;  %v2079_v6 = vsel %vm2062_vm7, %v2076_v4, %v2078_v3 }
  0xc9   : > { %1064 = vst.msk [vmem:[#allocation3 + $0x68] sm:$0xff] %vm1050_vm5, %v996_v45  ;;  %3582 = vmatprep.mubr.msk.bf16.mxu0 %vm1563_vm8, %v2077_v56  ;;  %v994_v8 = vpop.permute.xlu0 %993  ;;  %3536 = vmatprep.mubr.msk.bf16.mxu1 %vm1563_vm8, %v4406_v2 }
  0xca   : > { %1063 = vst.msk [vmem:[#allocation3 + $0x60] sm:$0xff] %vm1050_vm5, %v994_v8  ;;  %3583 = vmatmul.mubr.msk.bf16.gmra.mrb[12].mxu0 %vm1563_vm8, %v2079_v6 }
  0xcc   : > { %v1354_v9 = vpop.permute.xlu1 %1353  ;;  %v4421_v7 = vld [vmem:[#allocation3 + $0x58] sm:$0xff] }
  0xcd   : > { %1422 = vst.msk [vmem:[#allocation3 + $0x68] sm:$0xff] %vm1408_vm6, %v1354_v9  ;;  %v1352_v10 = vpop.permute.xlu0 %1351  ;;  %v4424_v11 = vld [vmem:[#allocation3 + $0x50] sm:$0xff]  ;;  %v2082_v12 = vrot.slane %v4421_v7, 4 }
  0xce   : > { %1421 = vst.msk [vmem:[#allocation3 + $0x60] sm:$0xff] %vm1408_vm6, %v1352_v10  ;;  %v2080_v13 = vrot.slane %v4424_v11, 4 }
  0xd0   : > { %3537 = vmatmul.mubr.msk.bf16.gmra.mrb[16].mxu1 %vm1563_vm8, %v4403_v63  ;;  %v2081_v14 = vsel %vm2062_vm7, %v2078_v3, %v2080_v13  ;;  %v2083_v15 = vsel %vm2062_vm7, %v2080_v13, %v2082_v12  ;;  %v1000_v16 = vpop.permute.xlu1 %999 }
  0xd1   : > { %3586 = vmatprep.mubr.msk.bf16.mxu0 %vm1563_vm8, %v2081_v14  ;;  %v998_v17 = vpop.permute.xlu0 %997  ;;  %3540 = vmatprep.mubr.msk.bf16.mxu1 %vm1563_vm8, %v4424_v11  ;;  %1066 = vst.msk [vmem:[#allocation3 + $0x78] sm:$0xff] %vm1050_vm5, %v1000_v16 }
  0xd2   : > { %1065 = vst.msk [vmem:[#allocation3 + $0x70] sm:$0xff] %vm1050_vm5, %v998_v17  ;;  %3587 = vmatmul.mubr.msk.bf16.gmra.mrb[16].mxu0 %vm1563_vm8, %v2083_v15 }
  0xd4   : > { %v4439_v18 = vld [vmem:[#allocation3 + $0x68] sm:$0xff]  ;;  %v1358_v20 = vpop.permute.xlu1 %1357 }
  0xd5   : > { %v1356_v21 = vpop.permute.xlu0 %1355  ;;  %v4441_v19 = vld [vmem:[#allocation3 + $0x60] sm:$0xff]  ;;  %v2086_v22 = vrot.slane %v4439_v18, 4  ;;  %1424 = vst.msk [vmem:[#allocation3 + $0x78] sm:$0xff] %vm1408_vm6, %v1358_v20 }
  0xd6   : > { %1423 = vst.msk [vmem:[#allocation3 + $0x70] sm:$0xff] %vm1408_vm6, %v1356_v21  ;;  %v2084_v24 = vrot.slane %v4441_v19, 4 }
  0xd8   : > { %3541 = vmatmul.mubr.msk.bf16.gmra.mrb[20].mxu1 %vm1563_vm8, %v4421_v7  ;;  %v2085_v25 = vsel %vm2062_vm7, %v2082_v12, %v2084_v24  ;;  %v2087_v26 = vsel %vm2062_vm7, %v2084_v24, %v2086_v22  ;;  %v1004_v27 = vpop.permute.xlu1 %1003 }
  0xd9   : > { %3544 = vmatprep.mubr.msk.bf16.mxu1 %vm1563_vm8, %v4441_v19  ;;  %3590 = vmatprep.mubr.msk.bf16.mxu0 %vm1563_vm8, %v2085_v25  ;;  %v1002_v28 = vpop.permute.xlu0 %1001  ;;  %1068 = vst.msk [vmem:[#allocation3 + $0x88] sm:$0xff] %vm1050_vm5, %v1004_v27 }
  0xda   : > { %3591 = vmatmul.mubr.msk.bf16.gmra.mrb[20].mxu0 %vm1563_vm8, %v2087_v26  ;;  %1067 = vst.msk [vmem:[#allocation3 + $0x80] sm:$0xff] %vm1050_vm5, %v1002_v28 }
  0xdb   : > { %3620 = vmatprep.mubr.msk.bf16.mxu0 %vm1563_vm8, %v4349_v29 }
  0xdc   : > { %v1362_v31 = vpop.permute.xlu1 %1361  ;;  %v4475_v37 = vld [vmem:[#allocation3 + $0x78] sm:$0xff] }
  0xdd   : > { %v1360_v32 = vpop.permute.xlu0 %1359  ;;  %1426 = vst.msk [vmem:[#allocation3 + $0x88] sm:$0xff] %vm1408_vm6, %v1362_v31  ;;  %v4465_v23 = vld [vmem:[#allocation3 + $0x70] sm:$0xff]  ;;  %v2090_v60 = vrot.slane %v4475_v37, 4 }
  0xde   : > { %1425 = vst.msk [vmem:[#allocation3 + $0x80] sm:$0xff] %vm1408_vm6, %v1360_v32  ;;  %v2088_v57 = vrot.slane %v4465_v23, 4 }
  0xe0   : > { %3545 = vmatmul.mubr.msk.bf16.gmra.mrb[24].mxu1 %vm1563_vm8, %v4439_v18  ;;  %v1008_v35 = vpop.permute.xlu1 %1007  ;;  %v2089_v59 = vsel %vm2062_vm7, %v2086_v22, %v2088_v57  ;;  %v2091_v62 = vsel %vm2062_vm7, %v2088_v57, %v2090_v60 }
  0xe1   : > { %v1006_v36 = vpop.permute.xlu0 %1005  ;;  %3548 = vmatprep.mubr.msk.bf16.mxu1 %vm1563_vm8, %v4465_v23  ;;  %1070 = vst.msk [vmem:[#allocation3 + $0x98] sm:$0xff] %vm1050_vm5, %v1008_v35 }
  0xe2   : > { %3621 = vmatmul.mubr.msk.bf16.vlgmr.msra.gmra.mrb[0].mxu0 %vm1563_vm8, %v4370_v33  ;;  %1069 = vst.msk [vmem:[#allocation3 + $0x90] sm:$0xff] %vm1050_vm5, %v1006_v36 }
  0xe3   : > { %3624 = vmatprep.mubr.msk.bf16.mxu0 %vm1563_vm8, %v4367_v47 }
  0xe4   : > { %v1366_v29 = vpop.permute.xlu1 %1365  ;;  %v1549_v30 = vld [vmem:[#allocation3 + $0x88] sm:$0xff] }
  0xe5   : > { %v1364_v38 = vpop.permute.xlu0 %1363  ;;  %1428 = vst.msk [vmem:[#allocation3 + $0x98] sm:$0xff] %vm1408_vm6, %v1366_v29  ;;  %v4481_v39 = vld [vmem:[#allocation3 + $0x80] sm:$0xff]  ;;  %v2094_v1 = vrot.slane %v1549_v30, 4 }
  0xe6   : > { %1427 = vst.msk [vmem:[#allocation3 + $0x90] sm:$0xff] %vm1408_vm6, %v1364_v38  ;;  %v2092_v61 = vrot.slane %v4481_v39, 4 }
  0xe8   : > { %3549 = vmatmul.mubr.msk.bf16.gmra.mrb[28].mxu1 %vm1563_vm8, %v4475_v37  ;;  %v1012_v40 = vpop.permute.xlu1 %1011  ;;  %v2095_v3 = vsel %vm2062_vm7, %v2092_v61, %v2094_v1 }
  0xe9   : > { %v1010_v41 = vpop.permute.xlu0 %1009  ;;  %3552 = vmatprep.mubr.msk.bf16.mxu1 %vm1563_vm8, %v4481_v39  ;;  %1072 = vst.msk [vmem:[#allocation3 + $0xa8] sm:$0xff] %vm1050_vm5, %v1012_v40 }
  0xea   : > { %3625 = vmatmul.mubr.msk.bf16.gmra.mrb[4].mxu0 %vm1563_vm8, %v4388_v54  ;;  %1071 = vst.msk [vmem:[#allocation3 + $0xa0] sm:$0xff] %vm1050_vm5, %v1010_v41 }
  0xeb   : > { %3628 = vmatprep.mubr.msk.bf16.mxu0 %vm1563_vm8, %v4385_v52 }
  0xec   : > { %v1370_v42 = vpop.permute.xlu1 %1369  ;;  %v1551_v43 = vld [vmem:[#allocation3 + $0x98] sm:$0xff] }
  0xed   : > { %v1368_v44 = vpop.permute.xlu0 %1367  ;;  %1430 = vst.msk [vmem:[#allocation3 + $0xa8] sm:$0xff] %vm1408_vm6, %v1370_v42  ;;  %v4494_v46 = vld [vmem:[#allocation3 + $0x90] sm:$0xff]  ;;  %v2098_v45 = vrot.slane %v1551_v43, 4 }
  0xee   : > { %1429 = vst.msk [vmem:[#allocation3 + $0xa0] sm:$0xff] %vm1408_vm6, %v1368_v44 }
  0xf0   : > { %3553 = vmatmul.mubr.msk.bf16.gmra.mrb[32].mxu1 %vm1563_vm8, %v1549_v30  ;;  %v1016_v47 = vpop.permute.xlu1 %1015 }
  0xf1   : > { %v1014_v48 = vpop.permute.xlu0 %1013  ;;  %3556 = vmatprep.mubr.msk.bf16.mxu1 %vm1563_vm8, %v4494_v46  ;;  %1074 = vst.msk [vmem:[#allocation3 + $0xb8] sm:$0xff] %vm1050_vm5, %v1016_v47 }
  0xf2   : > { %3629 = vmatmul.mubr.msk.bf16.gmra.mrb[8].mxu0 %vm1563_vm8, %v4406_v2  ;;  %1073 = vst.msk [vmem:[#allocation3 + $0xb0] sm:$0xff] %vm1050_vm5, %v1014_v48  ;;  %v2096_v2 = vrot.slane %v4494_v46, 4 }
  0xf3   : > { %3632 = vmatprep.mubr.msk.bf16.mxu0 %vm1563_vm8, %v4403_v63  ;;  %v2093_v63 = vsel %vm2062_vm7, %v2090_v60, %v2092_v61 }
  0xf4   : > { %v1374_v33 = vpop.permute.xlu1 %1373  ;;  %v1553_v51 = vld [vmem:[#allocation3 + $0xa8] sm:$0xff]  ;;  %v2097_v4 = vsel %vm2062_vm7, %v2094_v1, %v2096_v2  ;;  %v2099_v6 = vsel %vm2062_vm7, %v2096_v2, %v2098_v45 }
  0xf5   : > { %v1372_v5 = vpop.permute.xlu0 %1371  ;;  %1432 = vst.msk [vmem:[#allocation3 + $0xb8] sm:$0xff] %vm1408_vm6, %v1374_v33  ;;  %v1552_v0 = vld [vmem:[#allocation3 + $0xa0] sm:$0xff]  ;;  %v2102_v9 = vrot.slane %v1553_v51, 4 }
  0xf6   : > { %1431 = vst.msk [vmem:[#allocation3 + $0xb0] sm:$0xff] %vm1408_vm6, %v1372_v5  ;;  %v2100_v56 = vrot.slane %v1552_v0, 4  ;;  %v4604_v5 = vld [vmem:[%s4732_s2] ss:$0 sm:$0xff] }
  0xf8   : > { %3557 = vmatmul.mubr.msk.bf16.gmra.mrb[36].mxu1 %vm1563_vm8, %v1551_v43  ;;  %v1376_v34 = vpop.permute.xlu1 %1375  ;;  %v2101_v8 = vsel %vm2062_vm7, %v2098_v45, %v2100_v56  ;;  %v2103_v10 = vsel %vm2062_vm7, %v2100_v56, %v2102_v9 }
  0xf9   : > { %3560 = vmatprep.mubr.msk.bf16.mxu1 %vm1563_vm8, %v1552_v0  ;;  %v1018_v49 = vpop.permute.xlu0 %1017 }
  0xfa   : > { %3633 = vmatmul.mubr.msk.bf16.gmra.mrb[12].mxu0 %vm1563_vm8, %v4424_v11  ;;  %1075 = vst.msk [vmem:[#allocation3 + $0xc0] sm:$0xff] %vm1050_vm5, %v1018_v49 }
  0xfb   : > { %3636 = vmatprep.mubr.msk.bf16.mxu0 %vm1563_vm8, %v4421_v7  ;;  %1433 = vst.msk [vmem:[#allocation3 + $0xc0] sm:$0xff] %vm1408_vm6, %v1376_v34 }
  0xfc   : > { %v1378_v50 = vpop.permute.xlu1 %1377  ;;  %v1555_v58 = vld [vmem:[#allocation3 + $0xb8] sm:$0xff] }
  0xfd   : > { %v1020_v52 = vpop.permute.xlu0 %1019  ;;  %v1554_v53 = vld [vmem:[#allocation3 + $0xb0] sm:$0xff]  ;;  %v2106_v13 = vrot.slane %v1555_v58, 4 }
  0xfe   : > { %1076 = vst.msk [vmem:[#allocation3 + $0xc8] sm:$0xff] %vm1050_vm5, %v1020_v52  ;;  %v2104_v7 = vrot.slane %v1554_v53, 4 }
  0xff   : > { %1434 = vst.msk [vmem:[#allocation3 + $0xc8] sm:$0xff] %vm1408_vm6, %v1378_v50 }
 0x100   : > { %3561 = vmatmul.mubr.msk.bf16.gmra.mrb[40].mxu1 %vm1563_vm8, %v1553_v51  ;;  %v1380_v54 = vpop.permute.xlu1 %1379  ;;  %v2105_v11 = vsel %vm2062_vm7, %v2102_v9, %v2104_v7  ;;  %v2107_v15 = vsel %vm2062_vm7, %v2104_v7, %v2106_v13 }
 0x101   : > { %3564 = vmatprep.mubr.msk.bf16.mxu1 %vm1563_vm8, %v1554_v53  ;;  %v1022_v55 = vpop.permute.xlu0 %1021 }
 0x102   : > { %3637 = vmatmul.mubr.msk.bf16.gmra.mrb[16].mxu0 %vm1563_vm8, %v4441_v19  ;;  %1077 = vst.msk [vmem:[#allocation3 + $0xd0] sm:$0xff] %vm1050_vm5, %v1022_v55  ;;  %v2032_v12 = vld [vmem:[#allocation3 + $0xc0] sm:$0xff] }
 0x103   : > { %3640 = vmatprep.mubr.msk.bf16.mxu0 %vm1563_vm8, %v4439_v18  ;;  %1435 = vst.msk [vmem:[#allocation3 + $0xd0] sm:$0xff] %vm1408_vm6, %v1380_v54  ;;  %v2108_v14 = vrot.slane %v2032_v12, 4 }
 0x105   : > { %v2109_v16 = vsel %vm2062_vm7, %v2106_v13, %v2108_v14 }
 0x106   : > { %v2583_v17 = vld [vmem:[#allocation3 + $0xc8] sm:$0xff] }
 0x107   : > { %v2033_v18 = vld [vmem:[#allocation3 + $0xc8] sm:$0xf] }
 0x108   : > { %3565 = vmatmul.mubr.msk.bf16.gmra.mrb[44].mxu1 %vm1563_vm8, %v1555_v58  ;;  %v2110_v20 = vrot.slane %v2033_v18, 4 }
 0x109   : > { %3594 = vmatprep.mubr.msk.bf16.mxu1 %vm1563_vm8, %v2089_v59 }
 0x10a   : > { %3641 = vmatmul.mubr.msk.bf16.gmra.mrb[20].mxu0 %vm1563_vm8, %v4465_v23  ;;  %v2111_v21 = vsel %vm2062_vm7, %v2108_v14, %v2110_v20  ;;  %v2584_v19 = vld [vmem:[#allocation3 + $0xd0] sm:$0xff] }
 0x10b   : > { %3644 = vmatprep.mubr.msk.bf16.mxu0 %vm1563_vm8, %v4475_v37 }
 0x110   : > { %3595 = vmatmul.mubr.msk.bf16.vlgmr.msra.gmra.mrb[24].mxu1 %vm1563_vm8, %v2091_v62 }
 0x111   : > { %3598 = vmatprep.mubr.msk.bf16.mxu1 %vm1563_vm8, %v2093_v63 }
 0x112   : > { %3645 = vmatmul.mubr.msk.bf16.gmra.mrb[24].mxu0 %vm1563_vm8, %v4481_v39 }
 0x113   : > { %3648 = vmatprep.mubr.msk.bf16.mxu0 %vm1563_vm8, %v1549_v30 }
 0x118   : > { %3599 = vmatmul.mubr.msk.bf16.gmra.mrb[28].mxu1 %vm1563_vm8, %v2095_v3 }
 0x119   : > { %3602 = vmatprep.mubr.msk.bf16.mxu1 %vm1563_vm8, %v2097_v4 }
 0x11a   : > { %3649 = vmatmul.mubr.msk.bf16.gmra.mrb[28].mxu0 %vm1563_vm8, %v4494_v46 }
 0x11b   : > { %3652 = vmatprep.mubr.msk.bf16.mxu0 %vm1563_vm8, %v1551_v43 }
 0x120   : > { %3603 = vmatmul.mubr.msk.bf16.gmra.mrb[32].mxu1 %vm1563_vm8, %v2099_v6 }
 0x121   : > { %3606 = vmatprep.mubr.msk.bf16.mxu1 %vm1563_vm8, %v2101_v8 }
 0x122   : > { %3653 = vmatmul.mubr.msk.bf16.gmra.mrb[32].mxu0 %vm1563_vm8, %v1552_v0 }
 0x123   : > { %3656 = vmatprep.mubr.msk.bf16.mxu0 %vm1563_vm8, %v1553_v51 }
 0x128   : > { %3607 = vmatmul.mubr.msk.bf16.gmra.mrb[36].mxu1 %vm1563_vm8, %v2103_v10 }
 0x129   : > { %3610 = vmatprep.mubr.msk.bf16.mxu1 %vm1563_vm8, %v2105_v11 }
 0x12a   : > { %3657 = vmatmul.mubr.msk.bf16.gmra.mrb[36].mxu0 %vm1563_vm8, %v1554_v53 }
 0x12b   : > { %3660 = vmatprep.mubr.msk.bf16.mxu0 %vm1563_vm8, %v1555_v58 }
 0x130   : > { %3611 = vmatmul.mubr.msk.bf16.gmra.mrb[40].mxu1 %vm1563_vm8, %v2107_v15 }
 0x131   : > { %3614 = vmatprep.mubr.msk.bf16.mxu1 %vm1563_vm8, %v2109_v16 }
 0x132   : > { %3661 = vmatmul.mubr.msk.bf16.gmra.mrb[40].mxu0 %vm1563_vm8, %v2032_v12 }
 0x133   : > { %3664 = vmatprep.mubr.msk.bf16.mxu0 %vm1563_vm8, %v2583_v17 }
 0x138   : > { %3615 = vmatmul.mubr.msk.bf16.gmra.mrb[44].mxu1 %vm1563_vm8, %v2111_v21 }
 0x13a   : > { %3665 = vmatmul.mubr.msk.bf16.gmra.mrb[44].mxu0 %vm1563_vm8, %v2584_v19 }
 0x183   : > { %v3522_v22 = vpop.f32.mrb[0].mxu1 }
 0x184   : > { %v1674_v24 = vpop.f32.mrb[1].mxu1 }
 0x185   : > { %v3523_v25 = vpop.f32.mrb[2].mxu1 }
 0x186   : > { %v1677_v26 = vpop.f32.mrb[3].mxu1 }
 0x18b   : > { %v3526_v27 = vpop.f32.mrb[4].mxu1 }
 0x18c   : > { %v1690_v28 = vpop.f32.mrb[5].mxu1 }
 0x18d   : > { %v3527_v31 = vpop.f32.mrb[6].mxu1 }
 0x18e   : > { %v1693_v32 = vpop.f32.mrb[7].mxu1 }
 0x193   : > { %v3530_v23 = vpop.f32.mrb[8].mxu1 }
 0x194   : > { %v1706_v35 = vpop.f32.mrb[9].mxu1 }
 0x195   : > { %v4572_v36 = vpop.f32.mrb[10].mxu1 }
 0x196   : > { %v4574_v29 = vpop.f32.mrb[11].mxu1 }
 0x19b   : > { %v4576_v37 = vpop.f32.mrb[12].mxu1 }
 0x19c   : > { %v4578_v38 = vpop.f32.mrb[13].mxu1 }
 0x19d   : > { %v4580_v39 = vpop.f32.mrb[14].mxu1 }
 0x19e   : > { %v4582_v40 = vpop.f32.mrb[15].mxu1 }
 0x1a3   : > { %v4584_v41 = vpop.f32.mrb[16].mxu1 }
 0x1a4   : > { %v4586_v42 = vpop.f32.mrb[17].mxu1 }
 0x1a5   : > { %v4588_v30 = vpop.f32.mrb[18].mxu1 }
 0x1a6   : > { %v4590_v44 = vpop.f32.mrb[19].mxu1 }
 0x1ab   : > { %v4592_v46 = vpop.f32.mrb[20].mxu1 }
 0x1ac   : > { %v4594_v47 = vpop.f32.mrb[21].mxu1 }
 0x1ad   : > { %v4596_v48 = vpop.f32.mrb[22].mxu1 }
 0x1ae   : > { %v4598_v33 = vpop.f32.mrb[23].mxu1 }
 0x1b5   : > { %v3622_v43 = vpop.f32.mrb[0].mxu0 }
 0x1b6   : > { %v3670_v0 = vadd.f32 %v3622_v43, %v3522_v22  ;;  %v2702_v34 = vpop.f32.mrb[1].mxu0 }
 0x1b7   : > { %v3671_v49 = vadd.f32 %v2702_v34, %v1674_v24  ;;  %v3623_v50 = vpop.f32.mrb[2].mxu0 }
 0x1b8   : > { %v3046_v51 = vadd.f32 %v3670_v0, %v4604_v5  ;;  %v3672_v52 = vadd.f32 %v3623_v50, %v3523_v25  ;;  %v2705_v53 = vpop.f32.mrb[3].mxu0 }
 0x1b9   : > { %v3044_v54 = vadd.f32 %v3671_v49, %v4604_v5  ;;  %v3673_v55 = vadd.f32 %v2705_v53, %v1677_v26 }
 0x1ba   : > { %v3094_v57 = vmax.f32 %v3046_v51, 0.0  ;;  %v3047_v58 = vadd.f32 %v3672_v52, %v4604_v5 }
 0x1bb   : > { %v3092_v59 = vmax.f32 %v3044_v54, 0.0  ;;  %v3045_v60 = vadd.f32 %v3673_v55, %v4604_v5 }
 0x1bc   : > { %3142 = vst [vmem:[%s4610_s6 + $0x10] sm:$0xff] %v3094_v57  ;;  %v3095_v61 = vmax.f32 %v3047_v58, 0.0 }
 0x1bd   : > { %3140 = vst [vmem:[%s4610_s6] sm:$0xff] %v3092_v59  ;;  %v3093_v62 = vmax.f32 %v3045_v60, 0.0  ;;  %v3626_v63 = vpop.f32.mrb[4].mxu0 }
 0x1be   : > { %3143 = vst [vmem:[%s4610_s6 + $0x18] sm:$0xff] %v3095_v61  ;;  %v3674_v1 = vadd.f32 %v3626_v63, %v3526_v27  ;;  %v2718_v2 = vpop.f32.mrb[5].mxu0 }
 0x1bf   : > { %3141 = vst [vmem:[%s4610_s6 + $0x8] sm:$0xff] %v3093_v62  ;;  %v3675_v3 = vadd.f32 %v2718_v2, %v1690_v28  ;;  %v3627_v4 = vpop.f32.mrb[6].mxu0 }
 0x1c0   : > { %v3050_v45 = vadd.f32 %v3674_v1, %v4604_v5  ;;  %v3676_v56 = vadd.f32 %v3627_v4, %v3527_v31  ;;  %v2721_v6 = vpop.f32.mrb[7].mxu0 }
 0x1c1   : > { %v3048_v8 = vadd.f32 %v3675_v3, %v4604_v5  ;;  %v3677_v9 = vadd.f32 %v2721_v6, %v1693_v32 }
 0x1c2   : > { %v3098_v7 = vmax.f32 %v3050_v45, 0.0  ;;  %v3051_v10 = vadd.f32 %v3676_v56, %v4604_v5 }
 0x1c3   : > { %v3096_v11 = vmax.f32 %v3048_v8, 0.0  ;;  %v3049_v12 = vadd.f32 %v3677_v9, %v4604_v5 }
 0x1c4   : > { %3146 = vst [vmem:[%s4610_s6 + $0x30] sm:$0xff] %v3098_v7  ;;  %v3099_v13 = vmax.f32 %v3051_v10, 0.0 }
 0x1c5   : > { %3144 = vst [vmem:[%s4610_s6 + $0x20] sm:$0xff] %v3096_v11  ;;  %v3097_v14 = vmax.f32 %v3049_v12, 0.0  ;;  %v3630_v15 = vpop.f32.mrb[8].mxu0 }
 0x1c6   : > { %3147 = vst [vmem:[%s4610_s6 + $0x38] sm:$0xff] %v3099_v13  ;;  %v3678_v16 = vadd.f32 %v3630_v15, %v3530_v23  ;;  %v2734_v17 = vpop.f32.mrb[9].mxu0 }
 0x1c7   : > { %3145 = vst [vmem:[%s4610_s6 + $0x28] sm:$0xff] %v3097_v14  ;;  %v3679_v18 = vadd.f32 %v2734_v17, %v1706_v35  ;;  %v3631_v20 = vpop.f32.mrb[10].mxu0 }
 0x1c8   : > { %v3054_v21 = vadd.f32 %v3678_v16, %v4604_v5  ;;  %v3680_v19 = vadd.f32 %v3631_v20, %v4572_v36  ;;  %v2737_v22 = vpop.f32.mrb[11].mxu0 }
 0x1c9   : > { %v3052_v24 = vadd.f32 %v3679_v18, %v4604_v5  ;;  %v3681_v25 = vadd.f32 %v2737_v22, %v4574_v29 }
 0x1ca   : > { %v3102_v26 = vmax.f32 %v3054_v21, 0.0  ;;  %v3055_v27 = vadd.f32 %v3680_v19, %v4604_v5 }
 0x1cb   : > { %v3100_v28 = vmax.f32 %v3052_v24, 0.0  ;;  %v3053_v31 = vadd.f32 %v3681_v25, %v4604_v5 }
 0x1cc   : > { %3150 = vst [vmem:[%s4610_s6 + $0x50] sm:$0xff] %v3102_v26  ;;  %v3103_v32 = vmax.f32 %v3055_v27, 0.0 }
 0x1cd   : > { %3148 = vst [vmem:[%s4610_s6 + $0x40] sm:$0xff] %v3100_v28  ;;  %v3101_v23 = vmax.f32 %v3053_v31, 0.0  ;;  %v3634_v35 = vpop.f32.mrb[12].mxu0 }
 0x1ce   : > { %3151 = vst [vmem:[%s4610_s6 + $0x58] sm:$0xff] %v3103_v32  ;;  %v3682_v36 = vadd.f32 %v3634_v35, %v4576_v37  ;;  %v2750_v43 = vpop.f32.mrb[13].mxu0 }
 0x1cf   : > { %3149 = vst [vmem:[%s4610_s6 + $0x48] sm:$0xff] %v3101_v23  ;;  %v3683_v29 = vadd.f32 %v2750_v43, %v4578_v38  ;;  %v3635_v0 = vpop.f32.mrb[14].mxu0 }
 0x1d0   : > { %v3058_v34 = vadd.f32 %v3682_v36, %v4604_v5  ;;  %v3684_v49 = vadd.f32 %v3635_v0, %v4580_v39  ;;  %v2753_v50 = vpop.f32.mrb[15].mxu0 }
 0x1d1   : > { %v3056_v51 = vadd.f32 %v3683_v29, %v4604_v5  ;;  %v3685_v52 = vadd.f32 %v2753_v50, %v4582_v40 }
 0x1d2   : > { %v3106_v53 = vmax.f32 %v3058_v34, 0.0  ;;  %v3059_v37 = vadd.f32 %v3684_v49, %v4604_v5 }
 0x1d3   : > { %v3104_v54 = vmax.f32 %v3056_v51, 0.0  ;;  %v3057_v55 = vadd.f32 %v3685_v52, %v4604_v5 }
 0x1d4   : > { %3154 = vst [vmem:[%s4610_s6 + $0x70] sm:$0xff] %v3106_v53  ;;  %v3107_v38 = vmax.f32 %v3059_v37, 0.0 }
 0x1d5   : > { %3152 = vst [vmem:[%s4610_s6 + $0x60] sm:$0xff] %v3104_v54  ;;  %v3105_v57 = vmax.f32 %v3057_v55, 0.0  ;;  %v3638_v58 = vpop.f32.mrb[16].mxu0 }
 0x1d6   : > { %3155 = vst [vmem:[%s4610_s6 + $0x78] sm:$0xff] %v3107_v38  ;;  %v3686_v39 = vadd.f32 %v3638_v58, %v4584_v41  ;;  %v2766_v59 = vpop.f32.mrb[17].mxu0 }
 0x1d7   : > { %3153 = vst [vmem:[%s4610_s6 + $0x68] sm:$0xff] %v3105_v57  ;;  %v3687_v40 = vadd.f32 %v2766_v59, %v4586_v42  ;;  %v3639_v60 = vpop.f32.mrb[18].mxu0 }
 0x1d8   : > { %v3062_v61 = vadd.f32 %v3686_v39, %v4604_v5  ;;  %v3688_v62 = vadd.f32 %v3639_v60, %v4588_v30  ;;  %v2769_v63 = vpop.f32.mrb[19].mxu0 }
 0x1d9   : > { %v3060_v1 = vadd.f32 %v3687_v40, %v4604_v5  ;;  %v3689_v2 = vadd.f32 %v2769_v63, %v4590_v44 }
 0x1da   : > { %v3110_v3 = vmax.f32 %v3062_v61, 0.0  ;;  %v3063_v41 = vadd.f32 %v3688_v62, %v4604_v5 }
 0x1db   : > { %v3108_v4 = vmax.f32 %v3060_v1, 0.0  ;;  %v3061_v45 = vadd.f32 %v3689_v2, %v4604_v5 }
 0x1dc   : > { %3158 = vst [vmem:[%s4610_s6 + $0x90] sm:$0xff] %v3110_v3  ;;  %v3111_v42 = vmax.f32 %v3063_v41, 0.0 }
 0x1dd   : > { %3156 = vst [vmem:[%s4610_s6 + $0x80] sm:$0xff] %v3108_v4  ;;  %v3109_v56 = vmax.f32 %v3061_v45, 0.0  ;;  %v3642_v6 = vpop.f32.mrb[20].mxu0 }
 0x1de   : > { %3159 = vst [vmem:[%s4610_s6 + $0x98] sm:$0xff] %v3111_v42  ;;  %v3690_v30 = vadd.f32 %v3642_v6, %v4592_v46  ;;  %v2782_v8 = vpop.f32.mrb[21].mxu0 }
 0x1df   : > { %3157 = vst [vmem:[%s4610_s6 + $0x88] sm:$0xff] %v3109_v56  ;;  %v3691_v44 = vadd.f32 %v2782_v8, %v4594_v47  ;;  %v3643_v9 = vpop.f32.mrb[22].mxu0 }
 0x1e0   : > { %v3066_v7 = vadd.f32 %v3690_v30, %v4604_v5  ;;  %v3692_v10 = vadd.f32 %v3643_v9, %v4596_v48  ;;  %v2785_v11 = vpop.f32.mrb[23].mxu0 }
 0x1e1   : > { %v3064_v12 = vadd.f32 %v3691_v44, %v4604_v5  ;;  %v3693_v13 = vadd.f32 %v2785_v11, %v4598_v33 }
 0x1e2   : > { %v3114_v14 = vmax.f32 %v3066_v7, 0.0  ;;  %v3067_v46 = vadd.f32 %v3692_v10, %v4604_v5 }
 0x1e3   : > { %v3112_v15 = vmax.f32 %v3064_v12, 0.0  ;;  %v3065_v16 = vadd.f32 %v3693_v13, %v4604_v5  ;;  %v3596_v17 = vpop.f32.mrb[24].mxu1 }
 0x1e4   : > { %3162 = vst [vmem:[%s4610_s6 + $0xb0] sm:$0xff] %v3114_v14  ;;  %v3115_v47 = vmax.f32 %v3067_v46, 0.0  ;;  %v2322_v18 = vpop.f32.mrb[25].mxu1 }
 0x1e5   : > { %3160 = vst [vmem:[%s4610_s6 + $0xa0] sm:$0xff] %v3112_v15  ;;  %v3113_v20 = vmax.f32 %v3065_v16, 0.0  ;;  %v3597_v48 = vpop.f32.mrb[26].mxu1  ;;  %v3646_v21 = vpop.f32.mrb[24].mxu0 }
 0x1e6   : > { %3163 = vst [vmem:[%s4610_s6 + $0xb8] sm:$0xff] %v3115_v47  ;;  %v3694_v19 = vadd.f32 %v3646_v21, %v3596_v17  ;;  %v2325_v22 = vpop.f32.mrb[27].mxu1  ;;  %v2798_v33 = vpop.f32.mrb[25].mxu0 }
 0x1e7   : > { %3161 = vst [vmem:[%s4610_s6 + $0xa8] sm:$0xff] %v3113_v20  ;;  %v3695_v24 = vadd.f32 %v2798_v33, %v2322_v18  ;;  %v3647_v25 = vpop.f32.mrb[26].mxu0 }
 0x1e8   : > { %v3070_v26 = vadd.f32 %v3694_v19, %v4604_v5  ;;  %v3696_v27 = vadd.f32 %v3647_v25, %v3597_v48  ;;  %v2801_v28 = vpop.f32.mrb[27].mxu0 }
 0x1e9   : > { %v3068_v31 = vadd.f32 %v3695_v24, %v4604_v5  ;;  %v3697_v32 = vadd.f32 %v2801_v28, %v2325_v22 }
 0x1ea   : > { %v3118_v23 = vmax.f32 %v3070_v26, 0.0  ;;  %v3071_v35 = vadd.f32 %v3696_v27, %v4604_v5 }
 0x1eb   : > { %v3116_v36 = vmax.f32 %v3068_v31, 0.0  ;;  %v3069_v43 = vadd.f32 %v3697_v32, %v4604_v5  ;;  %v3600_v29 = vpop.f32.mrb[28].mxu1 }
 0x1ec   : > { %3166 = vst [vmem:[%s4610_s6 + $0xd0] sm:$0xff] %v3118_v23  ;;  %v3119_v0 = vmax.f32 %v3071_v35, 0.0  ;;  %v2338_v34 = vpop.f32.mrb[29].mxu1 }
 0x1ed   : > { %3164 = vst [vmem:[%s4610_s6 + $0xc0] sm:$0xff] %v3116_v36  ;;  %v3117_v49 = vmax.f32 %v3069_v43, 0.0  ;;  %v3601_v50 = vpop.f32.mrb[30].mxu1  ;;  %v3650_v51 = vpop.f32.mrb[28].mxu0 }
 0x1ee   : > { %3167 = vst [vmem:[%s4610_s6 + $0xd8] sm:$0xff] %v3119_v0  ;;  %v3698_v52 = vadd.f32 %v3650_v51, %v3600_v29  ;;  %v2341_v53 = vpop.f32.mrb[31].mxu1  ;;  %v2814_v37 = vpop.f32.mrb[29].mxu0 }
 0x1ef   : > { %3165 = vst [vmem:[%s4610_s6 + $0xc8] sm:$0xff] %v3117_v49  ;;  %v3699_v54 = vadd.f32 %v2814_v37, %v2338_v34  ;;  %v3651_v55 = vpop.f32.mrb[30].mxu0 }
 0x1f0   : > { %v3074_v38 = vadd.f32 %v3698_v52, %v4604_v5  ;;  %v3700_v57 = vadd.f32 %v3651_v55, %v3601_v50  ;;  %v2817_v58 = vpop.f32.mrb[31].mxu0 }
 0x1f1   : > { %v3072_v39 = vadd.f32 %v3699_v54, %v4604_v5  ;;  %v3701_v59 = vadd.f32 %v2817_v58, %v2341_v53 }
 0x1f2   : > { %v3122_v40 = vmax.f32 %v3074_v38, 0.0  ;;  %v3075_v60 = vadd.f32 %v3700_v57, %v4604_v5 }
 0x1f3   : > { %v3120_v61 = vmax.f32 %v3072_v39, 0.0  ;;  %v3073_v62 = vadd.f32 %v3701_v59, %v4604_v5  ;;  %v3604_v63 = vpop.f32.mrb[32].mxu1 }
 0x1f4   : > { %3170 = vst [vmem:[%s4610_s6 + $0xf0] sm:$0xff] %v3122_v40  ;;  %v3123_v1 = vmax.f32 %v3075_v60, 0.0  ;;  %v2354_v2 = vpop.f32.mrb[33].mxu1 }
 0x1f5   : > { %3168 = vst [vmem:[%s4610_s6 + $0xe0] sm:$0xff] %v3120_v61  ;;  %v3121_v3 = vmax.f32 %v3073_v62, 0.0  ;;  %v3605_v41 = vpop.f32.mrb[34].mxu1  ;;  %v3654_v4 = vpop.f32.mrb[32].mxu0 }
 0x1f6   : > { %3171 = vst [vmem:[%s4610_s6 + $0xf8] sm:$0xff] %v3123_v1  ;;  %v3702_v45 = vadd.f32 %v3654_v4, %v3604_v63  ;;  %v2357_v42 = vpop.f32.mrb[35].mxu1  ;;  %v2830_v56 = vpop.f32.mrb[33].mxu0 }
 0x1f7   : > { %3169 = vst [vmem:[%s4610_s6 + $0xe8] sm:$0xff] %v3121_v3  ;;  %v3703_v6 = vadd.f32 %v2830_v56, %v2354_v2  ;;  %v3655_v30 = vpop.f32.mrb[34].mxu0 }
 0x1f8   : > { %v3078_v8 = vadd.f32 %v3702_v45, %v4604_v5  ;;  %v3704_v44 = vadd.f32 %v3655_v30, %v3605_v41  ;;  %v2833_v9 = vpop.f32.mrb[35].mxu0 }
 0x1f9   : > { %v3076_v7 = vadd.f32 %v3703_v6, %v4604_v5  ;;  %v3705_v10 = vadd.f32 %v2833_v9, %v2357_v42 }
 0x1fa   : > { %v3126_v11 = vmax.f32 %v3078_v8, 0.0  ;;  %v3079_v12 = vadd.f32 %v3704_v44, %v4604_v5 }
 0x1fb   : > { %v3124_v13 = vmax.f32 %v3076_v7, 0.0  ;;  %v3077_v14 = vadd.f32 %v3705_v10, %v4604_v5  ;;  %v3608_v46 = vpop.f32.mrb[36].mxu1 }
 0x1fc   : > { %3174 = vst [vmem:[%s4610_s6 + $0x110] sm:$0xff] %v3126_v11  ;;  %v3127_v15 = vmax.f32 %v3079_v12, 0.0  ;;  %v2370_v16 = vpop.f32.mrb[37].mxu1 }
 0x1fd   : > { %3172 = vst [vmem:[%s4610_s6 + $0x100] sm:$0xff] %v3124_v13  ;;  %v3125_v17 = vmax.f32 %v3077_v14, 0.0  ;;  %v3609_v47 = vpop.f32.mrb[38].mxu1  ;;  %v3658_v18 = vpop.f32.mrb[36].mxu0 }
 0x1fe   : > { %3175 = vst [vmem:[%s4610_s6 + $0x118] sm:$0xff] %v3127_v15  ;;  %v3706_v20 = vadd.f32 %v3658_v18, %v3608_v46  ;;  %v2373_v48 = vpop.f32.mrb[39].mxu1  ;;  %v2846_v21 = vpop.f32.mrb[37].mxu0 }
 0x1ff   : > { %3173 = vst [vmem:[%s4610_s6 + $0x108] sm:$0xff] %v3125_v17  ;;  %v3707_v19 = vadd.f32 %v2846_v21, %v2370_v16  ;;  %v3659_v22 = vpop.f32.mrb[38].mxu0 }
 0x200   : > { %v3082_v33 = vadd.f32 %v3706_v20, %v4604_v5  ;;  %v3708_v24 = vadd.f32 %v3659_v22, %v3609_v47  ;;  %v2849_v25 = vpop.f32.mrb[39].mxu0 }
 0x201   : > { %v3080_v26 = vadd.f32 %v3707_v19, %v4604_v5  ;;  %v3709_v27 = vadd.f32 %v2849_v25, %v2373_v48 }
 0x202   : > { %v3130_v28 = vmax.f32 %v3082_v33, 0.0  ;;  %v3083_v31 = vadd.f32 %v3708_v24, %v4604_v5 }
 0x203   : > { %v3128_v32 = vmax.f32 %v3080_v26, 0.0  ;;  %v3081_v23 = vadd.f32 %v3709_v27, %v4604_v5  ;;  %v3612_v35 = vpop.f32.mrb[40].mxu1 }
 0x204   : > { %3178 = vst [vmem:[%s4610_s6 + $0x130] sm:$0xff] %v3130_v28  ;;  %v3131_v36 = vmax.f32 %v3083_v31, 0.0  ;;  %v2386_v43 = vpop.f32.mrb[41].mxu1 }
 0x205   : > { %3176 = vst [vmem:[%s4610_s6 + $0x120] sm:$0xff] %v3128_v32  ;;  %v3129_v29 = vmax.f32 %v3081_v23, 0.0  ;;  %v3613_v0 = vpop.f32.mrb[42].mxu1  ;;  %v3662_v34 = vpop.f32.mrb[40].mxu0 }
 0x206   : > { %3179 = vst [vmem:[%s4610_s6 + $0x138] sm:$0xff] %v3131_v36  ;;  %v3710_v49 = vadd.f32 %v3662_v34, %v3612_v35  ;;  %v2389_v50 = vpop.f32.mrb[43].mxu1  ;;  %v2862_v51 = vpop.f32.mrb[41].mxu0 }
 0x207   : > { %3177 = vst [vmem:[%s4610_s6 + $0x128] sm:$0xff] %v3129_v29  ;;  %v3711_v52 = vadd.f32 %v2862_v51, %v2386_v43  ;;  %v3663_v53 = vpop.f32.mrb[42].mxu0 }
 0x208   : > { %v3086_v37 = vadd.f32 %v3710_v49, %v4604_v5  ;;  %v3712_v54 = vadd.f32 %v3663_v53, %v3613_v0  ;;  %v2865_v55 = vpop.f32.mrb[43].mxu0 }
 0x209   : > { %v3084_v38 = vadd.f32 %v3711_v52, %v4604_v5  ;;  %v3713_v57 = vadd.f32 %v2865_v55, %v2389_v50 }
 0x20a   : > { %v3134_v58 = vmax.f32 %v3086_v37, 0.0  ;;  %v3087_v39 = vadd.f32 %v3712_v54, %v4604_v5 }
 0x20b   : > { %v3132_v59 = vmax.f32 %v3084_v38, 0.0  ;;  %v3085_v40 = vadd.f32 %v3713_v57, %v4604_v5  ;;  %v3616_v60 = vpop.f32.mrb[44].mxu1 }
 0x20c   : > { %3182 = vst [vmem:[%s4610_s6 + $0x150] sm:$0xff] %v3134_v58  ;;  %v3135_v61 = vmax.f32 %v3087_v39, 0.0  ;;  %v2402_v62 = vpop.f32.mrb[45].mxu1 }
 0x20d   : > { %3180 = vst [vmem:[%s4610_s6 + $0x140] sm:$0xff] %v3132_v59  ;;  %v3133_v63 = vmax.f32 %v3085_v40, 0.0  ;;  %v3617_v1 = vpop.f32.mrb[46].mxu1  ;;  %v3666_v2 = vpop.f32.mrb[44].mxu0 }
 0x20e   : > { %3183 = vst [vmem:[%s4610_s6 + $0x158] sm:$0xff] %v3135_v61  ;;  %v3714_v3 = vadd.f32 %v3666_v2, %v3616_v60  ;;  %v2405_v41 = vpop.f32.mrb[47].mxu1  ;;  %v2878_v4 = vpop.f32.mrb[45].mxu0 }
 0x20f   : > { %3181 = vst [vmem:[%s4610_s6 + $0x148] sm:$0xff] %v3133_v63  ;;  %v3715_v45 = vadd.f32 %v2878_v4, %v2402_v62  ;;  %v3667_v42 = vpop.f32.mrb[46].mxu0 }
 0x210   : > { %v3090_v56 = vadd.f32 %v3714_v3, %v4604_v5  ;;  %v3716_v6 = vadd.f32 %v3667_v42, %v3617_v1  ;;  %v2881_v30 = vpop.f32.mrb[47].mxu0 }
 0x211   : > { %v3088_v8 = vadd.f32 %v3715_v45, %v4604_v5  ;;  %v3717_v44 = vadd.f32 %v2881_v30, %v2405_v41 }
 0x212   : > { %v3138_v9 = vmax.f32 %v3090_v56, 0.0  ;;  %v3091_v7 = vadd.f32 %v3716_v6, %v4604_v5 }
 0x213   : > { %v3136_v10 = vmax.f32 %v3088_v8, 0.0  ;;  %v3089_v11 = vadd.f32 %v3717_v44, %v4604_v5 }
 0x214   : > { %3186 = vst [vmem:[%s4610_s6 + $0x170] sm:$0xff] %v3138_v9  ;;  %v3139_v12 = vmax.f32 %v3091_v7, 0.0 }
 0x215   : > { %3184 = vst [vmem:[%s4610_s6 + $0x160] sm:$0xff] %v3136_v10  ;;  %v3137_v13 = vmax.f32 %v3089_v11, 0.0 }
 0x216   : > { %3187 = vst [vmem:[%s4610_s6 + $0x178] sm:$0xff] %v3139_v12 }
 0x217   : > { %3185 = vst [vmem:[%s4610_s6 + $0x168] sm:$0xff] %v3137_v13 }
 0x218 PF: > { %s13_s14 = sadd.s32 1, %s3906_s14   ;;  %s4734_s12 = smov %s3902_s13 }
 0x219   : > { %p10_p5 = scmp.ge.s32.totalorder %s13_s14, 4   ;;  %s4735_s13 = smov %s4737_s15 }
 0x21b   :  { %12 = sbr.rel (!%p10_p5) target bundleno = 2 (0x2), region = 65 }

// kernel: inception_forward.7
= control target key start
LH: loop header
LB: loop body
LE: loop exit
PB: predicated region body
PF: predicated region fallthrough
CT: control target
= control target key end

     0   :  { %s6611_s12 = smov 0   ;;  %s6613_s13 = smov 0   ;;  %s8178_s0 = inlined_call_operand.vmem [shape: bf16[2,488,4], index: 0, kind: input, shape index: {}]   ;;  %s8179_s1 = inlined_call_operand.vmem [shape: bf16[5,20,128], index: 1, kind: input, shape index: {}]   ;;  %s8180_s2 = inlined_call_operand.vmem [shape: f32[1,128], index: 2, kind: input, shape index: {}]   ;;  %s8181_s3 = inlined_call_operand.vmem [shape: f32[2,384,128], index: 3, kind: output, shape index: {}]  }
   0x1   :  { %s6615_s14 = smov 0  }
   0x2 LB: > { %s25_s15 = sadd.s32 1, %s6581_s13  ;;  %p5473_p0 = scmp.ge.s32.totalorder %s6585_s14, 1  ;;  %s6585_s14 = sphi %s6615_s14, %s13_s14   ;;  %s6581_s13 = sphi %s6613_s13, %s8183_s13   ;;  %s6577_s12 = sphi %s6611_s12, %s8182_s12  }
   0x3   : > { %p27_p1 = scmp.ge.s32.totalorder %s25_s15, 2  ;;  %p151_p2 = scmp.lt.s32.totalorder %s6585_s14, 3 }
   0x5   : > { %s8185_s15 = smov (%p27_p1, %s25_s15), 0  ;;  %p152_p3 = pnand %p5473_p0, %p151_p2 }
   0x6   : > { %p179_p4 = scmp.lt.s32.totalorder (!%p152_p3), %s6577_s12, 1  ;;  %vm261_vm0 = vcmask (!%p152_p3), 27648   ;;  %vm1388_vm1 = vcmask (!%p152_p3), 1046528   ;;  %vm2399_vm2 = vcmask (!%p152_p3), 1045504   ;;  %s6587_s20 = smov (!%p152_p3), 8   ;;  %vm563_vm5 = vcmask (!%p152_p3), 31744  }
   0x7   : > { %155 = sbr.rel (%p152_p3) target bundleno = 717 (0x2cd), region = 32  ;;  %vm808_vm3 = vsmask.f32 (!%p152_p3), 7424  ;;  %s6588_s21 = smov (!%p152_p3), 16   ;;  %vm1785_vm4 = vsmask.f32 (!%p152_p3), 6400 }
   0x8   : > { %s6589_s22 = smov (!%p152_p3), 4   ;;  %s6590_s23 = smov (!%p152_p3), 12   ;;  %vm2787_vm6 = vcmask (!%p152_p3), 1041408   ;;  %vm1143_vm7 = vcmask (!%p152_p3), 64544   ;;  %vm1540_vm8 = vcmask (!%p152_p3), 97344   ;;  %vm2154_vm9 = vcmask (!%p152_p3), 130144  }
   0x9   : > { %vm2551_vm10 = vcmask (!%p152_p3), 162944   ;;  %vm2714_vm11 = vcmask (!%p152_p3), 162816   ;;  %vm3214_vm12 = vcmask (!%p152_p3), 1043456  }
   0xe   : > { %s8187_s12 = smov (!%p179_p4, %s6577_s12), 1 }
   0xf   : > { %s6367_s16 = smul.u32 244, %s8187_s12 }
  0x11   : > { %s6635_s19 = scalar_lea.vmem %s8178_s0, %s6367_s16 }
  0x12   : > { %v206_v0 = vld [vmem:[%s6635_s19 + $0x18] sm:$0xf]  ;;  %v207_v1 = vld [vmem:[%s6635_s19 + $0x1c] sm:$0xf]  ;;  %v208_v2 = vld [vmem:[%s6635_s19 + $0x20] sm:$0xf] }
  0x13   : > { %v209_v3 = vld [vmem:[%s6635_s19 + $0x24] sm:$0xf]  ;;  %268 = vst.msk [vmem:[#allocation2 + $0x18] sm:$0xf] %vm261_vm0, %v206_v0  ;;  %269 = vst.msk [vmem:[#allocation2 + $0x1c] sm:$0xf] %vm261_vm0, %v207_v1 }
  0x14   : > { %270 = vst.msk [vmem:[#allocation2 + $0x20] sm:$0xf] %vm261_vm0, %v208_v2  ;;  %v200_v4 = vld [vmem:[%s6635_s19] sm:$0xf]  ;;  %v201_v5 = vld [vmem:[%s6635_s19 + $0x4] sm:$0xf] }
  0x15   : > { %271 = vst.msk [vmem:[#allocation2 + $0x24] sm:$0xf] %vm261_vm0, %v209_v3  ;;  %v202_v6 = vld [vmem:[%s6635_s19 + $0x8] sm:$0xf]  ;;  %v203_v7 = vld [vmem:[%s6635_s19 + $0xc] sm:$0xf] }
  0x16   : > { %262 = vst.msk [vmem:[#allocation2] sm:$0xf] %vm261_vm0, %v200_v4  ;;  %263 = vst.msk [vmem:[#allocation2 + $0x4] sm:$0xf] %vm261_vm0, %v201_v5  ;;  %v210_v8 = vld [vmem:[%s6635_s19 + $0x28] sm:$0xf] }
  0x17   : > { %264 = vst.msk [vmem:[#allocation2 + $0x8] sm:$0xf] %vm261_vm0, %v202_v6  ;;  %265 = vst.msk [vmem:[#allocation2 + $0xc] sm:$0xf] %vm261_vm0, %v203_v7  ;;  %v211_v9 = vld [vmem:[%s6635_s19 + $0x2c] sm:$0xf] }
  0x18   : > { %272 = vst.msk [vmem:[#allocation2 + $0x28] sm:$0xf] %vm261_vm0, %v210_v8  ;;  %v204_v10 = vld [vmem:[%s6635_s19 + $0x10] sm:$0xf]  ;;  %v205_v11 = vld [vmem:[%s6635_s19 + $0x14] sm:$0xf] }
  0x19   : > { %273 = vst.msk [vmem:[#allocation2 + $0x2c] sm:$0xf] %vm261_vm0, %v211_v9  ;;  %266 = vst.msk [vmem:[#allocation2 + $0x10] sm:$0xf] %vm261_vm0, %v204_v10  ;;  %v212_v12 = vld [vmem:[%s6635_s19 + $0x30] sm:$0xf] }
  0x1a   : > { %267 = vst.msk [vmem:[#allocation2 + $0x14] sm:$0xf] %vm261_vm0, %v205_v11  ;;  %v213_v13 = vld [vmem:[%s6635_s19 + $0x34] sm:$0xf]  ;;  %v214_v14 = vld [vmem:[%s6635_s19 + $0x38] sm:$0xf] }
  0x1b   : > { %274 = vst.msk [vmem:[#allocation2 + $0x30] sm:$0xf] %vm261_vm0, %v212_v12  ;;  %275 = vst.msk [vmem:[#allocation2 + $0x34] sm:$0xf] %vm261_vm0, %v213_v13  ;;  %v215_v15 = vld [vmem:[%s6635_s19 + $0x3c] sm:$0xf] }
  0x1c   : > { %276 = vst.msk [vmem:[#allocation2 + $0x38] sm:$0xf] %vm261_vm0, %v214_v14  ;;  %v216_v16 = vld [vmem:[%s6635_s19 + $0x40] sm:$0xf]  ;;  %v217_v17 = vld [vmem:[%s6635_s19 + $0x44] sm:$0xf] }
  0x1d   : > { %277 = vst.msk [vmem:[#allocation2 + $0x3c] sm:$0xf] %vm261_vm0, %v215_v15  ;;  %v218_v18 = vld [vmem:[%s6635_s19 + $0x48] sm:$0xf]  ;;  %v219_v19 = vld [vmem:[%s6635_s19 + $0x4c] sm:$0xf] }
  0x1e   : > { %278 = vst.msk [vmem:[#allocation2 + $0x40] sm:$0xf] %vm261_vm0, %v216_v16  ;;  %279 = vst.msk [vmem:[#allocation2 + $0x44] sm:$0xf] %vm261_vm0, %v217_v17  ;;  %v220_v20 = vld [vmem:[%s6635_s19 + $0x50] sm:$0xf] }
  0x1f   : > { %280 = vst.msk [vmem:[#allocation2 + $0x48] sm:$0xf] %vm261_vm0, %v218_v18  ;;  %281 = vst.msk [vmem:[#allocation2 + $0x4c] sm:$0xf] %vm261_vm0, %v219_v19  ;;  %v221_v21 = vld [vmem:[%s6635_s19 + $0x54] sm:$0xf] }
  0x20   : > { %v222_v22 = vld [vmem:[%s6635_s19 + $0x58] sm:$0xf]  ;;  %v223_v23 = vld [vmem:[%s6635_s19 + $0x5c] sm:$0xf]  ;;  %282 = vst.msk [vmem:[#allocation2 + $0x50] sm:$0xf] %vm261_vm0, %v220_v20 }
  0x21   : > { %283 = vst.msk [vmem:[#allocation2 + $0x54] sm:$0xf] %vm261_vm0, %v221_v21  ;;  %284 = vst.msk [vmem:[#allocation2 + $0x58] sm:$0xf] %vm261_vm0, %v222_v22  ;;  %v6685_v24 = vld [vmem:[#allocation2 + $0x18] sm:$0xff]   ;;  %v6398_v25 = vld [vmem:[#allocation2 + $0x20] sm:$0xff]  }
  0x22   : > { %285 = vst.msk [vmem:[#allocation2 + $0x5c] sm:$0xf] %vm261_vm0, %v223_v23  ;;  %v1394_v26 = vrot.slane %v6685_v24, 1  ;;  %v1396_v27 = vrot.slane %v6398_v25, 1  ;;  %v6399_v28 = vld [vmem:[#allocation2] sm:$0xfe]  }
  0x23   : > { %v6400_v29 = vld [vmem:[#allocation2 + $0x8] sm:$0xff]   ;;  %v1389_v31 = vrot.slane %v6399_v28, 1  ;;  %v6694_v34 = vld [vmem:[#allocation2 + $0x10] sm:$0xff]   ;;  %v6697_v36 = vld [vmem:[#allocation2 + $0x18] sm:$0xff]  }
  0x24   : > { %v1397_v30 = vsel %vm1388_vm1, %v1394_v26, %v1396_v27  ;;  %v6691_v32 = vld [vmem:[#allocation2 + $0x28] sm:$0xff]   ;;  %v1390_v33 = vrot.slane %v6400_v29, 1  ;;  %v1392_v38 = vrot.slane %v6694_v34, 1  ;;  %v6701_v39 = vld [vmem:[#allocation2 + $0x20] sm:$0xff]   ;;  %v2405_v41 = vrot.slane %v6697_v36, 2  ;;  %v6716_v48 = vld [vmem:[#allocation2 + $0x10] sm:$0xff]  }
  0x25   : > { %1456 = vrot.lane.b32.xlu1 %v1397_v30, %s6587_s20  ;;  %v1398_v35 = vrot.slane %v6691_v32, 1  ;;  %v6708_v42 = vld [vmem:[#allocation2 + $0x8] sm:$0xff]   ;;  %v2407_v44 = vrot.slane %v6701_v39, 2  ;;  %v6405_v45 = vld [vmem:[#allocation2] sm:$0xfc]   ;;  %v825_v54 = vshll.u32 %v6716_v48, 16 }
  0x26   : > { %v1391_v37 = vsel %vm1388_vm1, %v1389_v31, %v1390_v33  ;;  %v1393_v43 = vsel %vm1388_vm1, %v1390_v33, %v1392_v38  ;;  %v6407_v46 = vld [vmem:[#allocation2 + $0x8] sm:$0xff]   ;;  %v2401_v47 = vrot.slane %v6708_v42, 2  ;;  %v2400_v50 = vrot.slane %v6405_v45, 2  ;;  %v6409_v53 = vld [vmem:[#allocation2] sm:$0xff]   ;;  %v6412_v3 = vld [vmem:[#allocation2 + $0x18] sm:$0xff]  }
  0x27   : > { %1450 = vrot.lane.b32.xlu0 %v1391_v37, %s6587_s20  ;;  %v1399_v40 = vsel %vm1388_vm1, %v1396_v27, %v1398_v35  ;;  %v2408_v49 = vsel %vm2399_vm2, %v2405_v41, %v2407_v44  ;;  %v817_v51 = vshll.u32 %v6407_v46, 16  ;;  %v821_v52 = vshrl.u32 %v6407_v46, 16  ;;  %v6410_v55 = vld [vmem:[#allocation2 + $0x20] sm:$0xff]   ;;  %v6729_v60 = vld [vmem:[#allocation2 + $0x28] sm:$0xff]   ;;  %v6413_v5 = vld [vmem:[#allocation2 + $0x18] sm:$0xff]  }
  0x28   : > { %v2402_v56 = vsel %vm2399_vm2, %v2400_v50, %v2401_v47  ;;  %v810_v58 = vshrl.u32 %v6409_v53, 16  ;;  %v812_v59 = vshll.u32 %v6409_v53, 16  ;;  %v6731_v61 = vrot.slane %v825_v54, 1  ;;  %v6414_v12 = vld [vmem:[#allocation2 + $0x20] sm:$0xff]   ;;  %v6416_v17 = vld [vmem:[#allocation2 + $0x8] sm:$0xff]   ;;  %v6418_v45 = vld [vmem:[#allocation2 + $0x10] sm:$0xff]  }
  0x29   : > { %1458 = vrot.lane.b32.xlu1 %v1399_v40, %s6587_s20  ;;  %v819_v57 = vrot.slane %v817_v51, 1  ;;  %v841_v62 = vshll.u32 %v6410_v55, 16  ;;  %v845_v1 = vshrl.u32 %v6410_v55, 16  ;;  %v849_v2 = vshll.u32 %v6729_v60, 16  ;;  %v6415_v25 = vld [vmem:[#allocation2] sm:$0xfe]  }
  0x2a   : > { %v814_v0 = vrot.slane %v812_v59, 1  ;;  %v833_v9 = vshll.u32 %v6412_v3, 16  ;;  %v837_v11 = vshrl.u32 %v6412_v3, 16  ;;  %v1813_v15 = vshrl.u32 %v6413_v5, 16  ;;  %v6754_v59 = vld [vmem:[#allocation2 + $0x28] sm:$0xff]   ;;  %v6784_v39 = vld [vmem:[#allocation2 + $0x38] sm:$0xff]  }
  0x2b   : > { %1452 = vrot.lane.b32.xlu0 %v1393_v43, %s6587_s20  ;;  %v823_v63 = vor.u32 %v821_v52, %v819_v57  ;;  %v843_v4 = vrot.slane %v841_v62, 1  ;;  %v6737_v8 = vrot.slane %v849_v2, 1  ;;  %v1816_v16 = vshll.u32 %v6413_v5, 16  ;;  %v6417_v43 = vld [vmem:[#allocation2 + $0x28] sm:$0xff]   ;;  %v6756_v62 = vld [vmem:[#allocation2 + $0x10] sm:$0xff]  }
  0x2c   : > { %v815_v7 = vor.u32 %v814_v0, %v810_v58  ;;  %v6741_v14 = vrot.slane %v833_v9, 1  ;;  %v1822_v19 = vshrl.u32 %v6414_v12, 16  ;;  %v1825_v20 = vshll.u32 %v6414_v12, 16  ;;  %v6421_v9 = vld [vmem:[#allocation2 + $0x30] sm:$0xff]  }
  0x2d   : > { %2467 = vrot.lane.b32.xlu1 %v2408_v49, %s6588_s21  ;;  %v828_v6 = vsel %vm808_vm3, %v823_v63, %v6731_v61  ;;  %v847_v10 = vor.u32 %v845_v1, %v843_v4  ;;  %v1815_v22 = vrot.slane %v1813_v15, 1  ;;  %v1818_v23 = vrot.slane %v1816_v16, 2  ;;  %v6766_v16 = vld [vmem:[#allocation2 + $0x38] sm:$0xff]   ;;  %v6427_v24 = vld [vmem:[#allocation2 + $0x30] sm:$0xff]  }
  0x2e   : > { %v820_v13 = vsel %vm808_vm3, %v815_v7, %v819_v57  ;;  %v839_v21 = vor.u32 %v837_v11, %v6741_v14  ;;  %v1824_v27 = vrot.slane %v1822_v19, 1  ;;  %v1827_v28 = vrot.slane %v1825_v20, 2 }
  0x2f   : > { %2461 = vrot.lane.b32.xlu0 %v2402_v56, %s6588_s21  ;;  %v852_v18 = vsel %vm808_vm3, %v847_v10, %v6737_v8  ;;  %v1795_v29 = vshrl.u32 %v6416_v17, 16  ;;  %v1798_v30 = vshll.u32 %v6416_v17, 16  ;;  %v6749_v33 = vor.u32 %v1818_v23, %v1815_v22 }
  0x30   : > { %v844_v31 = vsel %vm808_vm3, %v839_v21, %v843_v4  ;;  %v1787_v37 = vshrl.u32 %v6415_v25, 16  ;;  %v1790_v40 = vshll.u32 %v6415_v25, 16  ;;  %v1828_v46 = vor.u32 %v1827_v28, %v1824_v27  ;;  %v6423_v21 = vld [vmem:[#allocation2 + $0x30] sm:$0xff]   ;;  %v6426_v28 = vld [vmem:[#allocation2 + $0x38] sm:$0xff]  }
  0x31   : > { %1055 = vrot.lane.b32.xlu1 %v828_v6, %s6589_s22  ;;  %v1797_v49 = vrot.slane %v1795_v29, 1  ;;  %v1800_v50 = vrot.slane %v1798_v30, 2  ;;  %v1831_v53 = vshrl.u32 %v6417_v43, 16  ;;  %v1834_v54 = vshll.u32 %v6417_v43, 16 }
  0x32   : > { %v1789_v51 = vrot.slane %v1787_v37, 1  ;;  %v1792_v52 = vrot.slane %v1790_v40, 2  ;;  %v1829_v55 = vsel %vm1785_vm4, %v6749_v33, %v1828_v46  ;;  %v1804_v57 = vshrl.u32 %v6418_v45, 16 }
  0x33   : > { %1053 = vrot.lane.b32.xlu0 %v820_v13, %s6589_s22  ;;  %v1801_v56 = vor.u32 %v1800_v50, %v1797_v49  ;;  %v1807_v58 = vshll.u32 %v6418_v45, 16  ;;  %v1833_v0 = vrot.slane %v1831_v53, 1  ;;  %v1836_v1 = vrot.slane %v1834_v54, 2 }
  0x34   : > { %v1793_v63 = vor.u32 %v1792_v52, %v1789_v51  ;;  %v1806_v2 = vrot.slane %v1804_v57, 1  ;;  %v2409_v4 = vrot.slane %v6754_v59, 2  ;;  %v2403_v5 = vrot.slane %v6756_v62, 2  ;;  %v6807_v51 = vld [vmem:[#allocation2 + $0x38] sm:$0xff]   ;;  %v6813_v52 = vld [vmem:[#allocation2 + $0x48] sm:$0xff]  }
  0x35   : > { %1061 = vrot.lane.b32.xlu1 %v852_v18, %s6589_s22  ;;  %v1809_v3 = vrot.slane %v1807_v58, 2  ;;  %v1837_v7 = vor.u32 %v1836_v1, %v1833_v0  ;;  %v853_v10 = vshrl.u32 %v6729_v60, 16  ;;  %v829_v11 = vshrl.u32 %v6716_v48, 16  ;;  %v6425_v18 = vld [vmem:[#allocation2 + $0x30] sm:$0xff]   ;;  %v6824_v1 = vld [vmem:[#allocation2 + $0x40] sm:$0xff]  }
  0x36   : > { %v1802_v6 = vsel %vm1785_vm4, %v1793_v63, %v1801_v56  ;;  %v857_v15 = vshll.u32 %v6421_v9, 16  ;;  %v2410_v60 = vsel %vm2399_vm2, %v2407_v44, %v2409_v4  ;;  %v861_v20 = vshrl.u32 %v6421_v9, 16  ;;  %v6434_v63 = vld [vmem:[#allocation2 + $0x48] sm:$0xff]   ;;  %v231_v59 = vld [vmem:[%s6635_s19 + $0x7c] sm:$0xf] }
  0x37   : > { %1059 = vrot.lane.b32.xlu0 %v844_v31, %s6589_s22  ;;  %v1810_v12 = vor.u32 %v1809_v3, %v1806_v2  ;;  %v1838_v13 = vsel %vm1785_vm4, %v1828_v46, %v1837_v7  ;;  %v855_v48 = vor.u32 %v853_v10, %v6737_v8  ;;  %v2404_v22 = vsel %vm2399_vm2, %v2401_v47, %v2403_v5  ;;  %v6429_v46 = vld [vmem:[#allocation2 + $0x40] sm:$0xff]   ;;  %v6827_v3 = vld [vmem:[#allocation2 + $0x48] sm:$0xff]  }
  0x38   : > { %v859_v19 = vrot.slane %v857_v15, 1  ;;  %v831_v23 = vor.u32 %v829_v11, %v6731_v61  ;;  %v865_v25 = vshll.u32 %v6766_v16, 16  ;;  %v1840_v44 = vshrl.u32 %v6425_v18, 16  ;;  %293 = vst.msk [vmem:[#allocation2 + $0x7c] sm:$0xf] %vm261_vm0, %v231_v59 }
  0x39   : > { %2070 = vrot.lane.b32.xlu1 %v1829_v55, %s6590_s23  ;;  %v1811_v17 = vsel %vm1785_vm4, %v1801_v56, %v1810_v12  ;;  %v1843_v8 = vshll.u32 %v6425_v18, 16  ;;  %v1400_v61 = vrot.slane %v6423_v21, 1  ;;  %v1402_v30 = vrot.slane %v6784_v39, 1  ;;  %v6433_v55 = vld [vmem:[#allocation2 + $0x40] sm:$0xff]   ;;  %v6439_v39 = vld [vmem:[#allocation2 + $0x50] sm:$0xff]  }
  0x3a   : > { %v860_v27 = vsel %vm808_vm3, %v855_v48, %v859_v19  ;;  %v836_v42 = vsel %vm808_vm3, %v831_v23, %v6741_v14  ;;  %v863_v29 = vor.u32 %v861_v20, %v859_v19  ;;  %v6791_v47 = vrot.slane %v865_v25, 1  ;;  %v6848_v48 = vld [vmem:[#allocation2 + $0x50] sm:$0xff]   ;;  %v225_v19 = vld [vmem:[%s6635_s19 + $0x64] sm:$0xf]  ;;  %v227_v23 = vld [vmem:[%s6635_s19 + $0x6c] sm:$0xf] }
  0x3b   : > { %2064 = vrot.lane.b32.xlu0 %v1802_v6, %s6590_s23  ;;  %v1842_v31 = vrot.slane %v1840_v44, 1  ;;  %v1845_v37 = vrot.slane %v1843_v8, 2  ;;  %v1395_v40 = vsel %vm1388_vm1, %v1392_v38, %v1394_v26  ;;  %v1849_v43 = vshrl.u32 %v6426_v28, 16  ;;  %287 = vst.msk [vmem:[#allocation2 + $0x64] sm:$0xf] %vm261_vm0, %v225_v19 }
  0x3c   : > { %v1852_v14 = vshll.u32 %v6426_v28, 16  ;;  %v868_v45 = vsel %vm808_vm3, %v863_v29, %v6791_v47  ;;  %v1403_v49 = vsel %vm1388_vm1, %v1400_v61, %v1402_v30  ;;  %v1401_v26 = vsel %vm1388_vm1, %v1398_v35, %v1400_v61  ;;  %v228_v25 = vld [vmem:[%s6635_s19 + $0x70] sm:$0xf]  ;;  %289 = vst.msk [vmem:[#allocation2 + $0x6c] sm:$0xf] %vm261_vm0, %v227_v23  ;;  %v6875_v29 = vld [vmem:[#allocation2 + $0x48] sm:$0xff]  }
  0x3d   : > { %2072 = vrot.lane.b32.xlu1 %v1838_v13, %s6590_s23  ;;  %v1846_v50 = vor.u32 %v1845_v37, %v1842_v31  ;;  %v1851_v34 = vrot.slane %v1849_v43, 1  ;;  %v873_v53 = vshll.u32 %v6429_v46, 16  ;;  %v2411_v56 = vrot.slane %v6427_v24, 2  ;;  %v229_v44 = vld [vmem:[%s6635_s19 + $0x74] sm:$0xf]  ;;  %v6880_v31 = vld [vmem:[#allocation2 + $0x58] sm:$0xff]  }
  0x3e   : > { %v1854_v38 = vrot.slane %v1852_v14, 2  ;;  %v2413_v57 = vrot.slane %v6807_v51, 2  ;;  %v877_v58 = vshrl.u32 %v6429_v46, 16  ;;  %v1820_v32 = vsel %vm1785_vm4, %v1810_v12, %v6749_v33  ;;  %v230_v8 = vld [vmem:[%s6635_s19 + $0x78] sm:$0xf] }
  0x3f   : > { %2066 = vrot.lane.b32.xlu0 %v1811_v17, %s6590_s23  ;;  %v1847_v54 = vsel %vm1785_vm4, %v1837_v7, %v1846_v50  ;;  %v881_v0 = vshll.u32 %v6813_v52, 16  ;;  %v875_v2 = vrot.slane %v873_v53, 1  ;;  %v2406_v6 = vsel %vm2399_vm2, %v2403_v5, %v2405_v41  ;;  %v224_v17 = vld [vmem:[%s6635_s19 + $0x60] sm:$0xf]  ;;  %290 = vst.msk [vmem:[#allocation2 + $0x70] sm:$0xf] %vm261_vm0, %v228_v25 }
  0x40   : > { %v6821_v35 = vor.u32 %v1854_v38, %v1851_v34  ;;  %v1858_v7 = vshrl.u32 %v6433_v55, 16  ;;  %v1861_v33 = vshll.u32 %v6433_v55, 16  ;;  %v1867_v9 = vshrl.u32 %v6434_v63, 16  ;;  %286 = vst.msk [vmem:[#allocation2 + $0x60] sm:$0xf] %vm261_vm0, %v224_v17  ;;  %v6441_v38 = vld [vmem:[#allocation2 + $0x50] sm:$0xff]  }
  0x41   : > { %2469 = vrot.lane.b32.xlu1 %v2410_v60, %s6588_s21  ;;  %v1870_v10 = vshll.u32 %v6434_v63, 16  ;;  %v869_v12 = vshrl.u32 %v6766_v16, 16  ;;  %v6839_v36 = vrot.slane %v881_v0, 1  ;;  %v1404_v62 = vrot.slane %v6824_v1, 1  ;;  %291 = vst.msk [vmem:[#allocation2 + $0x74] sm:$0xf] %vm261_vm0, %v229_v44 }
  0x42   : > { %v1856_v11 = vsel %vm1785_vm4, %v1846_v50, %v6821_v35  ;;  %v2414_v41 = vsel %vm2399_vm2, %v2411_v56, %v2413_v57  ;;  %v879_v5 = vor.u32 %v877_v58, %v875_v2  ;;  %v1406_v13 = vrot.slane %v6827_v3, 1  ;;  %292 = vst.msk [vmem:[#allocation2 + $0x78] sm:$0xf] %vm261_vm0, %v230_v8  ;;  %v232_v28 = vld [vmem:[%s6635_s19 + $0x80] sm:$0xf]  ;;  %v6913_v0 = vld [vmem:[#allocation2 + $0x58] sm:$0xff]  }
  0x43   : > { %2463 = vrot.lane.b32.xlu0 %v2404_v22, %s6588_s21  ;;  %v1860_v15 = vrot.slane %v1858_v7, 1  ;;  %v1863_v16 = vrot.slane %v1861_v33, 2  ;;  %v1869_v18 = vrot.slane %v1867_v9, 1  ;;  %v1872_v60 = vrot.slane %v1870_v10, 2  ;;  %v226_v22 = vld [vmem:[%s6635_s19 + $0x68] sm:$0xf] }
  0x44   : > { %v2412_v20 = vsel %vm2399_vm2, %v2409_v4, %v2411_v56  ;;  %v871_v21 = vor.u32 %v869_v12, %v6791_v47  ;;  %288 = vst.msk [vmem:[#allocation2 + $0x68] sm:$0xf] %vm261_vm0, %v226_v22  ;;  %v884_v4 = vsel %vm808_vm3, %v879_v5, %v6839_v36  ;;  %294 = vst.msk [vmem:[#allocation2 + $0x80] sm:$0xf] %vm261_vm0, %v232_v28  ;;  %v6465_v47 = vld [vmem:[#allocation2 + $0x8] sm:$0xff]   ;;  %v889_v37 = vshll.u32 %v6848_v48, 16 }
  0x45   : > { %1063 = vrot.lane.b32.xlu1 %v860_v27, %s6589_s22  ;;  %v6435_v27 = vld [vmem:[#allocation2 + $0x40] sm:$0xff]   ;;  %v234_v43 = vld [vmem:[%s6635_s19 + $0x88] sm:$0xf]  ;;  %565 = vst.msk [vmem:[#allocation3 + $0x8] sm:$0xff] %vm563_vm5, %v6465_v47  ;;  %v235_v14 = vld [vmem:[%s6635_s19 + $0x8c] sm:$0xf]  ;;  %v1864_v50 = vor.u32 %v1863_v16, %v1860_v15  ;;  %v6893_v24 = vor.u32 %v1872_v60, %v1869_v18 }
  0x46   : > { %v876_v61 = vsel %vm808_vm3, %v871_v21, %v875_v2  ;;  %v237_v46 = vld [vmem:[%s6635_s19 + $0x94] sm:$0xf]  ;;  %296 = vst.msk [vmem:[#allocation2 + $0x88] sm:$0xf] %vm261_vm0, %v234_v43  ;;  %297 = vst.msk [vmem:[#allocation2 + $0x8c] sm:$0xf] %vm261_vm0, %v235_v14 }
  0x47   : > { %1057 = vrot.lane.b32.xlu0 %v836_v42, %s6589_s22  ;;  %v233_v42 = vld [vmem:[%s6635_s19 + $0x84] sm:$0xf]  ;;  %299 = vst.msk [vmem:[#allocation2 + $0x94] sm:$0xf] %vm261_vm0, %v237_v46  ;;  %v2415_v34 = vrot.slane %v6435_v27, 2  ;;  %v2417_v53 = vrot.slane %v6875_v29, 2  ;;  %v1874_v55 = vsel %vm1785_vm4, %v1864_v50, %v6893_v24 }
  0x48   : > { %295 = vst.msk [vmem:[#allocation2 + $0x84] sm:$0xf] %vm261_vm0, %v233_v42  ;;  %v891_v56 = vrot.slane %v889_v37, 1  ;;  %v893_v58 = vshrl.u32 %v6848_v48, 16  ;;  %v897_v63 = vshll.u32 %v6880_v31, 16  ;;  %v1876_v1 = vshrl.u32 %v6441_v38, 16 }
  0x49   : > { %1454 = vrot.lane.b32.xlu1 %v1395_v40, %s6587_s20  ;;  %v6466_v40 = vld [vmem:[#allocation2] sm:$0xff]   ;;  %v1879_v2 = vshll.u32 %v6441_v38, 16  ;;  %v2418_v33 = vsel %vm2399_vm2, %v2415_v34, %v2417_v53  ;;  %v1410_v12 = vrot.slane %v6913_v0, 1  ;;  %v6443_v18 = vld [vmem:[#allocation2 + $0x50] sm:$0xff]   ;;  %v901_v27 = vshrl.u32 %v6880_v31, 16 }
  0x4a   : > { %564 = vst.msk [vmem:[#allocation3] sm:$0xff] %vm563_vm5, %v6466_v40  ;;  %v895_v9 = vor.u32 %v893_v58, %v891_v56  ;;  %v899_v10 = vrot.slane %v897_v63, 1  ;;  %v6445_v17 = vld [vmem:[#allocation2 + $0x60] sm:$0xff]   ;;  %v2419_v22 = vrot.slane %v6443_v18, 2 }
  0x4b   : > { %1065 = vrot.lane.b32.xlu0 %v868_v45, %s6589_s22  ;;  %v236_v45 = vld [vmem:[%s6635_s19 + $0x90] sm:$0xf]  ;;  %v6449_v44 = vld [vmem:[#allocation2 + $0x60] sm:$0xff]   ;;  %v6450_v42 = vld [vmem:[#allocation2 + $0x68] sm:$0xff]  }
  0x4c   : > { %298 = vst.msk [vmem:[#allocation2 + $0x90] sm:$0xf] %vm261_vm0, %v236_v45  ;;  %v900_v16 = vsel %vm808_vm3, %v895_v9, %v899_v10  ;;  %v6447_v28 = vld [vmem:[#allocation2 + $0x60] sm:$0xff]   ;;  %v6954_v47 = vld [vmem:[#allocation2 + $0x68] sm:$0xff]   ;;  %v1897_v37 = vshll.u32 %v6449_v44, 16  ;;  %v1903_v43 = vshrl.u32 %v6450_v42, 16  ;;  %v2420_v45 = vsel %vm2399_vm2, %v2417_v53, %v2419_v22 }
  0x4d   : > { %1462 = vrot.lane.b32.xlu1 %v1403_v49, %s6587_s20  ;;  %v1407_v49 = vsel %vm1388_vm1, %v1404_v62, %v1406_v13  ;;  %v1906_v14 = vshll.u32 %v6450_v42, 16  ;;  %v903_v46 = vor.u32 %v901_v27, %v899_v10  ;;  %v6976_v63 = vld [vmem:[#allocation2 + $0x68] sm:$0xff]   ;;  %v6477_v18 = vld [vmem:[%s8179_s1] sm:$0xff]  }
  0x4e   : > { %v1905_v53 = vrot.slane %v1903_v43, 1  ;;  %5905 = vmatprep.subr.bf16.mxu1 %v6477_v18  ;;  %v6484_v42 = vld [vmem:[%s8179_s1 + $0x20] ss:$0 sps:$4 sm:$0x33]  }
  0x4f   : > { %1460 = vrot.lane.b32.xlu0 %v1401_v26, %s6587_s20  ;;  %v1405_v26 = vsel %vm1388_vm1, %v1402_v30, %v1404_v62  ;;  %v1865_v30 = vsel %vm1785_vm4, %v6821_v35, %v1864_v50  ;;  %v1878_v62 = vrot.slane %v1876_v1, 1  ;;  %v1414_v50 = vrot.slane %v6954_v47, 1  ;;  %v6982_v1 = vld [vmem:[#allocation2 + $0x70] sm:$0xff]   ;;  %5906 = vmatpush3.bf16.msra.mxu1 %v6477_v18 }
  0x50   : > { %v1908_v58 = vrot.slane %v1906_v14, 2  ;;  %v7045_v43 = vsel %vm2787_vm6, %v6484_v42, 0  ;;  %v242_v14 = vld [vmem:[%s6635_s19 + $0xa8] sm:$0xf] }
  0x51   : > { %2074 = vrot.lane.b32.xlu1 %v1847_v54, %s6590_s23  ;;  %v6442_v54 = vld [vmem:[#allocation2 + $0x58] sm:$0xff]   ;;  %304 = vst.msk [vmem:[#allocation2 + $0xa8] sm:$0xf] %vm261_vm0, %v242_v14 }
  0x52   : > { %v1888_v7 = vshll.u32 %v6442_v54, 16  ;;  %v6989_v9 = vor.u32 %v1908_v58, %v1905_v53  ;;  %v6464_v53 = vld [vmem:[#allocation2 + $0x80] sm:$0xff]  }
  0x53   : > { %2068 = vrot.lane.b32.xlu0 %v1820_v32, %s6590_s23  ;;  %v885_v32 = vshrl.u32 %v6813_v52, 16  ;;  %v2416_v52 = vsel %vm2399_vm2, %v2413_v57, %v2415_v34  ;;  %v6929_v57 = vld [vmem:[#allocation2 + $0x68] sm:$0xff]   ;;  %v6469_v34 = vld [vmem:[#allocation2 + $0x20] sm:$0xff]   ;;  %v7088_v47 = vld [vmem:[#allocation2 + $0x90] sm:$0xff]  }
  0x54   : > { %v1890_v15 = vrot.slane %v1888_v7, 2  ;;  %v913_v23 = vshll.u32 %v6929_v57, 16  ;;  %568 = vst.msk [vmem:[#allocation3 + $0x20] sm:$0xff] %vm563_vm5, %v6469_v34  ;;  %v7062_v34 = vld [vmem:[#allocation2 + $0x78] sm:$0xff]  }
  0x55   : > { %2465 = vrot.lane.b32.xlu1 %v2406_v6, %s6588_s21  ;;  %v1885_v6 = vshrl.u32 %v6442_v54, 16  ;;  %v887_v35 = vor.u32 %v885_v32, %v6839_v36  ;;  %v6932_v36 = vld [vmem:[#allocation2 + $0x58] sm:$0xff]   ;;  %v1899_v54 = vrot.slane %v1897_v37, 2 }
  0x56   : > { %v2421_v25 = vrot.slane %v6932_v36, 2  ;;  %v244_v36 = vld [vmem:[%s6635_s19 + $0xb0] sm:$0xf] }
  0x57   : > { %2076 = vrot.lane.b32.xlu0 %v1856_v11, %s6590_s23  ;;  %v1408_v11 = vrot.slane %v6439_v39, 1  ;;  %v1887_v5 = vrot.slane %v1885_v6, 1  ;;  %v892_v51 = vsel %vm808_vm3, %v887_v35, %v891_v56  ;;  %v6470_v56 = vld [vmem:[#allocation2 + $0x18] sm:$0xff]   ;;  %v917_v39 = vshrl.u32 %v6929_v57, 16  ;;  %v6457_v6 = vld [vmem:[#allocation2 + $0x70] sm:$0xff]  }
  0x58   : > { %v2422_v40 = vsel %vm2399_vm2, %v2419_v22, %v2421_v25  ;;  %567 = vst.msk [vmem:[#allocation3 + $0x18] sm:$0xff] %vm563_vm5, %v6470_v56  ;;  %v2425_v35 = vrot.slane %v6976_v63, 2  ;;  %v238_v57 = vld [vmem:[%s6635_s19 + $0x98] sm:$0xf]  ;;  %v241_v22 = vld [vmem:[%s6635_s19 + $0xa4] sm:$0xf] }
  0x59   : > { %2473 = vrot.lane.b32.xlu1 %v2414_v41, %s6588_s21  ;;  %v1881_v41 = vrot.slane %v1879_v2, 2  ;;  %v1411_v60 = vsel %vm1388_vm1, %v1408_v11, %v1410_v12  ;;  %v6937_v19 = vor.u32 %v1890_v15, %v1887_v5  ;;  %v1409_v21 = vsel %vm1388_vm1, %v1406_v13, %v1408_v11  ;;  %v6458_v11 = vld [vmem:[#allocation2 + $0x78] sm:$0xff]   ;;  %300 = vst.msk [vmem:[#allocation2 + $0x98] sm:$0xf] %vm261_vm0, %v238_v57  ;;  %v7104_v57 = vld [vmem:[#allocation2 + $0x88] sm:$0xff]  }
  0x5a   : > { %v6952_v13 = vrot.slane %v913_v23, 1  ;;  %303 = vst.msk [vmem:[#allocation2 + $0xa4] sm:$0xf] %vm261_vm0, %v241_v22  ;;  %306 = vst.msk [vmem:[#allocation2 + $0xb0] sm:$0xf] %vm261_vm0, %v244_v36 }
  0x5b   : > { %2471 = vrot.lane.b32.xlu0 %v2412_v20, %s6588_s21  ;;  %v1882_v48 = vor.u32 %v1881_v41, %v1878_v62  ;;  %v905_v20 = vshll.u32 %v6445_v17, 16  ;;  %v246_v36 = vld [vmem:[%s6635_s19 + $0xb8] sm:$0xf] }
  0x5c   : > { %308 = vst.msk [vmem:[#allocation2 + $0xb8] sm:$0xf] %vm261_vm0, %v246_v36 }
  0x5d   : > { %1069 = vrot.lane.b32.xlu1 %v884_v4, %s6589_s22  ;;  %v1892_v8 = vsel %vm1785_vm4, %v1882_v48, %v6937_v19  ;;  %v907_v59 = vrot.slane %v905_v20, 1  ;;  %v909_v4 = vshrl.u32 %v6445_v17, 16  ;;  %v1883_v3 = vsel %vm1785_vm4, %v6893_v24, %v1882_v48  ;;  %v6965_v24 = vld [vmem:[#allocation2 + $0x60] sm:$0xff]  }
  0x5e   : > { %v2423_v10 = vrot.slane %v6965_v24, 2  ;;  %v1416_v17 = vrot.slane %v6982_v1, 1  ;;  %v1915_v48 = vshll.u32 %v6457_v6, 16  ;;  %v1921_v20 = vshrl.u32 %v6458_v11, 16  ;;  %v6459_v24 = vld [vmem:[#allocation2 + $0x70] sm:$0xff]  }
  0x5f   : > { %1067 = vrot.lane.b32.xlu0 %v876_v61, %s6589_s22  ;;  %v1894_v61 = vshrl.u32 %v6449_v44, 16  ;;  %v911_v31 = vor.u32 %v909_v4, %v907_v59  ;;  %v1924_v44 = vshll.u32 %v6458_v11, 16  ;;  %v6482_v4 = vld [vmem:[#allocation2 + $0x10] sm:$0xff]   ;;  %v1933_v1 = vshll.u32 %v6464_v53, 16 }
  0x60   : > { %v2426_v27 = vsel %vm2399_vm2, %v2423_v10, %v2425_v35  ;;  %566 = vst.msk [vmem:[#allocation3 + $0x10] sm:$0xff] %vm563_vm5, %v6482_v4  ;;  %v2424_v37 = vsel %vm2399_vm2, %v2421_v25, %v2423_v10  ;;  %v245_v25 = vld [vmem:[%s6635_s19 + $0xb4] sm:$0xf]  ;;  %v1417_v58 = vsel %vm1388_vm1, %v1414_v50, %v1416_v17 }
  0x61   : > { %1466 = vrot.lane.b32.xlu1 %v1407_v49, %s6587_s20  ;;  %v1412_v49 = vrot.slane %v6447_v28, 1  ;;  %v1896_v38 = vrot.slane %v1894_v61, 1  ;;  %v916_v29 = vsel %vm808_vm3, %v911_v31, %v6952_v13  ;;  %v6483_v28 = vld [vmem:[%s8179_s1 + $0x8] ss:$0 sps:$4 sm:$0x33]   ;;  %v6487_v61 = vld [vmem:[#allocation2 + $0x30] sm:$0xff]  }
  0x62   : > { %6361 = vmatprep.subr.msk.bf16.mxu1 %vm2787_vm6, %v6483_v28  ;;  %v2789_v31 = vsel %vm2787_vm6, %v6483_v28, 0  ;;  %570 = vst.msk [vmem:[#allocation3 + $0x30] sm:$0xff] %vm563_vm5, %v6487_v61 }
  0x63   : > { %1464 = vrot.lane.b32.xlu0 %v1405_v26, %s6587_s20  ;;  %v6967_v26 = vld [vmem:[#allocation2 + $0x70] sm:$0xff]   ;;  %v1415_v7 = vsel %vm1388_vm1, %v1412_v49, %v1414_v50  ;;  %v1413_v62 = vsel %vm1388_vm1, %v1410_v12, %v1412_v49  ;;  %5908 = vmatpush3.bf16.msra.mxu1 %v2789_v31  ;;  %v1926_v49 = vrot.slane %v1924_v44, 2  ;;  %307 = vst.msk [vmem:[#allocation2 + $0xb4] sm:$0xf] %vm261_vm0, %v245_v25 }
  0x64   : > { %v921_v32 = vshll.u32 %v6967_v26, 16  ;;  %v925_v41 = vshrl.u32 %v6967_v26, 16  ;;  %v6474_v44 = vld [vmem:[#allocation2 + $0x90] sm:$0xff]  }
  0x65   : > { %2080 = vrot.lane.b32.xlu1 %v1874_v55, %s6590_s23  ;;  %v6970_v55 = vld [vmem:[#allocation2 + $0x78] sm:$0xff]  }
  0x66   : > { %v929_v2 = vshll.u32 %v6970_v55, 16  ;;  %v923_v5 = vrot.slane %v921_v32, 1  ;;  %v6467_v32 = vld [vmem:[#allocation2 + $0x88] sm:$0xff]   ;;  %v933_v11 = vshrl.u32 %v6970_v55, 16  ;;  %v953_v55 = vshll.u32 %v7088_v47, 16 }
  0x67   : > { %2078 = vrot.lane.b32.xlu0 %v1865_v30, %s6590_s23  ;;  %v908_v30 = vsel %vm808_vm3, %v903_v46, %v907_v59  ;;  %v1923_v46 = vrot.slane %v1921_v20, 1  ;;  %v949_v22 = vshrl.u32 %v6467_v32, 16 }
  0x68   : > { %v7001_v15 = vrot.slane %v929_v2, 1 }
  0x69   : > { %2477 = vrot.lane.b32.xlu1 %v2418_v33, %s6588_s21  ;;  %v1900_v33 = vor.u32 %v1899_v54, %v1896_v38  ;;  %v7065_v38 = vld [vmem:[#allocation2 + $0x80] sm:$0xff]  }
  0x6a   : > { %v935_v20 = vor.u32 %v933_v11, %v7001_v15  ;;  %v254_v11 = vld [vmem:[%s6635_s19 + $0xd8] sm:$0xf] }
  0x6b   : > { %2475 = vrot.lane.b32.xlu0 %v2416_v52, %s6588_s21  ;;  %v6992_v52 = vld [vmem:[#allocation2 + $0x78] sm:$0xff]   ;;  %v1910_v0 = vsel %vm1785_vm4, %v1900_v33, %v6989_v9  ;;  %v1901_v23 = vsel %vm1785_vm4, %v6937_v19, %v1900_v33  ;;  %v927_v19 = vor.u32 %v925_v41, %v923_v5  ;;  %v1930_v33 = vshrl.u32 %v6464_v53, 16  ;;  %v7097_v41 = vld [vmem:[#allocation2 + $0x80] sm:$0xff]   ;;  %v6508_v53 = vld [vmem:[#allocation2 + $0x50] sm:$0xff]   ;;  %316 = vst.msk [vmem:[#allocation2 + $0xd8] sm:$0xf] %vm261_vm0, %v254_v11 }
  0x6c   : > { %v1418_v12 = vrot.slane %v6992_v52, 1  ;;  %v7128_v52 = vrot.slane %v953_v55, 1  ;;  %574 = vst.msk [vmem:[#allocation3 + $0x50] sm:$0xff] %vm563_vm5, %v6508_v53 }
  0x6d   : > { %1073 = vrot.lane.b32.xlu1 %v900_v16, %s6589_s22  ;;  %v1912_v16 = vshrl.u32 %v6457_v6, 16  ;;  %v2429_v6 = vrot.slane %v7062_v34, 2 }
  0x6e   : > { %v1419_v54 = vsel %vm1388_vm1, %v1416_v17, %v1418_v12  ;;  %v6473_v17 = vld [vmem:[#allocation2 + $0x88] sm:$0xff]  }
  0x6f   : > { %1071 = vrot.lane.b32.xlu0 %v892_v51, %s6589_s22  ;;  %v6478_v51 = vld [vmem:[%s8179_s1 + $0x18] sm:$0xff]   ;;  %v1914_v59 = vrot.slane %v1912_v16, 1 }
  0x70   : > { %6009 = vmatprep.subr.bf16.mxu0 %v6478_v51 }
  0x71   : > { %1470 = vrot.lane.b32.xlu1 %v1411_v60, %s6587_s20  ;;  %v239_v60 = vld [vmem:[%s6635_s19 + $0x9c] sm:$0xf]  ;;  %6010 = vmatpush3.bf16.msra.mxu0 %v6478_v51  ;;  %v1935_v51 = vrot.slane %v1933_v1, 2  ;;  %v252_v1 = vld [vmem:[%s6635_s19 + $0xd0] sm:$0xf] }
  0x72   : > { %301 = vst.msk [vmem:[#allocation2 + $0x9c] sm:$0xf] %vm261_vm0, %v239_v60  ;;  %6363 = vmatprep.subr.msk.bf16.mxu0 %vm2787_vm6, %v6484_v42  ;;  %314 = vst.msk [vmem:[#allocation2 + $0xd0] sm:$0xf] %vm261_vm0, %v252_v1 }
  0x73   : > { %1468 = vrot.lane.b32.xlu0 %v1409_v21, %s6587_s20  ;;  %v240_v21 = vld [vmem:[%s6635_s19 + $0xa0] sm:$0xf] }
  0x74   : > { %302 = vst.msk [vmem:[#allocation2 + $0xa0] sm:$0xf] %vm261_vm0, %v240_v21  ;;  %v2431_v21 = vrot.slane %v7097_v41, 2 }
  0x75   : > { %2084 = vrot.lane.b32.xlu1 %v1892_v8, %s6590_s23  ;;  %v6481_v8 = vld [vmem:[#allocation2 + $0x28] sm:$0xff]   ;;  %6012 = vmatpush3.bf16.msra.mxu0 %v7045_v43 }
  0x76   : > { %569 = vst.msk [vmem:[#allocation3 + $0x28] sm:$0xff] %vm563_vm5, %v6481_v8  ;;  %v941_v8 = vshrl.u32 %v7065_v38, 16 }
  0x77   : > { %2082 = vrot.lane.b32.xlu0 %v1883_v3, %s6590_s23  ;;  %v1917_v3 = vrot.slane %v1915_v48, 2 }
  0x79   : > { %2481 = vrot.lane.b32.xlu1 %v2422_v40, %s6588_s21  ;;  %v919_v40 = vor.u32 %v917_v39, %v6952_v13  ;;  %v932_v13 = vsel %vm808_vm3, %v927_v19, %v7001_v15  ;;  %v1918_v56 = vor.u32 %v1917_v3, %v1914_v59  ;;  %v2427_v39 = vrot.slane %v6459_v24, 2  ;;  %v6498_v15 = vld [vmem:[#allocation2 + $0x40] sm:$0xff]   ;;  %v6499_v19 = vld [vmem:[#allocation2 + $0x38] sm:$0xff]  }
  0x7a   : > { %v1939_v59 = vshrl.u32 %v6473_v17, 16  ;;  %572 = vst.msk [vmem:[#allocation3 + $0x40] sm:$0xff] %vm563_vm5, %v6498_v15  ;;  %571 = vst.msk [vmem:[#allocation3 + $0x38] sm:$0xff] %vm563_vm5, %v6499_v19  ;;  %v248_v24 = vld [vmem:[%s6635_s19 + $0xc0] sm:$0xf]  ;;  %v957_v15 = vshrl.u32 %v7088_v47, 16 }
  0x7b   : > { %2479 = vrot.lane.b32.xlu0 %v2420_v45, %s6588_s21  ;;  %v243_v45 = vld [vmem:[%s6635_s19 + $0xac] sm:$0xf]  ;;  %v924_v26 = vsel %vm808_vm3, %v919_v40, %v923_v5  ;;  %v1919_v50 = vsel %vm1785_vm4, %v6989_v9, %v1918_v56  ;;  %v945_v5 = vshll.u32 %v6467_v32, 16  ;;  %v2430_v16 = vsel %vm2399_vm2, %v2427_v39, %v2429_v6  ;;  %310 = vst.msk [vmem:[#allocation2 + $0xc0] sm:$0xf] %vm261_vm0, %v248_v24 }
  0x7c   : > { %305 = vst.msk [vmem:[#allocation2 + $0xac] sm:$0xf] %vm261_vm0, %v243_v45  ;;  %v1932_v9 = vrot.slane %v1930_v33, 1  ;;  %v2428_v60 = vsel %vm2399_vm2, %v2425_v35, %v2427_v39  ;;  %v2432_v40 = vsel %vm2399_vm2, %v2429_v6, %v2431_v21  ;;  %v1941_v14 = vrot.slane %v1939_v59, 1  ;;  %v6509_v39 = vld [vmem:[#allocation2 + $0x48] sm:$0xff]   ;;  %v7164_v33 = vld [vmem:[#allocation2 + $0x90] sm:$0xff]  }
  0x7d   : > { %1077 = vrot.lane.b32.xlu1 %v916_v29, %s6589_s22  ;;  %v7072_v29 = vor.u32 %v1926_v49, %v1923_v46  ;;  %v947_v35 = vrot.slane %v945_v5, 1  ;;  %v1951_v45 = vshll.u32 %v6474_v44, 16  ;;  %v7142_v46 = vld [vmem:[#allocation2 + $0x98] sm:$0xff]   ;;  %v250_v32 = vld [vmem:[%s6635_s19 + $0xc8] sm:$0xf]  ;;  %573 = vst.msk [vmem:[#allocation3 + $0x48] sm:$0xff] %vm563_vm5, %v6509_v39 }
  0x7e   : > { %v7126_v3 = vor.u32 %v1935_v51, %v1932_v9  ;;  %v247_v49 = vld [vmem:[%s6635_s19 + $0xbc] sm:$0xf]  ;;  %312 = vst.msk [vmem:[#allocation2 + $0xc8] sm:$0xf] %vm261_vm0, %v250_v32  ;;  %v961_v9 = vshll.u32 %v7142_v46, 16  ;;  %v6518_v51 = vld [vmem:[#allocation2 + $0x60] sm:$0xff]  }
  0x7f   : > { %1075 = vrot.lane.b32.xlu0 %v908_v30, %s6589_s22  ;;  %v7080_v30 = vld [vmem:[#allocation2 + $0x80] sm:$0xff]   ;;  %v1928_v2 = vsel %vm1785_vm4, %v1918_v56, %v7072_v29  ;;  %v951_v31 = vor.u32 %v949_v22, %v947_v35  ;;  %309 = vst.msk [vmem:[#allocation2 + $0xbc] sm:$0xf] %vm261_vm0, %v247_v49 }
  0x80   : > { %576 = vst.msk [vmem:[#allocation3 + $0x60] sm:$0xff] %vm563_vm5, %v6518_v51 }
  0x81   : > { %1474 = vrot.lane.b32.xlu1 %v1415_v7, %s6587_s20  ;;  %v937_v7 = vshll.u32 %v7065_v38, 16  ;;  %v249_v38 = vld [vmem:[%s6635_s19 + $0xc4] sm:$0xf] }
  0x82   : > { %311 = vst.msk [vmem:[#allocation2 + $0xc4] sm:$0xf] %vm261_vm0, %v249_v38  ;;  %v7245_v38 = vld [vmem:[#allocation2 + $0x98] sm:$0xff]  }
  0x83   : > { %1472 = vrot.lane.b32.xlu0 %v1413_v62, %s6587_s20  ;;  %v1420_v62 = vrot.slane %v7080_v30, 1  ;;  %v965_v30 = vshrl.u32 %v7142_v46, 16  ;;  %v6496_v11 = vld [vmem:[#allocation2 + $0xa8] sm:$0xff]  }
  0x85   : > { %2088 = vrot.lane.b32.xlu1 %v1910_v0, %s6590_s23  ;;  %v939_v0 = vrot.slane %v937_v7, 1  ;;  %v1421_v63 = vsel %vm1388_vm1, %v1418_v12, %v1420_v62  ;;  %v1422_v12 = vrot.slane %v7104_v57, 1  ;;  %v7162_v7 = vld [vmem:[#allocation2 + $0x88] sm:$0xff]   ;;  %v963_v57 = vrot.slane %v961_v9, 1 }
  0x87   : > { %2086 = vrot.lane.b32.xlu0 %v1901_v23, %s6590_s23  ;;  %v7114_v23 = vld [vmem:[#allocation2 + $0x90] sm:$0xff]   ;;  %v940_v28 = vsel %vm808_vm3, %v935_v20, %v939_v0  ;;  %v943_v34 = vor.u32 %v941_v8, %v939_v0 }
  0x88   : > { %v1424_v61 = vrot.slane %v7114_v23, 1 }
  0x89   : > { %2485 = vrot.lane.b32.xlu1 %v2426_v27, %s6588_s21  ;;  %v1942_v27 = vshll.u32 %v6473_v17, 16  ;;  %v948_v5 = vsel %vm808_vm3, %v943_v34, %v947_v35  ;;  %v7174_v17 = vld [vmem:[#allocation2 + $0xa0] sm:$0xff]   ;;  %v2435_v35 = vrot.slane %v7164_v33, 2  ;;  %v259_v33 = vld [vmem:[%s6635_s19 + $0xec] sm:$0xf] }
  0x8a   : > { %v1425_v55 = vsel %vm1388_vm1, %v1422_v12, %v1424_v61  ;;  %321 = vst.msk [vmem:[#allocation2 + $0xec] sm:$0xf] %vm261_vm0, %v259_v33 }
  0x8b   : > { %2483 = vrot.lane.b32.xlu0 %v2424_v37, %s6588_s21  ;;  %v1948_v37 = vshrl.u32 %v6474_v44, 16  ;;  %v1423_v44 = vsel %vm1388_vm1, %v1420_v62, %v1422_v12  ;;  %v969_v62 = vshll.u32 %v7174_v17, 16 }
  0x8d   : > { %1081 = vrot.lane.b32.xlu1 %v932_v13, %s6589_s22  ;;  %v1944_v13 = vrot.slane %v1942_v27, 2  ;;  %v1950_v56 = vrot.slane %v1948_v37, 1  ;;  %v7220_v27 = vld [vmem:[#allocation2 + $0xa0] sm:$0xff]  }
  0x8f   : > { %1079 = vrot.lane.b32.xlu0 %v924_v26, %s6589_s22  ;;  %v1937_v26 = vsel %vm1785_vm4, %v7072_v29, %v7126_v3  ;;  %v956_v29 = vsel %vm808_vm3, %v951_v31, %v7128_v52  ;;  %v7227_v31 = vrot.slane %v969_v62, 1 }
  0x91   : > { %1478 = vrot.lane.b32.xlu1 %v1419_v54, %s6587_s20 }
  0x93   : > { %1476 = vrot.lane.b32.xlu0 %v1417_v58, %s6587_s20  ;;  %v1953_v58 = vrot.slane %v1951_v45, 2  ;;  %v959_v45 = vor.u32 %v957_v15, %v7128_v52 }
  0x95   : > { %2092 = vrot.lane.b32.xlu1 %v1928_v2, %s6590_s23  ;;  %v251_v2 = vld [vmem:[%s6635_s19 + $0xcc] sm:$0xf]  ;;  %v7192_v20 = vor.u32 %v1953_v58, %v1950_v56  ;;  %v7251_v56 = vld [vmem:[#allocation2 + $0xa0] sm:$0xff]  }
  0x96   : > { %313 = vst.msk [vmem:[#allocation2 + $0xcc] sm:$0xf] %vm261_vm0, %v251_v2  ;;  %v2439_v9 = vrot.slane %v7251_v56, 2 }
  0x97   : > { %v7092_v10 = vpop.permute.xlu1 %1456  ;;  %2090 = vrot.lane.b32.xlu0 %v1919_v50, %s6590_s23  ;;  %v253_v50 = vld [vmem:[%s6635_s19 + $0xd4] sm:$0xf] }
  0x98   : > { %315 = vst.msk [vmem:[#allocation2 + $0xd4] sm:$0xf] %vm261_vm0, %v253_v50  ;;  %v2437_v50 = vrot.slane %v7245_v38, 2 }
  0x99   : > { %v7101_v18 = vpop.permute.xlu0 %1450  ;;  %2489 = vrot.lane.b32.xlu1 %v2430_v16, %s6588_s21  ;;  %v255_v16 = vld [vmem:[%s6635_s19 + $0xdc] sm:$0xf] }
  0x9a   : > { %317 = vst.msk [vmem:[#allocation2 + $0xdc] sm:$0xf] %vm261_vm0, %v255_v16 }
  0x9b   : > { %v7109_v48 = vpop.permute.xlu1 %1458  ;;  %2487 = vrot.lane.b32.xlu0 %v2428_v60, %s6588_s21  ;;  %v1945_v60 = vor.u32 %v1944_v13, %v1941_v14  ;;  %v1428_v13 = vrot.slane %v7220_v27, 1 }
  0x9d   : > { %v1453_v4 = vpop.permute.xlu0 %1452  ;;  %1480 = vrot.lane.b32.xlu1 %v1421_v63, %s6587_s20  ;;  %v6489_v63 = vld [vmem:[#allocation2 + $0xa0] sm:$0xff]   ;;  %v1955_v59 = vsel %vm1785_vm4, %v1945_v60, %v7192_v20 }
  0x9e   : > { %v1966_v12 = vshrl.u32 %v6489_v63, 16 }
  0x9f   : > { %v7124_v42 = vpop.permute.xlu1 %2467  ;;  %1083 = vrot.lane.b32.xlu0 %v940_v28, %s6589_s22 }
  0xa0   : > { %v1968_v24 = vrot.slane %v1966_v12, 1  ;;  %v6528_v12 = vld [vmem:[#allocation2 + $0x70] sm:$0xff]  }
  0xa1   : > { %v7140_v25 = vpop.permute.xlu0 %2461  ;;  %2491 = vrot.lane.b32.xlu1 %v2432_v40, %s6588_s21  ;;  %v967_v40 = vor.u32 %v965_v30, %v963_v57  ;;  %578 = vst.msk [vmem:[#allocation3 + $0x70] sm:$0xff] %vm563_vm5, %v6528_v12 }
  0xa3   : > { %v1056_v54 = vpop.permute.xlu1 %1055  ;;  %2094 = vrot.lane.b32.xlu0 %v1937_v26, %s6590_s23  ;;  %v972_v41 = vsel %vm808_vm3, %v967_v40, %v7227_v31 }
  0xa4   : > { %1145 = vst.msk [vmem:[#allocation3 + $0x8] sm:$0xff] %vm1143_vm7, %v1056_v54  ;;  %v964_v54 = vsel %vm808_vm3, %v959_v45, %v963_v57  ;;  %v2438_v45 = vsel %vm2399_vm2, %v2435_v35, %v2437_v50 }
  0xa5   : > { %v1054_v6 = vpop.permute.xlu0 %1053  ;;  %1542 = vst.msk [vmem:[#allocation3 + $0x8] sm:$0xff] %vm1540_vm8, %v1453_v4  ;;  %1087 = vrot.lane.b32.xlu1 %v956_v29, %s6589_s22  ;;  %v1946_v4 = vsel %vm1785_vm4, %v7126_v3, %v1945_v60  ;;  %v7254_v29 = vld [vmem:[#allocation2 + $0xb0] sm:$0xff]   ;;  %v7273_v60 = vld [vmem:[#allocation2 + $0xa8] sm:$0xff]  }
  0xa6   : > { %1144 = vst.msk [vmem:[#allocation3] sm:$0xff] %vm1143_vm7, %v1054_v6 }
  0xa7   : > { %v1062_v0 = vpop.permute.xlu1 %1061  ;;  %1541 = vst.msk [vmem:[#allocation3] sm:$0xff] %vm1540_vm8, %v7101_v18  ;;  %1085 = vrot.lane.b32.xlu0 %v948_v5, %s6589_s22  ;;  %v6488_v18 = vld [vmem:[#allocation2 + $0x98] sm:$0xff]   ;;  %v6497_v5 = vld [vmem:[#allocation2 + $0xb0] sm:$0xff]  }
  0xa8   : > { %1148 = vst.msk [vmem:[#allocation3 + $0x20] sm:$0xff] %vm1143_vm7, %v1062_v0  ;;  %v1957_v19 = vshrl.u32 %v6488_v18, 16  ;;  %v1960_v28 = vshll.u32 %v6488_v18, 16  ;;  %v7278_v18 = vld [vmem:[#allocation2 + $0xb0] sm:$0xff]   ;;  %v1984_v57 = vshrl.u32 %v6497_v5, 16 }
  0xa9   : > { %v1060_v22 = vpop.permute.xlu0 %1059  ;;  %1545 = vst.msk [vmem:[#allocation3 + $0x20] sm:$0xff] %vm1540_vm8, %v7109_v48  ;;  %1484 = vrot.lane.b32.xlu1 %v1425_v55, %s6587_s20  ;;  %v2433_v48 = vrot.slane %v7162_v7, 2  ;;  %v6519_v7 = vld [vmem:[#allocation2 + $0x58] sm:$0xff]   ;;  %v985_v55 = vshll.u32 %v7254_v29, 16 }
  0xaa   : > { %1147 = vst.msk [vmem:[#allocation3 + $0x18] sm:$0xff] %vm1143_vm7, %v1060_v22  ;;  %v1959_v46 = vrot.slane %v1957_v19, 1  ;;  %v1962_v49 = vrot.slane %v1960_v28, 2  ;;  %v1987_v19 = vshll.u32 %v6497_v5, 16  ;;  %v7299_v28 = vld [vmem:[#allocation2 + $0xa8] sm:$0xff]  }
  0xab   : > { %1544 = vst.msk [vmem:[#allocation3 + $0x18] sm:$0xff] %vm1540_vm8, %v7092_v10  ;;  %v2071_v8 = vpop.permute.xlu1 %2070  ;;  %1482 = vrot.lane.b32.xlu0 %v1423_v44, %s6587_s20  ;;  %v6485_v10 = vld [vmem:[#allocation2 + $0x98] sm:$0xff]   ;;  %v2436_v47 = vsel %vm2399_vm2, %v2433_v48, %v2435_v35  ;;  %v2434_v14 = vsel %vm2399_vm2, %v2431_v21, %v2433_v48  ;;  %v1978_v48 = vshll.u32 %v6496_v11, 16  ;;  %v7290_v15 = vrot.slane %v985_v55, 1 }
  0xac   : > { %2158 = vst.msk [vmem:[#allocation3 + $0x18] sm:$0xff] %vm2154_vm9, %v2071_v8  ;;  %v1426_v36 = vrot.slane %v6485_v10, 1  ;;  %v1963_v32 = vor.u32 %v1962_v49, %v1959_v46  ;;  %v1430_v10 = vrot.slane %v7273_v60, 1  ;;  %v1986_v46 = vrot.slane %v1984_v57, 1  ;;  %v257_v49 = vld [vmem:[%s6635_s19 + $0xe4] sm:$0xf] }
  0xad   : > { %2555 = vst.msk [vmem:[#allocation3 + $0x18] sm:$0xff] %vm2551_vm10, %v7124_v42  ;;  %v2065_v37 = vpop.permute.xlu0 %2064  ;;  %2098 = vrot.lane.b32.xlu1 %v1955_v59, %s6590_s23  ;;  %v1969_v42 = vshll.u32 %v6489_v63, 16  ;;  %v1975_v63 = vshrl.u32 %v6496_v11, 16  ;;  %v973_v59 = vshrl.u32 %v7174_v17, 16  ;;  %v1432_v17 = vrot.slane %v7278_v18, 1  ;;  %v6540_v11 = vld [vmem:[#allocation2 + $0x80] sm:$0xff]  }
  0xae   : > { %2155 = vst.msk [vmem:[#allocation3] sm:$0xff] %vm2154_vm9, %v2065_v37  ;;  %v1429_v39 = vsel %vm1388_vm1, %v1426_v36, %v1428_v13  ;;  %v1427_v16 = vsel %vm1388_vm1, %v1424_v61, %v1426_v36  ;;  %v1964_v8 = vsel %vm1785_vm4, %v7192_v20, %v1963_v32  ;;  %v2440_v20 = vsel %vm2399_vm2, %v2437_v50, %v2439_v9  ;;  %v6541_v5 = vld [vmem:[%s8179_s1 + $0x2c] ss:$0 sps:$4 sm:$0x33]  }
  0xaf   : > { %2552 = vst.msk [vmem:[#allocation3] sm:$0xff] %vm2551_vm10, %v7140_v25  ;;  %2096 = vrot.lane.b32.xlu0 %v1946_v4, %s6590_s23  ;;  %v2073_v3 = vpop.permute.xlu1 %2072  ;;  %v1971_v21 = vrot.slane %v1969_v42, 2  ;;  %v6492_v25 = vld [vmem:[#allocation2 + $0xa8] sm:$0xff]   ;;  %v1980_v40 = vrot.slane %v1978_v48, 2  ;;  %v7302_v42 = vld [vmem:[#allocation2 + $0xb8] sm:$0xff]   ;;  %v975_v36 = vor.u32 %v973_v59, %v7227_v31  ;;  %v1989_v31 = vrot.slane %v1987_v19, 2 }
  0xb0   : > { %2159 = vst.msk [vmem:[#allocation3 + $0x20] sm:$0xff] %vm2154_vm9, %v2073_v3  ;;  %v977_v6 = vshll.u32 %v6492_v25, 16  ;;  %v981_v51 = vshrl.u32 %v6492_v25, 16  ;;  %v256_v3 = vld [vmem:[%s6635_s19 + $0xe0] sm:$0xf]  ;;  %v4383_v55 = vsel %vm2787_vm6, %v6541_v5, 0 }
  0xb1   : > { %v2067_v26 = vpop.permute.xlu0 %2066  ;;  %2495 = vrot.lane.b32.xlu1 %v2436_v47, %s6588_s21  ;;  %v7260_v2 = vor.u32 %v1971_v21, %v1968_v24  ;;  %575 = vst.msk [vmem:[#allocation3 + $0x58] sm:$0xff] %vm563_vm5, %v6519_v7  ;;  %v1977_v47 = vrot.slane %v1975_v63, 1  ;;  %v258_v24 = vld [vmem:[%s6635_s19 + $0xe8] sm:$0xf]  ;;  %v1433_v7 = vsel %vm1388_vm1, %v1430_v10, %v1432_v17  ;;  %v7346_v50 = vor.u32 %v1989_v31, %v1986_v46  ;;  %v7369_v48 = vld [vmem:[#allocation2 + $0xb8] sm:$0xff]   ;;  %v7372_v59 = vld [vmem:[#allocation2 + $0xc0] sm:$0xff]  }
  0xb2   : > { %2156 = vst.msk [vmem:[#allocation3 + $0x8] sm:$0xff] %vm2154_vm9, %v2067_v26  ;;  %v979_v23 = vrot.slane %v977_v6, 1  ;;  %v6532_v26 = vld [vmem:[%s8179_s1 + $0xc] sm:$0xff]   ;;  %v6533_v21 = vld [vmem:[%s8179_s1 + $0x24] sm:$0xff]   ;;  %v997_v63 = vshrl.u32 %v7302_v42, 16 }
  0xb3   : > { %2493 = vrot.lane.b32.xlu0 %v2434_v14, %s6588_s21  ;;  %v2470_v52 = vpop.permute.xlu1 %2469  ;;  %v1973_v22 = vsel %vm1785_vm4, %v1963_v32, %v7260_v2  ;;  %v6529_v14 = vld [vmem:[#allocation2 + $0x68] sm:$0xff]   ;;  %318 = vst.msk [vmem:[#allocation2 + $0xe0] sm:$0xf] %vm261_vm0, %v256_v3  ;;  %319 = vst.msk [vmem:[#allocation2 + $0xe4] sm:$0xf] %vm261_vm0, %v257_v49  ;;  %5957 = vmatprep.subr.bf16.mxu1 %v6532_v26  ;;  %v993_v32 = vshll.u32 %v7302_v42, 16 }
  0xb4   : > { %v7243_v34 = vld [vmem:[#allocation3 + $0x18] sm:$0xff]  ;;  %2556 = vst.msk [vmem:[#allocation3 + $0x20] sm:$0xff] %vm2551_vm10, %v2470_v52  ;;  %v983_v4 = vor.u32 %v981_v51, %v979_v23  ;;  %v6538_v52 = vld [vmem:[#allocation2 + $0x78] sm:$0xff]   ;;  %v980_v38 = vsel %vm808_vm3, %v975_v36, %v979_v23  ;;  %6061 = vmatprep.subr.bf16.mxu0 %v6533_v21 }
  0xb5   : > { %6013 = vmatprep.mubr.msk.bf16.mxu0 %vm2714_vm11, %v7243_v34  ;;  %v2464_v53 = vpop.permute.xlu0 %2463  ;;  %1091 = vrot.lane.b32.xlu1 %v972_v41, %s6589_s22  ;;  %320 = vst.msk [vmem:[#allocation2 + $0xe8] sm:$0xf] %vm261_vm0, %v258_v24  ;;  %v6539_v6 = vld [vmem:[#allocation2 + $0x88] sm:$0xff]   ;;  %v6506_v51 = vld [vmem:[#allocation2 + $0xb8] sm:$0xff]   ;;  %v995_v60 = vrot.slane %v993_v32, 1 }
  0xb6   : > { %2553 = vst.msk [vmem:[#allocation3 + $0x8] sm:$0xff] %vm2551_vm10, %v2464_v53  ;;  %v2678_v58 = vld [vmem:[#allocation3] sm:$0xff]  ;;  %v988_v35 = vsel %vm808_vm3, %v983_v4, %v7290_v15  ;;  %v2441_v53 = vrot.slane %v7299_v28, 2  ;;  %v1996_v4 = vshll.u32 %v6506_v51, 16  ;;  %v7435_v32 = vld [vmem:[#allocation2 + $0xc8] sm:$0xff]  }
  0xb7   : > { %1089 = vrot.lane.b32.xlu0 %v964_v54, %s6589_s22  ;;  %5909 = vmatprep.mubr.msk.bf16.mxu1 %vm2714_vm11, %v2678_v58  ;;  %v1064_v1 = vpop.permute.xlu1 %1063  ;;  %577 = vst.msk [vmem:[#allocation3 + $0x68] sm:$0xff] %vm563_vm5, %v6529_v14  ;;  %v7332_v54 = vld [vmem:[#allocation2 + $0xb0] sm:$0xff]   ;;  %v7335_v58 = vld [vmem:[#allocation2 + $0xc0] sm:$0xff]   ;;  %579 = vst.msk [vmem:[#allocation3 + $0x78] sm:$0xff] %vm563_vm5, %v6538_v52 }
  0xb8   : > { %1149 = vst.msk [vmem:[#allocation3 + $0x28] sm:$0xff] %vm1143_vm7, %v1064_v1  ;;  %v1981_v1 = vor.u32 %v1980_v40, %v1977_v47  ;;  %v1001_v23 = vshll.u32 %v7335_v58, 16  ;;  %v1434_v47 = vrot.slane %v7369_v48, 1  ;;  %v1436_v40 = vrot.slane %v7372_v59, 1  ;;  %v6546_v52 = vld [vmem:[#allocation2 + $0xa8] sm:$0xff]  }
  0xb9   : > { %v1058_v0 = vpop.permute.xlu0 %1057  ;;  %1488 = vrot.lane.b32.xlu1 %v1429_v39, %s6587_s20  ;;  %581 = vst.msk [vmem:[#allocation3 + $0x88] sm:$0xff] %vm563_vm5, %v6539_v6  ;;  %580 = vst.msk [vmem:[#allocation3 + $0x80] sm:$0xff] %vm563_vm5, %v6540_v11  ;;  %v2442_v42 = vsel %vm2399_vm2, %v2439_v9, %v2441_v53  ;;  %v1998_v46 = vrot.slane %v1996_v4, 2  ;;  %v6544_v9 = vld [vmem:[%s8179_s1 + $0x14] ss:$0 sps:$4 sm:$0x33]  }
  0xba   : > { %1146 = vst.msk [vmem:[#allocation3 + $0x10] sm:$0xff] %vm1143_vm7, %v1058_v0  ;;  %v1431_v0 = vsel %vm1388_vm1, %v1428_v13, %v1430_v10  ;;  %v1991_v27 = vsel %vm1785_vm4, %v1981_v1, %v7346_v50  ;;  %v2443_v13 = vrot.slane %v7332_v54, 2  ;;  %v1982_v57 = vsel %vm1785_vm4, %v7260_v2, %v1981_v1  ;;  %v6514_v6 = vld [vmem:[#allocation2 + $0xc8] sm:$0xff]   ;;  %v7440_v1 = vld [vmem:[%s8179_s1 + $0x18] sm:$0xff]  }
  0xbb   : > { %1486 = vrot.lane.b32.xlu0 %v1427_v16, %s6587_s20  ;;  %v1455_v61 = vpop.permute.xlu1 %1454  ;;  %v7281_v44 = vld [vmem:[#allocation3 + $0x20] sm:$0xff]  ;;  %v3346_v31 = vsel %vm2787_vm6, %v6544_v9, 0  ;;  %585 = vst.msk [vmem:[#allocation3 + $0xa8] sm:$0xff] %vm563_vm5, %v6546_v52  ;;  %v1009_v48 = vshll.u32 %v7435_v32, 16  ;;  %v1013_v59 = vshrl.u32 %v7435_v32, 16 }
  0xbc   : > { %1543 = vst.msk [vmem:[#allocation3 + $0x10] sm:$0xff] %vm1540_vm8, %v1455_v61  ;;  %6014 = vmatmul.mubr.msk.bf16.vlgmr.msra.gmra.mrb[0].mxu0 %vm2714_vm11, %v7281_v44  ;;  %v6507_v61 = vld [vmem:[#allocation2 + $0xc0] sm:$0xff]   ;;  %v2444_v12 = vsel %vm2399_vm2, %v2441_v53, %v2443_v13 }
  0xbd   : > { %v1066_v30 = vpop.permute.xlu0 %1065  ;;  %v2679_v62 = vld [vmem:[#allocation3 + $0x8] sm:$0xff]  ;;  %2102 = vrot.lane.b32.xlu1 %v1973_v22, %s6590_s23  ;;  %6062 = vmatpush3.bf16.msra.mxu0 %v6533_v21  ;;  %v2002_v19 = vshrl.u32 %v6507_v61, 16  ;;  %v2005_v28 = vshll.u32 %v6507_v61, 16  ;;  %v6516_v61 = vld [vmem:[#allocation2 + $0xd0] sm:$0xff]  }
  0xbe   : > { %1150 = vst.msk [vmem:[#allocation3 + $0x30] sm:$0xff] %vm1143_vm7, %v1066_v30  ;;  %5910 = vmatmul.mubr.msk.bf16.vlgmr.msra.gmra.mrb[0].mxu1 %vm2714_vm11, %v2679_v62  ;;  %6365 = vmatprep.subr.msk.bf16.mxu0 %vm2787_vm6, %v6541_v5  ;;  %v989_v30 = vshrl.u32 %v7254_v29, 16  ;;  %v1993_v62 = vshrl.u32 %v6506_v51, 16  ;;  %v6548_v5 = vld [vmem:[#allocation2 + $0xb8] sm:$0xff]  }
  0xbf   : > { %2100 = vrot.lane.b32.xlu0 %v1964_v8, %s6590_s23  ;;  %v1463_v37 = vpop.permute.xlu1 %1462  ;;  %5958 = vmatpush3.bf16.msra.mxu1 %v6532_v26  ;;  %v2004_v49 = vrot.slane %v2002_v19, 1  ;;  %v2007_v24 = vrot.slane %v2005_v28, 2  ;;  %v6543_v26 = vld [vmem:[#allocation2 + $0x90] sm:$0xff]   ;;  %587 = vst.msk [vmem:[#allocation3 + $0xb8] sm:$0xff] %vm563_vm5, %v6548_v5  ;;  %v1017_v19 = vshll.u32 %v6516_v61, 16 }
  0xc0   : > { %1547 = vst.msk [vmem:[#allocation3 + $0x30] sm:$0xff] %vm1540_vm8, %v1463_v37  ;;  %v999_v37 = vor.u32 %v997_v63, %v995_v60  ;;  %v991_v3 = vor.u32 %v989_v30, %v7290_v15  ;;  %v1995_v14 = vrot.slane %v1993_v62, 1  ;;  %6362 = vmatprep.subr.msk.bf16.mxu1 %vm2787_vm6, %v6544_v9  ;;  %v7474_v62 = vld [vmem:[#allocation2 + $0xc8] sm:$0xff]  }
  0xc1   : > { %v1461_v41 = vpop.permute.xlu0 %1460  ;;  %2499 = vrot.lane.b32.xlu1 %v2440_v20, %s6588_s21  ;;  %6064 = vmatpush3.bf16.msra.mxu0 %v4383_v55  ;;  %v7379_v20 = vrot.slane %v1001_v23, 1  ;;  %582 = vst.msk [vmem:[#allocation3 + $0x90] sm:$0xff] %vm563_vm5, %v6543_v26  ;;  %v6550_v23 = vld [vmem:[#allocation2 + $0xc0] sm:$0xff]  }
  0xc2   : > { %1546 = vst.msk [vmem:[#allocation3 + $0x28] sm:$0xff] %vm1540_vm8, %v1461_v41  ;;  %v7412_v41 = vld [vmem:[#allocation2 + $0xb8] sm:$0xff]   ;;  %v1999_v53 = vor.u32 %v1998_v46, %v1995_v14  ;;  %v6522_v14 = vld [vmem:[#allocation2 + $0xd0] sm:$0xff]  }
  0xc3   : > { %2497 = vrot.lane.b32.xlu0 %v2438_v45, %s6588_s21  ;;  %v2075_v25 = vpop.permute.xlu1 %2074  ;;  %v6542_v45 = vld [vmem:[#allocation2 + $0x98] sm:$0xff]   ;;  %v1004_v56 = vsel %vm808_vm3, %v999_v37, %v7379_v20  ;;  %5960 = vmatpush3.bf16.msra.mxu1 %v3346_v31  ;;  %v2445_v55 = vrot.slane %v7412_v41, 2  ;;  %588 = vst.msk [vmem:[#allocation3 + $0xc0] sm:$0xff] %vm563_vm5, %v6550_v23  ;;  %v1011_v37 = vrot.slane %v1009_v48, 1  ;;  %v6552_v46 = vld [vmem:[#allocation2 + $0xd0] sm:$0xff]   ;;  %v2020_v31 = vshrl.u32 %v6522_v14, 16 }
  0xc4   : > { %2160 = vst.msk [vmem:[#allocation3 + $0x28] sm:$0xff] %vm2154_vm9, %v2075_v25  ;;  %6165 = vmatprep.subr.bf16.mxu1 %v7440_v1  ;;  %v2000_v63 = vsel %vm1785_vm4, %v7346_v50, %v1999_v53  ;;  %v2023_v52 = vshll.u32 %v6522_v14, 16  ;;  %v7541_v48 = vld [vmem:[#allocation2 + $0xd8] sm:$0xff]  }
  0xc5   : > { %v2069_v39 = vpop.permute.xlu0 %2068  ;;  %1095 = vrot.lane.b32.xlu1 %v988_v35, %s6589_s22  ;;  %583 = vst.msk [vmem:[#allocation3 + $0x98] sm:$0xff] %vm563_vm5, %v6542_v45  ;;  %v7419_v35 = vld [vmem:[#allocation2 + $0xc0] sm:$0xff]   ;;  %v6551_v45 = vld [vmem:[#allocation2 + $0xc8] sm:$0xff]   ;;  %590 = vst.msk [vmem:[#allocation3 + $0xd0] sm:$0xff] %vm563_vm5, %v6552_v46 }
  0xc6   : > { %2157 = vst.msk [vmem:[#allocation3 + $0x10] sm:$0xff] %vm2154_vm9, %v2069_v39  ;;  %v7433_v39 = vor.u32 %v2007_v24, %v2004_v49 }
  0xc7   : > { %1093 = vrot.lane.b32.xlu0 %v980_v38, %s6589_s22  ;;  %v2466_v16 = vpop.permute.xlu1 %2465  ;;  %v1437_v38 = vsel %vm1388_vm1, %v1434_v47, %v1436_v40  ;;  %589 = vst.msk [vmem:[#allocation3 + $0xc8] sm:$0xff] %vm563_vm5, %v6551_v45 }
  0xc8   : > { %2554 = vst.msk [vmem:[#allocation3 + $0x10] sm:$0xff] %vm2551_vm10, %v2466_v16  ;;  %v1435_v16 = vsel %vm1388_vm1, %v1432_v17, %v1434_v47  ;;  %v2009_v18 = vsel %vm1785_vm4, %v1999_v53, %v7433_v39  ;;  %v2447_v17 = vrot.slane %v7419_v35, 2  ;;  %v7514_v35 = vld [vmem:[#allocation2 + $0xd8] sm:$0xff]  }
  0xc9   : > { %v2077_v22 = vpop.permute.xlu0 %2076  ;;  %1492 = vrot.lane.b32.xlu1 %v1433_v7, %s6587_s20  ;;  %v6547_v7 = vld [vmem:[#allocation2 + $0xa0] sm:$0xff]  }
  0xca   : > { %2161 = vst.msk [vmem:[#allocation3 + $0x30] sm:$0xff] %vm2154_vm9, %v2077_v22  ;;  %v7456_v22 = vld [vmem:[#allocation2 + $0xc8] sm:$0xff]  }
  0xcb   : > { %1490 = vrot.lane.b32.xlu0 %v1431_v0, %s6587_s20  ;;  %v2474_v8 = vpop.permute.xlu1 %2473  ;;  %584 = vst.msk [vmem:[#allocation3 + $0xa0] sm:$0xff] %vm563_vm5, %v6547_v7  ;;  %v6549_v0 = vld [vmem:[#allocation2 + $0xb0] sm:$0xff]   ;;  %v1438_v4 = vrot.slane %v7456_v22, 1  ;;  %v1015_v7 = vor.u32 %v1013_v59, %v1011_v37  ;;  %v6535_v22 = vld [vmem:[#allocation2 + $0xe8] sm:$0xff]  }
  0xcc   : > { %2558 = vst.msk [vmem:[#allocation3 + $0x30] sm:$0xff] %vm2551_vm10, %v2474_v8  ;;  %v2011_v8 = vshrl.u32 %v6514_v6, 16 }
  0xcd   : > { %v2472_v10 = vpop.permute.xlu0 %2471  ;;  %2106 = vrot.lane.b32.xlu1 %v1991_v27, %s6590_s23  ;;  %586 = vst.msk [vmem:[#allocation3 + $0xb0] sm:$0xff] %vm563_vm5, %v6549_v0  ;;  %v1439_v54 = vsel %vm1388_vm1, %v1436_v40, %v1438_v4  ;;  %v2022_v0 = vrot.slane %v2020_v31, 1 }
  0xce   : > { %2557 = vst.msk [vmem:[#allocation3 + $0x28] sm:$0xff] %vm2551_vm10, %v2472_v10  ;;  %v7476_v10 = vld [vmem:[#allocation2 + $0xd8] sm:$0xff]  }
  0xcf   : > { %2104 = vrot.lane.b32.xlu0 %v1982_v57, %s6590_s23  ;;  %v1070_v2 = vpop.permute.xlu1 %1069  ;;  %v2680_v29 = vld [vmem:[#allocation3 + $0x10] sm:$0xff]  ;;  %v2014_v57 = vshll.u32 %v6514_v6, 16  ;;  %v1029_v46 = vshrl.u32 %v7476_v10, 16 }
  0xd0   : > { %1152 = vst.msk [vmem:[#allocation3 + $0x40] sm:$0xff] %vm1143_vm7, %v1070_v2  ;;  %5913 = vmatprep.mubr.msk.bf16.mxu1 %vm2714_vm11, %v2680_v29  ;;  %v2013_v2 = vrot.slane %v2011_v8, 1  ;;  %v7543_v8 = vld [vmem:[#allocation2 + $0xe8] sm:$0xff]  }
  0xd1   : > { %v1068_v36 = vpop.permute.xlu0 %1067  ;;  %2503 = vrot.lane.b32.xlu1 %v2444_v12, %s6588_s21  ;;  %5914 = vmatmul.mubr.msk.bf16.gmra.mrb[4].mxu1 %vm2714_vm11, %v7243_v34  ;;  %v7409_v34 = vld [vmem:[%s8179_s1 + $0x30] sm:$0xff]   ;;  %v2446_v12 = vsel %vm2399_vm2, %v2443_v13, %v2445_v55  ;;  %v2016_v29 = vrot.slane %v2014_v57, 2  ;;  %v1019_v13 = vrot.slane %v1017_v19, 1 }
  0xd2   : > { %1151 = vst.msk [vmem:[#allocation3 + $0x38] sm:$0xff] %vm1143_vm7, %v1068_v36  ;;  %5917 = vmatprep.mubr.msk.bf16.mxu1 %vm2714_vm11, %v7281_v44  ;;  %v996_v44 = vsel %vm808_vm3, %v991_v3, %v995_v60  ;;  %6113 = vmatprep.subr.bf16.mxu0 %v7409_v34  ;;  %v1005_v60 = vshrl.u32 %v7335_v58, 16  ;;  %v2448_v58 = vsel %vm2399_vm2, %v2445_v55, %v2447_v17  ;;  %v1025_v3 = vshll.u32 %v7476_v10, 16  ;;  %v6523_v36 = vld [vmem:[#allocation2 + $0xd8] sm:$0xff]  }
  0xd3   : > { %2501 = vrot.lane.b32.xlu0 %v2442_v42, %s6588_s21  ;;  %v1467_v15 = vpop.permute.xlu1 %1466  ;;  %v7417_v33 = vld [vmem:[#allocation3 + $0x30] sm:$0xff]  ;;  %v2449_v42 = vrot.slane %v7474_v62, 2  ;;  %v2032_v53 = vshll.u32 %v6523_v36, 16  ;;  %v2025_v55 = vrot.slane %v2023_v52, 2  ;;  %v2050_v52 = vshll.u32 %v6535_v22, 16 }
  0xd4   : > { %1549 = vst.msk [vmem:[#allocation3 + $0x40] sm:$0xff] %vm1540_vm8, %v1467_v15  ;;  %v1007_v28 = vor.u32 %v1005_v60, %v7379_v20  ;;  %v1021_v20 = vshrl.u32 %v6516_v61, 16  ;;  %v7512_v41 = vrot.slane %v1025_v3, 1  ;;  %v260_v61 = vld [vmem:[%s6635_s19 + $0xf0] sm:$0xf]  ;;  %v6534_v3 = vld [vmem:[#allocation2 + $0xe0] sm:$0xff]  }
  0xd5   : > { %v1465_v21 = vpop.permute.xlu0 %1464  ;;  %v7424_v25 = vld [vmem:[#allocation3 + $0x28] sm:$0xff]  ;;  %1099 = vrot.lane.b32.xlu1 %v1004_v56, %s6589_s22  ;;  %v7502_v56 = vor.u32 %v2016_v29, %v2013_v2  ;;  %v2450_v15 = vsel %vm2399_vm2, %v2447_v17, %v2449_v42  ;;  %322 = vst.msk [vmem:[#allocation2 + $0xf0] sm:$0xf] %vm261_vm0, %v260_v61  ;;  %v2453_v29 = vrot.slane %v7541_v48, 2  ;;  %v2041_v31 = vshll.u32 %v6534_v3, 16 }
  0xd6   : > { %1548 = vst.msk [vmem:[#allocation3 + $0x38] sm:$0xff] %vm1540_vm8, %v1465_v21  ;;  %6017 = vmatprep.mubr.msk.bf16.mxu0 %vm2714_vm11, %v7424_v25  ;;  %v1012_v24 = vsel %vm808_vm3, %v1007_v28, %v1011_v37  ;;  %v1023_v21 = vor.u32 %v1021_v20, %v1019_v13  ;;  %v6526_v17 = vld [vmem:[#allocation2 + $0xe0] sm:$0xff]  }
  0xd7   : > { %1097 = vrot.lane.b32.xlu0 %v996_v44, %s6589_s22  ;;  %6018 = vmatmul.mubr.msk.bf16.gmra.mrb[4].mxu0 %vm2714_vm11, %v7417_v33  ;;  %v2081_v11 = vpop.permute.xlu1 %2080  ;;  %v6520_v44 = vld [vmem:[#allocation2 + $0xd0] sm:$0xff]   ;;  %v2018_v6 = vsel %vm1785_vm4, %v7433_v39, %v7502_v56  ;;  %v1033_v19 = vshll.u32 %v6526_v17, 16 }
  0xd8   : > { %2163 = vst.msk [vmem:[#allocation3 + $0x40] sm:$0xff] %vm2154_vm9, %v2081_v11  ;;  %v1440_v5 = vrot.slane %v6520_v44, 1  ;;  %v7579_v44 = vld [vmem:[#allocation2 + $0xe8] sm:$0xff]  }
  0xd9   : > { %v2079_v51 = vpop.permute.xlu0 %2078  ;;  %1496 = vrot.lane.b32.xlu1 %v1437_v38, %s6587_s20  ;;  %5918 = vmatmul.mubr.msk.bf16.gmra.mrb[8].mxu1 %vm2714_vm11, %v7424_v25  ;;  %v2029_v38 = vshrl.u32 %v6523_v36, 16  ;;  %v1035_v45 = vrot.slane %v1033_v19, 1 }
  0xda   : > { %2162 = vst.msk [vmem:[#allocation3 + $0x38] sm:$0xff] %vm2154_vm9, %v2079_v51  ;;  %5921 = vmatprep.mubr.msk.bf16.mxu1 %vm2714_vm11, %v7417_v33  ;;  %v1028_v51 = vsel %vm808_vm3, %v1023_v21, %v7512_v41  ;;  %v1441_v28 = vsel %vm1388_vm1, %v1438_v4, %v1440_v5  ;;  %v6559_v4 = vld [vmem:[#allocation2 + $0xe0] sm:$0xff]   ;;  %v2047_v21 = vshrl.u32 %v6535_v22, 16 }
  0xdb   : > { %1494 = vrot.lane.b32.xlu0 %v1435_v16, %s6587_s20  ;;  %v2478_v27 = vpop.permute.xlu1 %2477  ;;  %v1442_v16 = vrot.slane %v7514_v35, 1  ;;  %v2031_v23 = vrot.slane %v2029_v38, 1  ;;  %592 = vst.msk [vmem:[#allocation3 + $0xe0] sm:$0xff] %vm563_vm5, %v6559_v4 }
  0xdc   : > { %2560 = vst.msk [vmem:[#allocation3 + $0x40] sm:$0xff] %vm2551_vm10, %v2478_v27  ;;  %v1020_v27 = vsel %vm808_vm3, %v1015_v7, %v1019_v13 }
  0xdd   : > { %v2476_v30 = vpop.permute.xlu0 %2475  ;;  %2110 = vrot.lane.b32.xlu1 %v2009_v18, %s6590_s23  ;;  %v2034_v18 = vrot.slane %v2032_v53, 2  ;;  %v1443_v57 = vsel %vm1388_vm1, %v1440_v5, %v1442_v16 }
  0xde   : > { %2559 = vst.msk [vmem:[#allocation3 + $0x38] sm:$0xff] %vm2551_vm10, %v2476_v30  ;;  %v2026_v30 = vor.u32 %v2025_v55, %v2022_v0  ;;  %v2049_v55 = vrot.slane %v2047_v21, 1 }
  0xdf   : > { %2108 = vrot.lane.b32.xlu0 %v2000_v63, %s6590_s23  ;;  %v1074_v50 = vpop.permute.xlu1 %1073  ;;  %v6524_v63 = vld [vmem:[#allocation2 + $0xd0] sm:$0xff]  }
  0xe0   : > { %1154 = vst.msk [vmem:[#allocation3 + $0x50] sm:$0xff] %vm1143_vm7, %v1074_v50  ;;  %v2451_v2 = vrot.slane %v6524_v63, 2  ;;  %v2027_v20 = vsel %vm1785_vm4, %v7502_v56, %v2026_v30  ;;  %v2038_v56 = vshrl.u32 %v6534_v3, 16 }
  0xe1   : > { %v1072_v47 = vpop.permute.xlu0 %1071  ;;  %2507 = vrot.lane.b32.xlu1 %v2448_v58, %s6588_s21  ;;  %v7549_v58 = vor.u32 %v2034_v18, %v2031_v23  ;;  %v2052_v23 = vrot.slane %v2050_v52, 2 }
  0xe2   : > { %1153 = vst.msk [vmem:[#allocation3 + $0x48] sm:$0xff] %vm1143_vm7, %v1072_v47  ;;  %v1041_v47 = vshll.u32 %v7543_v8, 16  ;;  %v2454_v59 = vsel %vm2399_vm2, %v2451_v2, %v2453_v29  ;;  %v2452_v53 = vsel %vm2399_vm2, %v2449_v42, %v2451_v2  ;;  %v2040_v5 = vrot.slane %v2038_v56, 1 }
  0xe3   : > { %2505 = vrot.lane.b32.xlu0 %v2446_v12, %s6588_s21  ;;  %v1471_v49 = vpop.permute.xlu1 %1470  ;;  %v7500_v26 = vld [vmem:[#allocation3 + $0x40] sm:$0xff]  ;;  %v2036_v14 = vsel %vm1785_vm4, %v2026_v30, %v7549_v58  ;;  %v2053_v61 = vor.u32 %v2052_v23, %v2049_v55  ;;  %v6556_v30 = vld [vmem:[#allocation2 + $0xf0] ss:$0 sps:$4 sm:$0x33]  }
  0xe4   : > { %1551 = vst.msk [vmem:[#allocation3 + $0x50] sm:$0xff] %vm1540_vm8, %v1471_v49  ;;  %v6558_v12 = vld [vmem:[#allocation2 + $0xd8] sm:$0xff]  }
  0xe5   : > { %v1469_v40 = vpop.permute.xlu0 %1468  ;;  %v7506_v9 = vld [vmem:[#allocation3 + $0x38] sm:$0xff]  ;;  %1498 = vrot.lane.b32.xlu1 %v1439_v54, %s6587_s20  ;;  %v1037_v54 = vshrl.u32 %v6526_v17, 16  ;;  %591 = vst.msk [vmem:[#allocation3 + $0xd8] sm:$0xff] %vm563_vm5, %v6558_v12 }
  0xe6   : > { %1550 = vst.msk [vmem:[#allocation3 + $0x48] sm:$0xff] %vm1540_vm8, %v1469_v40  ;;  %5922 = vmatmul.mubr.msk.bf16.gmra.mrb[12].mxu1 %vm2714_vm11, %v7506_v9  ;;  %6021 = vmatprep.mubr.msk.bf16.mxu0 %vm2714_vm11, %v7506_v9  ;;  %v7577_v40 = vrot.slane %v1041_v47, 1  ;;  %v1045_v47 = vshrl.u32 %v7543_v8, 16  ;;  %v6557_v8 = vld [vmem:[#allocation2 + $0xf0] ss:$0 sps:$4 sm:$0x33]  }
  0xe7   : > { %1101 = vrot.lane.b32.xlu0 %v1012_v24, %s6589_s22  ;;  %5925 = vmatprep.mubr.msk.bf16.mxu1 %vm2714_vm11, %v7500_v26  ;;  %v2085_v32 = vpop.permute.xlu1 %2084  ;;  %v1039_v10 = vor.u32 %v1037_v54, %v1035_v45 }
  0xe8   : > { %6022 = vmatmul.mubr.msk.bf16.gmra.mrb[8].mxu0 %vm2714_vm11, %v7500_v26  ;;  %2165 = vst.msk [vmem:[#allocation3 + $0x50] sm:$0xff] %vm2154_vm9, %v2085_v32  ;;  %v1031_v32 = vor.u32 %v1029_v46, %v7512_v41  ;;  %v1047_v46 = vor.u32 %v1045_v47, %v7577_v40 }
  0xe9   : > { %v2083_v11 = vpop.permute.xlu0 %2082  ;;  %2509 = vrot.lane.b32.xlu1 %v2450_v15, %s6588_s21  ;;  %v6530_v15 = vld [vmem:[#allocation2 + $0xe0] sm:$0xff]   ;;  %v1044_v0 = vsel %vm808_vm3, %v1039_v10, %v7577_v40 }
  0xea   : > { %2164 = vst.msk [vmem:[#allocation3 + $0x48] sm:$0xff] %vm2154_vm9, %v2083_v11  ;;  %v1444_v7 = vrot.slane %v6530_v15, 1  ;;  %v1446_v11 = vrot.slane %v7579_v44, 1  ;;  %v1036_v42 = vsel %vm808_vm3, %v1031_v32, %v1035_v45  ;;  %v2059_v45 = vshll.u32 %v6556_v30, 16  ;;  %v4198_v32 = vld [vmem:[#allocation3 + $0x20] sm:$0xf0] }
  0xeb   : > { %2112 = vrot.lane.b32.xlu0 %v2018_v6, %s6590_s23  ;;  %v2482_v39 = vpop.permute.xlu1 %2481 }
  0xec   : > { %2562 = vst.msk [vmem:[#allocation3 + $0x50] sm:$0xff] %vm2551_vm10, %v2482_v39  ;;  %v1447_v18 = vsel %vm1388_vm1, %v1444_v7, %v1446_v11  ;;  %v6536_v39 = vld [vmem:[#allocation2 + $0xe0] sm:$0xff]   ;;  %v1445_v63 = vsel %vm1388_vm1, %v1442_v16, %v1444_v7  ;;  %v2061_v15 = vrot.slane %v2059_v45, 2  ;;  %v4253_v7 = vrot.slane %v7424_v25, 4 }
  0xed   : > { %v2480_v60 = vpop.permute.xlu0 %2479  ;;  %1105 = vrot.lane.b32.xlu1 %v1028_v51, %s6589_s22  ;;  %v2043_v51 = vrot.slane %v2041_v31, 2 }
  0xee   : > { %2561 = vst.msk [vmem:[#allocation3 + $0x48] sm:$0xff] %vm2551_vm10, %v2480_v60 }
  0xef   : > { %1103 = vrot.lane.b32.xlu0 %v1020_v27, %s6589_s22  ;;  %v1078_v50 = vpop.permute.xlu1 %1077  ;;  %v2044_v17 = vor.u32 %v2043_v51, %v2040_v5  ;;  %v6537_v27 = vld [vmem:[#allocation2 + $0xe8] sm:$0xff]   ;;  %v4252_v51 = vrot.slane %v4198_v32, 4 }
  0xf0   : > { %1156 = vst.msk [vmem:[#allocation3 + $0x60] sm:$0xff] %vm1143_vm7, %v1078_v50  ;;  %v2457_v12 = vrot.slane %v6537_v27, 2 }
  0xf1   : > { %v1076_v37 = vpop.permute.xlu0 %1075  ;;  %1502 = vrot.lane.b32.xlu1 %v1443_v57, %s6587_s20  ;;  %v6554_v57 = vld [vmem:[#allocation2 + $0xf0] ss:$0 sps:$4 sm:$0x11]   ;;  %v2054_v50 = vsel %vm1785_vm4, %v2044_v17, %v2053_v61  ;;  %v2045_v35 = vsel %vm1785_vm4, %v7549_v58, %v2044_v17  ;;  %v4254_v25 = vsel %vm3214_vm12, %v4252_v51, %v4253_v7  ;;  %v6553_v17 = vld [vmem:[%s8179_s1 + $0x38] ss:$0 sps:$4 sm:$0x33]  }
  0xf2   : > { %1155 = vst.msk [vmem:[#allocation3 + $0x58] sm:$0xff] %vm1143_vm7, %v1076_v37  ;;  %v6555_v37 = vld [vmem:[#allocation2 + $0xf0] ss:$0 sps:$4 sm:$0x11]   ;;  %v1049_v3 = vshll.u32 %v6554_v57, 16 }
  0xf3   : > { %1500 = vrot.lane.b32.xlu0 %v1441_v28, %s6587_s20  ;;  %v1475_v13 = vpop.permute.xlu1 %1474  ;;  %v7567_v36 = vld [vmem:[#allocation3 + $0x50] sm:$0xff]  ;;  %v2455_v28 = vrot.slane %v6536_v39, 2  ;;  %v1448_v4 = vrot.slane %v6555_v37, 1 }
  0xf4   : > { %1553 = vst.msk [vmem:[#allocation3 + $0x60] sm:$0xff] %vm1540_vm8, %v1475_v13 }
  0xf5   : > { %v1473_v49 = vpop.permute.xlu0 %1472  ;;  %v7571_v24 = vld [vmem:[#allocation3 + $0x48] sm:$0xff]  ;;  %2116 = vrot.lane.b32.xlu1 %v2036_v14, %s6590_s23  ;;  %v2056_v14 = vshrl.u32 %v6556_v30, 16  ;;  %v2458_v58 = vsel %vm2399_vm2, %v2455_v28, %v2457_v12  ;;  %v1449_v48 = vsel %vm1388_vm1, %v1446_v11, %v1448_v4 }
  0xf6   : > { %1552 = vst.msk [vmem:[#allocation3 + $0x58] sm:$0xff] %vm1540_vm8, %v1473_v49  ;;  %5926 = vmatmul.mubr.msk.bf16.gmra.mrb[16].mxu1 %vm2714_vm11, %v7571_v24  ;;  %6025 = vmatprep.mubr.msk.bf16.mxu0 %vm2714_vm11, %v7571_v24  ;;  %v1051_v49 = vrot.slane %v1049_v3, 1  ;;  %v4261_v30 = vrot.slane %v7571_v24, 4  ;;  %v4263_v24 = vrot.slane %v7567_v36, 4 }
  0xf7   : > { %2114 = vrot.lane.b32.xlu0 %v2027_v20, %s6590_s23  ;;  %5929 = vmatprep.mubr.msk.bf16.mxu1 %vm2714_vm11, %v7567_v36  ;;  %v2089_v38 = vpop.permute.xlu1 %2088  ;;  %v2456_v20 = vsel %vm2399_vm2, %v2453_v29, %v2455_v28  ;;  %v2459_v29 = vrot.slane %v6557_v8, 2 }
  0xf8   : > { %6026 = vmatmul.mubr.msk.bf16.gmra.mrb[12].mxu0 %vm2714_vm11, %v7567_v36  ;;  %2167 = vst.msk [vmem:[#allocation3 + $0x60] sm:$0xff] %vm2154_vm9, %v2089_v38  ;;  %v1052_v40 = vsel %vm808_vm3, %v1047_v46, %v1051_v49  ;;  %v4264_v3 = vsel %vm3214_vm12, %v4261_v30, %v4263_v24 }
  0xf9   : > { %v2087_v6 = vpop.permute.xlu0 %2086  ;;  %2513 = vrot.lane.b32.xlu1 %v2454_v59, %s6588_s21  ;;  %v2058_v59 = vrot.slane %v2056_v14, 1  ;;  %v2460_v52 = vsel %vm2399_vm2, %v2457_v12, %v2459_v29 }
  0xfa   : > { %2166 = vst.msk [vmem:[#allocation3 + $0x58] sm:$0xff] %vm2154_vm9, %v2087_v6 }
  0xfb   : > { %2511 = vrot.lane.b32.xlu0 %v2452_v53, %s6588_s21  ;;  %v2486_v62 = vpop.permute.xlu1 %2485  ;;  %v2062_v31 = vor.u32 %v2061_v15, %v2058_v59 }
  0xfc   : > { %2564 = vst.msk [vmem:[#allocation3 + $0x60] sm:$0xff] %vm2551_vm10, %v2486_v62  ;;  %v4255_v62 = vrot.slane %v7417_v33, 4 }
  0xfd   : > { %v2484_v41 = vpop.permute.xlu0 %2483  ;;  %1109 = vrot.lane.b32.xlu1 %v1044_v0, %s6589_s22  ;;  %v2063_v44 = vsel %vm1785_vm4, %v2053_v61, %v2062_v31 }
  0xfe   : > { %2563 = vst.msk [vmem:[#allocation3 + $0x58] sm:$0xff] %vm2551_vm10, %v2484_v41  ;;  %v4257_v41 = vrot.slane %v7506_v9, 4  ;;  %v4256_v39 = vsel %vm3214_vm12, %v4253_v7, %v4255_v62 }
  0xff   : > { %1107 = vrot.lane.b32.xlu0 %v1036_v42, %s6589_s22  ;;  %v1082_v60 = vpop.permute.xlu1 %1081 }
 0x100   : > { %1158 = vst.msk [vmem:[#allocation3 + $0x70] sm:$0xff] %vm1143_vm7, %v1082_v60  ;;  %v4258_v33 = vsel %vm3214_vm12, %v4255_v62, %v4257_v41  ;;  %v4864_v60 = vsel %vm2787_vm6, %v6553_v17, 0 }
 0x101   : > { %v1080_v19 = vpop.permute.xlu0 %1079  ;;  %1506 = vrot.lane.b32.xlu1 %v1447_v18, %s6587_s20 }
 0x102   : > { %1157 = vst.msk [vmem:[#allocation3 + $0x68] sm:$0xff] %vm1143_vm7, %v1080_v19 }
 0x103   : > { %1504 = vrot.lane.b32.xlu0 %v1445_v63, %s6587_s20  ;;  %v1479_v2 = vpop.permute.xlu1 %1478  ;;  %v7621_v16 = vld [vmem:[#allocation3 + $0x60] sm:$0xff]  ;;  %v4259_v63 = vrot.slane %v7500_v26, 4 }
 0x104   : > { %1555 = vst.msk [vmem:[#allocation3 + $0x70] sm:$0xff] %vm1540_vm8, %v1479_v2 }
 0x105   : > { %v1477_v54 = vpop.permute.xlu0 %1476  ;;  %v7624_v22 = vld [vmem:[#allocation3 + $0x58] sm:$0xff]  ;;  %2120 = vrot.lane.b32.xlu1 %v2054_v50, %s6590_s23  ;;  %v4262_v50 = vsel %vm3214_vm12, %v4259_v63, %v4261_v30 }
 0x106   : > { %1554 = vst.msk [vmem:[#allocation3 + $0x68] sm:$0xff] %vm1540_vm8, %v1477_v54  ;;  %5930 = vmatmul.mubr.msk.bf16.gmra.mrb[20].mxu1 %vm2714_vm11, %v7624_v22  ;;  %6029 = vmatprep.mubr.msk.bf16.mxu0 %vm2714_vm11, %v7624_v22  ;;  %v7711_v37 = vrot.slane %v7624_v22, 4  ;;  %v4267_v54 = vrot.slane %v7621_v16, 4 }
 0x107   : > { %2118 = vrot.lane.b32.xlu0 %v2045_v35, %s6590_s23  ;;  %5933 = vmatprep.mubr.msk.bf16.mxu1 %vm2714_vm11, %v7621_v16  ;;  %v2093_v13 = vpop.permute.xlu1 %2092 }
 0x108   : > { %6030 = vmatmul.mubr.msk.bf16.gmra.mrb[16].mxu0 %vm2714_vm11, %v7621_v16  ;;  %2169 = vst.msk [vmem:[#allocation3 + $0x70] sm:$0xff] %vm2154_vm9, %v2093_v13  ;;  %v4266_v36 = vsel %vm3214_vm12, %v4263_v24, %v7711_v37  ;;  %v7736_v13 = vsel %vm3214_vm12, %v7711_v37, %v4267_v54 }
 0x109   : > { %v2091_v56 = vpop.permute.xlu0 %2090  ;;  %2517 = vrot.lane.b32.xlu1 %v2458_v58, %s6588_s21 }
 0x10a   : > { %2168 = vst.msk [vmem:[#allocation3 + $0x68] sm:$0xff] %vm2154_vm9, %v2091_v56 }
 0x10b   : > { %2515 = vrot.lane.b32.xlu0 %v2456_v20, %s6588_s21  ;;  %v2490_v10 = vpop.permute.xlu1 %2489 }
 0x10c   : > { %2566 = vst.msk [vmem:[#allocation3 + $0x70] sm:$0xff] %vm2551_vm10, %v2490_v10 }
 0x10d   : > { %v2488_v21 = vpop.permute.xlu0 %2487  ;;  %1508 = vrot.lane.b32.xlu1 %v1449_v48, %s6587_s20 }
 0x10e   : > { %2565 = vst.msk [vmem:[#allocation3 + $0x68] sm:$0xff] %vm2551_vm10, %v2488_v21 }
 0x10f   : > { %v1481_v38 = vpop.permute.xlu1 %1480  ;;  %1111 = vrot.lane.b32.xlu0 %v1052_v40, %s6589_s22 }
 0x111   : > { %v1084_v53 = vpop.permute.xlu0 %1083  ;;  %2519 = vrot.lane.b32.xlu1 %v2460_v52, %s6588_s21 }
 0x112   : > { %1159 = vst.msk [vmem:[#allocation3 + $0x78] sm:$0xff] %vm1143_vm7, %v1084_v53 }
 0x113   : > { %1556 = vst.msk [vmem:[#allocation3 + $0x78] sm:$0xff] %vm1540_vm8, %v1481_v38  ;;  %v2492_v6 = vpop.permute.xlu1 %2491  ;;  %2122 = vrot.lane.b32.xlu0 %v2063_v44, %s6590_s23  ;;  %v7661_v11 = vld [vmem:[#allocation3 + $0x70] sm:$0xff]  ;;  %s6368_s23 = smul.u32 384, %s8187_s12 }
 0x114   : > { %v4271_v59 = vrot.slane %v7661_v11, 4 }
 0x115   : > { %v2095_v5 = vpop.permute.xlu0 %2094  ;;  %v7663_v0 = vld [vmem:[#allocation3 + $0x68] sm:$0xff]  ;;  %s8058_s30 = scalar_lea.vmem %s8181_s3, %s6368_s23 }
 0x116   : > { %2170 = vst.msk [vmem:[#allocation3 + $0x78] sm:$0xff] %vm2154_vm9, %v2095_v5  ;;  %5934 = vmatmul.mubr.msk.bf16.gmra.mrb[24].mxu1 %vm2714_vm11, %v7663_v0  ;;  %6033 = vmatprep.mubr.msk.bf16.mxu0 %vm2714_vm11, %v7663_v0  ;;  %v4269_v4 = vrot.slane %v7663_v0, 4 }
 0x117   : > { %2567 = vst.msk [vmem:[#allocation3 + $0x78] sm:$0xff] %vm2551_vm10, %v2492_v6  ;;  %5937 = vmatprep.mubr.msk.bf16.mxu1 %vm2714_vm11, %v7661_v11  ;;  %6034 = vmatmul.mubr.msk.bf16.gmra.mrb[20].mxu0 %vm2714_vm11, %v7661_v11  ;;  %v1088_v55 = vpop.permute.xlu1 %1087 }
 0x118   : > { %6065 = vmatprep.mubr.msk.bf16.mxu0 %vm2714_vm11, %v4254_v25  ;;  %1161 = vst.msk [vmem:[#allocation3 + $0x88] sm:$0xff] %vm1143_vm7, %v1088_v55  ;;  %v7741_v20 = vsel %vm3214_vm12, %v4267_v54, %v4269_v4  ;;  %v7758_v40 = vsel %vm3214_vm12, %v4269_v4, %v4271_v59 }
 0x119   : > { %v1086_v23 = vpop.permute.xlu0 %1085 }
 0x11a   : > { %1160 = vst.msk [vmem:[#allocation3 + $0x80] sm:$0xff] %vm1143_vm7, %v1086_v23 }
 0x11b   : > { %v1485_v42 = vpop.permute.xlu1 %1484 }
 0x11c   : > { %1558 = vst.msk [vmem:[#allocation3 + $0x88] sm:$0xff] %vm1540_vm8, %v1485_v42 }
 0x11d   : > { %v1483_v18 = vpop.permute.xlu0 %1482 }
 0x11e   : > { %1557 = vst.msk [vmem:[#allocation3 + $0x80] sm:$0xff] %vm1540_vm8, %v1483_v18  ;;  %v7686_v61 = vld [vmem:[#allocation3 + $0x78] sm:$0xff] }
 0x11f   : > { %5938 = vmatmul.mubr.msk.bf16.gmra.mrb[28].mxu1 %vm2714_vm11, %v7686_v61  ;;  %6066 = vmatmul.mubr.msk.bf16.vlgmr.msra.gmra.mrb[0].mxu0 %vm2714_vm11, %v4256_v39  ;;  %v2099_v9 = vpop.permute.xlu1 %2098  ;;  %v4273_v56 = vrot.slane %v7686_v61, 4 }
 0x120   : > { %6069 = vmatprep.mubr.msk.bf16.mxu0 %vm2714_vm11, %v4258_v33  ;;  %2172 = vst.msk [vmem:[#allocation3 + $0x88] sm:$0xff] %vm2154_vm9, %v2099_v9  ;;  %6114 = vmatpush3.bf16.msra.mxu0 %v7409_v34  ;;  %v4260_v34 = vsel %vm3214_vm12, %v4257_v41, %v4259_v63 }
 0x121   : > { %v2097_v27 = vpop.permute.xlu0 %2096  ;;  %6366 = vmatprep.subr.msk.bf16.mxu0 %vm2787_vm6, %v6553_v17  ;;  %v7765_v31 = vsel %vm3214_vm12, %v4271_v59, %v4273_v56 }
 0x122   : > { %2171 = vst.msk [vmem:[#allocation3 + $0x80] sm:$0xff] %vm2154_vm9, %v2097_v27 }
 0x123   : > { %v2496_v57 = vpop.permute.xlu1 %2495 }
 0x124   : > { %2569 = vst.msk [vmem:[#allocation3 + $0x88] sm:$0xff] %vm2551_vm10, %v2496_v57  ;;  %6116 = vmatpush3.bf16.msra.mxu0 %v4864_v60 }
 0x125   : > { %v2494_v19 = vpop.permute.xlu0 %2493 }
 0x126   : > { %2568 = vst.msk [vmem:[#allocation3 + $0x80] sm:$0xff] %vm2551_vm10, %v2494_v19 }
 0x127   : > { %6070 = vmatmul.mubr.msk.bf16.gmra.mrb[4].mxu0 %vm2714_vm11, %v4260_v34  ;;  %v1092_v28 = vpop.permute.xlu1 %1091  ;;  %v3161_v34 = vld [vmem:[#allocation3 + $0x10] sm:$0xff] }
 0x128   : > { %6073 = vmatprep.mubr.msk.bf16.mxu0 %vm2714_vm11, %v4262_v50  ;;  %1163 = vst.msk [vmem:[#allocation3 + $0x98] sm:$0xff] %vm1143_vm7, %v1092_v28  ;;  %v3160_v28 = vld [vmem:[#allocation3 + $0x8] sm:$0xf0] }
 0x129   : > { %v1090_v26 = vpop.permute.xlu0 %1089 }
 0x12a   : > { %1162 = vst.msk [vmem:[#allocation3 + $0x90] sm:$0xff] %vm1143_vm7, %v1090_v26 }
 0x12b   : > { %v1489_v12 = vpop.permute.xlu1 %1488  ;;  %v7714_v2 = vld [vmem:[#allocation3 + $0x88] sm:$0xff] }
 0x12c   : > { %1560 = vst.msk [vmem:[#allocation3 + $0x98] sm:$0xff] %vm1540_vm8, %v1489_v12  ;;  %v4277_v53 = vrot.slane %v7714_v2, 4  ;;  %v3216_v12 = vrot.slane %v3161_v34, 4  ;;  %v3167_v34 = vld [vmem:[#allocation3 + $0x40] sm:$0xff] }
 0x12d   : > { %v1487_v35 = vpop.permute.xlu0 %1486  ;;  %v7716_v47 = vld [vmem:[#allocation3 + $0x80] sm:$0xff] }
 0x12e   : > { %1559 = vst.msk [vmem:[#allocation3 + $0x90] sm:$0xff] %vm1540_vm8, %v1487_v35  ;;  %5941 = vmatprep.mubr.msk.bf16.mxu1 %vm2714_vm11, %v7716_v47  ;;  %v4275_v38 = vrot.slane %v7716_v47, 4  ;;  %v6560_v35 = vld [vmem:[#allocation2 + $0xe8] sm:$0xff]  }
 0x12f   : > { %5942 = vmatmul.mubr.msk.bf16.gmra.mrb[32].mxu1 %vm2714_vm11, %v7714_v2  ;;  %6074 = vmatmul.mubr.msk.bf16.gmra.mrb[8].mxu0 %vm2714_vm11, %v4264_v3  ;;  %v2103_v14 = vpop.permute.xlu1 %2102  ;;  %593 = vst.msk [vmem:[#allocation3 + $0xe8] sm:$0xff] %vm563_vm5, %v6560_v35 }
 0x130   : > { %6077 = vmatprep.mubr.msk.bf16.mxu0 %vm2714_vm11, %v4266_v36  ;;  %2174 = vst.msk [vmem:[#allocation3 + $0x98] sm:$0xff] %vm2154_vm9, %v2103_v14  ;;  %v7776_v6 = vsel %vm3214_vm12, %v4273_v56, %v4275_v38  ;;  %v7781_v7 = vsel %vm3214_vm12, %v4275_v38, %v4277_v53 }
 0x131   : > { %v2101_v45 = vpop.permute.xlu0 %2100 }
 0x132   : > { %2173 = vst.msk [vmem:[#allocation3 + $0x90] sm:$0xff] %vm2154_vm9, %v2101_v45  ;;  %v3215_v45 = vrot.slane %v3160_v28, 4 }
 0x133   : > { %v2500_v58 = vpop.permute.xlu1 %2499 }
 0x134   : > { %2571 = vst.msk [vmem:[#allocation3 + $0x98] sm:$0xff] %vm2551_vm10, %v2500_v58  ;;  %v3217_v58 = vsel %vm3214_vm12, %v3215_v45, %v3216_v12 }
 0x135   : > { %v2498_v8 = vpop.permute.xlu0 %2497 }
 0x136   : > { %2570 = vst.msk [vmem:[#allocation3 + $0x90] sm:$0xff] %vm2551_vm10, %v2498_v8 }
 0x137   : > { %6078 = vmatmul.mubr.msk.bf16.gmra.mrb[12].mxu0 %vm2714_vm11, %v7736_v13  ;;  %v1096_v46 = vpop.permute.xlu1 %1095 }
 0x138   : > { %6081 = vmatprep.mubr.msk.bf16.mxu0 %vm2714_vm11, %v7741_v20  ;;  %1165 = vst.msk [vmem:[#allocation3 + $0xa8] sm:$0xff] %vm1143_vm7, %v1096_v46 }
 0x139   : > { %v1094_v49 = vpop.permute.xlu0 %1093 }
 0x13a   : > { %1164 = vst.msk [vmem:[#allocation3 + $0xa0] sm:$0xff] %vm1143_vm7, %v1094_v49  ;;  %v3163_v49 = vld [vmem:[#allocation3 + $0x20] sm:$0xff] }
 0x13b   : > { %v1493_v15 = vpop.permute.xlu1 %1492  ;;  %v7750_v48 = vld [vmem:[#allocation3 + $0x98] sm:$0xff] }
 0x13c   : > { %1562 = vst.msk [vmem:[#allocation3 + $0xa8] sm:$0xff] %vm1540_vm8, %v1493_v15  ;;  %v4281_v23 = vrot.slane %v7750_v48, 4  ;;  %v3162_v15 = vld [vmem:[#allocation3 + $0x18] sm:$0xff] }
 0x13d   : > { %v1491_v29 = vpop.permute.xlu0 %1490  ;;  %v7752_v10 = vld [vmem:[#allocation3 + $0x90] sm:$0xff] }
 0x13e   : > { %1561 = vst.msk [vmem:[#allocation3 + $0xa0] sm:$0xff] %vm1540_vm8, %v1491_v29  ;;  %5945 = vmatprep.mubr.msk.bf16.mxu1 %vm2714_vm11, %v7752_v10  ;;  %v4279_v25 = vrot.slane %v7752_v10, 4  ;;  %v3220_v29 = vrot.slane %v3163_v49, 4  ;;  %v3168_v49 = vld [vmem:[#allocation3 + $0x48] sm:$0xff] }
 0x13f   : > { %5946 = vmatmul.mubr.msk.bf16.gmra.mrb[36].mxu1 %vm2714_vm11, %v7750_v48  ;;  %6082 = vmatmul.mubr.msk.bf16.gmra.mrb[16].mxu0 %vm2714_vm11, %v7758_v40  ;;  %v2107_v21 = vpop.permute.xlu1 %2106 }
 0x140   : > { %6085 = vmatprep.mubr.msk.bf16.mxu0 %vm2714_vm11, %v7765_v31  ;;  %2176 = vst.msk [vmem:[#allocation3 + $0xa8] sm:$0xff] %vm2154_vm9, %v2107_v21  ;;  %v7798_v18 = vsel %vm3214_vm12, %v4277_v53, %v4279_v25  ;;  %v7805_v17 = vsel %vm3214_vm12, %v4279_v25, %v4281_v23  ;;  %v3218_v21 = vrot.slane %v3162_v15, 4  ;;  %v7867_v25 = vld [vmem:[#allocation3 + $0x30] sm:$0xff] }
 0x141   : > { %v2105_v52 = vpop.permute.xlu0 %2104 }
 0x142   : > { %2175 = vst.msk [vmem:[#allocation3 + $0xa0] sm:$0xff] %vm2154_vm9, %v2105_v52  ;;  %v3219_v38 = vsel %vm3214_vm12, %v3216_v12, %v3218_v21  ;;  %v3221_v53 = vsel %vm3214_vm12, %v3218_v21, %v3220_v29  ;;  %v3230_v21 = vrot.slane %v3168_v49, 4 }
 0x143   : > { %v2504_v44 = vpop.permute.xlu1 %2503 }
 0x144   : > { %2573 = vst.msk [vmem:[#allocation3 + $0xa8] sm:$0xff] %vm2551_vm10, %v2504_v44 }
 0x145   : > { %v2502_v32 = vpop.permute.xlu0 %2501 }
 0x146   : > { %2572 = vst.msk [vmem:[#allocation3 + $0xa0] sm:$0xff] %vm2551_vm10, %v2502_v32 }
 0x147   : > { %6086 = vmatmul.mubr.msk.bf16.gmra.mrb[20].mxu0 %vm2714_vm11, %v7776_v6  ;;  %v1100_v5 = vpop.permute.xlu1 %1099 }
 0x148   : > { %6089 = vmatprep.mubr.msk.bf16.mxu0 %vm2714_vm11, %v7781_v7  ;;  %1167 = vst.msk [vmem:[#allocation3 + $0xb8] sm:$0xff] %vm1143_vm7, %v1100_v5 }
 0x149   : > { %v1098_v51 = vpop.permute.xlu0 %1097 }
 0x14a   : > { %1166 = vst.msk [vmem:[#allocation3 + $0xb0] sm:$0xff] %vm1143_vm7, %v1098_v51  ;;  %v3164_v51 = vld [vmem:[#allocation3 + $0x28] sm:$0xff] }
 0x14b   : > { %v1497_v55 = vpop.permute.xlu1 %1496  ;;  %v7790_v62 = vld [vmem:[#allocation3 + $0xa8] sm:$0xff] }
 0x14c   : > { %1564 = vst.msk [vmem:[#allocation3 + $0xb8] sm:$0xff] %vm1540_vm8, %v1497_v55  ;;  %v4285_v60 = vrot.slane %v7790_v62, 4 }
 0x14d   : > { %v1495_v42 = vpop.permute.xlu0 %1494  ;;  %v7792_v41 = vld [vmem:[#allocation3 + $0xa0] sm:$0xff] }
 0x14e   : > { %1563 = vst.msk [vmem:[#allocation3 + $0xb0] sm:$0xff] %vm1540_vm8, %v1495_v42  ;;  %5949 = vmatprep.mubr.msk.bf16.mxu1 %vm2714_vm11, %v7792_v41  ;;  %v4283_v9 = vrot.slane %v7792_v41, 4  ;;  %v6562_v42 = vld [vmem:[%s8179_s1 + $0x20] ss:$0 sps:$4 sm:$0x33]  }
 0x14f   : > { %5950 = vmatmul.mubr.msk.bf16.gmra.mrb[40].mxu1 %vm2714_vm11, %v7790_v62  ;;  %6090 = vmatmul.mubr.msk.bf16.gmra.mrb[24].mxu0 %vm2714_vm11, %v7798_v18  ;;  %v2111_v39 = vpop.permute.xlu1 %2110 }
 0x150   : > { %6093 = vmatprep.mubr.msk.bf16.mxu0 %vm2714_vm11, %v7805_v17  ;;  %2178 = vst.msk [vmem:[#allocation3 + $0xb8] sm:$0xff] %vm2154_vm9, %v2111_v39  ;;  %v7816_v57 = vsel %vm3214_vm12, %v4281_v23, %v4283_v9  ;;  %v7821_v30 = vsel %vm3214_vm12, %v4283_v9, %v4285_v60 }
 0x151   : > { %v2109_v33 = vpop.permute.xlu0 %2108 }
 0x152   : > { %2177 = vst.msk [vmem:[#allocation3 + $0xb0] sm:$0xff] %vm2154_vm9, %v2109_v33  ;;  %v3224_v33 = vrot.slane %v7867_v25, 4 }
 0x153   : > { %v2508_v27 = vpop.permute.xlu1 %2507 }
 0x154   : > { %2575 = vst.msk [vmem:[#allocation3 + $0xb8] sm:$0xff] %vm2551_vm10, %v2508_v27 }
 0x155   : > { %v2506_v63 = vpop.permute.xlu0 %2505 }
 0x156   : > { %2574 = vst.msk [vmem:[#allocation3 + $0xb0] sm:$0xff] %vm2551_vm10, %v2506_v63 }
 0x157   : > { %6094 = vmatmul.mubr.msk.bf16.gmra.mrb[28].mxu0 %vm2714_vm11, %v7816_v57  ;;  %v1499_v19 = vpop.permute.xlu1 %1498 }
 0x158   : > { %6097 = vmatprep.mubr.msk.bf16.mxu0 %vm2714_vm11, %v7821_v30 }
 0x159   : > { %v1102_v50 = vpop.permute.xlu0 %1101 }
 0x15a   : > { %1168 = vst.msk [vmem:[#allocation3 + $0xc0] sm:$0xff] %vm1143_vm7, %v1102_v50 }
 0x15b   : > { %1565 = vst.msk [vmem:[#allocation3 + $0xc0] sm:$0xff] %vm1540_vm8, %v1499_v19  ;;  %v2510_v26 = vpop.permute.xlu1 %2509  ;;  %v7827_v24 = vld [vmem:[#allocation3 + $0xb8] sm:$0xff] }
 0x15c   : > { %v4289_v3 = vrot.slane %v7827_v24, 4  ;;  %v3166_v19 = vld [vmem:[#allocation3 + $0x38] sm:$0xff] }
 0x15d   : > { %v2113_v36 = vpop.permute.xlu0 %2112  ;;  %v7830_v14 = vld [vmem:[#allocation3 + $0xb0] sm:$0xff] }
 0x15e   : > { %2179 = vst.msk [vmem:[#allocation3 + $0xc0] sm:$0xff] %vm2154_vm9, %v2113_v36  ;;  %5953 = vmatprep.mubr.msk.bf16.mxu1 %vm2714_vm11, %v7830_v14  ;;  %v4287_v54 = vrot.slane %v7830_v14, 4 }
 0x15f   : > { %2576 = vst.msk [vmem:[#allocation3 + $0xc0] sm:$0xff] %vm2551_vm10, %v2510_v26  ;;  %5954 = vmatmul.mubr.msk.bf16.gmra.mrb[44].mxu1 %vm2714_vm11, %v7827_v24  ;;  %v1106_v4 = vpop.permute.xlu1 %1105  ;;  %v3228_v26 = vrot.slane %v3167_v34, 4 }
 0x160   : > { %5961 = vmatprep.mubr.msk.bf16.mxu1 %vm2714_vm11, %v3217_v58  ;;  %v7843_v8 = vsel %vm3214_vm12, %v4285_v60, %v4287_v54  ;;  %1170 = vst.msk [vmem:[#allocation3 + $0xd0] sm:$0xff] %vm1143_vm7, %v1106_v4  ;;  %v7847_v46 = vsel %vm3214_vm12, %v4287_v54, %v4289_v3 }
 0x161   : > { %6098 = vmatmul.mubr.msk.bf16.gmra.mrb[32].mxu0 %vm2714_vm11, %v7843_v8  ;;  %v1104_v59 = vpop.permute.xlu0 %1103 }
 0x162   : > { %1169 = vst.msk [vmem:[#allocation3 + $0xc8] sm:$0xff] %vm1143_vm7, %v1104_v59  ;;  %6101 = vmatprep.mubr.msk.bf16.mxu0 %vm2714_vm11, %v7847_v46 }
 0x163   : > { %v1503_v56 = vpop.permute.xlu1 %1502 }
 0x164   : > { %1567 = vst.msk [vmem:[#allocation3 + $0xd0] sm:$0xff] %vm1540_vm8, %v1503_v56  ;;  %v3169_v56 = vld [vmem:[#allocation3 + $0x50] sm:$0xff] }
 0x165   : > { %v1501_v52 = vpop.permute.xlu0 %1500 }
 0x166   : > { %1566 = vst.msk [vmem:[#allocation3 + $0xc8] sm:$0xff] %vm1540_vm8, %v1501_v52  ;;  %v7857_v44 = vld [vmem:[#allocation3 + $0xc0] sm:$0xff] }
 0x167   : > { %5962 = vmatmul.mubr.msk.bf16.vlgmr.msra.gmra.mrb[0].mxu1 %vm2714_vm11, %v3219_v38  ;;  %v2117_v32 = vpop.permute.xlu1 %2116  ;;  %v7862_v5 = vrot.slane %v7857_v44, 4  ;;  %v3232_v38 = vrot.slane %v3169_v56, 4 }
 0x168   : > { %6167 = vmatpush3.bf16.msra.mxu1 %v7440_v1  ;;  %5965 = vmatprep.mubr.msk.bf16.mxu1 %vm2714_vm11, %v3221_v53  ;;  %2181 = vst.msk [vmem:[#allocation3 + $0xd0] sm:$0xff] %vm2154_vm9, %v2117_v32  ;;  %v3222_v1 = vrot.slane %v3164_v51, 4  ;;  %v3231_v32 = vsel %vm3214_vm12, %v3228_v26, %v3230_v21 }
 0x169   : > { %v2115_v55 = vpop.permute.xlu0 %2114  ;;  %v7871_v23 = vsel %vm3214_vm12, %v4289_v3, %v7862_v5  ;;  %6364 = vmatprep.subr.msk.bf16.mxu1 %vm2787_vm6, %v6562_v42  ;;  %v3233_v51 = vsel %vm3214_vm12, %v3230_v21, %v3232_v38 }
 0x16a   : > { %2180 = vst.msk [vmem:[#allocation3 + $0xc8] sm:$0xff] %vm2154_vm9, %v2115_v55  ;;  %6102 = vmatmul.mubr.msk.bf16.gmra.mrb[36].mxu0 %vm2714_vm11, %v7871_v23  ;;  %v3223_v27 = vsel %vm3214_vm12, %v3220_v29, %v3222_v1  ;;  %v3225_v60 = vsel %vm3214_vm12, %v3222_v1, %v3224_v33 }
 0x16b   : > { %v2514_v39 = vpop.permute.xlu1 %2513 }
 0x16c   : > { %2578 = vst.msk [vmem:[#allocation3 + $0xd0] sm:$0xff] %vm2551_vm10, %v2514_v39  ;;  %6168 = vmatpush3.bf16.msra.mxu1 %v7045_v43  ;;  %v3226_v43 = vrot.slane %v3166_v19, 4 }
 0x16d   : > { %v2512_v9 = vpop.permute.xlu0 %2511 }
 0x16e   : > { %2577 = vst.msk [vmem:[#allocation3 + $0xc8] sm:$0xff] %vm2551_vm10, %v2512_v9  ;;  %v3227_v45 = vsel %vm3214_vm12, %v3224_v33, %v3226_v43  ;;  %v3229_v58 = vsel %vm3214_vm12, %v3226_v43, %v3228_v26 }
 0x16f   : > { %5966 = vmatmul.mubr.msk.bf16.gmra.mrb[4].mxu1 %vm2714_vm11, %v3223_v27  ;;  %v1110_v63 = vpop.permute.xlu1 %1109 }
 0x170   : > { %5969 = vmatprep.mubr.msk.bf16.mxu1 %vm2714_vm11, %v3225_v60  ;;  %1172 = vst.msk [vmem:[#allocation3 + $0xe0] sm:$0xff] %vm1143_vm7, %v1110_v63  ;;  %v3235_v60 = vsel %vm3214_vm12, %v3232_v38, %v7711_v37 }
 0x171   : > { %v1108_v50 = vpop.permute.xlu0 %1107 }
 0x172   : > { %1171 = vst.msk [vmem:[#allocation3 + $0xd8] sm:$0xff] %vm1143_vm7, %v1108_v50 }
 0x173   : > { %v1507_v28 = vpop.permute.xlu1 %1506  ;;  %v7890_v12 = vld [vmem:[#allocation3 + $0xd0] sm:$0xff] }
 0x174   : > { %1569 = vst.msk [vmem:[#allocation3 + $0xe0] sm:$0xff] %vm1540_vm8, %v1507_v28  ;;  %v4295_v35 = vrot.slane %v7890_v12, 4 }
 0x175   : > { %v1505_v3 = vpop.permute.xlu0 %1504  ;;  %v7894_v36 = vld [vmem:[#allocation3 + $0xc8] sm:$0xff] }
 0x176   : > { %1568 = vst.msk [vmem:[#allocation3 + $0xd8] sm:$0xff] %vm1540_vm8, %v1505_v3  ;;  %v4293_v54 = vrot.slane %v7894_v36, 4 }
 0x177   : > { %5970 = vmatmul.mubr.msk.bf16.gmra.mrb[8].mxu1 %vm2714_vm11, %v3227_v45  ;;  %v2121_v4 = vpop.permute.xlu1 %2120 }
 0x178   : > { %5973 = vmatprep.mubr.msk.bf16.mxu1 %vm2714_vm11, %v3229_v58  ;;  %v4294_v59 = vsel %vm3214_vm12, %v7862_v5, %v4293_v54  ;;  %2183 = vst.msk [vmem:[#allocation3 + $0xe0] sm:$0xff] %vm2154_vm9, %v2121_v4  ;;  %v4296_v15 = vsel %vm3214_vm12, %v4293_v54, %v4295_v35 }
 0x179   : > { %6105 = vmatprep.mubr.msk.bf16.mxu0 %vm2714_vm11, %v4294_v59  ;;  %v2119_v29 = vpop.permute.xlu0 %2118 }
 0x17a   : > { %2182 = vst.msk [vmem:[#allocation3 + $0xd8] sm:$0xff] %vm2154_vm9, %v2119_v29  ;;  %6106 = vmatmul.mubr.msk.bf16.gmra.mrb[40].mxu0 %vm2714_vm11, %v4296_v15 }
 0x17b   : > { %v2518_v52 = vpop.permute.xlu1 %2517 }
 0x17c   : > { %2580 = vst.msk [vmem:[#allocation3 + $0xe0] sm:$0xff] %vm2551_vm10, %v2518_v52 }
 0x17d   : > { %v2516_v53 = vpop.permute.xlu0 %2515 }
 0x17e   : > { %2579 = vst.msk [vmem:[#allocation3 + $0xd8] sm:$0xff] %vm2551_vm10, %v2516_v53 }
 0x17f   : > { %5974 = vmatmul.mubr.msk.bf16.gmra.mrb[12].mxu1 %vm2714_vm11, %v3231_v32  ;;  %v1509_v55 = vpop.permute.xlu1 %1508 }
 0x180   : > { %5977 = vmatprep.mubr.msk.bf16.mxu1 %vm2714_vm11, %v3233_v51 }
 0x181   : > { %v1112_v42 = vpop.permute.xlu0 %1111 }
 0x182   : > { %1173 = vst.msk [vmem:[#allocation3 + $0xe8] sm:$0xff] %vm1143_vm7, %v1112_v42 }
 0x183   : > { %v4222_v1 = vld [vmem:[#allocation3 + $0xe0] sm:$0xf]  ;;  %1570 = vst.msk [vmem:[#allocation3 + $0xe8] sm:$0xff] %vm1540_vm8, %v1509_v55  ;;  %v2520_v33 = vpop.permute.xlu1 %2519 }
 0x184   : > { %v4299_v39 = vrot.slane %v4222_v1, 4 }
 0x185   : > { %v4221_v9 = vld [vmem:[#allocation3 + $0xd8] sm:$0xff]  ;;  %v2123_v27 = vpop.permute.xlu0 %2122 }
 0x186   : > { %v4297_v63 = vrot.slane %v4221_v9, 4  ;;  %2184 = vst.msk [vmem:[#allocation3 + $0xe8] sm:$0xff] %vm2154_vm9, %v2123_v27 }
 0x187   : > { %5978 = vmatmul.mubr.msk.bf16.gmra.mrb[16].mxu1 %vm2714_vm11, %v3235_v60  ;;  %2581 = vst.msk [vmem:[#allocation3 + $0xe8] sm:$0xff] %vm2551_vm10, %v2520_v33 }
 0x188   : > { %5981 = vmatprep.mubr.msk.bf16.mxu1 %vm2714_vm11, %v7736_v13  ;;  %v4298_v50 = vsel %vm3214_vm12, %v4295_v35, %v4297_v63  ;;  %v4300_v43 = vsel %vm3214_vm12, %v4297_v63, %v4299_v39 }
 0x189   : > { %6109 = vmatprep.mubr.msk.bf16.mxu0 %vm2714_vm11, %v4298_v50 }
 0x18a   : > { %6110 = vmatmul.mubr.msk.bf16.gmra.mrb[44].mxu0 %vm2714_vm11, %v4300_v43 }
 0x18b   : > { %6117 = vmatprep.mubr.msk.bf16.mxu0 %vm2714_vm11, %v7867_v25 }
 0x18f   : > { %5982 = vmatmul.mubr.msk.bf16.gmra.mrb[20].mxu1 %vm2714_vm11, %v7741_v20 }
 0x190   : > { %5985 = vmatprep.mubr.msk.bf16.mxu1 %vm2714_vm11, %v7758_v40 }
 0x192   : > { %6118 = vmatmul.mubr.msk.bf16.vlgmr.msra.gmra.mrb[0].mxu0 %vm2714_vm11, %v3166_v19  ;;  %v8052_v19 = vld [vmem:[%s8180_s2] ss:$0 sm:$0xff] }
 0x193   : > { %6121 = vmatprep.mubr.msk.bf16.mxu0 %vm2714_vm11, %v3167_v34 }
 0x197   : > { %5986 = vmatmul.mubr.msk.bf16.gmra.mrb[24].mxu1 %vm2714_vm11, %v7765_v31 }
 0x198   : > { %5989 = vmatprep.mubr.msk.bf16.mxu1 %vm2714_vm11, %v7776_v6 }
 0x19a   : > { %6122 = vmatmul.mubr.msk.bf16.gmra.mrb[4].mxu0 %vm2714_vm11, %v3168_v49 }
 0x19b   : > { %6125 = vmatprep.mubr.msk.bf16.mxu0 %vm2714_vm11, %v3169_v56 }
 0x19f   : > { %5990 = vmatmul.mubr.msk.bf16.gmra.mrb[28].mxu1 %vm2714_vm11, %v7781_v7 }
 0x1a0   : > { %5993 = vmatprep.mubr.msk.bf16.mxu1 %vm2714_vm11, %v7798_v18 }
 0x1a2   : > { %6126 = vmatmul.mubr.msk.bf16.gmra.mrb[8].mxu0 %vm2714_vm11, %v7624_v22 }
 0x1a3   : > { %6129 = vmatprep.mubr.msk.bf16.mxu0 %vm2714_vm11, %v7621_v16  ;;  %v3184_v16 = vld [vmem:[#allocation3 + $0xc8] sm:$0xf] }
 0x1a4   : > { %v3262_v22 = vrot.slane %v3184_v16, 4 }
 0x1a7   : > { %5994 = vmatmul.mubr.msk.bf16.gmra.mrb[32].mxu1 %vm2714_vm11, %v7805_v17 }
 0x1a8   : > { %5997 = vmatprep.mubr.msk.bf16.mxu1 %vm2714_vm11, %v7816_v57 }
 0x1aa   : > { %6130 = vmatmul.mubr.msk.bf16.gmra.mrb[12].mxu0 %vm2714_vm11, %v7663_v0  ;;  %v4776_v0 = vld [vmem:[#allocation3 + $0xe0] sm:$0xff] }
 0x1ab   : > { %6133 = vmatprep.mubr.msk.bf16.mxu0 %vm2714_vm11, %v7661_v11  ;;  %v3263_v11 = vsel %vm3214_vm12, %v7862_v5, %v3262_v22 }
 0x1af   : > { %5998 = vmatmul.mubr.msk.bf16.gmra.mrb[36].mxu1 %vm2714_vm11, %v7821_v30 }
 0x1b0   : > { %6001 = vmatprep.mubr.msk.bf16.mxu1 %vm2714_vm11, %v7843_v8 }
 0x1b2   : > { %6134 = vmatmul.mubr.msk.bf16.gmra.mrb[16].mxu0 %vm2714_vm11, %v7686_v61 }
 0x1b3   : > { %6137 = vmatprep.mubr.msk.bf16.mxu0 %vm2714_vm11, %v7716_v47 }
 0x1b7   : > { %6002 = vmatmul.mubr.msk.bf16.gmra.mrb[40].mxu1 %vm2714_vm11, %v7847_v46 }
 0x1b8   : > { %6005 = vmatprep.mubr.msk.bf16.mxu1 %vm2714_vm11, %v7871_v23 }
 0x1ba   : > { %6138 = vmatmul.mubr.msk.bf16.gmra.mrb[20].mxu0 %vm2714_vm11, %v7714_v2 }
 0x1bb   : > { %6141 = vmatprep.mubr.msk.bf16.mxu0 %vm2714_vm11, %v7752_v10 }
 0x1bf   : > { %6006 = vmatmul.mubr.msk.bf16.gmra.mrb[44].mxu1 %vm2714_vm11, %v3263_v11 }
 0x1c0   : > { %6037 = vmatprep.mubr.msk.bf16.mxu1 %vm2714_vm11, %v7686_v61  ;;  %v4777_v61 = vld [vmem:[#allocation3 + $0xe8] sm:$0xff] }
 0x1c2   : > { %6142 = vmatmul.mubr.msk.bf16.gmra.mrb[24].mxu0 %vm2714_vm11, %v7750_v48 }
 0x1c3   : > { %6145 = vmatprep.mubr.msk.bf16.mxu0 %vm2714_vm11, %v7792_v41 }
 0x1c7   : > { %6038 = vmatmul.mubr.msk.bf16.vlgmr.msra.gmra.mrb[24].mxu1 %vm2714_vm11, %v7716_v47 }
 0x1c8   : > { %6041 = vmatprep.mubr.msk.bf16.mxu1 %vm2714_vm11, %v7714_v2 }
 0x1ca   : > { %6146 = vmatmul.mubr.msk.bf16.gmra.mrb[28].mxu0 %vm2714_vm11, %v7790_v62 }
 0x1cb   : > { %6149 = vmatprep.mubr.msk.bf16.mxu0 %vm2714_vm11, %v7830_v14 }
 0x1cf   : > { %6042 = vmatmul.mubr.msk.bf16.gmra.mrb[28].mxu1 %vm2714_vm11, %v7752_v10 }
 0x1d0   : > { %6045 = vmatprep.mubr.msk.bf16.mxu1 %vm2714_vm11, %v7750_v48 }
 0x1d2   : > { %6150 = vmatmul.mubr.msk.bf16.gmra.mrb[32].mxu0 %vm2714_vm11, %v7827_v24 }
 0x1d3   : > { %6153 = vmatprep.mubr.msk.bf16.mxu0 %vm2714_vm11, %v7857_v44 }
 0x1d7   : > { %6046 = vmatmul.mubr.msk.bf16.gmra.mrb[32].mxu1 %vm2714_vm11, %v7792_v41 }
 0x1d8   : > { %6049 = vmatprep.mubr.msk.bf16.mxu1 %vm2714_vm11, %v7790_v62 }
 0x1da   : > { %6154 = vmatmul.mubr.msk.bf16.gmra.mrb[36].mxu0 %vm2714_vm11, %v7894_v36 }
 0x1db   : > { %6157 = vmatprep.mubr.msk.bf16.mxu0 %vm2714_vm11, %v7890_v12 }
 0x1df   : > { %6050 = vmatmul.mubr.msk.bf16.gmra.mrb[36].mxu1 %vm2714_vm11, %v7830_v14 }
 0x1e0   : > { %6053 = vmatprep.mubr.msk.bf16.mxu1 %vm2714_vm11, %v7827_v24 }
 0x1e2   : > { %6158 = vmatmul.mubr.msk.bf16.gmra.mrb[40].mxu0 %vm2714_vm11, %v4221_v9 }
 0x1e3   : > { %6161 = vmatprep.mubr.msk.bf16.mxu0 %vm2714_vm11, %v4776_v0 }
 0x1e7   : > { %6054 = vmatmul.mubr.msk.bf16.gmra.mrb[40].mxu1 %vm2714_vm11, %v7857_v44 }
 0x1e8   : > { %6057 = vmatprep.mubr.msk.bf16.mxu1 %vm2714_vm11, %v7894_v36 }
 0x1ea   : > { %6162 = vmatmul.mubr.msk.bf16.gmra.mrb[44].mxu0 %vm2714_vm11, %v4777_v61 }
 0x1ef   : > { %6058 = vmatmul.mubr.msk.bf16.gmra.mrb[44].mxu1 %vm2714_vm11, %v7890_v12 }
 0x23a   : > { %v5963_v37 = vpop.f32.mrb[0].mxu1 }
 0x23b   : > { %v3382_v2 = vpop.f32.mrb[1].mxu1 }
 0x23c   : > { %v5964_v47 = vpop.f32.mrb[2].mxu1 }
 0x23d   : > { %v3385_v13 = vpop.f32.mrb[3].mxu1 }
 0x242   : > { %v5967_v20 = vpop.f32.mrb[4].mxu1 }
 0x243   : > { %v3398_v48 = vpop.f32.mrb[5].mxu1 }
 0x244   : > { %v5968_v10 = vpop.f32.mrb[6].mxu1 }
 0x245   : > { %v3401_v40 = vpop.f32.mrb[7].mxu1 }
 0x24a   : > { %v5971_v31 = vpop.f32.mrb[8].mxu1 }
 0x24b   : > { %v3414_v6 = vpop.f32.mrb[9].mxu1 }
 0x24c   : > { %v8020_v7 = vpop.f32.mrb[10].mxu1 }
 0x24d   : > { %v8022_v62 = vpop.f32.mrb[11].mxu1 }
 0x252   : > { %v8024_v41 = vpop.f32.mrb[12].mxu1 }
 0x253   : > { %v8026_v18 = vpop.f32.mrb[13].mxu1 }
 0x254   : > { %v8028_v17 = vpop.f32.mrb[14].mxu1 }
 0x255   : > { %v8030_v57 = vpop.f32.mrb[15].mxu1 }
 0x25a   : > { %v8032_v30 = vpop.f32.mrb[16].mxu1 }
 0x25b   : > { %v8034_v24 = vpop.f32.mrb[17].mxu1 }
 0x25c   : > { %v8036_v14 = vpop.f32.mrb[18].mxu1 }
 0x25d   : > { %v8038_v8 = vpop.f32.mrb[19].mxu1 }
 0x262   : > { %v8040_v46 = vpop.f32.mrb[20].mxu1 }
 0x263   : > { %v8042_v44 = vpop.f32.mrb[21].mxu1 }
 0x264   : > { %v8044_v5 = vpop.f32.mrb[22].mxu1 }
 0x265   : > { %v8046_v25 = vpop.f32.mrb[23].mxu1  ;;  %v6119_v23 = vpop.f32.mrb[0].mxu0 }
 0x266   : > { %v6169_v34 = vadd.f32 %v6119_v23, %v5963_v37  ;;  %v4900_v28 = vpop.f32.mrb[1].mxu0 }
 0x267   : > { %v6170_v26 = vadd.f32 %v4900_v28, %v3382_v2  ;;  %v6120_v12 = vpop.f32.mrb[2].mxu0 }
 0x268   : > { %v5244_v35 = vadd.f32 %v6169_v34, %v8052_v19  ;;  %v6171_v3 = vadd.f32 %v6120_v12, %v5964_v47  ;;  %v4903_v36 = vpop.f32.mrb[3].mxu0 }
 0x269   : > { %v5242_v45 = vadd.f32 %v6170_v26, %v8052_v19  ;;  %v6172_v54 = vadd.f32 %v4903_v36, %v3385_v13 }
 0x26a   : > { %v5292_v58 = vmax.f32 %v5244_v35, 0.0  ;;  %v5245_v4 = vadd.f32 %v6171_v3, %v8052_v19 }
 0x26b   : > { %v5290_v49 = vmax.f32 %v5242_v45, 0.0  ;;  %v5243_v59 = vadd.f32 %v6172_v54, %v8052_v19 }
 0x26c   : > { %5340 = vst [vmem:[%s8058_s30 + $0x10] sm:$0xff] %v5292_v58  ;;  %v5293_v15 = vmax.f32 %v5245_v4, 0.0 }
 0x26d   : > { %5338 = vst [vmem:[%s8058_s30] sm:$0xff] %v5290_v49  ;;  %v5291_v56 = vmax.f32 %v5243_v59, 0.0  ;;  %v6123_v29 = vpop.f32.mrb[4].mxu0 }
 0x26e   : > { %5341 = vst [vmem:[%s8058_s30 + $0x18] sm:$0xff] %v5293_v15  ;;  %v6173_v21 = vadd.f32 %v6123_v29, %v5967_v20  ;;  %v4916_v52 = vpop.f32.mrb[5].mxu0 }
 0x26f   : > { %5339 = vst [vmem:[%s8058_s30 + $0x8] sm:$0xff] %v5291_v56  ;;  %v6174_v38 = vadd.f32 %v4916_v52, %v3398_v48  ;;  %v6124_v53 = vpop.f32.mrb[6].mxu0 }
 0x270   : > { %v5248_v32 = vadd.f32 %v6173_v21, %v8052_v19  ;;  %v6175_v51 = vadd.f32 %v6124_v53, %v5968_v10  ;;  %v4919_v55 = vpop.f32.mrb[7].mxu0 }
 0x271   : > { %v5246_v42 = vadd.f32 %v6174_v38, %v8052_v19  ;;  %v6176_v1 = vadd.f32 %v4919_v55, %v3401_v40 }
 0x272   : > { %v5296_v39 = vmax.f32 %v5248_v32, 0.0  ;;  %v5249_v33 = vadd.f32 %v6175_v51, %v8052_v19 }
 0x273   : > { %v5294_v9 = vmax.f32 %v5246_v42, 0.0  ;;  %v5247_v27 = vadd.f32 %v6176_v1, %v8052_v19 }
 0x274   : > { %5344 = vst [vmem:[%s8058_s30 + $0x30] sm:$0xff] %v5296_v39  ;;  %v5297_v60 = vmax.f32 %v5249_v33, 0.0 }
 0x275   : > { %5342 = vst [vmem:[%s8058_s30 + $0x20] sm:$0xff] %v5294_v9  ;;  %v5295_v63 = vmax.f32 %v5247_v27, 0.0  ;;  %v6127_v50 = vpop.f32.mrb[8].mxu0 }
 0x276   : > { %5345 = vst [vmem:[%s8058_s30 + $0x38] sm:$0xff] %v5297_v60  ;;  %v6177_v43 = vadd.f32 %v6127_v50, %v5971_v31  ;;  %v4932_v16 = vpop.f32.mrb[9].mxu0 }
 0x277   : > { %5343 = vst [vmem:[%s8058_s30 + $0x28] sm:$0xff] %v5295_v63  ;;  %v6178_v22 = vadd.f32 %v4932_v16, %v3414_v6  ;;  %v6128_v11 = vpop.f32.mrb[10].mxu0 }
 0x278   : > { %v5252_v0 = vadd.f32 %v6177_v43, %v8052_v19  ;;  %v6179_v61 = vadd.f32 %v6128_v11, %v8020_v7  ;;  %v4935_v37 = vpop.f32.mrb[11].mxu0 }
 0x279   : > { %v5250_v2 = vadd.f32 %v6178_v22, %v8052_v19  ;;  %v6180_v47 = vadd.f32 %v4935_v37, %v8022_v62 }
 0x27a   : > { %v5300_v13 = vmax.f32 %v5252_v0, 0.0  ;;  %v5253_v20 = vadd.f32 %v6179_v61, %v8052_v19 }
 0x27b   : > { %v5298_v48 = vmax.f32 %v5250_v2, 0.0  ;;  %v5251_v10 = vadd.f32 %v6180_v47, %v8052_v19 }
 0x27c   : > { %5348 = vst [vmem:[%s8058_s30 + $0x50] sm:$0xff] %v5300_v13  ;;  %v5301_v40 = vmax.f32 %v5253_v20, 0.0 }
 0x27d   : > { %5346 = vst [vmem:[%s8058_s30 + $0x40] sm:$0xff] %v5298_v48  ;;  %v5299_v31 = vmax.f32 %v5251_v10, 0.0  ;;  %v6131_v6 = vpop.f32.mrb[12].mxu0 }
 0x27e   : > { %5349 = vst [vmem:[%s8058_s30 + $0x58] sm:$0xff] %v5301_v40  ;;  %v6181_v7 = vadd.f32 %v6131_v6, %v8024_v41  ;;  %v4948_v23 = vpop.f32.mrb[13].mxu0 }
 0x27f   : > { %5347 = vst [vmem:[%s8058_s30 + $0x48] sm:$0xff] %v5299_v31  ;;  %v6182_v62 = vadd.f32 %v4948_v23, %v8026_v18  ;;  %v6132_v34 = vpop.f32.mrb[14].mxu0 }
 0x280   : > { %v5256_v28 = vadd.f32 %v6181_v7, %v8052_v19  ;;  %v6183_v26 = vadd.f32 %v6132_v34, %v8028_v17  ;;  %v4951_v12 = vpop.f32.mrb[15].mxu0 }
 0x281   : > { %v5254_v35 = vadd.f32 %v6182_v62, %v8052_v19  ;;  %v6184_v3 = vadd.f32 %v4951_v12, %v8030_v57 }
 0x282   : > { %v5304_v36 = vmax.f32 %v5256_v28, 0.0  ;;  %v5257_v41 = vadd.f32 %v6183_v26, %v8052_v19 }
 0x283   : > { %v5302_v45 = vmax.f32 %v5254_v35, 0.0  ;;  %v5255_v54 = vadd.f32 %v6184_v3, %v8052_v19 }
 0x284   : > { %5352 = vst [vmem:[%s8058_s30 + $0x70] sm:$0xff] %v5304_v36  ;;  %v5305_v18 = vmax.f32 %v5257_v41, 0.0 }
 0x285   : > { %5350 = vst [vmem:[%s8058_s30 + $0x60] sm:$0xff] %v5302_v45  ;;  %v5303_v58 = vmax.f32 %v5255_v54, 0.0  ;;  %v6135_v4 = vpop.f32.mrb[16].mxu0 }
 0x286   : > { %5353 = vst [vmem:[%s8058_s30 + $0x78] sm:$0xff] %v5305_v18  ;;  %v6185_v17 = vadd.f32 %v6135_v4, %v8032_v30  ;;  %v4964_v49 = vpop.f32.mrb[17].mxu0 }
 0x287   : > { %5351 = vst [vmem:[%s8058_s30 + $0x68] sm:$0xff] %v5303_v58  ;;  %v6186_v57 = vadd.f32 %v4964_v49, %v8034_v24  ;;  %v6136_v59 = vpop.f32.mrb[18].mxu0 }
 0x288   : > { %v5260_v15 = vadd.f32 %v6185_v17, %v8052_v19  ;;  %v6187_v56 = vadd.f32 %v6136_v59, %v8036_v14  ;;  %v4967_v29 = vpop.f32.mrb[19].mxu0 }
 0x289   : > { %v5258_v21 = vadd.f32 %v6186_v57, %v8052_v19  ;;  %v6188_v52 = vadd.f32 %v4967_v29, %v8038_v8 }
 0x28a   : > { %v5308_v38 = vmax.f32 %v5260_v15, 0.0  ;;  %v5261_v30 = vadd.f32 %v6187_v56, %v8052_v19 }
 0x28b   : > { %v5306_v53 = vmax.f32 %v5258_v21, 0.0  ;;  %v5259_v32 = vadd.f32 %v6188_v52, %v8052_v19 }
 0x28c   : > { %5356 = vst [vmem:[%s8058_s30 + $0x90] sm:$0xff] %v5308_v38  ;;  %v5309_v24 = vmax.f32 %v5261_v30, 0.0 }
 0x28d   : > { %5354 = vst [vmem:[%s8058_s30 + $0x80] sm:$0xff] %v5306_v53  ;;  %v5307_v51 = vmax.f32 %v5259_v32, 0.0  ;;  %v6139_v55 = vpop.f32.mrb[20].mxu0 }
 0x28e   : > { %5357 = vst [vmem:[%s8058_s30 + $0x98] sm:$0xff] %v5309_v24  ;;  %v6189_v14 = vadd.f32 %v6139_v55, %v8040_v46  ;;  %v4980_v42 = vpop.f32.mrb[21].mxu0 }
 0x28f   : > { %5355 = vst [vmem:[%s8058_s30 + $0x88] sm:$0xff] %v5307_v51  ;;  %v6190_v8 = vadd.f32 %v4980_v42, %v8042_v44  ;;  %v6140_v1 = vpop.f32.mrb[22].mxu0 }
 0x290   : > { %v5264_v39 = vadd.f32 %v6189_v14, %v8052_v19  ;;  %v6191_v33 = vadd.f32 %v6140_v1, %v8044_v5  ;;  %v4983_v9 = vpop.f32.mrb[23].mxu0 }
 0x291   : > { %v5262_v27 = vadd.f32 %v6190_v8, %v8052_v19  ;;  %v6192_v60 = vadd.f32 %v4983_v9, %v8046_v25 }
 0x292   : > { %v5312_v63 = vmax.f32 %v5264_v39, 0.0  ;;  %v5265_v46 = vadd.f32 %v6191_v33, %v8052_v19 }
 0x293   : > { %v5310_v50 = vmax.f32 %v5262_v27, 0.0  ;;  %v5263_v43 = vadd.f32 %v6192_v60, %v8052_v19 }
 0x294   : > { %5360 = vst [vmem:[%s8058_s30 + $0xb0] sm:$0xff] %v5312_v63  ;;  %v5313_v44 = vmax.f32 %v5265_v46, 0.0 }
 0x295   : > { %5358 = vst [vmem:[%s8058_s30 + $0xa0] sm:$0xff] %v5310_v50  ;;  %v5311_v16 = vmax.f32 %v5263_v43, 0.0  ;;  %v6143_v22 = vpop.f32.mrb[24].mxu0 }
 0x296   : > { %5361 = vst [vmem:[%s8058_s30 + $0xb8] sm:$0xff] %v5313_v44  ;;  %v4996_v11 = vpop.f32.mrb[25].mxu0 }
 0x297   : > { %5359 = vst [vmem:[%s8058_s30 + $0xa8] sm:$0xff] %v5311_v16  ;;  %v6144_v5 = vpop.f32.mrb[26].mxu0 }
 0x298   : > { %v4999_v0 = vpop.f32.mrb[27].mxu0 }
 0x29a   : > { %v6039_v61 = vpop.f32.mrb[24].mxu1 }
 0x29b   : > { %v6193_v37 = vadd.f32 %v6143_v22, %v6039_v61  ;;  %v3959_v2 = vpop.f32.mrb[25].mxu1 }
 0x29c   : > { %v6194_v25 = vadd.f32 %v4996_v11, %v3959_v2  ;;  %v6040_v47 = vpop.f32.mrb[26].mxu1 }
 0x29d   : > { %v5268_v13 = vadd.f32 %v6193_v37, %v8052_v19  ;;  %v6195_v20 = vadd.f32 %v6144_v5, %v6040_v47  ;;  %v3962_v48 = vpop.f32.mrb[27].mxu1  ;;  %v6147_v10 = vpop.f32.mrb[28].mxu0 }
 0x29e   : > { %v5266_v40 = vadd.f32 %v6194_v25, %v8052_v19  ;;  %v6196_v31 = vadd.f32 %v4999_v0, %v3962_v48  ;;  %v5012_v6 = vpop.f32.mrb[29].mxu0 }
 0x29f   : > { %v5316_v7 = vmax.f32 %v5268_v13, 0.0  ;;  %v5269_v23 = vadd.f32 %v6195_v20, %v8052_v19  ;;  %v6148_v62 = vpop.f32.mrb[30].mxu0 }
 0x2a0   : > { %v5314_v34 = vmax.f32 %v5266_v40, 0.0  ;;  %v5267_v28 = vadd.f32 %v6196_v31, %v8052_v19  ;;  %v5015_v26 = vpop.f32.mrb[31].mxu0 }
 0x2a1   : > { %5364 = vst [vmem:[%s8058_s30 + $0xd0] sm:$0xff] %v5316_v7  ;;  %v5317_v12 = vmax.f32 %v5269_v23, 0.0 }
 0x2a2   : > { %5362 = vst [vmem:[%s8058_s30 + $0xc0] sm:$0xff] %v5314_v34  ;;  %v5315_v35 = vmax.f32 %v5267_v28, 0.0  ;;  %v6043_v3 = vpop.f32.mrb[28].mxu1 }
 0x2a3   : > { %5365 = vst [vmem:[%s8058_s30 + $0xd8] sm:$0xff] %v5317_v12  ;;  %v6197_v36 = vadd.f32 %v6147_v10, %v6043_v3  ;;  %v3975_v41 = vpop.f32.mrb[29].mxu1 }
 0x2a4   : > { %5363 = vst [vmem:[%s8058_s30 + $0xc8] sm:$0xff] %v5315_v35  ;;  %v6198_v45 = vadd.f32 %v5012_v6, %v3975_v41  ;;  %v6044_v54 = vpop.f32.mrb[30].mxu1 }
 0x2a5   : > { %v5272_v18 = vadd.f32 %v6197_v36, %v8052_v19  ;;  %v6199_v58 = vadd.f32 %v6148_v62, %v6044_v54  ;;  %v3978_v4 = vpop.f32.mrb[31].mxu1  ;;  %v6151_v17 = vpop.f32.mrb[32].mxu0 }
 0x2a6   : > { %v5270_v49 = vadd.f32 %v6198_v45, %v8052_v19  ;;  %v6200_v57 = vadd.f32 %v5015_v26, %v3978_v4  ;;  %v5028_v59 = vpop.f32.mrb[33].mxu0 }
 0x2a7   : > { %v5320_v15 = vmax.f32 %v5272_v18, 0.0  ;;  %v5273_v56 = vadd.f32 %v6199_v58, %v8052_v19  ;;  %v6152_v29 = vpop.f32.mrb[34].mxu0 }
 0x2a8   : > { %v5318_v21 = vmax.f32 %v5270_v49, 0.0  ;;  %v5271_v52 = vadd.f32 %v6200_v57, %v8052_v19  ;;  %v5031_v38 = vpop.f32.mrb[35].mxu0 }
 0x2a9   : > { %5368 = vst [vmem:[%s8058_s30 + $0xf0] sm:$0xff] %v5320_v15  ;;  %v5321_v30 = vmax.f32 %v5273_v56, 0.0 }
 0x2aa   : > { %5366 = vst [vmem:[%s8058_s30 + $0xe0] sm:$0xff] %v5318_v21  ;;  %v5319_v53 = vmax.f32 %v5271_v52, 0.0  ;;  %v6047_v32 = vpop.f32.mrb[32].mxu1 }
 0x2ab   : > { %5369 = vst [vmem:[%s8058_s30 + $0xf8] sm:$0xff] %v5321_v30  ;;  %v6201_v24 = vadd.f32 %v6151_v17, %v6047_v32  ;;  %v3991_v51 = vpop.f32.mrb[33].mxu1 }
 0x2ac   : > { %5367 = vst [vmem:[%s8058_s30 + $0xe8] sm:$0xff] %v5319_v53  ;;  %v6202_v55 = vadd.f32 %v5028_v59, %v3991_v51  ;;  %v6048_v14 = vpop.f32.mrb[34].mxu1 }
 0x2ad   : > { %v5276_v42 = vadd.f32 %v6201_v24, %v8052_v19  ;;  %v6203_v8 = vadd.f32 %v6152_v29, %v6048_v14  ;;  %v3994_v1 = vpop.f32.mrb[35].mxu1  ;;  %v6155_v39 = vpop.f32.mrb[36].mxu0 }
 0x2ae   : > { %v5274_v33 = vadd.f32 %v6202_v55, %v8052_v19  ;;  %v6204_v9 = vadd.f32 %v5031_v38, %v3994_v1  ;;  %v5044_v27 = vpop.f32.mrb[37].mxu0 }
 0x2af   : > { %v5324_v60 = vmax.f32 %v5276_v42, 0.0  ;;  %v5277_v63 = vadd.f32 %v6203_v8, %v8052_v19  ;;  %v6156_v46 = vpop.f32.mrb[38].mxu0 }
 0x2b0   : > { %v5322_v50 = vmax.f32 %v5274_v33, 0.0  ;;  %v5275_v43 = vadd.f32 %v6204_v9, %v8052_v19  ;;  %v5047_v44 = vpop.f32.mrb[39].mxu0 }
 0x2b1   : > { %5372 = vst [vmem:[%s8058_s30 + $0x110] sm:$0xff] %v5324_v60  ;;  %v5325_v16 = vmax.f32 %v5277_v63, 0.0 }
 0x2b2   : > { %5370 = vst [vmem:[%s8058_s30 + $0x100] sm:$0xff] %v5322_v50  ;;  %v5323_v22 = vmax.f32 %v5275_v43, 0.0  ;;  %v6051_v11 = vpop.f32.mrb[36].mxu1 }
 0x2b3   : > { %5373 = vst [vmem:[%s8058_s30 + $0x118] sm:$0xff] %v5325_v16  ;;  %v6205_v5 = vadd.f32 %v6155_v39, %v6051_v11  ;;  %v4007_v0 = vpop.f32.mrb[37].mxu1 }
 0x2b4   : > { %5371 = vst [vmem:[%s8058_s30 + $0x108] sm:$0xff] %v5323_v22  ;;  %v6206_v61 = vadd.f32 %v5044_v27, %v4007_v0  ;;  %v6052_v37 = vpop.f32.mrb[38].mxu1 }
 0x2b5   : > { %v5280_v2 = vadd.f32 %v6205_v5, %v8052_v19  ;;  %v6207_v25 = vadd.f32 %v6156_v46, %v6052_v37  ;;  %v4010_v47 = vpop.f32.mrb[39].mxu1  ;;  %v6159_v13 = vpop.f32.mrb[40].mxu0 }
 0x2b6   : > { %v5278_v20 = vadd.f32 %v6206_v61, %v8052_v19  ;;  %v6208_v48 = vadd.f32 %v5047_v44, %v4010_v47  ;;  %v5060_v10 = vpop.f32.mrb[41].mxu0 }
 0x2b7   : > { %v5328_v40 = vmax.f32 %v5280_v2, 0.0  ;;  %v5281_v31 = vadd.f32 %v6207_v25, %v8052_v19  ;;  %v6160_v6 = vpop.f32.mrb[42].mxu0 }
 0x2b8   : > { %v5326_v7 = vmax.f32 %v5278_v20, 0.0  ;;  %v5279_v23 = vadd.f32 %v6208_v48, %v8052_v19  ;;  %v5063_v62 = vpop.f32.mrb[43].mxu0 }
 0x2b9   : > { %5376 = vst [vmem:[%s8058_s30 + $0x130] sm:$0xff] %v5328_v40  ;;  %v5329_v34 = vmax.f32 %v5281_v31, 0.0 }
 0x2ba   : > { %5374 = vst [vmem:[%s8058_s30 + $0x120] sm:$0xff] %v5326_v7  ;;  %v5327_v28 = vmax.f32 %v5279_v23, 0.0  ;;  %v6055_v26 = vpop.f32.mrb[40].mxu1 }
 0x2bb   : > { %5377 = vst [vmem:[%s8058_s30 + $0x138] sm:$0xff] %v5329_v34  ;;  %v6209_v12 = vadd.f32 %v6159_v13, %v6055_v26  ;;  %v4023_v35 = vpop.f32.mrb[41].mxu1 }
 0x2bc   : > { %5375 = vst [vmem:[%s8058_s30 + $0x128] sm:$0xff] %v5327_v28  ;;  %v6210_v3 = vadd.f32 %v5060_v10, %v4023_v35  ;;  %v6056_v36 = vpop.f32.mrb[42].mxu1 }
 0x2bd   : > { %v5284_v41 = vadd.f32 %v6209_v12, %v8052_v19  ;;  %v6211_v45 = vadd.f32 %v6160_v6, %v6056_v36  ;;  %v4026_v54 = vpop.f32.mrb[43].mxu1  ;;  %v6163_v18 = vpop.f32.mrb[44].mxu0 }
 0x2be   : > { %v5282_v58 = vadd.f32 %v6210_v3, %v8052_v19  ;;  %v6212_v4 = vadd.f32 %v5063_v62, %v4026_v54  ;;  %v5076_v17 = vpop.f32.mrb[45].mxu0 }
 0x2bf   : > { %v5332_v49 = vmax.f32 %v5284_v41, 0.0  ;;  %v5285_v57 = vadd.f32 %v6211_v45, %v8052_v19  ;;  %v6164_v59 = vpop.f32.mrb[46].mxu0 }
 0x2c0   : > { %v5330_v15 = vmax.f32 %v5282_v58, 0.0  ;;  %v5283_v56 = vadd.f32 %v6212_v4, %v8052_v19  ;;  %v5079_v29 = vpop.f32.mrb[47].mxu0 }
 0x2c1   : > { %5380 = vst [vmem:[%s8058_s30 + $0x150] sm:$0xff] %v5332_v49  ;;  %v5333_v21 = vmax.f32 %v5285_v57, 0.0 }
 0x2c2   : > { %5378 = vst [vmem:[%s8058_s30 + $0x140] sm:$0xff] %v5330_v15  ;;  %v5331_v52 = vmax.f32 %v5283_v56, 0.0  ;;  %v6059_v38 = vpop.f32.mrb[44].mxu1 }
 0x2c3   : > { %5381 = vst [vmem:[%s8058_s30 + $0x158] sm:$0xff] %v5333_v21  ;;  %v6213_v30 = vadd.f32 %v6163_v18, %v6059_v38  ;;  %v4039_v53 = vpop.f32.mrb[45].mxu1 }
 0x2c4   : > { %5379 = vst [vmem:[%s8058_s30 + $0x148] sm:$0xff] %v5331_v52  ;;  %v6214_v32 = vadd.f32 %v5076_v17, %v4039_v53  ;;  %v6060_v24 = vpop.f32.mrb[46].mxu1 }
 0x2c5   : > { %v5288_v51 = vadd.f32 %v6213_v30, %v8052_v19  ;;  %v6215_v55 = vadd.f32 %v6164_v59, %v6060_v24  ;;  %v4042_v14 = vpop.f32.mrb[47].mxu1 }
 0x2c6   : > { %v5286_v42 = vadd.f32 %v6214_v32, %v8052_v19  ;;  %v6216_v8 = vadd.f32 %v5079_v29, %v4042_v14 }
 0x2c7   : > { %v5336_v1 = vmax.f32 %v5288_v51, 0.0  ;;  %v5289_v39 = vadd.f32 %v6215_v55, %v8052_v19 }
 0x2c8   : > { %v5334_v33 = vmax.f32 %v5286_v42, 0.0  ;;  %v5287_v9 = vadd.f32 %v6216_v8, %v8052_v19 }
 0x2c9   : > { %5384 = vst [vmem:[%s8058_s30 + $0x170] sm:$0xff] %v5336_v1  ;;  %v5337_v27 = vmax.f32 %v5289_v39, 0.0 }
 0x2ca   : > { %5382 = vst [vmem:[%s8058_s30 + $0x160] sm:$0xff] %v5334_v33  ;;  %v5335_v60 = vmax.f32 %v5287_v9, 0.0 }
 0x2cb   : > { %5385 = vst [vmem:[%s8058_s30 + $0x178] sm:$0xff] %v5337_v27 }
 0x2cc   : > { %5383 = vst [vmem:[%s8058_s30 + $0x168] sm:$0xff] %v5335_v60 }
 0x2cd PF: > { %s13_s14 = sadd.s32 1, %s6585_s14   ;;  %s8182_s12 = smov %s6581_s13 }
 0x2ce   : > { %p10_p5 = scmp.ge.s32.totalorder %s13_s14, 4   ;;  %s8183_s13 = smov %s8185_s15 }
 0x2d0   :  { %12 = sbr.rel (!%p10_p5) target bundleno = 2 (0x2), region = 67 }

</bundles_post_ra>
